<compile_context>
chip_gen: v5e
topology: v5e:2x2
jax: 0.10.0
libtpu: 0.0.40
codegen_flags: <defaults>
</compile_context>

<pallas_src>
import functools

import jax
import jax.numpy as jnp
from jax.experimental import pallas as pl
from jax.experimental.pallas import tpu as pltpu

BN_EPS = 1e-5
HIDDEN_ARCH = (128, 256, 512, 1024)


def _round_up(x, m):
    return ((x + m - 1) // m) * m


# ----------------------------------------------------------------------------
# Fused Pallas kernel: [optional rec block] + 5-layer MLP (BN folded)
# ----------------------------------------------------------------------------
def _fused_mlp_kernel(eps_ref, delta_ref, x_ref,
                      w1_ref, b1_ref,
                      w2_ref, b2_ref,
                      w3_ref, b3_ref,
                      w4_ref, b4_ref,
                      w5_ref, b5_ref,
                      o_ref, *, apply_rec):
    x = x_ref[...]                                      # (bm, d_in), f32 or bf16
    if apply_rec:
        # ReccurrentBlock: dist = floor(dist*eps); dist[dist > delta] = delta
        xf = x.astype(jnp.float32)                      # exact floor in f32
        xf = jnp.minimum(jnp.floor(xf * eps_ref[0]), delta_ref[0])
        h = xf.astype(jnp.bfloat16)
    else:
        h = x.astype(jnp.bfloat16)                      # no-op if producer is bf16

    # layer 1: Linear + ReLU (no BN on the first hidden layer, as in MLPLayer)
    h = jnp.dot(h, w1_ref[...], preferred_element_type=jnp.float32) + b1_ref[...]
    h = jnp.maximum(h, 0.0).astype(jnp.bfloat16)

    # layers 2..4: Linear (+ folded eval-mode BN) + ReLU
    h = jnp.dot(h, w2_ref[...], preferred_element_type=jnp.float32) + b2_ref[...]
    h = jnp.maximum(h, 0.0).astype(jnp.bfloat16)
    h = jnp.dot(h, w3_ref[...], preferred_element_type=jnp.float32) + b3_ref[...]
    h = jnp.maximum(h, 0.0).astype(jnp.bfloat16)
    h = jnp.dot(h, w4_ref[...], preferred_element_type=jnp.float32) + b4_ref[...]
    h = jnp.maximum(h, 0.0).astype(jnp.bfloat16)

    # output head: columns zero-padded to 128 -> lane-dense, unmasked store.
    o_ref[...] = jnp.dot(h, w5_ref[...], preferred_element_type=jnp.float32) + b5_ref[...]


# ----------------------------------------------------------------------------
# Parameter init (mirrors MLPAdaptiveRecurrence.__init__) + kernel-side prep
# ----------------------------------------------------------------------------
def init_params(key, in_size, width, out_size=12, eps=10.0, delta=10.0):
    """Raw f32 parameters; weights stored transposed as (in, out)."""
    d_in = width * width * in_size
    sizes = [d_in, *HIDDEN_ARCH, out_size]
    params = {}
    keys = jax.random.split(key, len(sizes) - 1)
    for idx, (fan_in, fan_out) in enumerate(zip(sizes[:-1], sizes[1:]), start=1):
        std = (2.0 / fan_in) ** 0.5                      # kaiming_normal_, fan_in
        params[f"w{idx}"] = std * jax.random.normal(
            keys[idx - 1], (fan_in, fan_out), dtype=jnp.float32)
        params[f"b{idx}"] = jnp.zeros((1, fan_out), jnp.float32)
    # BatchNorm1d (layers 2..4), eval mode with default running stats:
    # scale = gamma/sqrt(var+eps) = 1/sqrt(1+eps); shift = beta - mean*scale = 0
    for idx, c in zip((2, 3, 4), HIDDEN_ARCH[1:]):
        params[f"s{idx}"] = jnp.full((1, c), 1.0 / (1.0 + BN_EPS) ** 0.5, jnp.float32)
        params[f"t{idx}"] = jnp.zeros((1, c), jnp.float32)
    # ReccurrentBlock parameters (constant-initialized)
    params["rec_eps"] = jnp.float32(eps)
    params["rec_delta"] = jnp.float32(delta)
    return params


def prepare_params(params):
    """One-time prep: fold eval-mode BN into Linears, cast to bf16, pad output head."""
    d_in = params["w1"].shape[0]
    out_size = params["w5"].shape[1]
    out_p = _round_up(out_size, 128)

    prep = {"d_in": d_in, "out_size": out_size}
    prep["w1"] = params["w1"].astype(jnp.bfloat16)
    prep["b1"] = params["b1"].astype(jnp.float32)
    for idx in (2, 3, 4):
        s, t = params[f"s{idx}"], params[f"t{idx}"]
        prep[f"w{idx}"] = (params[f"w{idx}"] * s).astype(jnp.bfloat16)
        prep[f"b{idx}"] = (params[f"b{idx}"] * s + t).astype(jnp.float32)
    # Output head: zero-pad columns to 128 for a lane-dense output slab.
    prep["w5"] = jnp.pad(params["w5"], ((0, 0), (0, out_p - out_size))).astype(jnp.bfloat16)
    prep["b5"] = jnp.pad(params["b5"], ((0, 0), (0, out_p - out_size))).astype(jnp.float32)
    # Rec-block scalars live in SMEM, shaped (1,).
    prep["rec_eps"] = jnp.asarray(params["rec_eps"], jnp.float32).reshape(1)
    prep["rec_delta"] = jnp.asarray(params["rec_delta"], jnp.float32).reshape(1)
    return prep


# ----------------------------------------------------------------------------
# Tile selection + VMEM budgeting
# ----------------------------------------------------------------------------
def _vmem_bytes(bm, d_in, out_p, x_itemsize, weights_double):
    """Conservative VMEM estimate for one pallas_call."""
    h1, h2, h3, h4 = HIDDEN_ARCH
    wbuf = 2 if weights_double else 1
    weights = 2 * (d_in * h1 + h1 * h2 + h2 * h3 + h3 * h4 + h4 * out_p) * wbuf
    biases = 4 * 8 * (h1 + h2 + h3 + h4 + out_p) * wbuf   # (1,h) pads to 8 sublanes
    x_buf = 2 * bm * d_in * x_itemsize                     # double-buffered x tile
    out_buf = 2 * bm * out_p * 4                           # double-buffered output tile
    acts = 3 * bm * h4 * 4                                 # live activation temporaries
    return weights + biases + x_buf + out_buf + acts


def _choose_bm(n, d_in, out_p, x_itemsize):
    if n <= 16:
        bm = _round_up(n, 8)                      # tiny batch: one grid step
    elif n <= 1024:
        bm = min(_round_up(pl.cdiv(n, 2), 8), 512)  # >=2 steps: both TCs on v7x
    else:
        bm = 512                                   # big tiles: amortize overhead, fill MXU
    # Keep the conservative estimate under the v7x 32 MiB scoped default
    # (assume double-buffered weights in case the single-buffer hint is rejected).
    budget = 24 * 1024 * 1024
    while bm > 8 and _vmem_bytes(bm, d_in, out_p, x_itemsize, True) > budget:
        bm = max(8, _round_up(bm // 2, 8))
    return bm


# ----------------------------------------------------------------------------
# Forward wrapper
# ----------------------------------------------------------------------------
def mlp_adaptive_recurrence_forward(x, prep, image_type="vi", bm=None):
    """Forward pass of MLPAdaptiveRecurrence.

    x: (N, C, H, W), f32 or bf16 (NCHW, like PyTorch).
    prep: dict from prepare_params(init_params(...)).
    """
    n = x.shape[0]
    x_flat = x.reshape(n, -1)                      # free reshape; keep producer dtype
    if x_flat.dtype not in (jnp.float32, jnp.bfloat16):
        x_flat = x_flat.astype(jnp.float32)
    d_in = x_flat.shape[1]
    assert d_in == prep["d_in"], "input features do not match the prepared params"

    out_p = prep["w5"].shape[1]
    out_size = prep["out_size"]
    h1, h2, h3, h4 = HIDDEN_ARCH
    x_itemsize = jnp.dtype(x_flat.dtype).itemsize

    if bm is None:
        bm = _choose_bm(n, d_in, out_p, x_itemsize)
    grid = (pl.cdiv(n, bm),)                       # ragged last tile; no x padding copy

    apply_rec = image_type != "vi"
    kernel = functools.partial(_fused_mlp_kernel, apply_rec=apply_rec)

    vmem_limit = int(min(max(2 * _vmem_bytes(bm, d_in, out_p, x_itemsize, True),
                             32 * 1024 * 1024), 56 * 1024 * 1024))

    def build(single_buffer_weights):
        def const2d(shape):
            # Grid-invariant block (weights/biases): resident across all grid steps.
            if single_buffer_weights:
                return pl.BlockSpec(shape, lambda i: (0, 0),
                                    pipeline_mode=pl.Buffered(1))
            return pl.BlockSpec(shape, lambda i: (0, 0))

        in_specs = [
            pl.BlockSpec(memory_space=pltpu.SMEM),            # rec_eps   (1,)
            pl.BlockSpec(memory_space=pltpu.SMEM),            # rec_delta (1,)
            pl.BlockSpec((bm, d_in), lambda i: (i, 0)),        # x tile (full-extent K)
            const2d((d_in, h1)), const2d((1, h1)),             # W1, b1
            const2d((h1, h2)), const2d((1, h2)),               # W2', b2'
            const2d((h2, h3)), const2d((1, h3)),               # W3', b3'
            const2d((h3, h4)), const2d((1, h4)),               # W4', b4'
            const2d((h4, out_p)), const2d((1, out_p)),         # W5 (padded), b5 (padded)
        ]
        out_spec = pl.BlockSpec((bm, out_p), lambda i: (i, 0))
        return pl.pallas_call(
            kernel,
            out_shape=jax.ShapeDtypeStruct((n, out_p), jnp.float32),
            grid=grid,
            in_specs=in_specs,
            out_specs=out_spec,
            compiler_params=pltpu.CompilerParams(
                dimension_semantics=("parallel",),
                vmem_limit_bytes=vmem_limit),
        )

    args = (prep["rec_eps"], prep["rec_delta"], x_flat,
            prep["w1"], prep["b1"],
            prep["w2"], prep["b2"],
            prep["w3"], prep["b3"],
            prep["w4"], prep["b4"],
            prep["w5"], prep["b5"])
    try:
        out = build(True)(*args)          # single-buffered resident weights
    except Exception:
        out = build(False)(*args)         # fallback: default double-buffering
    return out[:, :out_size]


# ----------------------------------------------------------------------------
# Pure-JAX f32 reference (mirrors the PyTorch module in eval mode)
# ----------------------------------------------------------------------------
def mlp_adaptive_recurrence_reference(x, params, image_type="vi"):
    n = x.shape[0]
    h = x.reshape(n, -1).astype(jnp.float32)
    if image_type != "vi":
        h = jnp.minimum(jnp.floor(h * params["rec_eps"]), params["rec_delta"])
    h = jax.nn.relu(h @ params["w1"] + params["b1"])
    for idx in (2, 3, 4):
        h = h @ params[f"w{idx}"] + params[f"b{idx}"]
        h = h * params[f"s{idx}"] + params[f"t{idx}"]
        h = jax.nn.relu(h)
    return h @ params["w5"] + params["b5"]


# ----------------------------------------------------------------------------
if __name__ == "__main__":
    key = jax.random.PRNGKey(0)
    k_x, k_p, k_x2 = jax.random.split(key, 3)

    # Small shapes consistent with the module: NCHW, width x width spatial.
    N, C, W, OUT = 2, 4, 16, 12                  # flattened features = 4*16*16 = 1024
    x = jax.random.normal(k_x, (N, C, W, W), dtype=jnp.float32)

    raw_params = init_params(k_p, in_size=C, width=W, out_size=OUT)
    prep = prepare_params(raw_params)            # one-time: fold BN, cast bf16, pad head

    def check(xin, image_type):
        y = mlp_adaptive_recurrence_forward(xin, prep, image_type=image_type)
        jax.block_until_ready(y)
        assert y.shape == (xin.shape[0], OUT)
        assert bool(jnp.isfinite(y).all())
        y_ref = mlp_adaptive_recurrence_reference(xin, raw_params, image_type=image_type)
        err = float(jnp.max(jnp.abs(y - y_ref)) / (jnp.max(jnp.abs(y_ref)) + 1e-6))
        assert err < 0.1, f"mismatch vs f32 reference ({image_type}): {err}"

    # default path: image_type='vi' (no recurrent block)
    check(x, "vi")
    # non-'vi' path also exercises the fused ReccurrentBlock
    check(x, "sar")
    # larger batch: multi-step grid (ragged last tile, >=2 steps for megacore)
    x_big = jax.random.normal(k_x2, (300, C, W, W), dtype=jnp.float32)
    check(x_big, "vi")

    print("KERNEL_OK")
</pallas_src>

<mosaic_0001>
module attributes {stable_mosaic.version = 11 : i64} {
  func.func @_fused_mlp_kernel(%arg0: i32, %arg1: memref<1xf32, #tpu.memory_space<smem>>, %arg2: memref<1xf32, #tpu.memory_space<smem>>, %arg3: memref<8x1024xf32, #tpu.memory_space<vmem>>, %arg4: memref<1024x128xbf16, #tpu.memory_space<vmem>>, %arg5: memref<1x128xf32, #tpu.memory_space<vmem>>, %arg6: memref<128x256xbf16, #tpu.memory_space<vmem>>, %arg7: memref<1x256xf32, #tpu.memory_space<vmem>>, %arg8: memref<256x512xbf16, #tpu.memory_space<vmem>>, %arg9: memref<1x512xf32, #tpu.memory_space<vmem>>, %arg10: memref<512x1024xbf16, #tpu.memory_space<vmem>>, %arg11: memref<1x1024xf32, #tpu.memory_space<vmem>>, %arg12: memref<1024x128xbf16, #tpu.memory_space<vmem>>, %arg13: memref<1x128xf32, #tpu.memory_space<vmem>>, %arg14: memref<8x128xf32, #tpu.memory_space<vmem>>) attributes {dimension_semantics = [#tpu.dimension_semantics<parallel>], iteration_bounds = array<i64: 1>, scalar_prefetch = 0 : i64, scratch_operands = 0 : i64, tpu.core_type = #tpu.core_type<tc>, window_params = [{transform_indices = @transform_0, window_bounds = array<i64: 1>}, {transform_indices = @transform_1, window_bounds = array<i64: 1>}, {transform_indices = @transform_2, window_bounds = array<i64: 8, 1024>}, {pipeline_mode = #tpu.pipeline_mode<synchronous>, transform_indices = @transform_3, window_bounds = array<i64: 1024, 128>}, {pipeline_mode = #tpu.pipeline_mode<synchronous>, transform_indices = @transform_4, window_bounds = array<i64: 1, 128>}, {pipeline_mode = #tpu.pipeline_mode<synchronous>, transform_indices = @transform_5, window_bounds = array<i64: 128, 256>}, {pipeline_mode = #tpu.pipeline_mode<synchronous>, transform_indices = @transform_6, window_bounds = array<i64: 1, 256>}, {pipeline_mode = #tpu.pipeline_mode<synchronous>, transform_indices = @transform_7, window_bounds = array<i64: 256, 512>}, {pipeline_mode = #tpu.pipeline_mode<synchronous>, transform_indices = @transform_8, window_bounds = array<i64: 1, 512>}, {pipeline_mode = #tpu.pipeline_mode<synchronous>, transform_indices = @transform_9, window_bounds = array<i64: 512, 1024>}, {pipeline_mode = #tpu.pipeline_mode<synchronous>, transform_indices = @transform_10, window_bounds = array<i64: 1, 1024>}, {pipeline_mode = #tpu.pipeline_mode<synchronous>, transform_indices = @transform_11, window_bounds = array<i64: 1024, 128>}, {pipeline_mode = #tpu.pipeline_mode<synchronous>, transform_indices = @transform_12, window_bounds = array<i64: 1, 128>}, {transform_indices = @transform_13, window_bounds = array<i64: 8, 128>}]} {
    %c0 = arith.constant 0 : index
    %c0_0 = arith.constant 0 : index
    %0 = vector.load %arg3[%c0, %c0_0] : memref<8x1024xf32, #tpu.memory_space<vmem>>, vector<8x1024xf32>
    %1 = arith.truncf %0 : vector<8x1024xf32> to vector<8x1024xbf16>
    %c0_1 = arith.constant 0 : index
    %c0_2 = arith.constant 0 : index
    %2 = vector.load %arg4[%c0_1, %c0_2] : memref<1024x128xbf16, #tpu.memory_space<vmem>>, vector<1024x128xbf16>
    %cst = arith.constant dense<0.000000e+00> : vector<8x128xf32>
    %3 = tpu.matmul %1, %2, %cst {dimension_numbers = #tpu.dot_dimension_numbers<[1], [0], [0], [1], [0, 0, 1, 1], [], []>} : vector<8x1024xbf16>, vector<1024x128xbf16>, vector<8x128xf32> -> vector<8x128xf32>
    %c0_3 = arith.constant 0 : index
    %c0_4 = arith.constant 0 : index
    %4 = vector.load %arg5[%c0_3, %c0_4] : memref<1x128xf32, #tpu.memory_space<vmem>>, vector<1x128xf32>
    %5 = vector.broadcast %4 : vector<1x128xf32> to vector<8x128xf32>
    %6 = arith.addf %3, %5 : vector<8x128xf32>
    %cst_5 = arith.constant 0.000000e+00 : f32
    %7 = vector.broadcast %cst_5 : f32 to vector<8x128xf32>
    %8 = arith.maximumf %6, %7 : vector<8x128xf32>
    %9 = arith.truncf %8 : vector<8x128xf32> to vector<8x128xbf16>
    %c0_6 = arith.constant 0 : index
    %c0_7 = arith.constant 0 : index
    %10 = vector.load %arg6[%c0_6, %c0_7] : memref<128x256xbf16, #tpu.memory_space<vmem>>, vector<128x256xbf16>
    %cst_8 = arith.constant dense<0.000000e+00> : vector<8x256xf32>
    %11 = tpu.matmul %9, %10, %cst_8 {dimension_numbers = #tpu.dot_dimension_numbers<[1], [0], [0], [1], [0, 0, 1, 1], [], []>} : vector<8x128xbf16>, vector<128x256xbf16>, vector<8x256xf32> -> vector<8x256xf32>
    %c0_9 = arith.constant 0 : index
    %c0_10 = arith.constant 0 : index
    %12 = vector.load %arg7[%c0_9, %c0_10] : memref<1x256xf32, #tpu.memory_space<vmem>>, vector<1x256xf32>
    %13 = vector.broadcast %12 : vector<1x256xf32> to vector<8x256xf32>
    %14 = arith.addf %11, %13 : vector<8x256xf32>
    %cst_11 = arith.constant 0.000000e+00 : f32
    %15 = vector.broadcast %cst_11 : f32 to vector<8x256xf32>
    %16 = arith.maximumf %14, %15 : vector<8x256xf32>
    %17 = arith.truncf %16 : vector<8x256xf32> to vector<8x256xbf16>
    %c0_12 = arith.constant 0 : index
    %c0_13 = arith.constant 0 : index
    %18 = vector.load %arg8[%c0_12, %c0_13] : memref<256x512xbf16, #tpu.memory_space<vmem>>, vector<256x512xbf16>
    %cst_14 = arith.constant dense<0.000000e+00> : vector<8x512xf32>
    %19 = tpu.matmul %17, %18, %cst_14 {dimension_numbers = #tpu.dot_dimension_numbers<[1], [0], [0], [1], [0, 0, 1, 1], [], []>} : vector<8x256xbf16>, vector<256x512xbf16>, vector<8x512xf32> -> vector<8x512xf32>
    %c0_15 = arith.constant 0 : index
    %c0_16 = arith.constant 0 : index
    %20 = vector.load %arg9[%c0_15, %c0_16] : memref<1x512xf32, #tpu.memory_space<vmem>>, vector<1x512xf32>
    %21 = vector.broadcast %20 : vector<1x512xf32> to vector<8x512xf32>
    %22 = arith.addf %19, %21 : vector<8x512xf32>
    %cst_17 = arith.constant 0.000000e+00 : f32
    %23 = vector.broadcast %cst_17 : f32 to vector<8x512xf32>
    %24 = arith.maximumf %22, %23 : vector<8x512xf32>
    %25 = arith.truncf %24 : vector<8x512xf32> to vector<8x512xbf16>
    %c0_18 = arith.constant 0 : index
    %c0_19 = arith.constant 0 : index
    %26 = vector.load %arg10[%c0_18, %c0_19] : memref<512x1024xbf16, #tpu.memory_space<vmem>>, vector<512x1024xbf16>
    %cst_20 = arith.constant dense<0.000000e+00> : vector<8x1024xf32>
    %27 = tpu.matmul %25, %26, %cst_20 {dimension_numbers = #tpu.dot_dimension_numbers<[1], [0], [0], [1], [0, 0, 1, 1], [], []>} : vector<8x512xbf16>, vector<512x1024xbf16>, vector<8x1024xf32> -> vector<8x1024xf32>
    %c0_21 = arith.constant 0 : index
    %c0_22 = arith.constant 0 : index
    %28 = vector.load %arg11[%c0_21, %c0_22] : memref<1x1024xf32, #tpu.memory_space<vmem>>, vector<1x1024xf32>
    %29 = vector.broadcast %28 : vector<1x1024xf32> to vector<8x1024xf32>
    %30 = arith.addf %27, %29 : vector<8x1024xf32>
    %cst_23 = arith.constant 0.000000e+00 : f32
    %31 = vector.broadcast %cst_23 : f32 to vector<8x1024xf32>
    %32 = arith.maximumf %30, %31 : vector<8x1024xf32>
    %33 = arith.truncf %32 : vector<8x1024xf32> to vector<8x1024xbf16>
    %c0_24 = arith.constant 0 : index
    %c0_25 = arith.constant 0 : index
    %34 = vector.load %arg12[%c0_24, %c0_25] : memref<1024x128xbf16, #tpu.memory_space<vmem>>, vector<1024x128xbf16>
    %cst_26 = arith.constant dense<0.000000e+00> : vector<8x128xf32>
    %35 = tpu.matmul %33, %34, %cst_26 {dimension_numbers = #tpu.dot_dimension_numbers<[1], [0], [0], [1], [0, 0, 1, 1], [], []>} : vector<8x1024xbf16>, vector<1024x128xbf16>, vector<8x128xf32> -> vector<8x128xf32>
    %c0_27 = arith.constant 0 : index
    %c0_28 = arith.constant 0 : index
    %36 = vector.load %arg13[%c0_27, %c0_28] : memref<1x128xf32, #tpu.memory_space<vmem>>, vector<1x128xf32>
    %37 = vector.broadcast %36 : vector<1x128xf32> to vector<8x128xf32>
    %38 = arith.addf %35, %37 : vector<8x128xf32>
    %c0_29 = arith.constant 0 : index
    %c0_30 = arith.constant 0 : index
    %39 = vector.load %arg14[%c0_29, %c0_30] : memref<8x128xf32, #tpu.memory_space<vmem>>, vector<8x128xf32>
    tpu.vector_store %arg14[%c0_29, %c0_30], %38 {strides = array<i32>} : memref<8x128xf32, #tpu.memory_space<vmem>>, vector<8x128xf32>,
    return
  }
  func.func @transform_0(%arg0: i32) -> i32 {
    %c0_i32 = arith.constant 0 : i32
    %c0_i32_0 = arith.constant 0 : i32
    return %c0_i32 : i32
  }
  func.func @transform_1(%arg0: i32) -> i32 {
    %c0_i32 = arith.constant 0 : i32
    %c0_i32_0 = arith.constant 0 : i32
    return %c0_i32 : i32
  }
  func.func @transform_2(%arg0: i32) -> (i32, i32) {
    %c0_i32 = arith.constant 0 : i32
    %c0_i32_0 = arith.constant 0 : i32
    return %arg0, %c0_i32 : i32, i32
  }
  func.func @transform_3(%arg0: i32) -> (i32, i32) {
    %c0_i32 = arith.constant 0 : i32
    %c0_i32_0 = arith.constant 0 : i32
    %c0_i32_1 = arith.constant 0 : i32
    return %c0_i32, %c0_i32_0 : i32, i32
  }
  func.func @transform_4(%arg0: i32) -> (i32, i32) {
    %c0_i32 = arith.constant 0 : i32
    %c0_i32_0 = arith.constant 0 : i32
    %c0_i32_1 = arith.constant 0 : i32
    return %c0_i32, %c0_i32_0 : i32, i32
  }
  func.func @transform_5(%arg0: i32) -> (i32, i32) {
    %c0_i32 = arith.constant 0 : i32
    %c0_i32_0 = arith.constant 0 : i32
    %c0_i32_1 = arith.constant 0 : i32
    return %c0_i32, %c0_i32_0 : i32, i32
  }
  func.func @transform_6(%arg0: i32) -> (i32, i32) {
    %c0_i32 = arith.constant 0 : i32
    %c0_i32_0 = arith.constant 0 : i32
    %c0_i32_1 = arith.constant 0 : i32
    return %c0_i32, %c0_i32_0 : i32, i32
  }
  func.func @transform_7(%arg0: i32) -> (i32, i32) {
    %c0_i32 = arith.constant 0 : i32
    %c0_i32_0 = arith.constant 0 : i32
    %c0_i32_1 = arith.constant 0 : i32
    return %c0_i32, %c0_i32_0 : i32, i32
  }
  func.func @transform_8(%arg0: i32) -> (i32, i32) {
    %c0_i32 = arith.constant 0 : i32
    %c0_i32_0 = arith.constant 0 : i32
    %c0_i32_1 = arith.constant 0 : i32
    return %c0_i32, %c0_i32_0 : i32, i32
  }
  func.func @transform_9(%arg0: i32) -> (i32, i32) {
    %c0_i32 = arith.constant 0 : i32
    %c0_i32_0 = arith.constant 0 : i32
    %c0_i32_1 = arith.constant 0 : i32
    return %c0_i32, %c0_i32_0 : i32, i32
  }
  func.func @transform_10(%arg0: i32) -> (i32, i32) {
    %c0_i32 = arith.constant 0 : i32
    %c0_i32_0 = arith.constant 0 : i32
    %c0_i32_1 = arith.constant 0 : i32
    return %c0_i32, %c0_i32_0 : i32, i32
  }
  func.func @transform_11(%arg0: i32) -> (i32, i32) {
    %c0_i32 = arith.constant 0 : i32
    %c0_i32_0 = arith.constant 0 : i32
    %c0_i32_1 = arith.constant 0 : i32
    return %c0_i32, %c0_i32_0 : i32, i32
  }
  func.func @transform_12(%arg0: i32) -> (i32, i32) {
    %c0_i32 = arith.constant 0 : i32
    %c0_i32_0 = arith.constant 0 : i32
    %c0_i32_1 = arith.constant 0 : i32
    return %c0_i32, %c0_i32_0 : i32, i32
  }
  func.func @transform_13(%arg0: i32) -> (i32, i32) {
    %c0_i32 = arith.constant 0 : i32
    %c0_i32_0 = arith.constant 0 : i32
    return %arg0, %c0_i32 : i32, i32
  }
}

module attributes {stable_mosaic.version = 11 : i64} {
  func.func @_fused_mlp_kernel(%arg0: i32, %arg1: memref<1xf32, #tpu.memory_space<smem>>, %arg2: memref<1xf32, #tpu.memory_space<smem>>, %arg3: memref<8x1024xf32, #tpu.memory_space<vmem>>, %arg4: memref<1024x128xbf16, #tpu.memory_space<vmem>>, %arg5: memref<1x128xf32, #tpu.memory_space<vmem>>, %arg6: memref<128x256xbf16, #tpu.memory_space<vmem>>, %arg7: memref<1x256xf32, #tpu.memory_space<vmem>>, %arg8: memref<256x512xbf16, #tpu.memory_space<vmem>>, %arg9: memref<1x512xf32, #tpu.memory_space<vmem>>, %arg10: memref<512x1024xbf16, #tpu.memory_space<vmem>>, %arg11: memref<1x1024xf32, #tpu.memory_space<vmem>>, %arg12: memref<1024x128xbf16, #tpu.memory_space<vmem>>, %arg13: memref<1x128xf32, #tpu.memory_space<vmem>>, %arg14: memref<8x128xf32, #tpu.memory_space<vmem>>) attributes {dimension_semantics = [#tpu.dimension_semantics<parallel>], iteration_bounds = array<i64: 1>, scalar_prefetch = 0 : i64, scratch_operands = 0 : i64, tpu.core_type = #tpu.core_type<tc>, window_params = [{transform_indices = @transform_0, window_bounds = array<i64: 1>}, {transform_indices = @transform_1, window_bounds = array<i64: 1>}, {transform_indices = @transform_2, window_bounds = array<i64: 8, 1024>}, {pipeline_mode = #tpu.pipeline_mode<synchronous>, transform_indices = @transform_3, window_bounds = array<i64: 1024, 128>}, {pipeline_mode = #tpu.pipeline_mode<synchronous>, transform_indices = @transform_4, window_bounds = array<i64: 1, 128>}, {pipeline_mode = #tpu.pipeline_mode<synchronous>, transform_indices = @transform_5, window_bounds = array<i64: 128, 256>}, {pipeline_mode = #tpu.pipeline_mode<synchronous>, transform_indices = @transform_6, window_bounds = array<i64: 1, 256>}, {pipeline_mode = #tpu.pipeline_mode<synchronous>, transform_indices = @transform_7, window_bounds = array<i64: 256, 512>}, {pipeline_mode = #tpu.pipeline_mode<synchronous>, transform_indices = @transform_8, window_bounds = array<i64: 1, 512>}, {pipeline_mode = #tpu.pipeline_mode<synchronous>, transform_indices = @transform_9, window_bounds = array<i64: 512, 1024>}, {pipeline_mode = #tpu.pipeline_mode<synchronous>, transform_indices = @transform_10, window_bounds = array<i64: 1, 1024>}, {pipeline_mode = #tpu.pipeline_mode<synchronous>, transform_indices = @transform_11, window_bounds = array<i64: 1024, 128>}, {pipeline_mode = #tpu.pipeline_mode<synchronous>, transform_indices = @transform_12, window_bounds = array<i64: 1, 128>}, {transform_indices = @transform_13, window_bounds = array<i64: 8, 128>}]} {
    %c0 = arith.constant 0 : index
    %c0_0 = arith.constant 0 : index
    %0 = vector.load %arg3[%c0, %c0_0] : memref<8x1024xf32, #tpu.memory_space<vmem>>, vector<8x1024xf32>
    %1 = arith.truncf %0 : vector<8x1024xf32> to vector<8x1024xbf16>
    %c0_1 = arith.constant 0 : index
    %c0_2 = arith.constant 0 : index
    %2 = vector.load %arg4[%c0_1, %c0_2] : memref<1024x128xbf16, #tpu.memory_space<vmem>>, vector<1024x128xbf16>
    %cst = arith.constant dense<0.000000e+00> : vector<8x128xf32>
    %3 = tpu.matmul %1, %2, %cst {dimension_numbers = #tpu.dot_dimension_numbers<[1], [0], [0], [1], [0, 0, 1, 1], [], []>} : vector<8x1024xbf16>, vector<1024x128xbf16>, vector<8x128xf32> -> vector<8x128xf32>
    %c0_3 = arith.constant 0 : index
    %c0_4 = arith.constant 0 : index
    %4 = vector.load %arg5[%c0_3, %c0_4] : memref<1x128xf32, #tpu.memory_space<vmem>>, vector<1x128xf32>
    %5 = vector.broadcast %4 : vector<1x128xf32> to vector<8x128xf32>
    %6 = arith.addf %3, %5 : vector<8x128xf32>
    %cst_5 = arith.constant 0.000000e+00 : f32
    %7 = vector.broadcast %cst_5 : f32 to vector<8x128xf32>
    %8 = arith.maximumf %6, %7 : vector<8x128xf32>
    %9 = arith.truncf %8 : vector<8x128xf32> to vector<8x128xbf16>
    %c0_6 = arith.constant 0 : index
    %c0_7 = arith.constant 0 : index
    %10 = vector.load %arg6[%c0_6, %c0_7] : memref<128x256xbf16, #tpu.memory_space<vmem>>, vector<128x256xbf16>
    %cst_8 = arith.constant dense<0.000000e+00> : vector<8x256xf32>
    %11 = tpu.matmul %9, %10, %cst_8 {dimension_numbers = #tpu.dot_dimension_numbers<[1], [0], [0], [1], [0, 0, 1, 1], [], []>} : vector<8x128xbf16>, vector<128x256xbf16>, vector<8x256xf32> -> vector<8x256xf32>
    %c0_9 = arith.constant 0 : index
    %c0_10 = arith.constant 0 : index
    %12 = vector.load %arg7[%c0_9, %c0_10] : memref<1x256xf32, #tpu.memory_space<vmem>>, vector<1x256xf32>
    %13 = vector.broadcast %12 : vector<1x256xf32> to vector<8x256xf32>
    %14 = arith.addf %11, %13 : vector<8x256xf32>
    %cst_11 = arith.constant 0.000000e+00 : f32
    %15 = vector.broadcast %cst_11 : f32 to vector<8x256xf32>
    %16 = arith.maximumf %14, %15 : vector<8x256xf32>
    %17 = arith.truncf %16 : vector<8x256xf32> to vector<8x256xbf16>
    %c0_12 = arith.constant 0 : index
    %c0_13 = arith.constant 0 : index
    %18 = vector.load %arg8[%c0_12, %c0_13] : memref<256x512xbf16, #tpu.memory_space<vmem>>, vector<256x512xbf16>
    %cst_14 = arith.constant dense<0.000000e+00> : vector<8x512xf32>
    %19 = tpu.matmul %17, %18, %cst_14 {dimension_numbers = #tpu.dot_dimension_numbers<[1], [0], [0], [1], [0, 0, 1, 1], [], []>} : vector<8x256xbf16>, vector<256x512xbf16>, vector<8x512xf32> -> vector<8x512xf32>
    %c0_15 = arith.constant 0 : index
    %c0_16 = arith.constant 0 : index
    %20 = vector.load %arg9[%c0_15, %c0_16] : memref<1x512xf32, #tpu.memory_space<vmem>>, vector<1x512xf32>
    %21 = vector.broadcast %20 : vector<1x512xf32> to vector<8x512xf32>
    %22 = arith.addf %19, %21 : vector<8x512xf32>
    %cst_17 = arith.constant 0.000000e+00 : f32
    %23 = vector.broadcast %cst_17 : f32 to vector<8x512xf32>
    %24 = arith.maximumf %22, %23 : vector<8x512xf32>
    %25 = arith.truncf %24 : vector<8x512xf32> to vector<8x512xbf16>
    %c0_18 = arith.constant 0 : index
    %c0_19 = arith.constant 0 : index
    %26 = vector.load %arg10[%c0_18, %c0_19] : memref<512x1024xbf16, #tpu.memory_space<vmem>>, vector<512x1024xbf16>
    %cst_20 = arith.constant dense<0.000000e+00> : vector<8x1024xf32>
    %27 = tpu.matmul %25, %26, %cst_20 {dimension_numbers = #tpu.dot_dimension_numbers<[1], [0], [0], [1], [0, 0, 1, 1], [], []>} : vector<8x512xbf16>, vector<512x1024xbf16>, vector<8x1024xf32> -> vector<8x1024xf32>
    %c0_21 = arith.constant 0 : index
    %c0_22 = arith.constant 0 : index
    %28 = vector.load %arg11[%c0_21, %c0_22] : memref<1x1024xf32, #tpu.memory_space<vmem>>, vector<1x1024xf32>
    %29 = vector.broadcast %28 : vector<1x1024xf32> to vector<8x1024xf32>
    %30 = arith.addf %27, %29 : vector<8x1024xf32>
    %cst_23 = arith.constant 0.000000e+00 : f32
    %31 = vector.broadcast %cst_23 : f32 to vector<8x1024xf32>
    %32 = arith.maximumf %30, %31 : vector<8x1024xf32>
    %33 = arith.truncf %32 : vector<8x1024xf32> to vector<8x1024xbf16>
    %c0_24 = arith.constant 0 : index
    %c0_25 = arith.constant 0 : index
    %34 = vector.load %arg12[%c0_24, %c0_25] : memref<1024x128xbf16, #tpu.memory_space<vmem>>, vector<1024x128xbf16>
    %cst_26 = arith.constant dense<0.000000e+00> : vector<8x128xf32>
    %35 = tpu.matmul %33, %34, %cst_26 {dimension_numbers = #tpu.dot_dimension_numbers<[1], [0], [0], [1], [0, 0, 1, 1], [], []>} : vector<8x1024xbf16>, vector<1024x128xbf16>, vector<8x128xf32> -> vector<8x128xf32>
    %c0_27 = arith.constant 0 : index
    %c0_28 = arith.constant 0 : index
    %36 = vector.load %arg13[%c0_27, %c0_28] : memref<1x128xf32, #tpu.memory_space<vmem>>, vector<1x128xf32>
    %37 = vector.broadcast %36 : vector<1x128xf32> to vector<8x128xf32>
    %38 = arith.addf %35, %37 : vector<8x128xf32>
    %c0_29 = arith.constant 0 : index
    %c0_30 = arith.constant 0 : index
    %39 = vector.load %arg14[%c0_29, %c0_30] : memref<8x128xf32, #tpu.memory_space<vmem>>, vector<8x128xf32>
    tpu.vector_store %arg14[%c0_29, %c0_30], %38 {strides = array<i32>} : memref<8x128xf32, #tpu.memory_space<vmem>>, vector<8x128xf32>,
    return
  }
  func.func @transform_0(%arg0: i32) -> i32 {
    %c0_i32 = arith.constant 0 : i32
    %c0_i32_0 = arith.constant 0 : i32
    return %c0_i32 : i32
  }
  func.func @transform_1(%arg0: i32) -> i32 {
    %c0_i32 = arith.constant 0 : i32
    %c0_i32_0 = arith.constant 0 : i32
    return %c0_i32 : i32
  }
  func.func @transform_2(%arg0: i32) -> (i32, i32) {
    %c0_i32 = arith.constant 0 : i32
    %c0_i32_0 = arith.constant 0 : i32
    return %arg0, %c0_i32 : i32, i32
  }
  func.func @transform_3(%arg0: i32) -> (i32, i32) {
    %c0_i32 = arith.constant 0 : i32
    %c0_i32_0 = arith.constant 0 : i32
    %c0_i32_1 = arith.constant 0 : i32
    return %c0_i32, %c0_i32_0 : i32, i32
  }
  func.func @transform_4(%arg0: i32) -> (i32, i32) {
    %c0_i32 = arith.constant 0 : i32
    %c0_i32_0 = arith.constant 0 : i32
    %c0_i32_1 = arith.constant 0 : i32
    return %c0_i32, %c0_i32_0 : i32, i32
  }
  func.func @transform_5(%arg0: i32) -> (i32, i32) {
    %c0_i32 = arith.constant 0 : i32
    %c0_i32_0 = arith.constant 0 : i32
    %c0_i32_1 = arith.constant 0 : i32
    return %c0_i32, %c0_i32_0 : i32, i32
  }
  func.func @transform_6(%arg0: i32) -> (i32, i32) {
    %c0_i32 = arith.constant 0 : i32
    %c0_i32_0 = arith.constant 0 : i32
    %c0_i32_1 = arith.constant 0 : i32
    return %c0_i32, %c0_i32_0 : i32, i32
  }
  func.func @transform_7(%arg0: i32) -> (i32, i32) {
    %c0_i32 = arith.constant 0 : i32
    %c0_i32_0 = arith.constant 0 : i32
    %c0_i32_1 = arith.constant 0 : i32
    return %c0_i32, %c0_i32_0 : i32, i32
  }
  func.func @transform_8(%arg0: i32) -> (i32, i32) {
    %c0_i32 = arith.constant 0 : i32
    %c0_i32_0 = arith.constant 0 : i32
    %c0_i32_1 = arith.constant 0 : i32
    return %c0_i32, %c0_i32_0 : i32, i32
  }
  func.func @transform_9(%arg0: i32) -> (i32, i32) {
    %c0_i32 = arith.constant 0 : i32
    %c0_i32_0 = arith.constant 0 : i32
    %c0_i32_1 = arith.constant 0 : i32
    return %c0_i32, %c0_i32_0 : i32, i32
  }
  func.func @transform_10(%arg0: i32) -> (i32, i32) {
    %c0_i32 = arith.constant 0 : i32
    %c0_i32_0 = arith.constant 0 : i32
    %c0_i32_1 = arith.constant 0 : i32
    return %c0_i32, %c0_i32_0 : i32, i32
  }
  func.func @transform_11(%arg0: i32) -> (i32, i32) {
    %c0_i32 = arith.constant 0 : i32
    %c0_i32_0 = arith.constant 0 : i32
    %c0_i32_1 = arith.constant 0 : i32
    return %c0_i32, %c0_i32_0 : i32, i32
  }
  func.func @transform_12(%arg0: i32) -> (i32, i32) {
    %c0_i32 = arith.constant 0 : i32
    %c0_i32_0 = arith.constant 0 : i32
    %c0_i32_1 = arith.constant 0 : i32
    return %c0_i32, %c0_i32_0 : i32, i32
  }
  func.func @transform_13(%arg0: i32) -> (i32, i32) {
    %c0_i32 = arith.constant 0 : i32
    %c0_i32_0 = arith.constant 0 : i32
    return %arg0, %c0_i32 : i32, i32
  }
}

</mosaic_0001>

<bundles_post_ra>
// kernel: tpu_custom_call.1
= control target key start
LH: loop header
LB: loop body
LE: loop exit
PB: predicated region body
PF: predicated region fallthrough
CT: control target
= control target key end

     0   :  { %20 = vsyncpa [#allocation5], 0  ;;  %s6875_s0 = inlined_call_operand.<no memory space> [shape: f32[1], index: 0, kind: input, shape index: {}]   ;;  %s6876_s1 = inlined_call_operand.<no memory space> [shape: f32[1], index: 1, kind: input, shape index: {}]   ;;  %s6877_s2 = inlined_call_operand.hbm [shape: f32[2,1024], index: 2, kind: input, shape index: {}]   ;;  %s6878_s3 = inlined_call_operand.hbm [shape: bf16[1024,128], index: 3, kind: input, shape index: {}]   ;;  %s6879_s4 = inlined_call_operand.vmem [shape: f32[1,128], index: 4, kind: input, shape index: {}]   ;;  %s6880_s5 = inlined_call_operand.hbm [shape: bf16[128,256], index: 5, kind: input, shape index: {}]   ;;  %s6881_s6 = inlined_call_operand.vmem [shape: f32[1,256], index: 6, kind: input, shape index: {}]   ;;  %s6882_s7 = inlined_call_operand.hbm [shape: bf16[256,512], index: 7, kind: input, shape index: {}]   ;;  %s6883_s8 = inlined_call_operand.hbm [shape: f32[1,512], index: 8, kind: input, shape index: {}]   ;;  %s6884_s9 = inlined_call_operand.hbm [shape: bf16[512,1024], index: 9, kind: input, shape index: {}]   ;;  %s6885_s10 = inlined_call_operand.vmem [shape: f32[1,1024], index: 10, kind: input, shape index: {}]   ;;  %s6886_s11 = inlined_call_operand.hbm [shape: bf16[1024,128], index: 11, kind: input, shape index: {}]   ;;  %s6887_s12 = inlined_call_operand.vmem [shape: f32[1,128], index: 12, kind: input, shape index: {}]   ;;  %s6888_s13 = inlined_call_operand.hbm [shape: f32[2,128], index: 13, kind: output, shape index: {}]  }
   0x1   :  { %21 = vsyncpa [#allocation8], 0 }
   0x2   :  { %22 = vsyncpa [#allocation11], 0 }
   0x3   :  { %23 = vsyncpa [#allocation14], 0 }
   0x4   :  { %24 = vsyncpa [#allocation6], 0  ;;  %s46_s25 = sshll.u32 %s6878_s3, 4  ;;  %s47_s25 = int_to_ptr.hbm [resolvable:$true] %s46_s25 }
   0x5   :  { %32 = vsyncadd [#allocation5], 768  ;;  %s6639_s26 = smov [#allocation7]   ;;  %s6640_s28 = smov 64  }
   0x6   :  { %s48_s27 = sshll.u32 %s6639_s26, 4  ;;  %s6641_s0 = smov 4   ;;  %s49_s27 = int_to_ptr.vmem [resolvable:$true] %s48_s27 }
   0x7   :  { %54 = dma.hbm_to_vmem [thread:$0]  %s47_s25, 8192, %s49_s27, [#allocation8], %s6640_s28, %s6640_s28, %s6641_s0  }
   0x8   :  { %s76_s30 = sshll.u32 %s6882_s7, 4  ;;  %s6642_s14 = smov [#allocation10]   ;;  %s77_s30 = int_to_ptr.hbm [resolvable:$true] %s76_s30 }
   0x9   :  { %s78_s15 = sshll.u32 %s6642_s14, 4  ;;  %s100_s17 = sshll.u32 %s6884_s9, 4  ;;  %s79_s15 = int_to_ptr.vmem [resolvable:$true] %s78_s15  ;;  %s101_s17 = int_to_ptr.hbm [resolvable:$true] %s100_s17 }
   0xa   :  { %s6643_s18 = smov 256   ;;  %s6644_s19 = smov 16  }
   0xb   :  { %84 = dma.hbm_to_vmem [thread:$0]  %s77_s30, 8192, %s79_s15, [#allocation11], %s6643_s18, %s6643_s18, %s6644_s19  }
   0xc   :  { %s6645_s20 = smov [#allocation13]   ;;  %s33_s24 = sshll.u32 %s6877_s2, 4  ;;  %s34_s24 = int_to_ptr.hbm [resolvable:$true] %s33_s24 }
   0xd   :  { %s102_s21 = sshll.u32 %s6645_s20, 4  ;;  %s6646_s7 = smov 512   ;;  %s103_s21 = int_to_ptr.vmem [resolvable:$true] %s102_s21 }
   0xe   :  { %s6647_s25 = smov 32   ;;  %s6648_s26 = smov [#allocation4]  }
   0xf   :  { %108 = dma.hbm_to_vmem [thread:$0]  %s101_s17, 32768, %s103_s21, [#allocation14], %s6646_s7, %s6646_s7, %s6647_s25  }
  0x10   :  { %s35_s27 = sshll.u32 %s6648_s26, 4  ;;  %s61_s1 = sshll.u32 %s6880_s5, 4  ;;  %s36_s27 = int_to_ptr.vmem [resolvable:$true] %s35_s27  ;;  %s62_s1 = int_to_ptr.hbm [resolvable:$true] %s61_s1 }
  0x11   :  { %41 = dma.hbm_to_vmem [thread:$0]  %s34_s24, 256, %s36_s27, [#allocation5], %s6643_s18, %s6643_s18, %s6644_s19  }
  0x12   :  { %s6649_s30 = smov [#allocation9]   ;;  %s90_s2 = sshll.u32 %s6883_s8, 4  ;;  %s91_s2 = int_to_ptr.hbm [resolvable:$true] %s90_s2 }
  0x13   :  { %s63_s14 = sshll.u32 %s6649_s30, 4  ;;  %s6650_s3 = smov 128   ;;  %s64_s14 = int_to_ptr.vmem [resolvable:$true] %s63_s14 }
  0x14   :  { %s6651_s20 = smov 8   ;;  %s6652_s17 = smov [#allocation12]  }
  0x15   :  { %69 = dma.hbm_to_vmem [thread:$0]  %s62_s1, 2048, %s64_s14, [#allocation8], %s6650_s3, %s6650_s3, %s6651_s20  }
  0x16   :  { %s92_s21 = sshll.u32 %s6652_s17, 4  ;;  %s115_s5 = sshll.u32 %s6886_s11, 4  ;;  %s93_s21 = int_to_ptr.vmem [resolvable:$true] %s92_s21  ;;  %s116_s5 = int_to_ptr.hbm [resolvable:$true] %s115_s5 }
  0x17   :  { %95 = dma.hbm_to_vmem [thread:$0]  %s91_s2, 64, %s93_s21, [#allocation11]  }
  0x18   :  { %s6653_s18 = smov [#allocation15]  }
  0x19   :  { %s117_s19 = sshll.u32 %s6653_s18, 4  ;;  %s118_s19 = int_to_ptr.vmem [resolvable:$true] %s117_s19 }
  0x1a   :  { %123 = dma.hbm_to_vmem [thread:$0]  %s116_s5, 8192, %s118_s19, [#allocation14], %s6640_s28, %s6640_s28, %s6641_s0  }
  0x1b   :  { %6629 = dma.done.wait [#allocation5], 1024  }
  0x1c   :  { %6630 = vsyncadd [#allocation5], 4294966272 }
  0x1d   :  { %6631 = dma.done.wait [#allocation8], 10240  }
  0x1e   :  { %6632 = vsyncadd [#allocation8], 4294957056 }
  0x1f   :  { %6633 = dma.done.wait [#allocation11], 8256  }
  0x20   :  { %6634 = vsyncadd [#allocation11], 4294959040 }
  0x21   :  { %6635 = dma.done.wait [#allocation14], 40960  }
  0x22   :  { %6636 = vsyncadd [#allocation14], 4294926336  ;;  %v5961_v0 = vld [vmem:[#allocation7 + $0x38] sm:$0xff]  ;;  %v5960_v4 = vld [vmem:[#allocation7 + $0x30] sm:$0xff] }
  0x23   :  { %v5969_v1 = vld [vmem:[#allocation7 + $0x78] sm:$0xff]  ;;  %725 = vmatpush.bf16.msra.mxu0 %v5961_v0  ;;  %v5968_v5 = vld [vmem:[#allocation7 + $0x70] sm:$0xff]  ;;  %v5959_v8 = vld [vmem:[#allocation7 + $0x28] sm:$0xff] }
  0x24   :  { %v5977_v2 = vld [vmem:[#allocation7 + $0xb8] sm:$0xff]  ;;  %738 = vmatpush.bf16.msra.mxu1 %v5969_v1  ;;  %v5976_v6 = vld [vmem:[#allocation7 + $0xb0] sm:$0xff]  ;;  %v5967_v9 = vld [vmem:[#allocation7 + $0x68] sm:$0xff] }
  0x25   :  { %v5985_v3 = vld [vmem:[#allocation7 + $0xf8] sm:$0xff]  ;;  %751 = vmatpush.bf16.msra.mxu2 %v5977_v2  ;;  %v5984_v7 = vld [vmem:[#allocation7 + $0xf0] sm:$0xff]  ;;  %v5975_v10 = vld [vmem:[#allocation7 + $0xa8] sm:$0xff] }
  0x26   :  { %764 = vmatpush.bf16.msra.mxu3 %v5985_v3  ;;  %v5983_v11 = vld [vmem:[#allocation7 + $0xe8] sm:$0xff]  ;;  %v5958_v12 = vld [vmem:[#allocation7 + $0x20] sm:$0xff]  ;;  %v5957_v16 = vld [vmem:[#allocation7 + $0x18] sm:$0xff] }
  0x27   :  { %726 = vmatpush.bf16.msra.mxu0 %v5960_v4  ;;  %v5966_v13 = vld [vmem:[#allocation7 + $0x60] sm:$0xff]  ;;  %v156_v18 = vld [vmem:[#allocation4 + $0x10] sm:$0xff]  ;;  %v5965_v19 = vld [vmem:[#allocation7 + $0x58] sm:$0xff] }
  0x28   :  { %739 = vmatpush.bf16.msra.mxu1 %v5968_v5  ;;  %v5974_v14 = vld [vmem:[#allocation7 + $0xa0] sm:$0xff]  ;;  %v160_v21 = vld [vmem:[#allocation4 + $0x30] sm:$0xff]  ;;  %v5973_v22 = vld [vmem:[#allocation7 + $0x98] sm:$0xff]  ;;  %172 = vst [vmem:[#allocation1 + $0x1] ss:$4 sm:$0xff] %v156_v18 }
  0x29   :  { %752 = vmatpush.bf16.msra.mxu2 %v5976_v6  ;;  %v5982_v15 = vld [vmem:[#allocation7 + $0xe0] sm:$0xff]  ;;  %v5981_v23 = vld [vmem:[#allocation7 + $0xd8] sm:$0xff]  ;;  %176 = vst [vmem:[#allocation1 + $0x3] ss:$4 sm:$0xff] %v160_v21  ;;  %v5956_v24 = vld [vmem:[#allocation7 + $0x10] sm:$0xff] }
  0x2a   :  { %765 = vmatpush.bf16.msra.mxu3 %v5984_v7  ;;  %v154_v17 = vld [vmem:[#allocation4] sm:$0xff]  ;;  %v5964_v25 = vld [vmem:[#allocation7 + $0x50] sm:$0xff]  ;;  %v155_v28 = vld [vmem:[#allocation4 + $0x8] sm:$0xff] }
  0x2b   :  { %727 = vmatpush.bf16.msra.mxu0 %v5959_v8  ;;  %v158_v20 = vld [vmem:[#allocation4 + $0x20] sm:$0xff]  ;;  %170 = vst [vmem:[#allocation1] ss:$4 sm:$0xff] %v154_v17  ;;  %v5972_v26 = vld [vmem:[#allocation7 + $0x90] sm:$0xff]  ;;  %v157_v29 = vld [vmem:[#allocation4 + $0x18] sm:$0xff] }
  0x2c   :  { %740 = vmatpush.bf16.msra.mxu1 %v5967_v9  ;;  %174 = vst [vmem:[#allocation1 + $0x2] ss:$4 sm:$0xff] %v158_v20  ;;  %v5980_v27 = vld [vmem:[#allocation7 + $0xd0] sm:$0xff]  ;;  %v5955_v30 = vld [vmem:[#allocation7 + $0x8] sm:$0xff]  ;;  %v5954_v35 = vld [vmem:[#allocation7] sm:$0xff] }
  0x2d   :  { %753 = vmatpush.bf16.msra.mxu2 %v5975_v10  ;;  %v5963_v31 = vld [vmem:[#allocation7 + $0x48] sm:$0xff]  ;;  %178 = vst [vmem:[#allocation1 + $0x20] ss:$4 sm:$0xff] %v155_v28  ;;  %v161_v36 = vld [vmem:[#allocation4 + $0x38] sm:$0xff]  ;;  %v5962_v37 = vld [vmem:[#allocation7 + $0x40] sm:$0xff] }
  0x2e   :  { %766 = vmatpush.bf16.msra.mxu3 %v5983_v11  ;;  %v5971_v32 = vld [vmem:[#allocation7 + $0x88] sm:$0xff]  ;;  %180 = vst [vmem:[#allocation1 + $0x21] ss:$4 sm:$0xff] %v157_v29  ;;  %v5970_v38 = vld [vmem:[#allocation7 + $0x80] sm:$0xff]  ;;  %v5993_v40 = vld [vmem:[#allocation7 + $0x138] sm:$0xff] }
  0x2f   :  { %728 = vmatpush.bf16.msra.mxu0 %v5958_v12  ;;  %v5979_v33 = vld [vmem:[#allocation7 + $0xc8] sm:$0xff]  ;;  %v5978_v39 = vld [vmem:[#allocation7 + $0xc0] sm:$0xff]  ;;  %v6001_v42 = vld [vmem:[#allocation7 + $0x178] sm:$0xff]  ;;  %184 = vst [vmem:[#allocation1 + $0x23] ss:$4 sm:$0xff] %v161_v36 }
  0x30   :  { %741 = vmatpush.bf16.msra.mxu1 %v5966_v13  ;;  %v159_v34 = vld [vmem:[#allocation4 + $0x28] sm:$0xff]  ;;  %v6009_v46 = vld [vmem:[#allocation7 + $0x1b8] sm:$0xff]  ;;  %v5992_v52 = vld [vmem:[#allocation7 + $0x130] sm:$0xff] }
  0x31   :  { %754 = vmatpush.bf16.msra.mxu2 %v5974_v14  ;;  %182 = vst [vmem:[#allocation1 + $0x22] ss:$4 sm:$0xff] %v159_v34  ;;  %v6017_v47 = vld [vmem:[#allocation7 + $0x1f8] sm:$0xff]  ;;  %v6000_v53 = vld [vmem:[#allocation7 + $0x170] sm:$0xff]  ;;  %v5991_v56 = vld [vmem:[#allocation7 + $0x128] sm:$0xff] }
  0x32   :  { %767 = vmatpush.bf16.msra.mxu3 %v5982_v15  ;;  %v6008_v54 = vld [vmem:[#allocation7 + $0x1b0] sm:$0xff]  ;;  %v5999_v57 = vld [vmem:[#allocation7 + $0x168] sm:$0xff]  ;;  %v5990_v60 = vld [vmem:[#allocation7 + $0x120] sm:$0xff] }
  0x33   :  { %729 = vmatpush.bf16.msra.mxu0 %v5957_v16  ;;  %v187_v41 = vld.sshfl [vmem:[#allocation1 + $0x10] sm:$0xff pattern:$0x73625140]  ;;  %v185_v43 = vld.sshfl [vmem:[#allocation1] sm:$0xff pattern:$0x73625140] }
  0x34   :  { %742 = vmatpush.bf16.msra.mxu1 %v5965_v19  ;;  %v188_v44 = vld.sshfl [vmem:[#allocation1 + $0x18] sm:$0xff pattern:$0x73625140]  ;;  %v186_v45 = vld.sshfl [vmem:[#allocation1 + $0x8] sm:$0xff pattern:$0x73625140]  ;;  %v203_v48 = vpack.c.bf16 %v187_v41, %v187_v41  ;;  %v201_v49 = vpack.c.bf16 %v185_v43, %v185_v43 }
  0x35   :  { %755 = vmatpush.bf16.msra.mxu2 %v5973_v22  ;;  %v204_v50 = vpack.c.bf16 %v188_v44, %v188_v44  ;;  %v202_v51 = vpack.c.bf16 %v186_v45, %v186_v45  ;;  %v6016_v55 = vld [vmem:[#allocation7 + $0x1f0] sm:$0xff]  ;;  %v6007_v58 = vld [vmem:[#allocation7 + $0x1a8] sm:$0xff]  ;;  %v5998_v61 = vld [vmem:[#allocation7 + $0x160] sm:$0xff] }
  0x36   :  { %768 = vmatpush.bf16.msra.mxu3 %v5981_v23  ;;  %v6015_v59 = vld [vmem:[#allocation7 + $0x1e8] sm:$0xff]  ;;  %v6006_v62 = vld [vmem:[#allocation7 + $0x1a0] sm:$0xff]  ;;  %v5989_v0 = vld [vmem:[#allocation7 + $0x118] sm:$0xff] }
  0x37   :  { %730 = vmatpush.bf16.msra.mxu0 %v5956_v24  ;;  %v6014_v63 = vld [vmem:[#allocation7 + $0x1e0] sm:$0xff]  ;;  %v5997_v1 = vld [vmem:[#allocation7 + $0x158] sm:$0xff]  ;;  %v5988_v4 = vld [vmem:[#allocation7 + $0x110] sm:$0xff] }
  0x38   :  { %743 = vmatpush.bf16.msra.mxu1 %v5964_v25  ;;  %v6005_v2 = vld [vmem:[#allocation7 + $0x198] sm:$0xff]  ;;  %v5996_v5 = vld [vmem:[#allocation7 + $0x150] sm:$0xff]  ;;  %v5987_v8 = vld [vmem:[#allocation7 + $0x108] sm:$0xff] }
  0x39   :  { %756 = vmatpush.bf16.msra.mxu2 %v5972_v26  ;;  %v6013_v3 = vld [vmem:[#allocation7 + $0x1d8] sm:$0xff]  ;;  %v6004_v6 = vld [vmem:[#allocation7 + $0x190] sm:$0xff]  ;;  %v5995_v9 = vld [vmem:[#allocation7 + $0x148] sm:$0xff] }
  0x3a   :  { %769 = vmatpush.bf16.msra.mxu3 %v5980_v27  ;;  %v6012_v7 = vld [vmem:[#allocation7 + $0x1d0] sm:$0xff]  ;;  %v6003_v10 = vld [vmem:[#allocation7 + $0x188] sm:$0xff]  ;;  %v5986_v12 = vld [vmem:[#allocation7 + $0x100] sm:$0xff] }
  0x3b   :  { %731 = vmatpush.bf16.msra.mxu0 %v5955_v30  ;;  %v6011_v11 = vld [vmem:[#allocation7 + $0x1c8] sm:$0xff]  ;;  %v5994_v13 = vld [vmem:[#allocation7 + $0x140] sm:$0xff]  ;;  %v189_v16 = vld.sshfl [vmem:[#allocation1 + $0x20] sm:$0xff pattern:$0x73625140] }
  0x3c   :  { %744 = vmatpush.bf16.msra.mxu1 %v5963_v31  ;;  %v6002_v14 = vld [vmem:[#allocation7 + $0x180] sm:$0xff]  ;;  %v191_v18 = vld.sshfl [vmem:[#allocation1 + $0x30] sm:$0xff pattern:$0x73625140]  ;;  %v205_v20 = vpack.c.bf16 %v189_v16, %v189_v16  ;;  %v4412_v24 = vld [vmem:[#allocation9 + $0x70] sm:$0xf] }
  0x3d   :  { %757 = vmatpush.bf16.msra.mxu2 %v5971_v32  ;;  %v6010_v15 = vld [vmem:[#allocation7 + $0x1c0] sm:$0xff]  ;;  %v192_v19 = vld.sshfl [vmem:[#allocation1 + $0x38] sm:$0xff pattern:$0x73625140]  ;;  %v207_v22 = vpack.c.bf16 %v191_v18, %v191_v18  ;;  %v6033_v25 = vld [vmem:[#allocation9 + $0x74] sm:$0xf0] }
  0x3e   :  { %770 = vmatpush.bf16.msra.mxu3 %v5979_v33  ;;  %v190_v17 = vld.sshfl [vmem:[#allocation1 + $0x28] sm:$0xff pattern:$0x73625140]  ;;  %v208_v23 = vpack.c.bf16 %v192_v19, %v192_v19  ;;  %v6032_v26 = vld [vmem:[#allocation9 + $0x74] sm:$0xf]  ;;  %v4413_v27 = vor.u32 %v6033_v25, %v4412_v24 }
  0x3f   :  { %732 = vmatpush.bf16.msra.mxu0 %v5954_v35  ;;  %v206_v21 = vpack.c.bf16 %v190_v17, %v190_v17  ;;  %v4414_v28 = vld [vmem:[#allocation9 + $0x78] sm:$0xf0]  ;;  %v4404_v29 = vld [vmem:[#allocation9 + $0x60] sm:$0xf]  ;;  %v6031_v30 = vld [vmem:[#allocation9 + $0x64] sm:$0xf0] }
  0x40   :  { %745 = vmatpush.bf16.msra.mxu1 %v5962_v37  ;;  %v4417_v31 = vor.u32 %v6032_v26, %v4414_v28  ;;  %v6030_v32 = vld [vmem:[#allocation9 + $0x64] sm:$0xf]  ;;  %v4406_v33 = vld [vmem:[#allocation9 + $0x68] sm:$0xf0]  ;;  %v4405_v34 = vor.u32 %v6031_v30, %v4404_v29  ;;  %v4396_v36 = vld [vmem:[#allocation9 + $0x50] sm:$0xf] }
  0x41   :  { %758 = vmatpush.bf16.msra.mxu2 %v5970_v38  ;;  %v4409_v35 = vor.u32 %v6030_v32, %v4406_v33  ;;  %v6029_v37 = vld [vmem:[#allocation9 + $0x54] sm:$0xf0]  ;;  %v6028_v38 = vld [vmem:[#allocation9 + $0x54] sm:$0xf]  ;;  %v6027_v43 = vld [vmem:[#allocation9 + $0x44] sm:$0xf0] }
  0x42   :  { %771 = vmatpush.bf16.msra.mxu3 %v5978_v39  ;;  %733 = vmatmul.bf16.vlgmr.msra.gmra.mxu0 %v201_v49  ;;  %v4397_v39 = vor.u32 %v6029_v37, %v4396_v36  ;;  %v6026_v44 = vld [vmem:[#allocation9 + $0x44] sm:$0xf]  ;;  %v4390_v45 = vld [vmem:[#allocation9 + $0x48] sm:$0xf0]  ;;  %v6025_v49 = vld [vmem:[#allocation9 + $0x34] sm:$0xf0] }
  0x43   :  { %777 = vmatpush.bf16.msrb.mxu0 %v5993_v40  ;;  %746 = vmatmul.bf16.vlgmr.msra.gmra.mxu1 %v202_v51  ;;  %v4398_v40 = vld [vmem:[#allocation9 + $0x58] sm:$0xf0]  ;;  %v6064_v16 = vld [vmem:[#allocation10 + $0xec] sm:$0xf0]  ;;  %v4660_v17 = vld [vmem:[#allocation10 + $0x1e0] sm:$0xf] }
  0x44   :  { %790 = vmatpush.bf16.msrb.mxu1 %v6001_v42  ;;  %759 = vmatmul.bf16.vlgmr.msra.gmra.mxu2 %v203_v48  ;;  %v4401_v41 = vor.u32 %v6028_v38, %v4398_v40  ;;  %v4388_v42 = vld [vmem:[#allocation9 + $0x40] sm:$0xf]  ;;  %v4380_v48 = vld [vmem:[#allocation9 + $0x30] sm:$0xf]  ;;  %v6094_v26 = vld [vmem:[#allocation10 + $0x1e4] sm:$0xf] }
  0x45   :  { %803 = vmatpush.bf16.msrb.mxu2 %v6009_v46  ;;  %772 = vmatmul.bf16.vlgmr.msra.gmra.mxu3 %v204_v50  ;;  %v4389_v46 = vor.u32 %v6027_v43, %v4388_v42  ;;  %v6024_v50 = vld [vmem:[#allocation9 + $0x34] sm:$0xf]  ;;  %v4381_v51 = vor.u32 %v6025_v49, %v4380_v48  ;;  %v4516_v28 = vld [vmem:[#allocation10 + $0xc0] sm:$0xf]  ;;  %v6060_v30 = vld [vmem:[#allocation10 + $0xcc] sm:$0xf0] }
  0x46   :  { %816 = vmatpush.bf16.msrb.mxu3 %v6017_v47  ;;  %v4393_v47 = vor.u32 %v6026_v44, %v4390_v45  ;;  %v6092_v32 = vld [vmem:[#allocation10 + $0x1cc] sm:$0xf0]  ;;  %v6058_v36 = vld [vmem:[#allocation10 + $0xc4] sm:$0xf]  ;;  %v4518_v37 = vld [vmem:[#allocation10 + $0xd0] sm:$0xf0] }
  0x47   :  { %778 = vmatpush.bf16.msrb.mxu0 %v5992_v52  ;;  %v4382_v52 = vld [vmem:[#allocation9 + $0x38] sm:$0xf0]  ;;  %v6090_v38 = vld [vmem:[#allocation10 + $0x1c4] sm:$0xf]  ;;  %v4646_v40 = vld [vmem:[#allocation10 + $0x1d0] sm:$0xf0] }
  0x48   :  { %791 = vmatpush.bf16.msrb.mxu1 %v6000_v53  ;;  %v4385_v53 = vor.u32 %v6024_v50, %v4382_v52  ;;  %v6056_v42 = vld [vmem:[#allocation10 + $0xac] sm:$0xf0]  ;;  %v4649_v43 = vor.u32 %v6090_v38, %v4646_v40  ;;  %v4628_v44 = vld [vmem:[#allocation10 + $0x1a0] sm:$0xf]  ;;  %v4502_v48 = vld [vmem:[#allocation10 + $0xb0] sm:$0xf0] }
  0x49   :  { %804 = vmatpush.bf16.msrb.mxu2 %v6008_v54  ;;  %v4372_v54 = vld [vmem:[#allocation9 + $0x20] sm:$0xf]  ;;  %v6088_v45 = vld [vmem:[#allocation10 + $0x1ac] sm:$0xf0]  ;;  %v6086_v49 = vld [vmem:[#allocation10 + $0x1a4] sm:$0xf] }
  0x4a   :  { %817 = vmatpush.bf16.msrb.mxu3 %v6016_v55  ;;  %v6023_v55 = vld [vmem:[#allocation9 + $0x24] sm:$0xf0]  ;;  %v4630_v50 = vld [vmem:[#allocation10 + $0x1b0] sm:$0xf0]  ;;  %v4629_v52 = vor.u32 %v6088_v45, %v4628_v44 }
  0x4b   :  { %779 = vmatpush.bf16.msrb.mxu0 %v5991_v56  ;;  %v6022_v56 = vld [vmem:[#allocation9 + $0x24] sm:$0xf]  ;;  %v4566_v40 = vld [vmem:[#allocation10 + $0x130] sm:$0xf0] }
  0x4c   :  { %792 = vmatpush.bf16.msrb.mxu1 %v5999_v57 }
  0x4d   :  { %805 = vmatpush.bf16.msrb.mxu2 %v6007_v58  ;;  %v4373_v58 = vor.u32 %v6023_v55, %v4372_v54  ;;  %v4484_v54 = vld [vmem:[#allocation10 + $0x80] sm:$0xf]  ;;  %v6052_v55 = vld [vmem:[#allocation10 + $0x8c] sm:$0xf0] }
  0x4e   :  { %818 = vmatpush.bf16.msrb.mxu3 %v6015_v59  ;;  %v4374_v59 = vld [vmem:[#allocation9 + $0x28] sm:$0xf0] }
  0x4f   :  { %780 = vmatpush.bf16.msrb.mxu0 %v5990_v60 }
  0x50   :  { %793 = vmatpush.bf16.msrb.mxu1 %v5998_v61  ;;  %v4377_v61 = vor.u32 %v6022_v56, %v4374_v59  ;;  %v4612_v56 = vld [vmem:[#allocation10 + $0x180] sm:$0xf]  ;;  %v6050_v59 = vld [vmem:[#allocation10 + $0x84] sm:$0xf] }
  0x51   :  { %806 = vmatpush.bf16.msrb.mxu2 %v6006_v62  ;;  %v4364_v62 = vld [vmem:[#allocation9 + $0x10] sm:$0xf] }
  0x52   :  { %819 = vmatpush.bf16.msrb.mxu3 %v6014_v63  ;;  %v6021_v63 = vld [vmem:[#allocation9 + $0x14] sm:$0xf0] }
  0x53   :  { %781 = vmatpush.bf16.msrb.mxu0 %v5989_v0  ;;  %v6020_v0 = vld [vmem:[#allocation9 + $0x14] sm:$0xf] }
  0x54   :  { %794 = vmatpush.bf16.msrb.mxu1 %v5997_v1  ;;  %v4365_v1 = vor.u32 %v6021_v63, %v4364_v62  ;;  %v6082_v62 = vld [vmem:[#allocation10 + $0x184] sm:$0xf]  ;;  %v4614_v63 = vld [vmem:[#allocation10 + $0x190] sm:$0xf0] }
  0x55   :  { %807 = vmatpush.bf16.msrb.mxu2 %v6005_v2  ;;  %v4366_v2 = vld [vmem:[#allocation9 + $0x18] sm:$0xf0] }
  0x56   :  { %820 = vmatpush.bf16.msrb.mxu3 %v6013_v3  ;;  %v4369_v3 = vor.u32 %v6020_v0, %v4366_v2  ;;  %v4485_v0 = vor.u32 %v6052_v55, %v4484_v54  ;;  %v6034_v54 = vld [vmem:[#allocation10 + $0x4] sm:$0xf]  ;;  %v4422_v55 = vld [vmem:[#allocation10 + $0x10] sm:$0xf0] }
  0x57   :  { %782 = vmatpush.bf16.msrb.mxu0 %v5988_v4 }
  0x58   :  { %795 = vmatpush.bf16.msrb.mxu1 %v5996_v5 }
  0x59   :  { %808 = vmatpush.bf16.msrb.mxu2 %v6004_v6  ;;  %v4356_v6 = vld [vmem:[#allocation9] sm:$0xf] }
  0x5a   :  { %821 = vmatpush.bf16.msrb.mxu3 %v6012_v7  ;;  %v6019_v7 = vld [vmem:[#allocation9 + $0x4] sm:$0xf0] }
  0x5b   :  { %783 = vmatpush.bf16.msrb.mxu0 %v5987_v8  ;;  %v6018_v8 = vld [vmem:[#allocation9 + $0x4] sm:$0xf] }
  0x5c   :  { %796 = vmatpush.bf16.msrb.mxu1 %v5995_v9 }
  0x5d   :  { %809 = vmatpush.bf16.msrb.mxu2 %v6003_v10  ;;  %v4357_v10 = vor.u32 %v6019_v7, %v4356_v6  ;;  %v6048_v6 = vld [vmem:[#allocation10 + $0x6c] sm:$0xf0]  ;;  %v4596_v7 = vld [vmem:[#allocation10 + $0x160] sm:$0xf] }
  0x5e   :  { %822 = vmatpush.bf16.msrb.mxu3 %v6011_v11  ;;  %v4358_v11 = vld [vmem:[#allocation9 + $0x8] sm:$0xf0] }
  0x5f   :  { %784 = vmatpush.bf16.msrb.mxu0 %v5986_v12 }
  0x60   :  { %797 = vmatpush.bf16.msrb.mxu1 %v5994_v13  ;;  %v4361_v13 = vor.u32 %v6018_v8, %v4358_v11  ;;  %v4617_v8 = vor.u32 %v6082_v62, %v4614_v63  ;;  %v4470_v11 = vld [vmem:[#allocation10 + $0x70] sm:$0xf0]  ;;  %v6065_v62 = vld [vmem:[#allocation10 + $0xf4] sm:$0xf0]  ;;  %v4668_v63 = vld [vmem:[#allocation10 + $0x1e8] sm:$0xf] }
  0x61   :  { %810 = vmatpush.bf16.msrb.mxu2 %v6002_v14  ;;  %v6435_v14 = vld [vmem:[%s6879_s4] ss:$0 sm:$0xff] }
  0x62   :  { %823 = vmatpush.bf16.msrb.mxu3 %v6010_v15  ;;  %785 = vmatmul.bf16.vlgmr.msrb.gmra.mxu0 %v205_v20  ;;  %v4532_v15 = vld [vmem:[#allocation10 + $0xe0] sm:$0xf]  ;;  %v6096_v20 = vld [vmem:[#allocation10 + $0x1ec] sm:$0xf0] }
  0x63   :  { %798 = vmatmul.bf16.vlgmr.msrb.gmra.mxu1 %v206_v21  ;;  %933 = vmatpush.bf16.msra.mxu0 %v4413_v27  ;;  %v4533_v19 = vor.u32 %v6064_v16, %v4532_v15  ;;  %v6062_v21 = vld [vmem:[#allocation10 + $0xe4] sm:$0xf]  ;;  %v4661_v24 = vor.u32 %v6096_v20, %v4660_v17  ;;  %v4662_v27 = vld [vmem:[#allocation10 + $0x1f0] sm:$0xf0]  ;;  %v6044_v20 = vld [vmem:[#allocation10 + $0x4c] sm:$0xf0] }
  0x64   :  { %811 = vmatmul.bf16.vlgmr.msrb.gmra.mxu2 %v207_v22  ;;  %946 = vmatpush.bf16.msra.mxu1 %v4417_v31  ;;  %v4534_v22 = vld [vmem:[#allocation10 + $0xf0] sm:$0xf0]  ;;  %v4665_v29 = vor.u32 %v6094_v26, %v4662_v27  ;;  %v4644_v31 = vld [vmem:[#allocation10 + $0x1c0] sm:$0xf]  ;;  %v6074_v27 = vld [vmem:[#allocation10 + $0x144] sm:$0xf] }
  0x65   :  { %824 = vmatmul.bf16.vlgmr.msrb.gmra.mxu3 %v208_v23  ;;  %v4537_v25 = vor.u32 %v6062_v21, %v4534_v22  ;;  %1357 = vmatpush.bf16.msra.mxu2 %v4533_v19  ;;  %v4452_v19 = vld [vmem:[#allocation10 + $0x40] sm:$0xf] }
  0x66   :  { %1370 = vmatpush.bf16.msra.mxu3 %v4661_v24  ;;  %v4580_v21 = vld [vmem:[#allocation10 + $0x140] sm:$0xf]  ;;  %v6042_v24 = vld [vmem:[#allocation10 + $0x44] sm:$0xf] }
  0x67   :  { %934 = vmatpush.bf16.msra.mxu0 %v4405_v34  ;;  %v4517_v34 = vor.u32 %v6060_v30, %v4516_v28  ;;  %v4582_v28 = vld [vmem:[#allocation10 + $0x150] sm:$0xf0] }
  0x68   :  { %947 = vmatpush.bf16.msra.mxu1 %v4409_v35  ;;  %v4645_v35 = vor.u32 %v6092_v32, %v4644_v31  ;;  %v4436_v31 = vld [vmem:[#allocation10 + $0x20] sm:$0xf]  ;;  %v6040_v32 = vld [vmem:[#allocation10 + $0x2c] sm:$0xf0] }
  0x69   :  { %1358 = vmatpush.bf16.msra.mxu2 %v4517_v34  ;;  %v4585_v34 = vor.u32 %v6074_v27, %v4582_v28  ;;  %v4508_v28 = vld [vmem:[#allocation10 + $0xa8] sm:$0xf] }
  0x6a   :  { %1371 = vmatpush.bf16.msra.mxu3 %v4645_v35  ;;  %v6072_v35 = vld [vmem:[#allocation10 + $0x12c] sm:$0xf0] }
  0x6b   :  { %935 = vmatpush.bf16.msra.mxu0 %v4397_v39  ;;  %v4521_v39 = vor.u32 %v6058_v36, %v4518_v37  ;;  %v6038_v36 = vld [vmem:[#allocation10 + $0x24] sm:$0xf]  ;;  %v4438_v37 = vld [vmem:[#allocation10 + $0x30] sm:$0xf0] }
  0x6c   :  { %948 = vmatpush.bf16.msra.mxu1 %v4401_v41  ;;  %v4500_v41 = vld [vmem:[#allocation10 + $0xa0] sm:$0xf] }
  0x6e   :  { %1372 = vmatpush.bf16.msra.mxu3 %v4629_v52 }
  0x6f   :  { %936 = vmatpush.bf16.msra.mxu0 %v4389_v46  ;;  %v6054_v46 = vld [vmem:[#allocation10 + $0xa4] sm:$0xf] }
  0x70   :  { %949 = vmatpush.bf16.msra.mxu1 %v4393_v47  ;;  %v4501_v47 = vor.u32 %v6056_v42, %v4500_v41 }
  0x72   :  { %1359 = vmatpush.bf16.msra.mxu2 %v4501_v47 }
  0x73   :  { %937 = vmatpush.bf16.msra.mxu0 %v4381_v51 }
  0x74   :  { %950 = vmatpush.bf16.msra.mxu1 %v4385_v53  ;;  %v4505_v53 = vor.u32 %v6054_v46, %v4502_v48  ;;  %v4441_v48 = vor.u32 %v6038_v36, %v4438_v37  ;;  %v6087_v36 = vld [vmem:[#allocation10 + $0x1ac] sm:$0xf]  ;;  %v4638_v37 = vld [vmem:[#allocation10 + $0x1b8] sm:$0xf0] }
  0x76   :  { %1360 = vmatpush.bf16.msra.mxu2 %v4485_v0  ;;  %v6097_v0 = vld [vmem:[#allocation10 + $0x1f4] sm:$0xf0] }
  0x77   :  { %938 = vmatpush.bf16.msra.mxu0 %v4373_v58  ;;  %v6084_v58 = vld [vmem:[#allocation10 + $0x18c] sm:$0xf0] }
  0x78   :  { %951 = vmatpush.bf16.msra.mxu1 %v4377_v61  ;;  %v4486_v61 = vld [vmem:[#allocation10 + $0x90] sm:$0xf0] }
  0x79   :  { %v4489_v2 = vor.u32 %v6050_v59, %v4486_v61  ;;  %v4540_v59 = vld [vmem:[#allocation10 + $0xe8] sm:$0xf] }
  0x7b   :  { %939 = vmatpush.bf16.msra.mxu0 %v4365_v1 }
  0x7c   :  { %952 = vmatpush.bf16.msra.mxu1 %v4369_v3  ;;  %v4468_v3 = vld [vmem:[#allocation10 + $0x60] sm:$0xf] }
  0x7f   :  { %940 = vmatpush.bf16.msra.mxu0 %v4357_v10  ;;  %v6046_v10 = vld [vmem:[#allocation10 + $0x64] sm:$0xf] }
  0x80   :  { %953 = vmatpush.bf16.msra.mxu1 %v4361_v13  ;;  %v4598_v13 = vld [vmem:[#allocation10 + $0x170] sm:$0xf0] }
  0x83   :  { %1383 = vmatpush.bf16.msrb.mxu0 %v4537_v25  ;;  %v4454_v25 = vld [vmem:[#allocation10 + $0x50] sm:$0xf0] }
  0x84   :  { %1396 = vmatpush.bf16.msrb.mxu1 %v4665_v29  ;;  %v4453_v29 = vor.u32 %v6044_v20, %v4452_v19  ;;  %v4457_v30 = vor.u32 %v6042_v24, %v4454_v25  ;;  %v6093_v19 = vld [vmem:[#allocation10 + $0x1d4] sm:$0xf0]  ;;  %v6059_v20 = vld [vmem:[#allocation10 + $0xcc] sm:$0xf] }
  0x87   :  { %1384 = vmatpush.bf16.msrb.mxu0 %v4521_v39  ;;  %v6070_v39 = vld [vmem:[#allocation10 + $0x124] sm:$0xf] }
  0x88   :  { %1397 = vmatpush.bf16.msrb.mxu1 %v4649_v43  ;;  %v4437_v43 = vor.u32 %v6040_v32, %v4436_v31  ;;  %v4569_v52 = vor.u32 %v6070_v39, %v4566_v40  ;;  %v6089_v31 = vld [vmem:[#allocation10 + $0x1b4] sm:$0xf0]  ;;  %v6055_v32 = vld [vmem:[#allocation10 + $0xac] sm:$0xf]  ;;  %v4492_v39 = vld [vmem:[#allocation10 + $0x88] sm:$0xf] }
  0x89   :  { %v6053_v40 = vld [vmem:[#allocation10 + $0x94] sm:$0xf0] }
  0x8b   :  { %1385 = vmatpush.bf16.msrb.mxu0 %v4505_v53  ;;  %v6068_v53 = vld [vmem:[#allocation10 + $0x10c] sm:$0xf0] }
  0x8f   :  { %1386 = vmatpush.bf16.msrb.mxu0 %v4489_v2  ;;  %v4542_v2 = vld [vmem:[#allocation10 + $0xf8] sm:$0xf0] }
  0xbf   :  { %v734_v57 = vpop.f32.mrf.mxu0 }
  0xc0   :  { %v6754_v60 = vpop.f32.mrf.mxu1  ;;  %v735_v33 = vadd.f32 %v6435_v14, %v734_v57  ;;  %v4633_v57 = vor.u32 %v6086_v49, %v4630_v50  ;;  %v4469_v14 = vor.u32 %v6048_v6, %v4468_v3  ;;  %v4420_v49 = vld [vmem:[#allocation10] sm:$0xf]  ;;  %v6036_v50 = vld [vmem:[#allocation10 + $0xc] sm:$0xf0]  ;;  %v4425_v6 = vor.u32 %v6034_v54, %v4422_v55  ;;  %v6081_v55 = vld [vmem:[#allocation10 + $0x174] sm:$0xf0] }
  0xc1   :  { %v4421_v61 = vor.u32 %v6036_v50, %v4420_v49  ;;  %v4622_v49 = vld [vmem:[#allocation10 + $0x198] sm:$0xf0] }
  0xc2   :  { %v748_v51 = vadd.f32 %v6754_v60, %v735_v33  ;;  %v4613_v60 = vor.u32 %v6084_v58, %v4612_v56  ;;  %1398 = vmatpush.bf16.msrb.mxu1 %v4633_v57  ;;  %1361 = vmatpush.bf16.msra.mxu2 %v4469_v14  ;;  %v4564_v33 = vld [vmem:[#allocation10 + $0x120] sm:$0xf]  ;;  %v6066_v57 = vld [vmem:[#allocation10 + $0x104] sm:$0xf]  ;;  %v4550_v58 = vld [vmem:[#allocation10 + $0x110] sm:$0xf0]  ;;  %v4669_v14 = vor.u32 %v6097_v0, %v4668_v63 }
  0xc3   :  { %v4565_v47 = vor.u32 %v6072_v35, %v4564_v33  ;;  %v4510_v33 = vld [vmem:[#allocation10 + $0xb8] sm:$0xf0]  ;;  %v4460_v63 = vld [vmem:[#allocation10 + $0x48] sm:$0xf] }
  0xc4   :  { %1373 = vmatpush.bf16.msra.mxu3 %v4613_v60  ;;  %v6063_v60 = vld [vmem:[#allocation10 + $0xec] sm:$0xf]  ;;  %v4513_v35 = vor.u32 %v6055_v32, %v4510_v33 }
  0xc6   :  { %1399 = vmatpush.bf16.msrb.mxu1 %v4617_v8  ;;  %1362 = vmatpush.bf16.msra.mxu2 %v4453_v29  ;;  %v4670_v8 = vld [vmem:[#allocation10 + $0x1f8] sm:$0xf0]  ;;  %v6057_v29 = vld [vmem:[#allocation10 + $0xb4] sm:$0xf0] }
  0xc7   :  { %v6756_v4 = vpop.f32.mrf.mxu2  ;;  %v736_v9 = vpop.f32.mrf.mxu0 }
  0xc8   :  { %v6758_v5 = vpop.f32.mrf.mxu3  ;;  %v749_v12 = vpop.f32.mrf.mxu1  ;;  %v761_v1 = vadd.f32 %v6756_v4, %v748_v51  ;;  %v6080_v9 = vld [vmem:[#allocation10 + $0x16c] sm:$0xf0]  ;;  %v4548_v51 = vld [vmem:[#allocation10 + $0x100] sm:$0xf] }
  0xc9   :  { %v6078_v12 = vld [vmem:[#allocation10 + $0x164] sm:$0xf]  ;;  %v4597_v17 = vor.u32 %v6080_v9, %v4596_v7  ;;  %v4549_v3 = vor.u32 %v6068_v53, %v4548_v51  ;;  %v6095_v7 = vld [vmem:[#allocation10 + $0x1ec] sm:$0xf]  ;;  %v4476_v51 = vld [vmem:[#allocation10 + $0x68] sm:$0xf] }
  0xca   :  { %v774_v15 = vadd.f32 %v6758_v5, %v761_v1  ;;  %v4601_v22 = vor.u32 %v6078_v12, %v4598_v13  ;;  %1363 = vmatpush.bf16.msra.mxu2 %v4437_v43  ;;  %v6085_v43 = vld [vmem:[#allocation10 + $0x194] sm:$0xf0]  ;;  %v4604_v53 = vld [vmem:[#allocation10 + $0x168] sm:$0xf] }
  0xcb   :  { %1374 = vmatpush.bf16.msra.mxu3 %v4597_v17  ;;  %v4652_v17 = vld [vmem:[#allocation10 + $0x1c8] sm:$0xf] }
  0xcc   :  { %1400 = vmatpush.bf16.msrb.mxu1 %v4601_v22  ;;  %v6091_v22 = vld [vmem:[#allocation10 + $0x1cc] sm:$0xf]  ;;  %v4653_v25 = vor.u32 %v6093_v19, %v4652_v17 }
  0xcd   :  { %v6071_v19 = vld [vmem:[#allocation10 + $0x12c] sm:$0xf] }
  0xce   :  { %1364 = vmatpush.bf16.msra.mxu2 %v4421_v61  ;;  %v6079_v61 = vld [vmem:[#allocation10 + $0x16c] sm:$0xf] }
  0xcf   :  { %v762_v18 = vpop.f32.mrf.mxu2 }
  0xd0   :  { %v775_v23 = vpop.f32.mrf.mxu3  ;;  %v4473_v18 = vor.u32 %v6046_v10, %v4470_v11  ;;  %1401 = vmatpush.bf16.msrb.mxu1 %v4585_v34  ;;  %v4553_v10 = vor.u32 %v6066_v57, %v4550_v58  ;;  %v4541_v11 = vor.u32 %v6065_v62, %v4540_v59  ;;  %v4478_v57 = vld [vmem:[#allocation10 + $0x78] sm:$0xf0]  ;;  %v4605_v58 = vor.u32 %v6081_v55, %v4604_v53  ;;  %v5124_v55 = vld [vmem:[#allocation13 + $0x380] sm:$0xf] }
  0xd1   :  { %v6076_v23 = vld [vmem:[#allocation10 + $0x14c] sm:$0xf0]  ;;  %v4606_v62 = vld [vmem:[#allocation10 + $0x178] sm:$0xf0] }
  0xd2   :  { %1387 = vmatpush.bf16.msrb.mxu0 %v4473_v18  ;;  %v4581_v5 = vor.u32 %v6076_v23, %v4580_v21  ;;  %v4673_v18 = vor.u32 %v6095_v7, %v4670_v8  ;;  %v4526_v21 = vld [vmem:[#allocation10 + $0xd8] sm:$0xf0]  ;;  %1409 = vmatpush.bf16.msrb.mxu2 %v4541_v11  ;;  %v4609_v0 = vor.u32 %v6079_v61, %v4606_v62  ;;  %v6043_v7 = vld [vmem:[#allocation10 + $0x4c] sm:$0xf]  ;;  %v5636_v62 = vld [vmem:[#allocation13 + $0x780] sm:$0xf] }
  0xd3   :  { %v4654_v23 = vld [vmem:[#allocation10 + $0x1d8] sm:$0xf0] }
  0xd4   :  { %1375 = vmatpush.bf16.msra.mxu3 %v4581_v5  ;;  %1402 = vmatpush.bf16.msrb.mxu1 %v4569_v52  ;;  %v4657_v27 = vor.u32 %v6091_v22, %v4654_v23  ;;  %v4636_v5 = vld [vmem:[#allocation10 + $0x1a8] sm:$0xf]  ;;  %v6049_v52 = vld [vmem:[#allocation10 + $0x74] sm:$0xf0]  ;;  %v4462_v8 = vld [vmem:[#allocation10 + $0x58] sm:$0xf0] }
  0xd5   :  { %v4637_v34 = vor.u32 %v6089_v31, %v4636_v5  ;;  %v4477_v54 = vor.u32 %v6049_v52, %v4476_v51  ;;  %v4590_v11 = vld [vmem:[#allocation10 + $0x158] sm:$0xf0]  ;;  %v4428_v23 = vld [vmem:[#allocation10 + $0x8] sm:$0xf]  ;;  %v6067_v5 = vld [vmem:[#allocation10 + $0x10c] sm:$0xf] }
  0xd6   :  { %1388 = vmatpush.bf16.msrb.mxu0 %v4457_v30  ;;  %v4509_v30 = vor.u32 %v6057_v29, %v4508_v28  ;;  %v6035_v28 = vld [vmem:[#allocation10 + $0xc] sm:$0xf]  ;;  %v4430_v29 = vld [vmem:[#allocation10 + $0x18] sm:$0xf0]  ;;  %v6286_v51 = vld [vmem:[#allocation13 + $0x5dc] sm:$0xf0] }
  0xd7   :  { %v4433_v33 = vor.u32 %v6035_v28, %v4430_v29  ;;  %v6262_v28 = vld [vmem:[#allocation13 + $0x51c] sm:$0xf0] }
  0xd8   :  { %1376 = vmatpush.bf16.msra.mxu3 %v4565_v47  ;;  %1403 = vmatpush.bf16.msrb.mxu1 %v4553_v10  ;;  %v4465_v10 = vor.u32 %v6043_v7, %v4462_v8  ;;  %v5092_v7 = vld [vmem:[#allocation13 + $0x340] sm:$0xf] }
  0xd9   :  { %v6206_v8 = vld [vmem:[#allocation13 + $0x35c] sm:$0xf0] }
  0xda   :  { %1389 = vmatpush.bf16.msrb.mxu0 %v4441_v48  ;;  %v6083_v48 = vld [vmem:[#allocation10 + $0x18c] sm:$0xf] }
  0xdb   :  { %v4625_v50 = vor.u32 %v6083_v48, %v4622_v49 }
  0xdc   :  { %1377 = vmatpush.bf16.msra.mxu3 %v4549_v3 }
  0xde   :  { %1390 = vmatpush.bf16.msrb.mxu0 %v4425_v6 }
  0xdf   :  { %v786_v16 = vpop.f32.mrf.mxu0 }
  0xe0   :  { %v799_v4 = vpop.f32.mrf.mxu1  ;;  %v787_v26 = vadd.f32 %v786_v16, %v774_v15  ;;  %v4545_v15 = vor.u32 %v6063_v60, %v4542_v2  ;;  %v4524_v16 = vld [vmem:[#allocation10 + $0xc8] sm:$0xf]  ;;  %1422 = vmatpush.bf16.msrb.mxu3 %v4669_v14  ;;  %v6077_v2 = vld [vmem:[#allocation10 + $0x154] sm:$0xf0] }
  0xe1   :  { %v4588_v60 = vld [vmem:[#allocation10 + $0x148] sm:$0xf] }
  0xe2   :  { %v800_v38 = vadd.f32 %v799_v4, %v787_v26  ;;  %v6061_v4 = vld [vmem:[#allocation10 + $0xd4] sm:$0xf0]  ;;  %v4529_v26 = vor.u32 %v6059_v20, %v4526_v21  ;;  %v4589_v6 = vor.u32 %v6077_v2, %v4588_v60  ;;  %v4574_v20 = vld [vmem:[#allocation10 + $0x138] sm:$0xf0]  ;;  %v6278_v60 = vld [vmem:[#allocation13 + $0x59c] sm:$0xf0] }
  0xe3   :  { %v4525_v24 = vor.u32 %v6061_v4, %v4524_v16  ;;  %v6073_v16 = vld [vmem:[#allocation10 + $0x134] sm:$0xf0]  ;;  %v6039_v4 = vld [vmem:[#allocation10 + $0x2c] sm:$0xf] }
  0xe4   :  { %1423 = vmatpush.bf16.msrb.mxu3 %v4653_v25  ;;  %v4556_v25 = vld [vmem:[#allocation10 + $0x108] sm:$0xf] }
  0xe5   :  { %1410 = vmatpush.bf16.msrb.mxu2 %v4525_v24  ;;  %v6037_v24 = vld [vmem:[#allocation10 + $0x14] sm:$0xf0] }
  0xe6   :  { %v4429_v31 = vor.u32 %v6037_v24, %v4428_v23  ;;  %v5572_v24 = vld [vmem:[#allocation13 + $0x700] sm:$0xf] }
  0xe7   :  { %v812_v41 = vpop.f32.mrf.mxu2  ;;  %v788_v45 = vpop.f32.mrf.mxu0 }
  0xe8   :  { %v825_v42 = vpop.f32.mrf.mxu3  ;;  %v813_v44 = vadd.f32 %v812_v41, %v800_v38  ;;  %v801_v46 = vpop.f32.mrf.mxu1  ;;  %v4641_v38 = vor.u32 %v6087_v36, %v4638_v37  ;;  %1424 = vmatpush.bf16.msrb.mxu3 %v4637_v34  ;;  %v4620_v41 = vld [vmem:[#allocation10 + $0x188] sm:$0xf]  ;;  %v4494_v45 = vld [vmem:[#allocation10 + $0x98] sm:$0xf0] }
  0xe9   :  { %1411 = vmatpush.bf16.msrb.mxu2 %v4509_v30  ;;  %v4621_v46 = vor.u32 %v6085_v43, %v4620_v41  ;;  %v4558_v30 = vld [vmem:[#allocation10 + $0x118] sm:$0xf0]  ;;  %v6222_v43 = vld [vmem:[#allocation13 + $0x3dc] sm:$0xf0] }
  0xea   :  { %v826_v56 = vadd.f32 %v825_v42, %v813_v44  ;;  %v4493_v42 = vor.u32 %v6053_v40, %v4492_v39  ;;  %v6051_v44 = vld [vmem:[#allocation10 + $0x8c] sm:$0xf]  ;;  %v4561_v34 = vor.u32 %v6067_v5, %v4558_v30  ;;  %v5028_v5 = vld [vmem:[#allocation13 + $0x2c0] sm:$0xf] }
  0xeb   :  { %v4497_v47 = vor.u32 %v6051_v44, %v4494_v45  ;;  %v4900_v44 = vld [vmem:[#allocation13 + $0x1c0] sm:$0xf] }
  0xec   :  { %v829_v1 = vmax.f32 %v826_v56, 0.0  ;;  %1425 = vmatpush.bf16.msrb.mxu3 %v4621_v46  ;;  %v6047_v56 = vld [vmem:[#allocation10 + $0x6c] sm:$0xf]  ;;  %v6158_v45 = vld [vmem:[#allocation13 + $0x1dc] sm:$0xf0] }
  0xed   :  { %1412 = vmatpush.bf16.msrb.mxu2 %v4493_v42  ;;  %v4481_v59 = vor.u32 %v6047_v56, %v4478_v57  ;;  %v5156_v42 = vld [vmem:[#allocation13 + $0x3c0] sm:$0xf]  ;;  %v4901_v57 = vor.u32 %v6158_v45, %v4900_v44 }
  0xee   :  { %v830_v9 = vpack.c.bf16 %v829_v1, %v829_v1  ;;  %v6045_v1 = vld [vmem:[#allocation10 + $0x54] sm:$0xf0]  ;;  %v5668_v46 = vld [vmem:[#allocation13 + $0x7c0] sm:$0xf] }
  0xef   :  { %v814_v12 = vpop.f32.mrf.mxu2  ;;  %v4461_v3 = vor.u32 %v6045_v1, %v4460_v63  ;;  %v6214_v56 = vld [vmem:[#allocation13 + $0x39c] sm:$0xf0] }
  0xf0   :  { %v827_v13 = vpop.f32.mrf.mxu3  ;;  %941 = vmatmul.bf16.vlgmr.msra.gmra.mxu0 %v830_v9  ;;  %954 = vmatmul.bf16.vlgmr.msra.gmra.mxu1 %v830_v9  ;;  %v6075_v9 = vld [vmem:[#allocation10 + $0x14c] sm:$0xf]  ;;  %v4444_v12 = vld [vmem:[#allocation10 + $0x28] sm:$0xf]  ;;  %v5380_v1 = vld [vmem:[#allocation13 + $0x580] sm:$0xf] }
  0xf1   :  { %1435 = vmatpush.bf16.msra.mxu0 %v4545_v15  ;;  %1448 = vmatpush.bf16.msra.mxu1 %v4673_v18  ;;  %v6041_v13 = vld [vmem:[#allocation10 + $0x34] sm:$0xf0]  ;;  %v4593_v14 = vor.u32 %v6075_v9, %v4590_v11  ;;  %v4572_v15 = vld [vmem:[#allocation10 + $0x128] sm:$0xf]  ;;  %v4446_v18 = vld [vmem:[#allocation10 + $0x38] sm:$0xf0] }
  0xf2   :  { %1413 = vmatpush.bf16.msrb.mxu2 %v4477_v54  ;;  %1426 = vmatpush.bf16.msrb.mxu3 %v4605_v58  ;;  %v4445_v17 = vor.u32 %v6041_v13, %v4444_v12  ;;  %v4573_v21 = vor.u32 %v6073_v16, %v4572_v15  ;;  %v4449_v22 = vor.u32 %v6039_v4, %v4446_v18  ;;  %v4868_v58 = vld [vmem:[#allocation13 + $0x180] sm:$0xf] }
  0xf3   :  { %v5157_v54 = vor.u32 %v6222_v43, %v5156_v42  ;;  %v6142_v11 = vld [vmem:[#allocation13 + $0x15c] sm:$0xf0] }
  0xf4   :  { %v5604_v13 = vld [vmem:[#allocation13 + $0x740] sm:$0xf] }
  0xf5   :  { %1436 = vmatpush.bf16.msra.mxu0 %v4529_v26  ;;  %1449 = vmatpush.bf16.msra.mxu1 %v4657_v27  ;;  %v4577_v26 = vor.u32 %v6071_v19, %v4574_v20  ;;  %v6069_v27 = vld [vmem:[#allocation10 + $0x114] sm:$0xf0]  ;;  %v6334_v15 = vld [vmem:[#allocation13 + $0x75c] sm:$0xf0] }
  0xf6   :  { %1414 = vmatpush.bf16.msrb.mxu2 %v4461_v3  ;;  %1427 = vmatpush.bf16.msrb.mxu3 %v4589_v6  ;;  %v4557_v32 = vor.u32 %v6069_v27, %v4556_v25  ;;  %v5125_v6 = vor.u32 %v6214_v56, %v5124_v55  ;;  %v5348_v16 = vld [vmem:[#allocation13 + $0x540] sm:$0xf]  ;;  %v5605_v23 = vor.u32 %v6334_v15, %v5604_v13  ;;  %v4902_v13 = vld [vmem:[#allocation13 + $0x1e0] sm:$0xf0] }
  0xf7   :  { %v6270_v4 = vld [vmem:[#allocation13 + $0x55c] sm:$0xf0] }
  0xf8   :  { %v5060_v18 = vld [vmem:[#allocation13 + $0x300] sm:$0xf]  ;;  %v5349_v25 = vor.u32 %v6270_v4, %v5348_v16 }
  0xf9   :  { %1437 = vmatpush.bf16.msra.mxu0 %v4513_v35  ;;  %1450 = vmatpush.bf16.msra.mxu1 %v4641_v38  ;;  %v847_v35 = vld [vmem:[%s6881_s6] sm:$0x3]  ;;  %v6198_v19 = vld [vmem:[#allocation13 + $0x31c] sm:$0xf0] }
  0xfa   :  { %1415 = vmatpush.bf16.msrb.mxu2 %v4445_v17  ;;  %1428 = vmatpush.bf16.msrb.mxu3 %v4573_v21  ;;  %v849_v36 = vperm.slane %v847_v35, 0  ;;  %v850_v37 = vperm.slane %v847_v35, 1  ;;  %v5093_v17 = vor.u32 %v6206_v8, %v5092_v7  ;;  %v4804_v21 = vld [vmem:[#allocation13 + $0x100] sm:$0xf]  ;;  %v5061_v29 = vor.u32 %v6198_v19, %v5060_v18  ;;  %v5670_v18 = vld [vmem:[#allocation13 + $0x7e0] sm:$0xf0] }
  0xfb   :  { %v5316_v27 = vld [vmem:[#allocation13 + $0x500] sm:$0xf] }
  0xfc   :  { %v6190_v30 = vld [vmem:[#allocation13 + $0x2dc] sm:$0xf0] }
  0xfd   :  { %1438 = vmatpush.bf16.msra.mxu0 %v4497_v47  ;;  %1451 = vmatpush.bf16.msra.mxu1 %v4625_v50  ;;  %v6350_v47 = vld [vmem:[#allocation13 + $0x7dc] sm:$0xf0] }
  0xfe   :  { %1416 = vmatpush.bf16.msrb.mxu2 %v4429_v31  ;;  %1429 = vmatpush.bf16.msrb.mxu3 %v4557_v32  ;;  %v5412_v50 = vld [vmem:[#allocation13 + $0x5c0] sm:$0xf]  ;;  %v5669_v61 = vor.u32 %v6350_v47, %v5668_v46 }
  0xff   :  { %v5413_v63 = vor.u32 %v6286_v51, %v5412_v50  ;;  %v4772_v32 = vld [vmem:[#allocation13 + $0xc0] sm:$0xf] }
 0x100   :  { %v5540_v35 = vld [vmem:[#allocation13 + $0x6c0] sm:$0xf] }
 0x101   :  { %1439 = vmatpush.bf16.msra.mxu0 %v4481_v59  ;;  %1452 = vmatpush.bf16.msra.mxu1 %v4609_v0  ;;  %v6150_v59 = vld [vmem:[#allocation13 + $0x19c] sm:$0xf0] }
 0x102   :  { %v6342_v0 = vld [vmem:[#allocation13 + $0x79c] sm:$0xf0]  ;;  %v4869_v9 = vor.u32 %v6150_v59, %v4868_v58 }
 0x103   :  { %v5637_v12 = vor.u32 %v6342_v0, %v5636_v62  ;;  %v6182_v42 = vld [vmem:[#allocation13 + $0x29c] sm:$0xf0] }
 0x104   :  { %v4740_v44 = vld [vmem:[#allocation13 + $0x80] sm:$0xf] }
 0x105   :  { %1440 = vmatpush.bf16.msra.mxu0 %v4465_v10  ;;  %1453 = vmatpush.bf16.msra.mxu1 %v4593_v14  ;;  %v4836_v10 = vld [vmem:[#allocation13 + $0x140] sm:$0xf]  ;;  %v5381_v14 = vor.u32 %v6278_v60, %v5380_v1 }
 0x106   :  { %v4837_v20 = vor.u32 %v6142_v11, %v4836_v10  ;;  %v6118_v45 = vld [vmem:[#allocation13 + $0x9c] sm:$0xf0]  ;;  %v5158_v11 = vld [vmem:[#allocation13 + $0x3e0] sm:$0xf0] }
 0x107   :  { %v5508_v47 = vld [vmem:[#allocation13 + $0x680] sm:$0xf] }
 0x108   :  { %v5252_v50 = vld [vmem:[#allocation13 + $0x480] sm:$0xf] }
 0x109   :  { %1441 = vmatpush.bf16.msra.mxu0 %v4449_v22  ;;  %1454 = vmatpush.bf16.msra.mxu1 %v4577_v26  ;;  %v6134_v22 = vld [vmem:[#allocation13 + $0x11c] sm:$0xf0] }
 0x10a   :  { %v6326_v26 = vld [vmem:[#allocation13 + $0x71c] sm:$0xf0]  ;;  %v4805_v31 = vor.u32 %v6134_v22, %v4804_v21  ;;  %v5126_v22 = vld [vmem:[#allocation13 + $0x3a0] sm:$0xf0] }
 0x10b   :  { %v6246_v51 = vld [vmem:[#allocation13 + $0x49c] sm:$0xf0] }
 0x10c   :  { %v4964_v55 = vld [vmem:[#allocation13 + $0x240] sm:$0xf] }
 0x10d   :  { %1442 = vmatpush.bf16.msra.mxu0 %v4433_v33  ;;  %1455 = vmatpush.bf16.msra.mxu1 %v4561_v34  ;;  %v6126_v33 = vld [vmem:[#allocation13 + $0xdc] sm:$0xf0]  ;;  %v5573_v34 = vor.u32 %v6326_v26, %v5572_v24  ;;  %v4870_v24 = vld [vmem:[#allocation13 + $0x1a0] sm:$0xf0] }
 0x10e   :  { %v4773_v43 = vor.u32 %v6126_v33, %v4772_v32  ;;  %v6174_v56 = vld [vmem:[#allocation13 + $0x25c] sm:$0xf0]  ;;  %v6194_v33 = vld [vmem:[#allocation13 + $0x304] sm:$0xf] }
 0x10f   :  { %v4708_v58 = vld [vmem:[#allocation13 + $0x40] sm:$0xf] }
 0x110   :  { %v6110_v59 = vld [vmem:[#allocation13 + $0x5c] sm:$0xf0] }
 0x111   :  { %v5476_v62 = vld [vmem:[#allocation13 + $0x640] sm:$0xf] }
 0x112   :  { %v6302_v0 = vld [vmem:[#allocation13 + $0x65c] sm:$0xf0] }
 0x113   :  { %v5220_v1 = vld [vmem:[#allocation13 + $0x440] sm:$0xf] }
 0x114   :  { %v6238_v60 = vld [vmem:[#allocation13 + $0x45c] sm:$0xf0] }
 0x115   :  { %v4676_v7 = vld [vmem:[#allocation13] sm:$0xf]  ;;  %v5221_v10 = vor.u32 %v6238_v60, %v5220_v1  ;;  %v5606_v1 = vld [vmem:[#allocation13 + $0x760] sm:$0xf0] }
 0x116   :  { %v6102_v8 = vld [vmem:[#allocation13 + $0x1c] sm:$0xf0] }
 0x117   :  { %v6294_v15 = vld [vmem:[#allocation13 + $0x61c] sm:$0xf0]  ;;  %v4677_v4 = vor.u32 %v6102_v8, %v4676_v7  ;;  %v6162_v8 = vld [vmem:[#allocation13 + $0x204] sm:$0xf] }
 0x16d   :  { %v942_v38 = vpop.f32.mrf.mxu0  ;;  %v955_v39 = vpop.f32.mrf.mxu1 }
 0x16e   :  { %v943_v40 = vadd.f32 %v942_v38, %v849_v36  ;;  %v956_v41 = vadd.f32 %v955_v39, %v850_v37  ;;  %v5317_v36 = vor.u32 %v6262_v28, %v5316_v27  ;;  %v6318_v37 = vld [vmem:[#allocation13 + $0x6dc] sm:$0xf0]  ;;  %v6202_v28 = vld [vmem:[#allocation13 + $0x344] sm:$0xf] }
 0x16f   :  { %v5284_v38 = vld [vmem:[#allocation13 + $0x4c0] sm:$0xf]  ;;  %v5541_v46 = vor.u32 %v6318_v37, %v5540_v35  ;;  %v5062_v35 = vld [vmem:[#allocation13 + $0x320] sm:$0xf0] }
 0x170   :  { %v959_v48 = vmax.f32 %v943_v40, 0.0  ;;  %v960_v49 = vmax.f32 %v956_v41, 0.0  ;;  %v6254_v39 = vld [vmem:[#allocation13 + $0x4dc] sm:$0xf0]  ;;  %v5029_v40 = vor.u32 %v6190_v30, %v5028_v5  ;;  %v5094_v5 = vld [vmem:[#allocation13 + $0x360] sm:$0xf0] }
 0x171   :  { %v4996_v41 = vld [vmem:[#allocation13 + $0x280] sm:$0xf]  ;;  %v6138_v30 = vld [vmem:[#allocation13 + $0x144] sm:$0xf]  ;;  %v5097_v32 = vor.u32 %v6202_v28, %v5094_v5 }
 0x172   :  { %v6769_v52 = vpack.c.bf16 %v959_v48, %v959_v48  ;;  %v6771_v53 = vpack.c.bf16 %v960_v49, %v960_v49  ;;  %v5285_v48 = vor.u32 %v6254_v39, %v5284_v38  ;;  %v6310_v49 = vld [vmem:[#allocation13 + $0x69c] sm:$0xf0]  ;;  %v4806_v37 = vld [vmem:[#allocation13 + $0x120] sm:$0xf0]  ;;  %v5065_v38 = vor.u32 %v6194_v33, %v5062_v35 }
 0x173   :  { %v6306_v28 = vld [vmem:[#allocation13 + $0x684] sm:$0xf] }
 0x174   :  { %1365 = vmatmul.bf16.vlgmr.msra.gmra.mxu2 %v6769_v52  ;;  %1378 = vmatmul.bf16.vlgmr.msra.gmra.mxu3 %v6771_v53  ;;  %v6298_v33 = vld [vmem:[#allocation13 + $0x644] sm:$0xf] }
 0x175   :  { %1391 = vmatmul.bf16.vlgmr.msrb.gmra.mxu0 %v6769_v52  ;;  %1404 = vmatmul.bf16.vlgmr.msrb.gmra.mxu1 %v6771_v53  ;;  %v944_v2 = vpop.f32.mrf.mxu0  ;;  %v957_v3 = vpop.f32.mrf.mxu1 }
 0x176   :  { %3036 = vmatpush.bf16.msra.mxu3 %v5157_v54  ;;  %3023 = vmatpush.bf16.msra.mxu2 %v4901_v57  ;;  %v4997_v54 = vor.u32 %v6182_v42, %v4996_v41  ;;  %v4741_v57 = vor.u32 %v6118_v45, %v4740_v44  ;;  %v6166_v2 = vld [vmem:[#allocation13 + $0x21c] sm:$0xf0]  ;;  %v4709_v3 = vor.u32 %v6110_v59, %v4708_v58  ;;  %v5030_v41 = vld [vmem:[#allocation13 + $0x2e0] sm:$0xf0] }
 0x177   :  { %3062 = vmatpush.bf16.msrb.mxu1 %v5669_v61  ;;  %3049 = vmatpush.bf16.msrb.mxu0 %v5413_v63  ;;  %v5509_v61 = vor.u32 %v6310_v49, %v5508_v47  ;;  %v5253_v63 = vor.u32 %v6246_v51, %v5252_v50  ;;  %v4998_v44 = vld [vmem:[#allocation13 + $0x2a0] sm:$0xf0]  ;;  %v6230_v49 = vld [vmem:[#allocation13 + $0x41c] sm:$0xf0] }
 0x178   :  { %v6338_v45 = vld [vmem:[#allocation13 + $0x784] sm:$0xf] }
 0x179   :  { %v5638_v47 = vld [vmem:[#allocation13 + $0x7a0] sm:$0xf0] }
 0x17a   :  { %3037 = vmatpush.bf16.msra.mxu3 %v5125_v6  ;;  %3024 = vmatpush.bf16.msra.mxu2 %v4869_v9  ;;  %v6218_v6 = vld [vmem:[#allocation13 + $0x3c4] sm:$0xf]  ;;  %v5477_v9 = vor.u32 %v6302_v0, %v5476_v62  ;;  %v5641_v50 = vor.u32 %v6338_v45, %v5638_v47  ;;  %v6781_v45 = vld [vmem:[#allocation12] sm:$0xf] }
 0x17b   :  { %3063 = vmatpush.bf16.msrb.mxu1 %v5637_v12  ;;  %3050 = vmatpush.bf16.msrb.mxu0 %v5381_v14  ;;  %v6154_v12 = vld [vmem:[#allocation13 + $0x1c4] sm:$0xf]  ;;  %v5444_v14 = vld [vmem:[#allocation13 + $0x600] sm:$0xf]  ;;  %v5161_v19 = vor.u32 %v6218_v6, %v5158_v11 }
 0x17c   :  { %v4905_v21 = vor.u32 %v6154_v12, %v4902_v13  ;;  %v5414_v58 = vld [vmem:[#allocation13 + $0x5e0] sm:$0xf0] }
 0x17d   :  { %v4966_v62 = vld [vmem:[#allocation13 + $0x260] sm:$0xf0] }
 0x17e   :  { %3038 = vmatpush.bf16.msra.mxu3 %v5093_v17  ;;  %3025 = vmatpush.bf16.msra.mxu2 %v4837_v20  ;;  %v6346_v17 = vld [vmem:[#allocation13 + $0x7c4] sm:$0xf] }
 0x17f   :  { %3064 = vmatpush.bf16.msrb.mxu1 %v5605_v23  ;;  %3051 = vmatpush.bf16.msrb.mxu0 %v5349_v25  ;;  %v6210_v20 = vld [vmem:[#allocation13 + $0x384] sm:$0xf]  ;;  %v5445_v25 = vor.u32 %v6294_v15, %v5444_v14  ;;  %v5673_v26 = vor.u32 %v6346_v17, %v5670_v18 }
 0x180   :  { %v6146_v23 = vld [vmem:[#allocation13 + $0x184] sm:$0xf]  ;;  %v5129_v27 = vor.u32 %v6210_v20, %v5126_v22 }
 0x181   :  { %v5382_v6 = vld [vmem:[#allocation13 + $0x5a0] sm:$0xf0] }
 0x182   :  { %3039 = vmatpush.bf16.msra.mxu3 %v5061_v29  ;;  %3026 = vmatpush.bf16.msra.mxu2 %v4805_v31  ;;  %v4873_v29 = vor.u32 %v6146_v23, %v4870_v24  ;;  %v4838_v31 = vld [vmem:[#allocation13 + $0x160] sm:$0xf0] }
 0x183   :  { %3065 = vmatpush.bf16.msrb.mxu1 %v5573_v34  ;;  %3052 = vmatpush.bf16.msrb.mxu0 %v5317_v36  ;;  %v4841_v34 = vor.u32 %v6138_v30, %v4838_v31  ;;  %v6130_v36 = vld [vmem:[#allocation13 + $0x104] sm:$0xf] }
 0x184   :  { %1417 = vmatmul.bf16.vlgmr.msrb.gmra.mxu2 %v6769_v52  ;;  %1430 = vmatmul.bf16.vlgmr.msrb.gmra.mxu3 %v6771_v53  ;;  %v4809_v39 = vor.u32 %v6130_v36, %v4806_v37  ;;  %v6322_v11 = vld [vmem:[#allocation13 + $0x704] sm:$0xf] }
 0x185   :  { %1443 = vmatmul.bf16.vlgmr.msra.gmra.mxu0 %v6769_v52  ;;  %1456 = vmatmul.bf16.vlgmr.msra.gmra.mxu1 %v6771_v53  ;;  %v4965_v52 = vor.u32 %v6174_v56, %v4964_v55  ;;  %v4932_v53 = vld [vmem:[#allocation13 + $0x200] sm:$0xf]  ;;  %v4774_v55 = vld [vmem:[#allocation13 + $0xe0] sm:$0xf0] }
 0x186   :  { %3040 = vmatpush.bf16.msra.mxu3 %v5029_v40  ;;  %3027 = vmatpush.bf16.msra.mxu2 %v4773_v43  ;;  %v4933_v16 = vor.u32 %v6166_v2, %v4932_v53  ;;  %v6186_v40 = vld [vmem:[#allocation13 + $0x2c4] sm:$0xf] }
 0x187   :  { %3066 = vmatpush.bf16.msrb.mxu1 %v5541_v46  ;;  %3053 = vmatpush.bf16.msrb.mxu0 %v5285_v48  ;;  %v5033_v42 = vor.u32 %v6186_v40, %v5030_v41  ;;  %v6178_v43 = vld [vmem:[#allocation13 + $0x284] sm:$0xf]  ;;  %v5188_v48 = vld [vmem:[#allocation13 + $0x400] sm:$0xf] }
 0x188   :  { %v5001_v46 = vor.u32 %v6178_v43, %v4998_v44  ;;  %v5189_v51 = vor.u32 %v6230_v49, %v5188_v48  ;;  %v6282_v56 = vld [vmem:[#allocation13 + $0x5c4] sm:$0xf]  ;;  %v1030_v48 = vperm.slane %v6781_v45, 1 }
 0x189   :  { %v5417_v59 = vor.u32 %v6282_v56, %v5414_v58  ;;  %v4742_v53 = vld [vmem:[#allocation13 + $0xa0] sm:$0xf0]  ;;  %v6223_v58 = vld [vmem:[#allocation13 + $0x3e4] sm:$0xf0] }
 0x18a   :  { %3041 = vmatpush.bf16.msra.mxu3 %v4997_v54  ;;  %3028 = vmatpush.bf16.msra.mxu2 %v4741_v57  ;;  %v6122_v54 = vld [vmem:[#allocation13 + $0xc4] sm:$0xf] }
 0x18b   :  { %3067 = vmatpush.bf16.msrb.mxu1 %v5509_v61  ;;  %3054 = vmatpush.bf16.msrb.mxu0 %v5253_v63  ;;  %v4777_v57 = vor.u32 %v6122_v54, %v4774_v55  ;;  %v6170_v61 = vld [vmem:[#allocation13 + $0x244] sm:$0xf]  ;;  %v1029_v55 = vperm.slane %v6781_v45, 0 }
 0x18c   :  { %v6330_v63 = vld [vmem:[#allocation13 + $0x744] sm:$0xf]  ;;  %v4969_v0 = vor.u32 %v6170_v61, %v4966_v62 }
 0x18d   :  { %v5609_v60 = vor.u32 %v6330_v63, %v5606_v1  ;;  %v6274_v2 = vld [vmem:[#allocation13 + $0x584] sm:$0xf] }
 0x18e   :  { %3042 = vmatpush.bf16.msra.mxu3 %v4965_v52  ;;  %3029 = vmatpush.bf16.msra.mxu2 %v4709_v3  ;;  %v6114_v52 = vld [vmem:[#allocation13 + $0x84] sm:$0xf]  ;;  %v5385_v7 = vor.u32 %v6274_v2, %v5382_v6  ;;  %v4908_v6 = vld [vmem:[#allocation13 + $0x1c8] sm:$0xf] }
 0x18f   :  { %3068 = vmatpush.bf16.msrb.mxu1 %v5477_v9  ;;  %3055 = vmatpush.bf16.msrb.mxu0 %v5221_v10  ;;  %v4745_v3 = vor.u32 %v6114_v52, %v4742_v53  ;;  %v4934_v9 = vld [vmem:[#allocation13 + $0x220] sm:$0xf0]  ;;  %v6215_v52 = vld [vmem:[#allocation13 + $0x3a4] sm:$0xf0] }
 0x190   :  { %v4937_v10 = vor.u32 %v6162_v8, %v4934_v9  ;;  %v5574_v12 = vld [vmem:[#allocation13 + $0x720] sm:$0xf0] }
 0x191   :  { %v5577_v13 = vor.u32 %v6322_v11, %v5574_v12  ;;  %v6106_v14 = vld [vmem:[#allocation13 + $0x44] sm:$0xf]  ;;  %v5100_v11 = vld [vmem:[#allocation13 + $0x348] sm:$0xf] }
 0x192   :  { %3043 = vmatpush.bf16.msra.mxu3 %v4933_v16  ;;  %3030 = vmatpush.bf16.msra.mxu2 %v4677_v4  ;;  %v4710_v15 = vld [vmem:[#allocation13 + $0x60] sm:$0xf0]  ;;  %v6207_v12 = vld [vmem:[#allocation13 + $0x364] sm:$0xf0] }
 0x193   :  { %3069 = vmatpush.bf16.msrb.mxu1 %v5445_v25  ;;  %3056 = vmatpush.bf16.msrb.mxu0 %v5189_v51  ;;  %v6266_v16 = vld [vmem:[#allocation13 + $0x544] sm:$0xf]  ;;  %v4713_v4 = vor.u32 %v6106_v14, %v4710_v15  ;;  %v4876_v14 = vld [vmem:[#allocation13 + $0x188] sm:$0xf] }
 0x194   :  { %v5350_v17 = vld [vmem:[#allocation13 + $0x560] sm:$0xf0]  ;;  %v6151_v15 = vld [vmem:[#allocation13 + $0x1a4] sm:$0xf0] }
 0x195   :  { %v5353_v18 = vor.u32 %v6266_v16, %v5350_v17  ;;  %v5542_v20 = vld [vmem:[#allocation13 + $0x6e0] sm:$0xf0]  ;;  %v1032_v17 = vperm.slane %v6781_v45, 3 }
 0x196   :  { %3088 = vmatpush.bf16.msrb.mxu3 %v5161_v19  ;;  %3075 = vmatpush.bf16.msrb.mxu2 %v4905_v21  ;;  %v6314_v19 = vld [vmem:[#allocation13 + $0x6c4] sm:$0xf] }
 0x197   :  { %3114 = vmatpush.bf16.msra.mxu1 %v5673_v26  ;;  %3101 = vmatpush.bf16.msra.mxu0 %v5417_v59  ;;  %v5545_v21 = vor.u32 %v6314_v19, %v5542_v20  ;;  %v6098_v22 = vld [vmem:[#allocation13 + $0x4] sm:$0xf]  ;;  %v4877_v19 = vor.u32 %v6151_v15, %v4876_v14  ;;  %v5068_v20 = vld [vmem:[#allocation13 + $0x308] sm:$0xf] }
 0x198   :  { %v4678_v23 = vld [vmem:[#allocation13 + $0x20] sm:$0xf0]  ;;  %v6167_v14 = vld [vmem:[#allocation13 + $0x224] sm:$0xf0] }
 0x199   :  { %v6258_v24 = vld [vmem:[#allocation13 + $0x504] sm:$0xf]  ;;  %v4681_v25 = vor.u32 %v6098_v22, %v4678_v23  ;;  %v5580_v15 = vld [vmem:[#allocation13 + $0x708] sm:$0xf] }
 0x19a   :  { %3089 = vmatpush.bf16.msrb.mxu3 %v5129_v27  ;;  %3076 = vmatpush.bf16.msrb.mxu2 %v4873_v29  ;;  %v5318_v26 = vld [vmem:[#allocation13 + $0x520] sm:$0xf0] }
 0x19b   :  { %3115 = vmatpush.bf16.msra.mxu1 %v5641_v50  ;;  %3102 = vmatpush.bf16.msra.mxu0 %v5385_v7  ;;  %v5321_v27 = vor.u32 %v6258_v24, %v5318_v26  ;;  %v5510_v29 = vld [vmem:[#allocation13 + $0x6a0] sm:$0xf0]  ;;  %v6159_v7 = vld [vmem:[#allocation13 + $0x1e4] sm:$0xf0] }
 0x19c   :  { %v5513_v5 = vor.u32 %v6306_v28, %v5510_v29  ;;  %v6250_v30 = vld [vmem:[#allocation13 + $0x4c4] sm:$0xf]  ;;  %v4844_v24 = vld [vmem:[#allocation13 + $0x148] sm:$0xf]  ;;  %v1031_v28 = vperm.slane %v6781_v45, 2 }
 0x19d   :  { %v5286_v31 = vld [vmem:[#allocation13 + $0x4e0] sm:$0xf0]  ;;  %v5036_v29 = vld [vmem:[#allocation13 + $0x2c8] sm:$0xf] }
 0x19e   :  { %3090 = vmatpush.bf16.msrb.mxu3 %v5097_v32  ;;  %3077 = vmatpush.bf16.msrb.mxu2 %v4841_v34  ;;  %v5289_v32 = vor.u32 %v6250_v30, %v5286_v31  ;;  %v5478_v34 = vld [vmem:[#allocation13 + $0x660] sm:$0xf0]  ;;  %v6191_v31 = vld [vmem:[#allocation13 + $0x2e4] sm:$0xf0] }
 0x19f   :  { %3116 = vmatpush.bf16.msra.mxu1 %v5609_v60  ;;  %3103 = vmatpush.bf16.msra.mxu0 %v5353_v18  ;;  %v5481_v35 = vor.u32 %v6298_v33, %v5478_v34  ;;  %v6242_v36 = vld [vmem:[#allocation13 + $0x484] sm:$0xf]  ;;  %v5132_v60 = vld [vmem:[#allocation13 + $0x388] sm:$0xf]  ;;  %v5101_v18 = vor.u32 %v6207_v12, %v5100_v11 }
 0x1a0   :  { %v5254_v37 = vld [vmem:[#allocation13 + $0x4a0] sm:$0xf0]  ;;  %v5133_v9 = vor.u32 %v6215_v52, %v5132_v60  ;;  %v6351_v33 = vld [vmem:[#allocation13 + $0x7e4] sm:$0xf0] }
 0x1a1   :  { %v5446_v40 = vld [vmem:[#allocation13 + $0x620] sm:$0xf0]  ;;  %v4812_v34 = vld [vmem:[#allocation13 + $0x108] sm:$0xf] }
 0x1a2   :  { %3091 = vmatpush.bf16.msrb.mxu3 %v5065_v38  ;;  %3078 = vmatpush.bf16.msrb.mxu2 %v4809_v39  ;;  %v5257_v38 = vor.u32 %v6242_v36, %v5254_v37  ;;  %v6290_v39 = vld [vmem:[#allocation13 + $0x604] sm:$0xf]  ;;  %v6183_v45 = vld [vmem:[#allocation13 + $0x2a4] sm:$0xf0] }
 0x1a3   :  { %3117 = vmatpush.bf16.msra.mxu1 %v5577_v13  ;;  %3104 = vmatpush.bf16.msra.mxu0 %v5321_v27  ;;  %v5449_v41 = vor.u32 %v6290_v39, %v5446_v40  ;;  %v5222_v43 = vld [vmem:[#allocation13 + $0x460] sm:$0xf0]  ;;  %v5037_v40 = vor.u32 %v6191_v31, %v5036_v29  ;;  %v4940_v12 = vld [vmem:[#allocation13 + $0x208] sm:$0xf]  ;;  %v5134_v31 = vld [vmem:[#allocation13 + $0x3a8] sm:$0xf0] }
 0x1a4   :  { %v5190_v47 = vld [vmem:[#allocation13 + $0x420] sm:$0xf0] }
 0x1a6   :  { %3092 = vmatpush.bf16.msrb.mxu3 %v5033_v42  ;;  %3079 = vmatpush.bf16.msrb.mxu2 %v4777_v57  ;;  %v6234_v42 = vld [vmem:[#allocation13 + $0x444] sm:$0xf]  ;;  %v5164_v57 = vld [vmem:[#allocation13 + $0x3c8] sm:$0xf] }
 0x1a7   :  { %3118 = vmatpush.bf16.msra.mxu1 %v5545_v21  ;;  %3105 = vmatpush.bf16.msra.mxu0 %v5289_v32  ;;  %v5225_v44 = vor.u32 %v6234_v42, %v5222_v43  ;;  %v6199_v21 = vld [vmem:[#allocation13 + $0x324] sm:$0xf0] }
 0x1a8   :  { %v5069_v27 = vor.u32 %v6199_v21, %v5068_v20  ;;  %v5676_v32 = vld [vmem:[#allocation13 + $0x7c8] sm:$0xf] }
 0x1a9   :  { %v5004_v42 = vld [vmem:[#allocation13 + $0x288] sm:$0xf] }
 0x1aa   :  { %3093 = vmatpush.bf16.msrb.mxu3 %v5001_v46  ;;  %3080 = vmatpush.bf16.msrb.mxu2 %v4745_v3  ;;  %v6226_v46 = vld [vmem:[#allocation13 + $0x404] sm:$0xf]  ;;  %v4716_v20 = vld [vmem:[#allocation13 + $0x48] sm:$0xf] }
 0x1ab   :  { %3119 = vmatpush.bf16.msra.mxu1 %v5513_v5  ;;  %3106 = vmatpush.bf16.msra.mxu0 %v5257_v38  ;;  %v5193_v49 = vor.u32 %v6226_v46, %v5190_v47  ;;  %v5644_v46 = vld [vmem:[#allocation13 + $0x788] sm:$0xf] }
 0x1ac   :  { %v6343_v47 = vld [vmem:[#allocation13 + $0x7a4] sm:$0xf0] }
 0x1ad   :  { %v6111_v21 = vld [vmem:[#allocation13 + $0x64] sm:$0xf0] }
 0x1ae   :  { %3094 = vmatpush.bf16.msrb.mxu3 %v4969_v0  ;;  %3081 = vmatpush.bf16.msrb.mxu2 %v4713_v4  ;;  %v5165_v0 = vor.u32 %v6223_v58, %v5164_v57  ;;  %v5005_v58 = vor.u32 %v6183_v45, %v5004_v42  ;;  %v4717_v29 = vor.u32 %v6111_v21, %v4716_v20  ;;  %v6203_v45 = vld [vmem:[#allocation13 + $0x34c] sm:$0xf] }
 0x1af   :  { %3120 = vmatpush.bf16.msra.mxu1 %v5481_v35  ;;  %3107 = vmatpush.bf16.msra.mxu0 %v5225_v44  ;;  %v6135_v35 = vld [vmem:[#allocation13 + $0x124] sm:$0xf0]  ;;  %v6179_v21 = vld [vmem:[#allocation13 + $0x28c] sm:$0xf] }
 0x1b0   :  { %v4813_v44 = vor.u32 %v6135_v35, %v4812_v34  ;;  %v5324_v34 = vld [vmem:[#allocation13 + $0x508] sm:$0xf] }
 0x1b1   :  { %v6263_v35 = vld [vmem:[#allocation13 + $0x524] sm:$0xf0] }
 0x1b2   :  { %3095 = vmatpush.bf16.msrb.mxu3 %v4937_v10  ;;  %3082 = vmatpush.bf16.msrb.mxu2 %v4681_v25  ;;  %v4909_v10 = vor.u32 %v6159_v7, %v4908_v6  ;;  %v6143_v25 = vld [vmem:[#allocation13 + $0x164] sm:$0xf0] }
 0x1b3   :  { %3121 = vmatpush.bf16.msra.mxu1 %v5449_v41  ;;  %3108 = vmatpush.bf16.msra.mxu0 %v5193_v49  ;;  %v4845_v30 = vor.u32 %v6143_v25, %v4844_v24  ;;  %v5677_v41 = vor.u32 %v6351_v33, %v5676_v32  ;;  %v6119_v7 = vld [vmem:[#allocation13 + $0xa4] sm:$0xf0]  ;;  %v4941_v24 = vor.u32 %v6167_v14, %v4940_v12  ;;  %v5678_v12 = vld [vmem:[#allocation13 + $0x7e8] sm:$0xf0] }
 0x1b4   :  { %v4684_v32 = vld [vmem:[#allocation13 + $0x8] sm:$0xf] }
 0x1b5   :  { %v6103_v33 = vld [vmem:[#allocation13 + $0x24] sm:$0xf0] }
 0x1b6   :  { %v4685_v42 = vor.u32 %v6103_v33, %v4684_v32 }
 0x1f2   :  { %v1392_v50 = vpop.f32.mrf.mxu0  ;;  %v1405_v51 = vpop.f32.mrf.mxu1 }
 0x1f3   :  { %v1393_v54 = vadd.f32 %v1392_v50, %v1030_v48 }
 0x1f5   :  { %v1406_v56 = vadd.f32 %v1405_v51, %v1393_v54  ;;  %v4780_v51 = vld [vmem:[#allocation13 + $0xc8] sm:$0xf] }
 0x1f6   :  { %v6127_v54 = vld [vmem:[#allocation13 + $0xe4] sm:$0xf0] }
 0x1f7   :  { %v1462_v59 = vmax.f32 %v1406_v56, 0.0  ;;  %v1366_v61 = vpop.f32.mrf.mxu2  ;;  %v1379_v62 = vpop.f32.mrf.mxu3  ;;  %v6287_v56 = vld [vmem:[#allocation13 + $0x5e4] sm:$0xf0]  ;;  %v4781_v52 = vor.u32 %v6127_v54, %v4780_v51  ;;  %v6147_v51 = vld [vmem:[#allocation13 + $0x18c] sm:$0xf] }
 0x1f8   :  { %v1367_v63 = vadd.f32 %v1366_v61, %v1029_v55  ;;  %v5420_v55 = vld [vmem:[#allocation13 + $0x5c8] sm:$0xf]  ;;  %v4878_v54 = vld [vmem:[#allocation13 + $0x1a8] sm:$0xf0] }
 0x1f9   :  { %v6785_v1 = vpack.c.bf16 %v1462_v59, %v1462_v59  ;;  %v5645_v59 = vor.u32 %v6343_v47, %v5644_v46  ;;  %v4972_v61 = vld [vmem:[#allocation13 + $0x248] sm:$0xf]  ;;  %v5102_v46 = vld [vmem:[#allocation13 + $0x368] sm:$0xf0] }
 0x1fa   :  { %v1380_v53 = vadd.f32 %v1379_v62, %v1367_v63  ;;  %v1394_v2 = vpop.f32.mrf.mxu0  ;;  %v1407_v3 = vpop.f32.mrf.mxu1  ;;  %v6175_v62 = vld [vmem:[#allocation13 + $0x264] sm:$0xf0] }
 0x1fb   :  { %3044 = vmatmul.bf16.vlgmr.msra.gmra.mxu3 %v6785_v1  ;;  %v5612_v63 = vld [vmem:[#allocation13 + $0x748] sm:$0xf] }
 0x1fc   :  { %v1461_v8 = vmax.f32 %v1380_v53, 0.0  ;;  %3140 = vmatpush.bf16.msra.mxu3 %v5165_v0  ;;  %v6335_v0 = vld [vmem:[#allocation13 + $0x764] sm:$0xf0]  ;;  %v5421_v53 = vor.u32 %v6287_v56, %v5420_v55  ;;  %v5105_v55 = vor.u32 %v6203_v45, %v5102_v46  ;;  %v5390_v45 = vld [vmem:[#allocation13 + $0x5a8] sm:$0xf0] }
 0x1fd   :  { %v4748_v2 = vld [vmem:[#allocation13 + $0x88] sm:$0xf]  ;;  %v5613_v11 = vor.u32 %v6335_v0, %v5612_v63 }
 0x1fe   :  { %v6788_v13 = vpack.c.bf16 %v1461_v8, %v1461_v8  ;;  %v5388_v8 = vld [vmem:[#allocation13 + $0x588] sm:$0xf] }
 0x1ff   :  { %v1368_v16 = vpop.f32.mrf.mxu2  ;;  %v1381_v4 = vpop.f32.mrf.mxu3  ;;  %v5484_v56 = vld [vmem:[#allocation13 + $0x648] sm:$0xf] }
 0x200   :  { %3141 = vmatpush.bf16.msra.mxu3 %v5133_v9  ;;  %3031 = vmatmul.bf16.vlgmr.msra.gmra.mxu2 %v6788_v13  ;;  %v6279_v9 = vld [vmem:[#allocation13 + $0x5a4] sm:$0xf0]  ;;  %v4749_v4 = vor.u32 %v6119_v7, %v4748_v2  ;;  %v4846_v2 = vld [vmem:[#allocation13 + $0x168] sm:$0xf0] }
 0x201   :  { %3127 = vmatpush.bf16.msra.mxu2 %v4909_v10  ;;  %v4973_v10 = vor.u32 %v6175_v62, %v4972_v61  ;;  %v6327_v16 = vld [vmem:[#allocation13 + $0x724] sm:$0xf0]  ;;  %v5070_v61 = vld [vmem:[#allocation13 + $0x328] sm:$0xf0]  ;;  %v4881_v62 = vor.u32 %v6147_v51, %v4878_v54 }
 0x202   :  { %v1444_v22 = vpop.f32.mrf.mxu0  ;;  %v1457_v23 = vpop.f32.mrf.mxu1  ;;  %v5581_v25 = vor.u32 %v6327_v16, %v5580_v15  ;;  %v5260_v63 = vld [vmem:[#allocation13 + $0x488] sm:$0xf]  ;;  %v5582_v51 = vld [vmem:[#allocation13 + $0x728] sm:$0xf0] }
 0x203   :  { %v1445_v26 = vadd.f32 %v1444_v22, %v1032_v17  ;;  %v5389_v17 = vor.u32 %v6279_v9, %v5388_v8  ;;  %v5356_v22 = vld [vmem:[#allocation13 + $0x548] sm:$0xf]  ;;  %v6187_v8 = vld [vmem:[#allocation13 + $0x2cc] sm:$0xf] }
 0x204   :  { %3142 = vmatpush.bf16.msra.mxu3 %v5101_v18  ;;  %v6219_v18 = vld [vmem:[#allocation13 + $0x3cc] sm:$0xf]  ;;  %v6247_v0 = vld [vmem:[#allocation13 + $0x4a4] sm:$0xf0] }
 0x205   :  { %v1458_v5 = vadd.f32 %v1457_v23, %v1445_v26  ;;  %3128 = vmatpush.bf16.msra.mxu2 %v4877_v19  ;;  %v5166_v19 = vld [vmem:[#allocation13 + $0x3e8] sm:$0xf0]  ;;  %v6271_v23 = vld [vmem:[#allocation13 + $0x564] sm:$0xf0]  ;;  %v5261_v9 = vor.u32 %v6247_v0, %v5260_v63 }
 0x206   :  { %v5169_v26 = vor.u32 %v6219_v18, %v5166_v19  ;;  %v6295_v7 = vld [vmem:[#allocation13 + $0x624] sm:$0xf0]  ;;  %v4814_v18 = vld [vmem:[#allocation13 + $0x128] sm:$0xf0] }
 0x207   :  { %v1464_v36 = vmax.f32 %v1458_v5, 0.0  ;;  %v1418_v37 = vpop.f32.mrf.mxu2  ;;  %v1431_v38 = vpop.f32.mrf.mxu3  ;;  %v5357_v5 = vor.u32 %v6271_v23, %v5356_v22  ;;  %v5228_v15 = vld [vmem:[#allocation13 + $0x448] sm:$0xf]  ;;  %v5006_v23 = vld [vmem:[#allocation13 + $0x2a8] sm:$0xf0] }
 0x208   :  { %3143 = vmatpush.bf16.msra.mxu3 %v5069_v27  ;;  %v1419_v39 = vadd.f32 %v1418_v37, %v1031_v28  ;;  %v5548_v27 = vld [vmem:[#allocation13 + $0x6c8] sm:$0xf]  ;;  %v6155_v37 = vld [vmem:[#allocation13 + $0x1cc] sm:$0xf]  ;;  %v5009_v32 = vor.u32 %v6179_v21, %v5006_v23  ;;  %v5108_v21 = vld [vmem:[#allocation13 + $0x350] sm:$0xf] }
 0x209   :  { %v6793_v43 = vpack.c.bf16 %v1464_v36, %v1464_v36  ;;  %3129 = vmatpush.bf16.msra.mxu2 %v4845_v30  ;;  %v6319_v28 = vld [vmem:[#allocation13 + $0x6e4] sm:$0xf0]  ;;  %v6211_v30 = vld [vmem:[#allocation13 + $0x38c] sm:$0xf] }
 0x20a   :  { %v1432_v48 = vadd.f32 %v1431_v38, %v1419_v39  ;;  %v1446_v49 = vpop.f32.mrf.mxu0  ;;  %v1459_v50 = vpop.f32.mrf.mxu1  ;;  %v5549_v36 = vor.u32 %v6319_v28, %v5548_v27  ;;  %v4910_v38 = vld [vmem:[#allocation13 + $0x1e8] sm:$0xf0]  ;;  %v5137_v39 = vor.u32 %v6211_v30, %v5134_v31  ;;  %v6239_v16 = vld [vmem:[#allocation13 + $0x464] sm:$0xf0] }
 0x20b   :  { %3070 = vmatmul.bf16.vlgmr.msrb.gmra.mxu1 %v6793_v43  ;;  %3096 = vmatmul.bf16.vlgmr.msrb.gmra.mxu3 %v6785_v1  ;;  %v4913_v47 = vor.u32 %v6155_v37, %v4910_v38  ;;  %v6255_v49 = vld [vmem:[#allocation13 + $0x4e4] sm:$0xf0]  ;;  %v5229_v22 = vor.u32 %v6239_v16, %v5228_v15  ;;  %v6283_v30 = vld [vmem:[#allocation13 + $0x5cc] sm:$0xf]  ;;  %v4916_v15 = vld [vmem:[#allocation13 + $0x1d0] sm:$0xf] }
 0x20c   :  { %v1463_v57 = vmax.f32 %v1432_v48, 0.0  ;;  %3144 = vmatpush.bf16.msra.mxu3 %v5037_v40  ;;  %3166 = vmatpush.bf16.msrb.mxu1 %v5677_v41  ;;  %v5516_v40 = vld [vmem:[#allocation13 + $0x688] sm:$0xf]  ;;  %v5422_v31 = vld [vmem:[#allocation13 + $0x5e8] sm:$0xf0] }
 0x20d   :  { %3130 = vmatpush.bf16.msra.mxu2 %v4813_v44  ;;  %v6311_v41 = vld [vmem:[#allocation13 + $0x6a4] sm:$0xf0]  ;;  %v5325_v44 = vor.u32 %v6263_v35, %v5324_v34  ;;  %v6171_v34 = vld [vmem:[#allocation13 + $0x24c] sm:$0xf]  ;;  %v6160_v16 = vld [vmem:[#allocation13 + $0x1ec] sm:$0xf0] }
 0x20e   :  { %v6797_v60 = vpack.c.bf16 %v1463_v57, %v1463_v57  ;;  %v5292_v48 = vld [vmem:[#allocation13 + $0x4c8] sm:$0xf]  ;;  %v5517_v50 = vor.u32 %v6311_v41, %v5516_v40  ;;  %v6331_v37 = vld [vmem:[#allocation13 + $0x74c] sm:$0xf]  ;;  %v5425_v40 = vor.u32 %v6283_v30, %v5422_v31  ;;  %v4917_v23 = vor.u32 %v6160_v16, %v4916_v15 }
 0x20f   :  { %v1420_v3 = vpop.f32.mrf.mxu2  ;;  %v1433_v6 = vpop.f32.mrf.mxu3  ;;  %v6303_v57 = vld [vmem:[#allocation13 + $0x664] sm:$0xf0]  ;;  %v5614_v38 = vld [vmem:[#allocation13 + $0x768] sm:$0xf0] }
 0x210   :  { %3145 = vmatpush.bf16.msra.mxu3 %v5005_v58  ;;  %3167 = vmatpush.bf16.msrb.mxu1 %v5645_v59  ;;  %v5293_v58 = vor.u32 %v6255_v49, %v5292_v48  ;;  %v6195_v59 = vld [vmem:[#allocation13 + $0x30c] sm:$0xf]  ;;  %v5452_v6 = vld [vmem:[#allocation13 + $0x608] sm:$0xf] }
 0x211   :  { %3057 = vmatmul.bf16.vlgmr.msrb.gmra.mxu0 %v6797_v60  ;;  %3083 = vmatmul.bf16.vlgmr.msrb.gmra.mxu2 %v6788_v13  ;;  %v5073_v3 = vor.u32 %v6195_v59, %v5070_v61  ;;  %v5196_v27 = vld [vmem:[#allocation13 + $0x408] sm:$0xf]  ;;  %v6115_v41 = vld [vmem:[#allocation13 + $0x8c] sm:$0xf] }
 0x212   :  { %3131 = vmatpush.bf16.msra.mxu2 %v4781_v52  ;;  %3153 = vmatpush.bf16.msrb.mxu0 %v5421_v53  ;;  %v5485_v52 = vor.u32 %v6303_v57, %v5484_v56  ;;  %v6139_v53 = vld [vmem:[#allocation13 + $0x14c] sm:$0xf]  ;;  %v6231_v28 = vld [vmem:[#allocation13 + $0x424] sm:$0xf0]  ;;  %v5172_v56 = vld [vmem:[#allocation13 + $0x3d0] sm:$0xf] }
 0x213   :  { %v4849_v14 = vor.u32 %v6139_v53, %v4846_v2  ;;  %v5197_v35 = vor.u32 %v6231_v28, %v5196_v27  ;;  %v6163_v48 = vld [vmem:[#allocation13 + $0x20c] sm:$0xf]  ;;  %v6224_v57 = vld [vmem:[#allocation13 + $0x3ec] sm:$0xf0] }
 0x214   :  { %3146 = vmatpush.bf16.msra.mxu3 %v4973_v10  ;;  %3168 = vmatpush.bf16.msrb.mxu1 %v5613_v11  ;;  %v5038_v10 = vld [vmem:[#allocation13 + $0x2e8] sm:$0xf0]  ;;  %v4884_v27 = vld [vmem:[#allocation13 + $0x190] sm:$0xf] }
 0x215   :  { %v6347_v11 = vld [vmem:[#allocation13 + $0x7cc] sm:$0xf]  ;;  %v5041_v19 = vor.u32 %v6187_v8, %v5038_v10  ;;  %v6216_v8 = vld [vmem:[#allocation13 + $0x3ac] sm:$0xf0] }
 0x216   :  { %3132 = vmatpush.bf16.msra.mxu2 %v4749_v4  ;;  %3154 = vmatpush.bf16.msrb.mxu0 %v5389_v17  ;;  %v5453_v4 = vor.u32 %v6295_v7, %v5452_v6  ;;  %v6131_v17 = vld [vmem:[#allocation13 + $0x10c] sm:$0xf]  ;;  %v5681_v20 = vor.u32 %v6347_v11, %v5678_v12  ;;  %v5140_v7 = vld [vmem:[#allocation13 + $0x390] sm:$0xf] }
 0x217   :  { %v4942_v49 = vld [vmem:[#allocation13 + $0x228] sm:$0xf0]  ;;  %v6152_v28 = vld [vmem:[#allocation13 + $0x1ac] sm:$0xf0] }
 0x218   :  { %3147 = vmatpush.bf16.msra.mxu3 %v4941_v24  ;;  %3169 = vmatpush.bf16.msrb.mxu1 %v5581_v25  ;;  %v6339_v24 = vld [vmem:[#allocation13 + $0x78c] sm:$0xf]  ;;  %v4945_v63 = vor.u32 %v6163_v48, %v4942_v49  ;;  %v6352_v48 = vld [vmem:[#allocation13 + $0x7ec] sm:$0xf0] }
 0x219   :  { %v5646_v25 = vld [vmem:[#allocation13 + $0x7a8] sm:$0xf0] }
 0x21a   :  { %3133 = vmatpush.bf16.msra.mxu2 %v4717_v29  ;;  %3155 = vmatpush.bf16.msrb.mxu0 %v5357_v5  ;;  %v6123_v29 = vld [vmem:[#allocation13 + $0xcc] sm:$0xf]  ;;  %v5649_v33 = vor.u32 %v6339_v24, %v5646_v25 }
 0x21b   :  { %3122 = vmatmul.bf16.vlgmr.msra.gmra.mxu1 %v6793_v43  ;;  %3148 = vmatmul.bf16.vlgmr.msra.gmra.mxu3 %v6785_v1  ;;  %v4782_v5 = vld [vmem:[#allocation13 + $0xe8] sm:$0xf0] }
 0x21c   :  { %3192 = vmatpush.bf16.msrb.mxu3 %v5169_v26  ;;  %3170 = vmatpush.bf16.msrb.mxu1 %v5549_v36  ;;  %v4817_v26 = vor.u32 %v6131_v17, %v4814_v18  ;;  %v4974_v36 = vld [vmem:[#allocation13 + $0x268] sm:$0xf0] }
 0x21d   :  { %v4977_v46 = vor.u32 %v6171_v34, %v4974_v36  ;;  %v4718_v59 = vld [vmem:[#allocation13 + $0x68] sm:$0xf0]  ;;  %v4885_v34 = vor.u32 %v6152_v28, %v4884_v27  ;;  %v6328_v27 = vld [vmem:[#allocation13 + $0x72c] sm:$0xf0] }
 0x21e   :  { %3134 = vmatpush.bf16.msra.mxu2 %v4685_v42  ;;  %3156 = vmatpush.bf16.msrb.mxu0 %v5325_v44  ;;  %v4750_v42 = vld [vmem:[#allocation13 + $0xa8] sm:$0xf0] }
 0x21f   :  { %v6275_v44 = vld [vmem:[#allocation13 + $0x58c] sm:$0xf]  ;;  %v4753_v54 = vor.u32 %v6115_v41, %v4750_v42 }
 0x220   :  { %3193 = vmatpush.bf16.msrb.mxu3 %v5137_v39  ;;  %3171 = vmatpush.bf16.msrb.mxu1 %v5517_v50  ;;  %v4785_v39 = vor.u32 %v6123_v29, %v4782_v5  ;;  %v6323_v50 = vld [vmem:[#allocation13 + $0x70c] sm:$0xf] }
 0x221   :  { %3109 = vmatmul.bf16.vlgmr.msra.gmra.mxu0 %v6797_v60  ;;  %3135 = vmatmul.bf16.vlgmr.msra.gmra.mxu2 %v6788_v13  ;;  %v6267_v61 = vld [vmem:[#allocation13 + $0x54c] sm:$0xf]  ;;  %v5585_v0 = vor.u32 %v6323_v50, %v5582_v51 }
 0x222   :  { %3179 = vmatpush.bf16.msrb.mxu2 %v4913_v47  ;;  %3157 = vmatpush.bf16.msrb.mxu0 %v5293_v58  ;;  %v5617_v47 = vor.u32 %v6331_v37, %v5614_v38  ;;  %v6107_v58 = vld [vmem:[#allocation13 + $0x4c] sm:$0xf]  ;;  %v4852_v38 = vld [vmem:[#allocation13 + $0x150] sm:$0xf] }
 0x223   :  { %v6315_v53 = vld [vmem:[#allocation13 + $0x6cc] sm:$0xf] }
 0x224   :  { %3194 = vmatpush.bf16.msrb.mxu3 %v5105_v55  ;;  %3172 = vmatpush.bf16.msrb.mxu1 %v5485_v52  ;;  %v5393_v55 = vor.u32 %v6275_v44, %v5390_v45  ;;  %v5173_v52 = vor.u32 %v6224_v57, %v5172_v56  ;;  %v5550_v2 = vld [vmem:[#allocation13 + $0x6e8] sm:$0xf0]  ;;  %v5044_v44 = vld [vmem:[#allocation13 + $0x2d0] sm:$0xf] }
 0x225   :  { %v4686_v10 = vld [vmem:[#allocation13 + $0x28] sm:$0xf0]  ;;  %v6136_v56 = vld [vmem:[#allocation13 + $0x12c] sm:$0xf0] }
 0x226   :  { %3180 = vmatpush.bf16.msrb.mxu2 %v4881_v62  ;;  %3158 = vmatpush.bf16.msrb.mxu0 %v5261_v9  ;;  %v5358_v62 = vld [vmem:[#allocation13 + $0x568] sm:$0xf0] }
 0x227   :  { %v5361_v6 = vor.u32 %v6267_v61, %v5358_v62  ;;  %v6099_v9 = vld [vmem:[#allocation13 + $0xc] sm:$0xf]  ;;  %v6184_v62 = vld [vmem:[#allocation13 + $0x2ac] sm:$0xf0] }
 0x228   :  { %3195 = vmatpush.bf16.msrb.mxu3 %v5073_v3  ;;  %3173 = vmatpush.bf16.msrb.mxu1 %v5453_v4  ;;  %v4721_v3 = vor.u32 %v6107_v58, %v4718_v59  ;;  %v6259_v11 = vld [vmem:[#allocation13 + $0x50c] sm:$0xf]  ;;  %v5141_v4 = vor.u32 %v6216_v8, %v5140_v7  ;;  %v5012_v59 = vld [vmem:[#allocation13 + $0x290] sm:$0xf] }
 0x229   :  { %v5326_v12 = vld [vmem:[#allocation13 + $0x528] sm:$0xf0]  ;;  %v5428_v7 = vld [vmem:[#allocation13 + $0x5d0] sm:$0xf] }
 0x22a   :  { %3181 = vmatpush.bf16.msrb.mxu2 %v4849_v14  ;;  %3159 = vmatpush.bf16.msrb.mxu0 %v5229_v22  ;;  %v5553_v14 = vor.u32 %v6315_v53, %v5550_v2  ;;  %v6307_v17 = vld [vmem:[#allocation13 + $0x68c] sm:$0xf]  ;;  %v6208_v22 = vld [vmem:[#allocation13 + $0x36c] sm:$0xf0] }
 0x22b   :  { %3174 = vmatmul.bf16.vlgmr.msrb.gmra.mxu1 %v6793_v43  ;;  %v5518_v18 = vld [vmem:[#allocation13 + $0x6a8] sm:$0xf0]  ;;  %v5109_v29 = vor.u32 %v6208_v22, %v5108_v21  ;;  %v6288_v8 = vld [vmem:[#allocation13 + $0x5ec] sm:$0xf0] }
 0x22c   :  { %3196 = vmatpush.bf16.msrb.mxu3 %v5041_v19  ;;  %3218 = vmatpush.bf16.msra.mxu1 %v5681_v20  ;;  %v4689_v19 = vor.u32 %v6099_v9, %v4686_v10  ;;  %v5329_v20 = vor.u32 %v6259_v11, %v5326_v12  ;;  %v6251_v24 = vld [vmem:[#allocation13 + $0x4cc] sm:$0xf]  ;;  %v5013_v9 = vor.u32 %v6184_v62, %v5012_v59  ;;  %v4980_v12 = vld [vmem:[#allocation13 + $0x250] sm:$0xf]  ;;  %v6204_v59 = vld [vmem:[#allocation13 + $0x354] sm:$0xf] }
 0x22d   :  { %v5294_v25 = vld [vmem:[#allocation13 + $0x4e8] sm:$0xf0]  ;;  %v5429_v16 = vor.u32 %v6288_v8, %v5428_v7  ;;  %v6280_v21 = vld [vmem:[#allocation13 + $0x5ac] sm:$0xf0]  ;;  %v5110_v62 = vld [vmem:[#allocation13 + $0x370] sm:$0xf0] }
 0x22e   :  { %3182 = vmatpush.bf16.msrb.mxu2 %v4817_v26  ;;  %3160 = vmatpush.bf16.msrb.mxu0 %v5197_v35  ;;  %v5521_v26 = vor.u32 %v6307_v17, %v5518_v18  ;;  %v6299_v5 = vld [vmem:[#allocation13 + $0x64c] sm:$0xf]  ;;  %v5297_v31 = vor.u32 %v6251_v24, %v5294_v25  ;;  %v6336_v17 = vld [vmem:[#allocation13 + $0x76c] sm:$0xf0] }
 0x22f   :  { %v5486_v30 = vld [vmem:[#allocation13 + $0x668] sm:$0xf0]  ;;  %v4756_v18 = vld [vmem:[#allocation13 + $0x90] sm:$0xf] }
 0x230   :  { %3197 = vmatpush.bf16.msrb.mxu3 %v5009_v32  ;;  %3219 = vmatpush.bf16.msra.mxu1 %v5649_v33  ;;  %v5076_v32 = vld [vmem:[#allocation13 + $0x310] sm:$0xf]  ;;  %v6243_v35 = vld [vmem:[#allocation13 + $0x48c] sm:$0xf]  ;;  %v5489_v37 = vor.u32 %v6299_v5, %v5486_v30  ;;  %v6220_v5 = vld [vmem:[#allocation13 + $0x3d4] sm:$0xf] }
 0x231   :  { %3161 = vmatmul.bf16.vlgmr.msrb.gmra.mxu0 %v6797_v60  ;;  %v6200_v33 = vld [vmem:[#allocation13 + $0x32c] sm:$0xf0]  ;;  %v5262_v36 = vld [vmem:[#allocation13 + $0x4a8] sm:$0xf0]  ;;  %v5174_v30 = vld [vmem:[#allocation13 + $0x3f0] sm:$0xf0] }
 0x232   :  { %3183 = vmatpush.bf16.msrb.mxu2 %v4785_v39  ;;  %3205 = vmatpush.bf16.msra.mxu0 %v5425_v40  ;;  %v6144_v39 = vld [vmem:[#allocation13 + $0x16c] sm:$0xf0]  ;;  %v5077_v40 = vor.u32 %v6200_v33, %v5076_v32  ;;  %v6291_v41 = vld [vmem:[#allocation13 + $0x60c] sm:$0xf]  ;;  %v5265_v45 = vor.u32 %v6243_v35, %v5262_v36 }
 0x233   :  { %v5454_v42 = vld [vmem:[#allocation13 + $0x628] sm:$0xf0]  ;;  %v4853_v49 = vor.u32 %v6144_v39, %v4852_v38  ;;  %v6168_v25 = vld [vmem:[#allocation13 + $0x22c] sm:$0xf0] }
 0x234   :  { %3198 = vmatpush.bf16.msrb.mxu3 %v4977_v46  ;;  %3220 = vmatpush.bf16.msra.mxu1 %v5617_v47  ;;  %v6192_v46 = vld [vmem:[#allocation13 + $0x2ec] sm:$0xf0]  ;;  %v6235_v50 = vld [vmem:[#allocation13 + $0x44c] sm:$0xf] }
 0x235   :  { %v5684_v47 = vld [vmem:[#allocation13 + $0x7d0] sm:$0xf]  ;;  %v5230_v51 = vld [vmem:[#allocation13 + $0x468] sm:$0xf0]  ;;  %v5045_v57 = vor.u32 %v6192_v46, %v5044_v44  ;;  %v5142_v44 = vld [vmem:[#allocation13 + $0x3b0] sm:$0xf0] }
 0x236   :  { %3184 = vmatpush.bf16.msrb.mxu2 %v4753_v54  ;;  %3206 = vmatpush.bf16.msra.mxu0 %v5393_v55  ;;  %v5457_v54 = vor.u32 %v6291_v41, %v5454_v42  ;;  %v4820_v55 = vld [vmem:[#allocation13 + $0x110] sm:$0xf]  ;;  %v5685_v58 = vor.u32 %v6352_v48, %v5684_v47  ;;  %v5233_v61 = vor.u32 %v6235_v50, %v5230_v51  ;;  %v6227_v53 = vld [vmem:[#allocation13 + $0x40c] sm:$0xf]  ;;  %v6212_v42 = vld [vmem:[#allocation13 + $0x394] sm:$0xf] }
 0x237   :  { %v5198_v2 = vld [vmem:[#allocation13 + $0x428] sm:$0xf0]  ;;  %v6112_v32 = vld [vmem:[#allocation13 + $0x6c] sm:$0xf0]  ;;  %v4918_v50 = vld [vmem:[#allocation13 + $0x1f0] sm:$0xf0] }
 0x238   :  { %3199 = vmatpush.bf16.msrb.mxu3 %v4945_v63  ;;  %3221 = vmatpush.bf16.msra.mxu1 %v5585_v0  ;;  %v5652_v63 = vld [vmem:[#allocation13 + $0x790] sm:$0xf]  ;;  %v5201_v11 = vor.u32 %v6227_v53, %v5198_v2  ;;  %v4886_v53 = vld [vmem:[#allocation13 + $0x1b0] sm:$0xf0] }
 0x239   :  { %v6344_v0 = vld [vmem:[#allocation13 + $0x7ac] sm:$0xf0] }
 0x23a   :  { %3185 = vmatpush.bf16.msrb.mxu2 %v4721_v3  ;;  %3207 = vmatpush.bf16.msra.mxu0 %v5361_v6  ;;  %v4788_v3 = vld [vmem:[#allocation13 + $0xd0] sm:$0xf]  ;;  %v5653_v10 = vor.u32 %v6344_v0, %v5652_v63 }
 0x23b   :  { %3200 = vmatmul.bf16.vlgmr.msrb.gmra.mxu3 %v6785_v1  ;;  %v6128_v6 = vld [vmem:[#allocation13 + $0xec] sm:$0xf0] }
 0x23c   :  { %3244 = vmatpush.bf16.msra.mxu3 %v5173_v52  ;;  %3222 = vmatpush.bf16.msra.mxu1 %v5553_v14  ;;  %v4821_v52 = vor.u32 %v6136_v56, %v4820_v55  ;;  %v6176_v14 = vld [vmem:[#allocation13 + $0x26c] sm:$0xf0]  ;;  %v4789_v15 = vor.u32 %v6128_v6, %v4788_v3  ;;  %v5113_v3 = vor.u32 %v6204_v59, %v5110_v62  ;;  %v5398_v59 = vld [vmem:[#allocation13 + $0x5b0] sm:$0xf0] }
 0x23d   :  { %v4981_v22 = vor.u32 %v6176_v14, %v4980_v12  ;;  %v5364_v33 = vld [vmem:[#allocation13 + $0x550] sm:$0xf]  ;;  %v6164_v62 = vld [vmem:[#allocation13 + $0x214] sm:$0xf] }
 0x23e   :  { %3186 = vmatpush.bf16.msrb.mxu2 %v4689_v19  ;;  %3208 = vmatpush.bf16.msra.mxu0 %v5329_v20  ;;  %v6120_v19 = vld [vmem:[#allocation13 + $0xac] sm:$0xf0] }
 0x23f   :  { %v5396_v20 = vld [vmem:[#allocation13 + $0x590] sm:$0xf]  ;;  %v4757_v28 = vor.u32 %v6120_v19, %v4756_v18 }
 0x240   :  { %3245 = vmatpush.bf16.msra.mxu3 %v5141_v4  ;;  %3223 = vmatpush.bf16.msra.mxu1 %v5521_v26  ;;  %v5620_v4 = vld [vmem:[#allocation13 + $0x750] sm:$0xf] }
 0x241   :  { %3187 = vmatmul.bf16.vlgmr.msrb.gmra.mxu2 %v6788_v13  ;;  %v5621_v24 = vor.u32 %v6336_v17, %v5620_v4  ;;  %v5588_v26 = vld [vmem:[#allocation13 + $0x710] sm:$0xf] }
 0x242   :  { %3231 = vmatpush.bf16.msra.mxu2 %v4917_v23  ;;  %3209 = vmatpush.bf16.msra.mxu0 %v5297_v31  ;;  %v4948_v23 = vld [vmem:[#allocation13 + $0x210] sm:$0xf]  ;;  %v5589_v36 = vor.u32 %v6328_v27, %v5588_v26 }
 0x243   :  { %v4724_v31 = vld [vmem:[#allocation13 + $0x50] sm:$0xf]  ;;  %v4949_v35 = vor.u32 %v6168_v25, %v4948_v23  ;;  %v5686_v25 = vld [vmem:[#allocation13 + $0x7f0] sm:$0xf0] }
 0x244   :  { %3246 = vmatpush.bf16.msra.mxu3 %v5109_v29  ;;  %3224 = vmatpush.bf16.msra.mxu1 %v5489_v37  ;;  %v5397_v29 = vor.u32 %v6280_v21, %v5396_v20  ;;  %v5177_v37 = vor.u32 %v6220_v5, %v5174_v30  ;;  %v5556_v38 = vld [vmem:[#allocation13 + $0x6d0] sm:$0xf]  ;;  %v6188_v21 = vld [vmem:[#allocation13 + $0x2d4] sm:$0xf] }
 0x245   :  { %v6320_v39 = vld [vmem:[#allocation13 + $0x6ec] sm:$0xf0] }
 0x246   :  { %3232 = vmatpush.bf16.msra.mxu2 %v4885_v34  ;;  %3210 = vmatpush.bf16.msra.mxu0 %v5265_v45  ;;  %v6272_v34 = vld [vmem:[#allocation13 + $0x56c] sm:$0xf0]  ;;  %v5557_v51 = vor.u32 %v6320_v39, %v5556_v38 }
 0x247   :  { %v5365_v41 = vor.u32 %v6272_v34, %v5364_v33  ;;  %v4692_v45 = vld [vmem:[#allocation13 + $0x10] sm:$0xf]  ;;  %v5014_v33 = vld [vmem:[#allocation13 + $0x2b0] sm:$0xf0] }
 0x248   :  { %3247 = vmatpush.bf16.msra.mxu3 %v5077_v40  ;;  %3225 = vmatpush.bf16.msra.mxu1 %v5457_v54  ;;  %v4725_v40 = vor.u32 %v6112_v32, %v4724_v31  ;;  %v6104_v46 = vld [vmem:[#allocation13 + $0x2c] sm:$0xf0]  ;;  %v5145_v54 = vor.u32 %v6212_v42, %v5142_v44  ;;  %v6180_v32 = vld [vmem:[#allocation13 + $0x294] sm:$0xf] }
 0x249   :  { %v5332_v47 = vld [vmem:[#allocation13 + $0x510] sm:$0xf]  ;;  %v4693_v55 = vor.u32 %v6104_v46, %v4692_v45  ;;  %v6284_v42 = vld [vmem:[#allocation13 + $0x5d4] sm:$0xf]  ;;  %v5017_v45 = vor.u32 %v6180_v32, %v5014_v33  ;;  %v5116_v32 = vld [vmem:[#allocation13 + $0x358] sm:$0xf] }
 0x24a   :  { %3233 = vmatpush.bf16.msra.mxu2 %v4853_v49  ;;  %3211 = vmatpush.bf16.msra.mxu0 %v5233_v61  ;;  %v6264_v48 = vld [vmem:[#allocation13 + $0x52c] sm:$0xf0]  ;;  %v6156_v49 = vld [vmem:[#allocation13 + $0x1d4] sm:$0xf] }
 0x24b   :  { %3226 = vmatmul.bf16.vlgmr.msra.gmra.mxu1 %v6793_v43  ;;  %v5333_v56 = vor.u32 %v6264_v48, %v5332_v47  ;;  %v4921_v61 = vor.u32 %v6156_v49, %v4918_v50  ;;  %v5300_v63 = vld [vmem:[#allocation13 + $0x4d0] sm:$0xf]  ;;  %v5430_v44 = vld [vmem:[#allocation13 + $0x5f0] sm:$0xf0] }
 0x24c   :  { %3248 = vmatpush.bf16.msra.mxu3 %v5045_v57  ;;  %3270 = vmatpush.bf16.msrb.mxu1 %v5685_v58  ;;  %v5524_v57 = vld [vmem:[#allocation13 + $0x690] sm:$0xf]  ;;  %v6172_v49 = vld [vmem:[#allocation13 + $0x254] sm:$0xf] }
 0x24d   :  { %v6312_v58 = vld [vmem:[#allocation13 + $0x6ac] sm:$0xf0]  ;;  %v4982_v50 = vld [vmem:[#allocation13 + $0x270] sm:$0xf0] }
 0x24e   :  { %3234 = vmatpush.bf16.msra.mxu2 %v4821_v52  ;;  %3212 = vmatpush.bf16.msra.mxu0 %v5201_v11  ;;  %v6256_v0 = vld [vmem:[#allocation13 + $0x4ec] sm:$0xf0]  ;;  %v6148_v52 = vld [vmem:[#allocation13 + $0x194] sm:$0xf]  ;;  %v5525_v2 = vor.u32 %v6312_v58, %v5524_v57 }
 0x24f   :  { %v5301_v6 = vor.u32 %v6256_v0, %v5300_v63  ;;  %v5492_v7 = vld [vmem:[#allocation13 + $0x650] sm:$0xf]  ;;  %v5078_v11 = vld [vmem:[#allocation13 + $0x330] sm:$0xf0] }
 0x250   :  { %3249 = vmatpush.bf16.msra.mxu3 %v5013_v9  ;;  %3271 = vmatpush.bf16.msrb.mxu1 %v5653_v10  ;;  %v6304_v8 = vld [vmem:[#allocation13 + $0x66c] sm:$0xf0]  ;;  %v6196_v9 = vld [vmem:[#allocation13 + $0x314] sm:$0xf]  ;;  %v4889_v10 = vor.u32 %v6148_v52, %v4886_v53 }
 0x251   :  { %3213 = vmatmul.bf16.vlgmr.msra.gmra.mxu0 %v6797_v60  ;;  %v5268_v12 = vld [vmem:[#allocation13 + $0x490] sm:$0xf]  ;;  %v5493_v4 = vor.u32 %v6304_v8, %v5492_v7  ;;  %v5081_v18 = vor.u32 %v6196_v9, %v5078_v11  ;;  %v4758_v57 = vld [vmem:[#allocation13 + $0xb0] sm:$0xf0]  ;;  %v6225_v7 = vld [vmem:[#allocation13 + $0x3f4] sm:$0xf0] }
 0x252   :  { %3235 = vmatpush.bf16.msra.mxu2 %v4789_v15  ;;  %3257 = vmatpush.bf16.msrb.mxu0 %v5429_v16  ;;  %v6248_v14 = vld [vmem:[#allocation13 + $0x4ac] sm:$0xf0]  ;;  %v6140_v15 = vld [vmem:[#allocation13 + $0x154] sm:$0xf] }
 0x253   :  { %v4854_v16 = vld [vmem:[#allocation13 + $0x170] sm:$0xf0]  ;;  %v5460_v17 = vld [vmem:[#allocation13 + $0x610] sm:$0xf]  ;;  %v5269_v19 = vor.u32 %v6248_v14, %v5268_v12 }
 0x254   :  { %3250 = vmatpush.bf16.msra.mxu3 %v4981_v22  ;;  %3272 = vmatpush.bf16.msrb.mxu1 %v5621_v24  ;;  %v6296_v20 = vld [vmem:[#allocation13 + $0x62c] sm:$0xf0]  ;;  %v5046_v22 = vld [vmem:[#allocation13 + $0x2f0] sm:$0xf0]  ;;  %v4857_v23 = vor.u32 %v6140_v15, %v4854_v16 }
 0x255   :  { %v6348_v24 = vld [vmem:[#allocation13 + $0x7d4] sm:$0xf]  ;;  %v5236_v26 = vld [vmem:[#allocation13 + $0x450] sm:$0xf]  ;;  %v5461_v5 = vor.u32 %v6296_v20, %v5460_v17  ;;  %v5049_v30 = vor.u32 %v6188_v21, %v5046_v22  ;;  %v6217_v20 = vld [vmem:[#allocation13 + $0x3b4] sm:$0xf0] }
 0x256   :  { %3236 = vmatpush.bf16.msra.mxu2 %v4757_v28  ;;  %3258 = vmatpush.bf16.msrb.mxu0 %v5397_v29  ;;  %v6240_v27 = vld [vmem:[#allocation13 + $0x46c] sm:$0xf0]  ;;  %v6132_v28 = vld [vmem:[#allocation13 + $0x114] sm:$0xf]  ;;  %v5689_v31 = vor.u32 %v6348_v24, %v5686_v25  ;;  %v4924_v25 = vld [vmem:[#allocation13 + $0x1d8] sm:$0xf] }
 0x257   :  { %v4822_v29 = vld [vmem:[#allocation13 + $0x130] sm:$0xf0]  ;;  %v5237_v34 = vor.u32 %v6240_v27, %v5236_v26  ;;  %v5204_v38 = vld [vmem:[#allocation13 + $0x410] sm:$0xf]  ;;  %v6161_v26 = vld [vmem:[#allocation13 + $0x1f4] sm:$0xf0] }
 0x258   :  { %3251 = vmatpush.bf16.msra.mxu3 %v4949_v35  ;;  %3273 = vmatpush.bf16.msrb.mxu1 %v5589_v36  ;;  %v4825_v35 = vor.u32 %v6132_v28, %v4822_v29  ;;  %v6340_v36 = vld [vmem:[#allocation13 + $0x794] sm:$0xf]  ;;  %v6232_v39 = vld [vmem:[#allocation13 + $0x42c] sm:$0xf0]  ;;  %v4925_v33 = vor.u32 %v6161_v26, %v4924_v25 }
 0x259   :  { %v5205_v47 = vor.u32 %v6232_v39, %v5204_v38  ;;  %v6276_v58 = vld [vmem:[#allocation13 + $0x594] sm:$0xf]  ;;  %v6153_v38 = vld [vmem:[#allocation13 + $0x1b4] sm:$0xf0] }
 0x25a   :  { %3237 = vmatpush.bf16.msra.mxu2 %v4725_v40  ;;  %3259 = vmatpush.bf16.msrb.mxu0 %v5365_v41  ;;  %v6124_v40 = vld [vmem:[#allocation13 + $0xd4] sm:$0xf] }
 0x25b   :  { %3252 = vmatmul.bf16.vlgmr.msra.gmra.mxu3 %v6785_v1  ;;  %v4790_v41 = vld [vmem:[#allocation13 + $0xf0] sm:$0xf0] }
 0x25c   :  { %3296 = vmatpush.bf16.msrb.mxu3 %v5177_v37  ;;  %3274 = vmatpush.bf16.msrb.mxu1 %v5557_v51  ;;  %v5654_v37 = vld [vmem:[#allocation13 + $0x7b0] sm:$0xf0]  ;;  %v4793_v48 = vor.u32 %v6124_v40, %v4790_v41 }
 0x25d   :  { %v5657_v46 = vor.u32 %v6340_v36, %v5654_v37  ;;  %v6332_v51 = vld [vmem:[#allocation13 + $0x754] sm:$0xf]  ;;  %v4892_v37 = vld [vmem:[#allocation13 + $0x198] sm:$0xf] }
 0x25e   :  { %3238 = vmatpush.bf16.msra.mxu2 %v4693_v55  ;;  %3260 = vmatpush.bf16.msrb.mxu0 %v5333_v56  ;;  %v5622_v55 = vld [vmem:[#allocation13 + $0x770] sm:$0xf0] }
 0x25f   :  { %v6116_v56 = vld [vmem:[#allocation13 + $0x94] sm:$0xf]  ;;  %v5625_v63 = vor.u32 %v6332_v51, %v5622_v55  ;;  %v6145_v51 = vld [vmem:[#allocation13 + $0x174] sm:$0xf0] }
 0x260   :  { %3297 = vmatpush.bf16.msrb.mxu3 %v5145_v54  ;;  %3275 = vmatpush.bf16.msrb.mxu1 %v5525_v2  ;;  %v5433_v54 = vor.u32 %v6284_v42, %v5430_v44  ;;  %v4761_v0 = vor.u32 %v6116_v56, %v4758_v57  ;;  %v4950_v52 = vld [vmem:[#allocation13 + $0x230] sm:$0xf0] }
 0x261   :  { %3239 = vmatmul.bf16.vlgmr.msra.gmra.mxu2 %v6788_v13  ;;  %v6324_v53 = vld [vmem:[#allocation13 + $0x714] sm:$0xf]  ;;  %v4953_v12 = vor.u32 %v6164_v62, %v4950_v52 }
 0x262   :  { %3283 = vmatpush.bf16.msrb.mxu2 %v4921_v61  ;;  %3261 = vmatpush.bf16.msrb.mxu0 %v5301_v6  ;;  %v4985_v61 = vor.u32 %v6172_v49, %v4982_v50  ;;  %v5590_v2 = vld [vmem:[#allocation13 + $0x730] sm:$0xf0]  ;;  %v5180_v6 = vld [vmem:[#allocation13 + $0x3d8] sm:$0xf] }
 0x263   :  { %v6108_v8 = vld [vmem:[#allocation13 + $0x54] sm:$0xf]  ;;  %v5593_v14 = vor.u32 %v6324_v53, %v5590_v2  ;;  %v5181_v15 = vor.u32 %v6225_v7, %v5180_v6  ;;  %v4860_v50 = vld [vmem:[#allocation13 + $0x158] sm:$0xf] }
 0x264   :  { %3298 = vmatpush.bf16.msrb.mxu3 %v5113_v3  ;;  %3276 = vmatpush.bf16.msrb.mxu1 %v5493_v4  ;;  %v5401_v3 = vor.u32 %v6276_v58, %v5398_v59  ;;  %v4726_v9 = vld [vmem:[#allocation13 + $0x70] sm:$0xf0]  ;;  %v5052_v59 = vld [vmem:[#allocation13 + $0x2d8] sm:$0xf]  ;;  %v4861_v62 = vor.u32 %v6145_v51, %v4860_v50  ;;  %v6221_v50 = vld [vmem:[#allocation13 + $0x3dc] sm:$0xf] }
 0x265   :  { %v5366_v11 = vld [vmem:[#allocation13 + $0x570] sm:$0xf0]  ;;  %v4729_v17 = vor.u32 %v6108_v8, %v4726_v9  ;;  %v4828_v2 = vld [vmem:[#allocation13 + $0x118] sm:$0xf]  ;;  %v5182_v51 = vld [vmem:[#allocation13 + $0x3f8] sm:$0xf0] }
 0x266   :  { %3284 = vmatpush.bf16.msrb.mxu2 %v4889_v10  ;;  %3262 = vmatpush.bf16.msrb.mxu0 %v5269_v19  ;;  %v6268_v10 = vld [vmem:[#allocation13 + $0x554] sm:$0xf]  ;;  %v5148_v19 = vld [vmem:[#allocation13 + $0x398] sm:$0xf] }
 0x267   :  { %v6316_v16 = vld [vmem:[#allocation13 + $0x6d4] sm:$0xf]  ;;  %v5149_v28 = vor.u32 %v6217_v20, %v5148_v19  ;;  %v4796_v20 = vld [vmem:[#allocation13 + $0xd8] sm:$0xf] }
 0x268   :  { %3299 = vmatpush.bf16.msrb.mxu3 %v5081_v18  ;;  %3277 = vmatpush.bf16.msrb.mxu1 %v5461_v5  ;;  %v5558_v4 = vld [vmem:[#allocation13 + $0x6f0] sm:$0xf0]  ;;  %v5369_v18 = vor.u32 %v6268_v10, %v5366_v11  ;;  %v5020_v11 = vld [vmem:[#allocation13 + $0x298] sm:$0xf] }
 0x269   :  { %v6100_v21 = vld [vmem:[#allocation13 + $0x14] sm:$0xf]  ;;  %v5561_v27 = vor.u32 %v6316_v16, %v5558_v4  ;;  %v6345_v4 = vld [vmem:[#allocation13 + $0x7b4] sm:$0xf0] }
 0x26a   :  { %3285 = vmatpush.bf16.msrb.mxu2 %v4857_v23  ;;  %3263 = vmatpush.bf16.msrb.mxu0 %v5237_v34  ;;  %v4694_v22 = vld [vmem:[#allocation13 + $0x30] sm:$0xf0]  ;;  %v6209_v34 = vld [vmem:[#allocation13 + $0x374] sm:$0xf0] }
 0x26b   :  { %3278 = vmatmul.bf16.vlgmr.msrb.gmra.mxu1 %v6793_v43  ;;  %v6260_v23 = vld [vmem:[#allocation13 + $0x514] sm:$0xf]  ;;  %v4697_v29 = vor.u32 %v6100_v21, %v4694_v22  ;;  %v5117_v40 = vor.u32 %v6209_v34, %v5116_v32  ;;  %v6129_v21 = vld [vmem:[#allocation13 + $0xf4] sm:$0xf0] }
 0x26c   :  { %3300 = vmatpush.bf16.msrb.mxu3 %v5049_v30  ;;  %3322 = vmatpush.bf16.msra.mxu1 %v5689_v31  ;;  %v5334_v24 = vld [vmem:[#allocation13 + $0x530] sm:$0xf0]  ;;  %v5436_v22 = vld [vmem:[#allocation13 + $0x5d8] sm:$0xf] }
 0x26d   :  { %v5337_v5 = vor.u32 %v6260_v23, %v5334_v24  ;;  %v6308_v30 = vld [vmem:[#allocation13 + $0x694] sm:$0xf]  ;;  %v6289_v23 = vld [vmem:[#allocation13 + $0x5f4] sm:$0xf0] }
 0x26e   :  { %3286 = vmatpush.bf16.msrb.mxu2 %v4825_v35  ;;  %3264 = vmatpush.bf16.msrb.mxu0 %v5205_v47  ;;  %v5526_v31 = vld [vmem:[#allocation13 + $0x6b0] sm:$0xf0]  ;;  %v6201_v47 = vld [vmem:[#allocation13 + $0x334] sm:$0xf0]  ;;  %v5437_v32 = vor.u32 %v6289_v23, %v5436_v22  ;;  %v6205_v23 = vld [vmem:[#allocation13 + $0x35c] sm:$0xf] }
 0x26f   :  { %v6252_v35 = vld [vmem:[#allocation13 + $0x4d4] sm:$0xf]  ;;  %v5529_v39 = vor.u32 %v6308_v30, %v5526_v31  ;;  %v5628_v30 = vld [vmem:[#allocation13 + $0x758] sm:$0xf] }
 0x270   :  { %3301 = vmatpush.bf16.msrb.mxu3 %v5017_v45  ;;  %3323 = vmatpush.bf16.msra.mxu1 %v5657_v46  ;;  %v5302_v36 = vld [vmem:[#allocation13 + $0x4f0] sm:$0xf0]  ;;  %v5084_v45 = vld [vmem:[#allocation13 + $0x318] sm:$0xf]  ;;  %v4893_v46 = vor.u32 %v6153_v38, %v4892_v37 }
 0x271   :  { %3265 = vmatmul.bf16.vlgmr.msrb.gmra.mxu0 %v6797_v60  ;;  %v5305_v41 = vor.u32 %v6252_v35, %v5302_v36  ;;  %v6300_v42 = vld [vmem:[#allocation13 + $0x654] sm:$0xf]  ;;  %v5085_v56 = vor.u32 %v6201_v47, %v5084_v45  ;;  %v4764_v34 = vld [vmem:[#allocation13 + $0x98] sm:$0xf] }
 0x272   :  { %3287 = vmatpush.bf16.msrb.mxu2 %v4793_v48  ;;  %3309 = vmatpush.bf16.msra.mxu0 %v5433_v54  ;;  %v5494_v44 = vld [vmem:[#allocation13 + $0x670] sm:$0xf0]  ;;  %v6121_v35 = vld [vmem:[#allocation13 + $0xb4] sm:$0xf0] }
 0x273   :  { %v6244_v48 = vld [vmem:[#allocation13 + $0x494] sm:$0xf]  ;;  %v5497_v54 = vor.u32 %v6300_v42, %v5494_v44  ;;  %v5404_v36 = vld [vmem:[#allocation13 + $0x598] sm:$0xf]  ;;  %v4765_v44 = vor.u32 %v6121_v35, %v4764_v34 }
 0x274   :  { %3302 = vmatpush.bf16.msrb.mxu3 %v4985_v61  ;;  %3324 = vmatpush.bf16.msra.mxu1 %v5625_v63  ;;  %v5270_v49 = vld [vmem:[#allocation13 + $0x4b0] sm:$0xf0]  ;;  %v6193_v61 = vld [vmem:[#allocation13 + $0x2f4] sm:$0xf0] }
 0x275   :  { %v6292_v55 = vld [vmem:[#allocation13 + $0x614] sm:$0xf]  ;;  %v5273_v57 = vor.u32 %v6244_v48, %v5270_v49  ;;  %v5692_v63 = vld [vmem:[#allocation13 + $0x7d8] sm:$0xf]  ;;  %v5053_v9 = vor.u32 %v6193_v61, %v5052_v59 }
 0x276   :  { %3288 = vmatpush.bf16.msrb.mxu2 %v4761_v0  ;;  %3310 = vmatpush.bf16.msra.mxu0 %v5401_v3  ;;  %v5462_v58 = vld [vmem:[#allocation13 + $0x630] sm:$0xf0]  ;;  %v6353_v0 = vld [vmem:[#allocation13 + $0x7f4] sm:$0xf0] }
 0x277   :  { %v6236_v52 = vld [vmem:[#allocation13 + $0x454] sm:$0xf]  ;;  %v6137_v3 = vld [vmem:[#allocation13 + $0x134] sm:$0xf0]  ;;  %v5465_v6 = vor.u32 %v6292_v55, %v5462_v58  ;;  %v5693_v10 = vor.u32 %v6353_v0, %v5692_v63 }
 0x278   :  { %3303 = vmatpush.bf16.msrb.mxu3 %v4953_v12  ;;  %3325 = vmatpush.bf16.msra.mxu1 %v5593_v14  ;;  %v5238_v53 = vld [vmem:[#allocation13 + $0x470] sm:$0xf0]  ;;  %v6185_v12 = vld [vmem:[#allocation13 + $0x2b4] sm:$0xf0]  ;;  %v4829_v16 = vor.u32 %v6137_v3, %v4828_v2  ;;  %v6213_v2 = vld [vmem:[#allocation13 + $0x39c] sm:$0xf] }
 0x279   :  { %v6820_v7 = vld [vmem:[%s6885_s10] sm:$0xff]  ;;  %v5021_v24 = vor.u32 %v6185_v12, %v5020_v11  ;;  %v5150_v3 = vld [vmem:[#allocation13 + $0x3b8] sm:$0xf0] }
 0x27a   :  { %3289 = vmatpush.bf16.msrb.mxu2 %v4729_v17  ;;  %3311 = vmatpush.bf16.msra.mxu0 %v5369_v18  ;;  %v5660_v14 = vld [vmem:[#allocation13 + $0x798] sm:$0xf]  ;;  %v6228_v17 = vld [vmem:[#allocation13 + $0x414] sm:$0xf]  ;;  %v1727_v19 = vperm.slane %v6820_v7, 0 }
 0x27b   :  { %3304 = vmatmul.bf16.vlgmr.msrb.gmra.mxu3 %v6785_v1  ;;  %v5206_v18 = vld [vmem:[#allocation13 + $0x430] sm:$0xf0]  ;;  %v5661_v25 = vor.u32 %v6345_v4, %v5660_v14  ;;  %v6281_v37 = vld [vmem:[#allocation13 + $0x5b4] sm:$0xf0]  ;;  %v6157_v14 = vld [vmem:[#allocation13 + $0x1dc] sm:$0xf] }
 0x27c   :  { %3348 = vmatpush.bf16.msra.mxu3 %v5181_v15  ;;  %3326 = vmatpush.bf16.msra.mxu1 %v5561_v27  ;;  %v5241_v15 = vor.u32 %v6236_v52, %v5238_v53  ;;  %v5209_v27 = vor.u32 %v6228_v17, %v5206_v18  ;;  %v6169_v45 = vld [vmem:[#allocation13 + $0x234] sm:$0xf0]  ;;  %v5405_v49 = vor.u32 %v6281_v37, %v5404_v36  ;;  %v6197_v36 = vld [vmem:[#allocation13 + $0x31c] sm:$0xf] }
 0x27d   :  { %v6329_v47 = vld [vmem:[#allocation13 + $0x734] sm:$0xf0]  ;;  %v5153_v17 = vor.u32 %v6213_v2, %v5150_v3  ;;  %v6181_v3 = vld [vmem:[#allocation13 + $0x29c] sm:$0xf] }
 0x27e   :  { %3290 = vmatpush.bf16.msrb.mxu2 %v4697_v29  ;;  %3312 = vmatpush.bf16.msra.mxu0 %v5337_v5  ;;  %v3045_v8 = vpop.f32.mrf.mxu3  ;;  %v4988_v29 = vld [vmem:[#allocation13 + $0x258] sm:$0xf] }
 0x27f   :  { %v6177_v5 = vld [vmem:[#allocation13 + $0x274] sm:$0xf0] }
 0x280   :  { %3349 = vmatpush.bf16.msra.mxu3 %v5149_v28  ;;  %3327 = vmatpush.bf16.msra.mxu1 %v5529_v39  ;;  %v4797_v28 = vor.u32 %v6129_v21, %v4796_v20  ;;  %v4989_v39 = vor.u32 %v6177_v5, %v4988_v29  ;;  %v6113_v55 = vld [vmem:[#allocation13 + $0x74] sm:$0xf0]  ;;  %v6149_v29 = vld [vmem:[#allocation13 + $0x19c] sm:$0xf] }
 0x281   :  { %3291 = vmatmul.bf16.vlgmr.msrb.gmra.mxu2 %v6788_v13  ;;  %v5564_v63 = vld [vmem:[#allocation13 + $0x6d8] sm:$0xf]  ;;  %v4894_v5 = vld [vmem:[#allocation13 + $0x1b8] sm:$0xf0] }
 0x282   :  { %3335 = vmatpush.bf16.msra.mxu2 %v4925_v33  ;;  %3313 = vmatpush.bf16.msra.mxu0 %v5305_v41  ;;  %v6337_v33 = vld [vmem:[#allocation13 + $0x774] sm:$0xf0]  ;;  %v4897_v37 = vor.u32 %v6149_v29, %v4894_v5  ;;  %v6333_v29 = vld [vmem:[#allocation13 + $0x75c] sm:$0xf] }
 0x283   :  { %v3032_v26 = vpop.f32.mrf.mxu2  ;;  %v5629_v42 = vor.u32 %v6337_v33, %v5628_v30  ;;  %v6321_v0 = vld [vmem:[#allocation13 + $0x6f4] sm:$0xf0] }
 0x284   :  { %3350 = vmatpush.bf16.msra.mxu3 %v5117_v40  ;;  %3328 = vmatpush.bf16.msra.mxu1 %v5497_v54  ;;  %v3033_v31 = vadd.f32 %v3032_v26, %v1727_v19  ;;  %v4956_v40 = vld [vmem:[#allocation13 + $0x218] sm:$0xf]  ;;  %v5565_v4 = vor.u32 %v6321_v0, %v5564_v63  ;;  %v5118_v26 = vld [vmem:[#allocation13 + $0x378] sm:$0xf0] }
 0x285   :  { %v4732_v54 = vld [vmem:[#allocation13 + $0x58] sm:$0xf]  ;;  %v4957_v58 = vor.u32 %v6169_v45, %v4956_v40  ;;  %v4862_v45 = vld [vmem:[#allocation13 + $0x178] sm:$0xf0] }
 0x286   :  { %3336 = vmatpush.bf16.msra.mxu2 %v4893_v46  ;;  %3314 = vmatpush.bf16.msra.mxu0 %v5273_v57  ;;  %v3047_v38 = vpop.f32.mrf.mxu3  ;;  %v3046_v41 = vadd.f32 %v3045_v8, %v3033_v31  ;;  %v5596_v46 = vld [vmem:[#allocation13 + $0x718] sm:$0xf]  ;;  %v4733_v52 = vor.u32 %v6113_v55, %v4732_v54  ;;  %v6189_v54 = vld [vmem:[#allocation13 + $0x2dc] sm:$0xf] }
 0x287   :  { %v6273_v57 = vld [vmem:[#allocation13 + $0x574] sm:$0xf0]  ;;  %v5597_v59 = vor.u32 %v6329_v47, %v5596_v46  ;;  %v5086_v38 = vld [vmem:[#allocation13 + $0x338] sm:$0xf0] }
 0x288   :  { %3351 = vmatpush.bf16.msra.mxu3 %v5085_v56  ;;  %3329 = vmatpush.bf16.msra.mxu1 %v5465_v6  ;;  %v3071_v48 = vpop.f32.mrf.mxu1  ;;  %v5372_v56 = vld [vmem:[#allocation13 + $0x558] sm:$0xf]  ;;  %v5054_v55 = vld [vmem:[#allocation13 + $0x2f8] sm:$0xf0] }
 0x289   :  { %v5373_v53 = vor.u32 %v6273_v57, %v5372_v56  ;;  %v4700_v6 = vld [vmem:[#allocation13 + $0x18] sm:$0xf]  ;;  %v6349_v57 = vld [vmem:[#allocation13 + $0x7dc] sm:$0xf] }
 0x28a   :  { %3337 = vmatpush.bf16.msra.mxu2 %v4861_v62  ;;  %3315 = vmatpush.bf16.msra.mxu0 %v5241_v15  ;;  %v5185_v62 = vor.u32 %v6221_v50, %v5182_v51  ;;  %v6105_v8 = vld [vmem:[#allocation13 + $0x34] sm:$0xf0]  ;;  %v4926_v15 = vld [vmem:[#allocation13 + $0x1f8] sm:$0xf0] }
 0x28b   :  { %3330 = vmatmul.bf16.vlgmr.msra.gmra.mxu1 %v6793_v43  ;;  %v3034_v61 = vpop.f32.mrf.mxu2  ;;  %v4701_v19 = vor.u32 %v6105_v8, %v4700_v6  ;;  %v5532_v21 = vld [vmem:[#allocation13 + $0x698] sm:$0xf]  ;;  %v4830_v63 = vld [vmem:[#allocation13 + $0x138] sm:$0xf0] }
 0x28c   :  { %3352 = vmatpush.bf16.msra.mxu3 %v5053_v9  ;;  %3374 = vmatpush.bf16.msrb.mxu1 %v5693_v10  ;;  %v5340_v9 = vld [vmem:[#allocation13 + $0x518] sm:$0xf]  ;;  %v5022_v6 = vld [vmem:[#allocation13 + $0x2b8] sm:$0xf0] }
 0x28d   :  { %v6265_v10 = vld [vmem:[#allocation13 + $0x534] sm:$0xf0] }
 0x28e   :  { %3338 = vmatpush.bf16.msra.mxu2 %v4829_v16  ;;  %3316 = vmatpush.bf16.msra.mxu0 %v5209_v27  ;;  %v3058_v11 = vpop.f32.mrf.mxu0  ;;  %v6825_v12 = vpop.f32.mrf.mxu3  ;;  %v5341_v20 = vor.u32 %v6265_v10, %v5340_v9  ;;  %v6313_v22 = vld [vmem:[#allocation13 + $0x6b4] sm:$0xf0]  ;;  %v6341_v10 = vld [vmem:[#allocation13 + $0x79c] sm:$0xf] }
 0x28f   :  { %v3059_v16 = vadd.f32 %v3058_v11, %v3046_v41  ;;  %v5308_v27 = vld [vmem:[#allocation13 + $0x4d8] sm:$0xf]  ;;  %v5533_v30 = vor.u32 %v6313_v22, %v5532_v21  ;;  %v5662_v11 = vld [vmem:[#allocation13 + $0x7b8] sm:$0xf0]  ;;  %v5025_v22 = vor.u32 %v6181_v3, %v5022_v6 }
 0x290   :  { %3353 = vmatpush.bf16.msra.mxu3 %v5021_v24  ;;  %3375 = vmatpush.bf16.msrb.mxu1 %v5661_v25  ;;  %v3073_v18 = vpop.f32.mrf.mxu1  ;;  %v4929_v25 = vor.u32 %v6157_v14, %v4926_v15  ;;  %v5500_v34 = vld [vmem:[#allocation13 + $0x658] sm:$0xf] }
 0x291   :  { %3317 = vmatmul.bf16.vlgmr.msra.gmra.mxu0 %v6797_v60  ;;  %v6827_v24 = vadd.f32 %v3071_v48, %v3059_v16  ;;  %v6305_v35 = vld [vmem:[#allocation13 + $0x674] sm:$0xf0]  ;;  %v4798_v18 = vld [vmem:[#allocation13 + $0xf8] sm:$0xf0] }
 0x292   :  { %3339 = vmatpush.bf16.msra.mxu2 %v4797_v28  ;;  %3361 = vmatpush.bf16.msrb.mxu0 %v5437_v32  ;;  %v6257_v28 = vld [vmem:[#allocation13 + $0x4f4] sm:$0xf0]  ;;  %v5121_v32 = vor.u32 %v6205_v23, %v5118_v26  ;;  %v5501_v46 = vor.u32 %v6305_v35, %v5500_v34  ;;  %v5665_v23 = vor.u32 %v6341_v10, %v5662_v11  ;;  %v6277_v34 = vld [vmem:[#allocation13 + $0x59c] sm:$0xf] }
 0x293   :  { %v5309_v33 = vor.u32 %v6257_v28, %v5308_v27  ;;  %v6249_v40 = vld [vmem:[#allocation13 + $0x4b4] sm:$0xf0]  ;;  %v6173_v27 = vld [vmem:[#allocation13 + $0x25c] sm:$0xf] }
 0x294   :  { %3354 = vmatpush.bf16.msra.mxu3 %v4989_v39  ;;  %3376 = vmatpush.bf16.msrb.mxu1 %v5629_v42  ;;  %v6830_v31 = vpop.f32.mrf.mxu2  ;;  %v5276_v39 = vld [vmem:[#allocation13 + $0x498] sm:$0xf]  ;;  %v4990_v28 = vld [vmem:[#allocation13 + $0x278] sm:$0xf0] }
 0x295   :  { %v5468_v47 = vld [vmem:[#allocation13 + $0x618] sm:$0xf]  ;;  %v5277_v50 = vor.u32 %v6249_v40, %v5276_v39  ;;  %v5406_v35 = vld [vmem:[#allocation13 + $0x5b8] sm:$0xf0] }
 0x296   :  { %3340 = vmatpush.bf16.msra.mxu2 %v4765_v44  ;;  %3362 = vmatpush.bf16.msrb.mxu0 %v5405_v49  ;;  %v3060_v41 = vpop.f32.mrf.mxu0  ;;  %v3099_v42 = vpop.f32.mrf.mxu3  ;;  %v6141_v44 = vld [vmem:[#allocation13 + $0x15c] sm:$0xf]  ;;  %v5089_v49 = vor.u32 %v6197_v36, %v5086_v38  ;;  %v6297_v51 = vld [vmem:[#allocation13 + $0x634] sm:$0xf0]  ;;  %v4993_v36 = vor.u32 %v6173_v27, %v4990_v28  ;;  %v6360_v27 = vld [vmem:[#allocation15 + $0x30] sm:$0xff] }
 0x297   :  { %v4865_v56 = vor.u32 %v6141_v44, %v4862_v45  ;;  %v6241_v61 = vld [vmem:[#allocation13 + $0x474] sm:$0xf0]  ;;  %v5469_v0 = vor.u32 %v6297_v51, %v5468_v47  ;;  %v6165_v40 = vld [vmem:[#allocation13 + $0x21c] sm:$0xf]  ;;  %v5409_v45 = vor.u32 %v6277_v34, %v5406_v35 }
 0x298   :  { %3355 = vmatpush.bf16.msra.mxu3 %v4957_v58  ;;  %3377 = vmatpush.bf16.msrb.mxu1 %v5597_v59  ;;  %v6833_v48 = vpop.f32.mrf.mxu1  ;;  %v5694_v58 = vld [vmem:[#allocation13 + $0x7f8] sm:$0xf0]  ;;  %v5244_v59 = vld [vmem:[#allocation13 + $0x458] sm:$0xf] }
 0x299   :  { %v5697_v2 = vor.u32 %v6349_v57, %v5694_v58  ;;  %v5245_v8 = vor.u32 %v6241_v61, %v5244_v59  ;;  %v5212_v14 = vld [vmem:[#allocation13 + $0x418] sm:$0xf]  ;;  %v4958_v41 = vld [vmem:[#allocation13 + $0x238] sm:$0xf0] }
 0x29a   :  { %3341 = vmatpush.bf16.msra.mxu2 %v4733_v52  ;;  %3363 = vmatpush.bf16.msrb.mxu0 %v5373_v53  ;;  %v5057_v53 = vor.u32 %v6189_v54, %v5054_v55  ;;  %v5598_v47 = vld [vmem:[#allocation13 + $0x738] sm:$0xf0] }
 0x29b   :  { %3356 = vmatmul.bf16.vlgmr.msra.gmra.mxu3 %v6785_v1  ;;  %v6269_v51 = vld [vmem:[#allocation13 + $0x55c] sm:$0xf] }
 0x29c   :  { %3400 = vmatpush.bf16.msrb.mxu3 %v5185_v62  ;;  %3378 = vmatpush.bf16.msrb.mxu1 %v5565_v4  ;;  %v6133_v62 = vld [vmem:[#allocation13 + $0x11c] sm:$0xf]  ;;  %v3086_v52 = vpop.f32.mrf.mxu2  ;;  %v6233_v4 = vld [vmem:[#allocation13 + $0x434] sm:$0xf0] }
 0x29d   :  { %v4833_v9 = vor.u32 %v6133_v62, %v4830_v63  ;;  %v5374_v54 = vld [vmem:[#allocation13 + $0x578] sm:$0xf0] }
 0x29e   :  { %3342 = vmatpush.bf16.msra.mxu2 %v4701_v19  ;;  %3364 = vmatpush.bf16.msrb.mxu0 %v5341_v20  ;;  %v6835_v15 = vpop.f32.mrf.mxu0  ;;  %v6837_v16 = vpop.f32.mrf.mxu3  ;;  %v6285_v19 = vld [vmem:[#allocation13 + $0x5dc] sm:$0xf]  ;;  %v5377_v61 = vor.u32 %v6269_v51, %v5374_v54  ;;  %v6364_v51 = vld [vmem:[#allocation15 + $0x50] sm:$0xff] }
 0x29f   :  { %v5438_v20 = vld [vmem:[#allocation13 + $0x5f8] sm:$0xf0]  ;;  %v6384_v54 = vld [vmem:[#allocation15 + $0xf0] sm:$0xff] }
 0x2a0   :  { %3401 = vmatpush.bf16.msrb.mxu3 %v5153_v17  ;;  %3379 = vmatpush.bf16.msrb.mxu1 %v5533_v30  ;;  %v6125_v17 = vld [vmem:[#allocation13 + $0xdc] sm:$0xf]  ;;  %v3125_v21 = vpop.f32.mrf.mxu1  ;;  %v5441_v5 = vor.u32 %v6285_v19, %v5438_v20 }
 0x2a1   :  { %3343 = vmatmul.bf16.vlgmr.msra.gmra.mxu2 %v6788_v13  ;;  %v4801_v26 = vor.u32 %v6125_v17, %v4798_v18  ;;  %v5630_v30 = vld [vmem:[#allocation13 + $0x778] sm:$0xf0] }
 0x2a2   :  { %3387 = vmatpush.bf16.msrb.mxu2 %v4929_v25  ;;  %3365 = vmatpush.bf16.msrb.mxu0 %v5309_v33  ;;  %v5213_v25 = vor.u32 %v6233_v4, %v5212_v14  ;;  %v4766_v33 = vld [vmem:[#allocation13 + $0xb8] sm:$0xf0]  ;;  %v5633_v38 = vor.u32 %v6333_v29, %v5630_v30  ;;  %v6366_v30 = vld [vmem:[#allocation15 + $0x60] sm:$0xff] }
 0x2a3   :  { %v6369_v58 = vld [vmem:[#allocation15 + $0x78] sm:$0xff] }
 0x2a4   :  { %3402 = vmatpush.bf16.msrb.mxu3 %v5121_v32  ;;  %3380 = vmatpush.bf16.msrb.mxu1 %v5501_v46  ;;  %v6117_v32 = vld [vmem:[#allocation13 + $0x9c] sm:$0xf] }
 0x2a5   :  { %v4769_v39 = vor.u32 %v6117_v32, %v4766_v33  ;;  %v6325_v46 = vld [vmem:[#allocation13 + $0x71c] sm:$0xf] }
 0x2a6   :  { %3388 = vmatpush.bf16.msrb.mxu2 %v4897_v37  ;;  %3366 = vmatpush.bf16.msrb.mxu0 %v5277_v50  ;;  %v6840_v37 = vpop.f32.mrf.mxu2  ;;  %v3112_v42 = vpop.f32.mrf.mxu0  ;;  %v4734_v50 = vld [vmem:[#allocation13 + $0x78] sm:$0xf0]  ;;  %v5601_v57 = vor.u32 %v6325_v46, %v5598_v47  ;;  %v6358_v46 = vld [vmem:[#allocation15 + $0x20] sm:$0xff] }
 0x2a7   :  { %v3151_v44 = vpop.f32.mrf.mxu3  ;;  %v6317_v62 = vld [vmem:[#allocation13 + $0x6dc] sm:$0xf] }
 0x2a8   :  { %3403 = vmatpush.bf16.msrb.mxu3 %v5089_v49  ;;  %3381 = vmatpush.bf16.msrb.mxu1 %v5469_v0  ;;  %v6109_v49 = vld [vmem:[#allocation13 + $0x5c] sm:$0xf]  ;;  %v6843_v55 = vpop.f32.mrf.mxu1 }
 0x2a9   :  { %v4737_v59 = vor.u32 %v6109_v49, %v4734_v50  ;;  %v5566_v63 = vld [vmem:[#allocation13 + $0x6f8] sm:$0xf0] }
 0x2aa   :  { %3389 = vmatpush.bf16.msrb.mxu2 %v4865_v56  ;;  %3367 = vmatpush.bf16.msrb.mxu0 %v5245_v8  ;;  %v4961_v56 = vor.u32 %v6165_v40, %v4958_v41  ;;  %v6101_v0 = vld [vmem:[#allocation13 + $0x1c] sm:$0xf]  ;;  %v5569_v6 = vor.u32 %v6317_v62, %v5566_v63  ;;  %v6368_v8 = vld [vmem:[#allocation15 + $0x70] sm:$0xff]  ;;  %v6383_v62 = vld [vmem:[#allocation15 + $0xe8] sm:$0xff] }
 0x2ab   :  { %3382 = vmatmul.bf16.vlgmr.msrb.gmra.mxu1 %v6793_v43  ;;  %v4702_v52 = vld [vmem:[#allocation13 + $0x38] sm:$0xf0] }
 0x2ac   :  { %3404 = vmatpush.bf16.msrb.mxu3 %v5057_v53  ;;  %3426 = vmatpush.bf16.msra.mxu1 %v5697_v2  ;;  %v6261_v53 = vld [vmem:[#allocation13 + $0x51c] sm:$0xf] }
 0x2ad   :  { %v5342_v2 = vld [vmem:[#allocation13 + $0x538] sm:$0xf0] }
 0x2ae   :  { %3390 = vmatpush.bf16.msrb.mxu2 %v4833_v9  ;;  %3368 = vmatpush.bf16.msrb.mxu0 %v5213_v25  ;;  %v3138_v3 = vpop.f32.mrf.mxu2  ;;  %v4705_v9 = vor.u32 %v6101_v0, %v4702_v52  ;;  %v5345_v10 = vor.u32 %v6261_v53, %v5342_v2  ;;  %v6309_v11 = vld [vmem:[#allocation13 + $0x69c] sm:$0xf]  ;;  %v6846_v4 = vpop.f32.mrf.mxu0  ;;  %v6356_v0 = vld [vmem:[#allocation15 + $0x10] sm:$0xff]  ;;  %v1730_v53 = vperm.slane %v6820_v7, 3 }
 0x2af   :  { %v5534_v14 = vld [vmem:[#allocation13 + $0x6b8] sm:$0xf0]  ;;  %v6382_v3 = vld [vmem:[#allocation15 + $0xe0] sm:$0xff] }
 0x2b0   :  { %3405 = vmatpush.bf16.msrb.mxu3 %v5025_v22  ;;  %3427 = vmatpush.bf16.msra.mxu1 %v5665_v23  ;;  %v6361_v17 = vld [vmem:[#allocation15 + $0x38] sm:$0xff]  ;;  %v3177_v20 = vpop.f32.mrf.mxu1  ;;  %v5537_v21 = vor.u32 %v6309_v11, %v5534_v14  ;;  %v6367_v22 = vld [vmem:[#allocation15 + $0x68] sm:$0xff]  ;;  %v1729_v11 = vperm.slane %v6820_v7, 2 }
 0x2b1   :  { %3369 = vmatmul.bf16.vlgmr.msrb.gmra.mxu0 %v6797_v60  ;;  %v6253_v18 = vld [vmem:[#allocation13 + $0x4dc] sm:$0xf] }
 0x2b2   :  { %3391 = vmatpush.bf16.msrb.mxu2 %v4801_v26  ;;  %3413 = vmatpush.bf16.msra.mxu0 %v5441_v5  ;;  %v5310_v19 = vld [vmem:[#allocation13 + $0x4f8] sm:$0xf0] }
 0x2b3   :  { %v5313_v23 = vor.u32 %v6253_v18, %v5310_v19  ;;  %v6301_v25 = vld [vmem:[#allocation13 + $0x65c] sm:$0xf]  ;;  %v3439_v18 = vmax.f32 %v6827_v24, 0.0  ;;  %v6374_v19 = vld [vmem:[#allocation15 + $0xa0] sm:$0xff]  ;;  %v6400_v24 = vld [vmem:[#allocation15 + $0x170] sm:$0xff] }
 0x2b4   :  { %3406 = vmatpush.bf16.msrb.mxu3 %v4993_v36  ;;  %3428 = vmatpush.bf16.msra.mxu1 %v5633_v38  ;;  %v5502_v26 = vld [vmem:[#allocation13 + $0x678] sm:$0xf0]  ;;  %v6359_v36 = vld [vmem:[#allocation15 + $0x28] sm:$0xff] }
 0x2b5   :  { %v6245_v28 = vld [vmem:[#allocation13 + $0x49c] sm:$0xf]  ;;  %v5505_v5 = vor.u32 %v6301_v25, %v5502_v26  ;;  %v6380_v25 = vld [vmem:[#allocation15 + $0xd0] sm:$0xff]  ;;  %v3447_v26 = vpack.c.bf16 %v3439_v18, %v3439_v18 }
 0x2b6   :  { %3392 = vmatpush.bf16.msrb.mxu2 %v4769_v39  ;;  %3414 = vmatpush.bf16.msra.mxu0 %v5409_v45  ;;  %v5278_v29 = vld [vmem:[#allocation13 + $0x4b8] sm:$0xf0]  ;;  %v3164_v35 = vpop.f32.mrf.mxu0 }
 0x2b7   :  { %v5281_v32 = vor.u32 %v6245_v28, %v5278_v29  ;;  %v6293_v33 = vld [vmem:[#allocation13 + $0x61c] sm:$0xf]  ;;  %v6392_v29 = vld [vmem:[#allocation15 + $0x130] sm:$0xff] }
 0x2b8   :  { %3407 = vmatpush.bf16.msrb.mxu3 %v4961_v56  ;;  %3429 = vmatpush.bf16.msra.mxu1 %v5601_v57  ;;  %v5470_v34 = vld [vmem:[#allocation13 + $0x638] sm:$0xf0] }
 0x2b9   :  { %v6237_v38 = vld [vmem:[#allocation13 + $0x45c] sm:$0xf]  ;;  %v5473_v41 = vor.u32 %v6293_v33, %v5470_v34  ;;  %v6391_v34 = vld [vmem:[#allocation15 + $0x128] sm:$0xff] }
 0x2ba   :  { %3393 = vmatpush.bf16.msrb.mxu2 %v4737_v59  ;;  %3415 = vmatpush.bf16.msra.mxu0 %v5377_v61  ;;  %v5246_v39 = vld [vmem:[#allocation13 + $0x478] sm:$0xf0]  ;;  %v6363_v61 = vld [vmem:[#allocation15 + $0x48] sm:$0xff] }
 0x2bb   :  { %3408 = vmatmul.bf16.vlgmr.msrb.gmra.mxu3 %v6785_v1  ;;  %v1728_v1 = vperm.slane %v6820_v7, 1  ;;  %v6365_v42 = vld [vmem:[#allocation15 + $0x58] sm:$0xff]  ;;  %v5249_v45 = vor.u32 %v6237_v38, %v5246_v39  ;;  %v6378_v38 = vld [vmem:[#allocation15 + $0xc0] sm:$0xff] }
 0x2bc   :  { %3984 = vmatpush.bf16.msra.mxu3 %v6369_v58  ;;  %3430 = vmatpush.bf16.msra.mxu1 %v5569_v6  ;;  %v6229_v47 = vld [vmem:[#allocation13 + $0x41c] sm:$0xf]  ;;  %v6355_v6 = vld [vmem:[#allocation15 + $0x8] sm:$0xff] }
 0x2bd   :  { %v3085_v40 = vadd.f32 %v6830_v31, %v1728_v1  ;;  %v5214_v49 = vld [vmem:[#allocation13 + $0x438] sm:$0xf0] }
 0x2be   :  { %3394 = vmatpush.bf16.msrb.mxu2 %v4705_v9  ;;  %3416 = vmatpush.bf16.msra.mxu0 %v5345_v10  ;;  %v3201_v44 = vpop.f32.mrf.mxu3  ;;  %v5217_v56 = vor.u32 %v6229_v47, %v5214_v49  ;;  %v6357_v57 = vld [vmem:[#allocation15 + $0x18] sm:$0xff]  ;;  %v1731_v49 = vperm.slane %v6820_v7, 4 }
 0x2bf   :  { %v3098_v50 = vadd.f32 %v6825_v12, %v3085_v40  ;;  %v6377_v58 = vld [vmem:[#allocation15 + $0xb8] sm:$0xff] }
 0x2c0   :  { %3985 = vmatpush.bf16.msra.mxu3 %v6368_v8  ;;  %3431 = vmatpush.bf16.msra.mxu1 %v5537_v21  ;;  %v6381_v14 = vld [vmem:[#allocation15 + $0xd8] sm:$0xff] }
 0x2c1   :  { %3395 = vmatmul.bf16.vlgmr.msrb.gmra.mxu2 %v6788_v13  ;;  %v6385_v13 = vld [vmem:[#allocation15 + $0xf8] sm:$0xff]  ;;  %v3111_v31 = vadd.f32 %v6835_v15, %v3098_v50  ;;  %v6376_v15 = vld [vmem:[#allocation15 + $0xb0] sm:$0xff] }
 0x2c2   :  { %3971 = vmatpush.bf16.msra.mxu2 %v6361_v17  ;;  %3417 = vmatpush.bf16.msra.mxu0 %v5313_v23  ;;  %v6393_v20 = vld [vmem:[#allocation15 + $0x138] sm:$0xff]  ;;  %v3137_v23 = vadd.f32 %v6840_v37, %v1729_v11  ;;  %v6372_v37 = vld [vmem:[#allocation15 + $0x90] sm:$0xff] }
 0x2c3   :  { %v3124_v12 = vadd.f32 %v6833_v48, %v3111_v31  ;;  %v6375_v48 = vld [vmem:[#allocation15 + $0xa8] sm:$0xff]  ;;  %v6373_v28 = vld [vmem:[#allocation15 + $0x98] sm:$0xff] }
 0x2c4   :  { %3986 = vmatpush.bf16.msra.mxu3 %v6367_v22  ;;  %3432 = vmatpush.bf16.msra.mxu1 %v5505_v5  ;;  %v3188_v59 = vpop.f32.mrf.mxu2  ;;  %v6401_v1 = vld [vmem:[#allocation15 + $0x178] sm:$0xff]  ;;  %v3150_v5 = vadd.f32 %v6837_v16, %v3137_v23  ;;  %v6390_v16 = vld [vmem:[#allocation15 + $0x120] sm:$0xff] }
 0x2c5   :  { %v3440_v2 = vmax.f32 %v3124_v12, 0.0  ;;  %v3189_v9 = vadd.f32 %v3188_v59, %v1730_v53  ;;  %v6386_v12 = vld [vmem:[#allocation15 + $0x100] sm:$0xff] }
 0x2c6   :  { %3972 = vmatpush.bf16.msra.mxu2 %v6360_v27  ;;  %3418 = vmatpush.bf16.msra.mxu0 %v5281_v32  ;;  %v3203_v63 = vpop.f32.mrf.mxu3  ;;  %v3163_v35 = vadd.f32 %v6846_v4, %v3150_v5 }
 0x2c7   :  { %v3448_v10 = vpack.c.bf16 %v3440_v2, %v3440_v2  ;;  %v3202_v22 = vadd.f32 %v3201_v44, %v3189_v9  ;;  %v6370_v44 = vld [vmem:[#allocation15 + $0x80] sm:$0xff]  ;;  %v6409_v2 = vld [vmem:[#allocation15 + $0x1b8] sm:$0xff] }
 0x2c8   :  { %3987 = vmatpush.bf16.msra.mxu3 %v6366_v30  ;;  %3433 = vmatpush.bf16.msra.mxu1 %v5473_v41  ;;  %v3227_v52 = vpop.f32.mrf.mxu1  ;;  %v6379_v30 = vld [vmem:[#allocation15 + $0xc8] sm:$0xff] }
 0x2c9   :  { %v6371_v41 = vld [vmem:[#allocation15 + $0x88] sm:$0xff] }
 0x2ca   :  { %3973 = vmatpush.bf16.msra.mxu2 %v6359_v36  ;;  %3419 = vmatpush.bf16.msra.mxu0 %v5249_v45  ;;  %v6399_v36 = vld [vmem:[#allocation15 + $0x168] sm:$0xff]  ;;  %v6389_v45 = vld [vmem:[#allocation15 + $0x118] sm:$0xff] }
 0x2cb   :  { %3434 = vmatmul.bf16.vlgmr.msra.gmra.mxu1 %v6793_v43  ;;  %v6362_v43 = vld [vmem:[#allocation15 + $0x40] sm:$0xff] }
 0x2cc   :  { %3988 = vmatpush.bf16.msra.mxu3 %v6365_v42  ;;  %4010 = vmatpush.bf16.msrb.mxu1 %v6385_v13  ;;  %v3190_v8 = vpop.f32.mrf.mxu2  ;;  %v3176_v42 = vadd.f32 %v6843_v55, %v3163_v35  ;;  %v6397_v55 = vld [vmem:[#allocation15 + $0x158] sm:$0xff] }
 0x2cd   :  { %v6407_v8 = vld [vmem:[#allocation15 + $0x1a8] sm:$0xff] }
 0x2ce   :  { %3974 = vmatpush.bf16.msra.mxu2 %v6358_v46  ;;  %3420 = vmatpush.bf16.msra.mxu0 %v5217_v56  ;;  %v3214_v17 = vpop.f32.mrf.mxu0  ;;  %v3441_v4 = vmax.f32 %v3176_v42, 0.0  ;;  %v6398_v46 = vld [vmem:[#allocation15 + $0x160] sm:$0xff] }
 0x2cf   :  { %v3215_v27 = vadd.f32 %v3214_v17, %v3202_v22 }
 0x2d0   :  { %3989 = vmatpush.bf16.msra.mxu3 %v6364_v51  ;;  %4011 = vmatpush.bf16.msrb.mxu1 %v6384_v54  ;;  %v3229_v21 = vpop.f32.mrf.mxu1  ;;  %v6388_v51 = vld [vmem:[#allocation15 + $0x110] sm:$0xff]  ;;  %v3449_v54 = vpack.c.bf16 %v3441_v4, %v3441_v4 }
 0x2d1   :  { %3421 = vmatmul.bf16.vlgmr.msra.gmra.mxu0 %v6797_v60  ;;  %v6354_v60 = vld [vmem:[#allocation15] sm:$0xff]  ;;  %v3228_v33 = vadd.f32 %v3227_v52, %v3215_v27 }
 0x2d2   :  { %3975 = vmatpush.bf16.msra.mxu2 %v6357_v57  ;;  %3997 = vmatpush.bf16.msrb.mxu0 %v6377_v58  ;;  %v6387_v57 = vld [vmem:[#allocation15 + $0x108] sm:$0xff]  ;;  %v6396_v58 = vld [vmem:[#allocation15 + $0x150] sm:$0xff] }
 0x2d3   :  { %v3442_v39 = vmax.f32 %v3228_v33, 0.0  ;;  %v6415_v33 = vld [vmem:[#allocation15 + $0x1e8] sm:$0xff] }
 0x2d4   :  { %3990 = vmatpush.bf16.msra.mxu3 %v6363_v61  ;;  %4012 = vmatpush.bf16.msrb.mxu1 %v6383_v62 }
 0x2d5   :  { %v3450_v13 = vpack.c.bf16 %v3442_v39, %v3442_v39  ;;  %v6413_v39 = vld [vmem:[#allocation15 + $0x1d8] sm:$0xff] }
 0x2d6   :  { %3976 = vmatpush.bf16.msra.mxu2 %v6356_v0  ;;  %3998 = vmatpush.bf16.msrb.mxu0 %v6376_v15  ;;  %v3216_v32 = vpop.f32.mrf.mxu0  ;;  %v6395_v0 = vld [vmem:[#allocation15 + $0x148] sm:$0xff] }
 0x2d8   :  { %3991 = vmatpush.bf16.msra.mxu3 %v6362_v43  ;;  %4013 = vmatpush.bf16.msrb.mxu1 %v6382_v3  ;;  %v6394_v43 = vld [vmem:[#allocation15 + $0x140] sm:$0xff] }
 0x2da   :  { %3977 = vmatpush.bf16.msra.mxu2 %v6355_v6  ;;  %3999 = vmatpush.bf16.msrb.mxu0 %v6375_v48  ;;  %v6408_v6 = vld [vmem:[#allocation15 + $0x1b0] sm:$0xff] }
 0x2db   :  { %3992 = vmatmul.bf16.vlgmr.msra.gmra.mxu3 %v3448_v10  ;;  %v6406_v10 = vld [vmem:[#allocation15 + $0x1a0] sm:$0xff] }
 0x2dc   :  { %4014 = vmatpush.bf16.msrb.mxu1 %v6381_v14  ;;  %4036 = vmatpush.bf16.msrb.mxu3 %v6401_v1  ;;  %v1732_v14 = vperm.slane %v6820_v7, 5 }
 0x2de   :  { %3978 = vmatpush.bf16.msra.mxu2 %v6354_v60  ;;  %4000 = vmatpush.bf16.msrb.mxu0 %v6374_v19  ;;  %v3253_v40 = vpop.f32.mrf.mxu3  ;;  %v6405_v60 = vld [vmem:[#allocation15 + $0x198] sm:$0xff] }
 0x2e0   :  { %4015 = vmatpush.bf16.msrb.mxu1 %v6380_v25  ;;  %4037 = vmatpush.bf16.msrb.mxu3 %v6400_v24  ;;  %v6403_v25 = vld [vmem:[#allocation15 + $0x188] sm:$0xff]  ;;  %v6417_v24 = vld [vmem:[#allocation15 + $0x1f8] sm:$0xff] }
 0x2e1   :  { %3979 = vmatmul.bf16.vlgmr.msra.gmra.mxu2 %v3447_v26 }
 0x2e2   :  { %4023 = vmatpush.bf16.msrb.mxu2 %v6393_v20  ;;  %4001 = vmatpush.bf16.msrb.mxu0 %v6373_v28  ;;  %v6404_v20 = vld [vmem:[#allocation15 + $0x190] sm:$0xff] }
 0x2e4   :  { %4016 = vmatpush.bf16.msrb.mxu1 %v6379_v30  ;;  %4038 = vmatpush.bf16.msrb.mxu3 %v6399_v36  ;;  %v3240_v47 = vpop.f32.mrf.mxu2  ;;  %v6416_v30 = vld [vmem:[#allocation15 + $0x1f0] sm:$0xff]  ;;  %v1733_v36 = vperm.slane %v6820_v7, 6 }
 0x2e5   :  { %v3241_v56 = vadd.f32 %v3240_v47, %v1731_v49  ;;  %v6410_v49 = vld [vmem:[#allocation15 + $0x1c0] sm:$0xff] }
 0x2e6   :  { %4024 = vmatpush.bf16.msrb.mxu2 %v6392_v29  ;;  %4002 = vmatpush.bf16.msrb.mxu0 %v6372_v37  ;;  %v3255_v50 = vpop.f32.mrf.mxu3  ;;  %v6402_v29 = vld [vmem:[#allocation15 + $0x180] sm:$0xff] }
 0x2e7   :  { %v3254_v61 = vadd.f32 %v3253_v40, %v3241_v56  ;;  %v1734_v56 = vperm.slane %v6820_v7, 7 }
 0x2e8   :  { %4017 = vmatpush.bf16.msrb.mxu1 %v6378_v38  ;;  %4039 = vmatpush.bf16.msrb.mxu3 %v6398_v46  ;;  %v3279_v31 = vpop.f32.mrf.mxu1 }
 0x2ea   :  { %4025 = vmatpush.bf16.msrb.mxu2 %v6391_v34  ;;  %4003 = vmatpush.bf16.msrb.mxu0 %v6371_v41  ;;  %v6414_v34 = vld [vmem:[#allocation15 + $0x1e0] sm:$0xff] }
 0x2eb   :  { %4018 = vmatmul.bf16.vlgmr.msrb.gmra.mxu1 %v3450_v13 }
 0x2ec   :  { %4040 = vmatpush.bf16.msrb.mxu3 %v6397_v55  ;;  %v3242_v59 = vpop.f32.mrf.mxu2  ;;  %4062 = vmatpush.bf16.msra.mxu1 %v6417_v24 }
 0x2ee   :  { %4026 = vmatpush.bf16.msrb.mxu2 %v6390_v16  ;;  %4004 = vmatpush.bf16.msrb.mxu0 %v6370_v44  ;;  %v3266_v62 = vpop.f32.mrf.mxu0  ;;  %v6412_v16 = vld [vmem:[#allocation15 + $0x1d0] sm:$0xff]  ;;  %v6411_v44 = vld [vmem:[#allocation15 + $0x1c8] sm:$0xff] }
 0x2ef   :  { %v3267_v63 = vadd.f32 %v3266_v62, %v3254_v61 }
 0x2f0   :  { %4041 = vmatpush.bf16.msrb.mxu3 %v6396_v58  ;;  %v3281_v15 = vpop.f32.mrf.mxu1  ;;  %4063 = vmatpush.bf16.msra.mxu1 %v6416_v30 }
 0x2f1   :  { %4005 = vmatmul.bf16.vlgmr.msrb.gmra.mxu0 %v3449_v54  ;;  %v3280_v52 = vadd.f32 %v3279_v31, %v3267_v63 }
 0x2f2   :  { %4027 = vmatpush.bf16.msrb.mxu2 %v6389_v45  ;;  %4049 = vmatpush.bf16.msra.mxu0 %v6409_v2 }
 0x2f3   :  { %v3443_v53 = vmax.f32 %v3280_v52, 0.0 }
 0x2f4   :  { %4042 = vmatpush.bf16.msrb.mxu3 %v6395_v0  ;;  %4064 = vmatpush.bf16.msra.mxu1 %v6415_v33 }
 0x2f5   :  { %v3451_v3 = vpack.c.bf16 %v3443_v53, %v3443_v53 }
 0x2f6   :  { %4028 = vmatpush.bf16.msrb.mxu2 %v6388_v51  ;;  %v3268_v48 = vpop.f32.mrf.mxu0  ;;  %4050 = vmatpush.bf16.msra.mxu0 %v6408_v6 }
 0x2f8   :  { %4043 = vmatpush.bf16.msrb.mxu3 %v6394_v43  ;;  %4065 = vmatpush.bf16.msra.mxu1 %v6414_v34 }
 0x2fa   :  { %4029 = vmatpush.bf16.msrb.mxu2 %v6387_v57  ;;  %4051 = vmatpush.bf16.msra.mxu0 %v6407_v8 }
 0x2fc   :  { %4066 = vmatpush.bf16.msra.mxu1 %v6413_v39 }
 0x2fe   :  { %4030 = vmatpush.bf16.msrb.mxu2 %v6386_v12  ;;  %v3305_v9 = vpop.f32.mrf.mxu3  ;;  %4052 = vmatpush.bf16.msra.mxu0 %v6406_v10 }
 0x300   :  { %4067 = vmatpush.bf16.msra.mxu1 %v6412_v16 }
 0x301   :  { %4031 = vmatmul.bf16.vlgmr.msrb.gmra.mxu2 %v3451_v3  ;;  %v6436_v3 = vld [vmem:[%s6887_s12] ss:$0 sm:$0xff] }
 0x302   :  { %4053 = vmatpush.bf16.msra.mxu0 %v6405_v60 }
 0x304   :  { %v3292_v11 = vpop.f32.mrf.mxu2  ;;  %4068 = vmatpush.bf16.msra.mxu1 %v6411_v44 }
 0x305   :  { %v3293_v19 = vadd.f32 %v3292_v11, %v1732_v14 }
 0x306   :  { %v3307_v17 = vpop.f32.mrf.mxu3  ;;  %4054 = vmatpush.bf16.msra.mxu0 %v6404_v20 }
 0x307   :  { %v3306_v22 = vadd.f32 %v3305_v9, %v3293_v19 }
 0x308   :  { %v3331_v18 = vpop.f32.mrf.mxu1  ;;  %4069 = vmatpush.bf16.msra.mxu1 %v6410_v49 }
 0x30a   :  { %4055 = vmatpush.bf16.msra.mxu0 %v6403_v25 }
 0x30c   :  { %v3294_v21 = vpop.f32.mrf.mxu2 }
 0x30e   :  { %v3318_v23 = vpop.f32.mrf.mxu0  ;;  %4056 = vmatpush.bf16.msra.mxu0 %v6402_v29 }
 0x30f   :  { %v3319_v26 = vadd.f32 %v3318_v23, %v3306_v22 }
 0x310   :  { %v3333_v27 = vpop.f32.mrf.mxu1 }
 0x311   :  { %v3332_v28 = vadd.f32 %v3331_v18, %v3319_v26 }
 0x313   :  { %v3444_v1 = vmax.f32 %v3332_v28, 0.0 }
 0x315   :  { %v3452_v5 = vpack.c.bf16 %v3444_v1, %v3444_v1 }
 0x316   :  { %v3320_v32 = vpop.f32.mrf.mxu0 }
 0x317   :  { %4044 = vmatmul.bf16.vlgmr.msrb.gmra.mxu3 %v3452_v5 }
 0x31e   :  { %v3357_v37 = vpop.f32.mrf.mxu3 }
 0x324   :  { %v3344_v35 = vpop.f32.mrf.mxu2 }
 0x325   :  { %v3345_v41 = vadd.f32 %v3344_v35, %v1733_v36 }
 0x326   :  { %v3359_v38 = vpop.f32.mrf.mxu3 }
 0x327   :  { %v3358_v13 = vadd.f32 %v3357_v37, %v3345_v41 }
 0x328   :  { %v3383_v40 = vpop.f32.mrf.mxu1 }
 0x32c   :  { %v3346_v42 = vpop.f32.mrf.mxu2 }
 0x32e   :  { %v3370_v45 = vpop.f32.mrf.mxu0 }
 0x32f   :  { %v3371_v4 = vadd.f32 %v3370_v45, %v3358_v13 }
 0x330   :  { %v3385_v46 = vpop.f32.mrf.mxu1 }
 0x331   :  { %v3384_v47 = vadd.f32 %v3383_v40, %v3371_v4 }
 0x333   :  { %v3445_v50 = vmax.f32 %v3384_v47, 0.0 }
 0x335   :  { %v3453_v51 = vpack.c.bf16 %v3445_v50, %v3445_v50 }
 0x336   :  { %v3372_v54 = vpop.f32.mrf.mxu0 }
 0x337   :  { %4057 = vmatmul.bf16.vlgmr.msra.gmra.mxu0 %v3453_v51 }
 0x33e   :  { %v3409_v55 = vpop.f32.mrf.mxu3 }
 0x344   :  { %v3396_v31 = vpop.f32.mrf.mxu2 }
 0x345   :  { %v3397_v59 = vadd.f32 %v3396_v31, %v1734_v56 }
 0x346   :  { %v3411_v57 = vpop.f32.mrf.mxu3 }
 0x347   :  { %v3410_v12 = vadd.f32 %v3409_v55, %v3397_v59 }
 0x348   :  { %v3435_v58 = vpop.f32.mrf.mxu1 }
 0x34c   :  { %v3398_v61 = vpop.f32.mrf.mxu2 }
 0x34e   :  { %v3422_v62 = vpop.f32.mrf.mxu0 }
 0x34f   :  { %v3423_v63 = vadd.f32 %v3422_v62, %v3410_v12 }
 0x350   :  { %v3437_v0 = vpop.f32.mrf.mxu1 }
 0x351   :  { %v3436_v15 = vadd.f32 %v3435_v58, %v3423_v63 }
 0x353   :  { %v3446_v52 = vmax.f32 %v3436_v15, 0.0 }
 0x355   :  { %v3454_v53 = vpack.c.bf16 %v3446_v52, %v3446_v52 }
 0x356   :  { %v3424_v43 = vpop.f32.mrf.mxu0 }
 0x357   :  { %4070 = vmatmul.bf16.vlgmr.msra.gmra.mxu1 %v3454_v53 }
 0x35e   :  { %v3993_v2 = vpop.f32.mrf.mxu3 }
 0x364   :  { %v3980_v6 = vpop.f32.mrf.mxu2 }
 0x365   :  { %v3981_v7 = vadd.f32 %v6436_v3, %v3980_v6 }
 0x366   :  { %v3995_v48 = vpop.f32.mrf.mxu3 }
 0x367   :  { %v3994_v8 = vadd.f32 %v3993_v2, %v3981_v7 }
 0x368   :  { %v4019_v9 = vpop.f32.mrf.mxu1 }
 0x36c   :  { %v3982_v10 = vpop.f32.mrf.mxu2 }
 0x36e   :  { %v4006_v11 = vpop.f32.mrf.mxu0 }
 0x36f   :  { %v4007_v14 = vadd.f32 %v4006_v11, %v3994_v8 }
 0x370   :  { %v4021_v17 = vpop.f32.mrf.mxu1 }
 0x371   :  { %v4020_v60 = vadd.f32 %v4019_v9, %v4007_v14 }
 0x376   :  { %v4008_v18 = vpop.f32.mrf.mxu0 }
 0x384   :  { %v4032_v19 = vpop.f32.mrf.mxu2 }
 0x385   :  { %v4033_v20 = vadd.f32 %v4032_v19, %v4020_v60 }
 0x38c   :  { %v4034_v21 = vpop.f32.mrf.mxu2 }
 0x39a   :  { %v4045_v22 = vpop.f32.mrf.mxu3 }
 0x39b   :  { %v4046_v27 = vadd.f32 %v4045_v22, %v4033_v20 }
 0x3a2   :  { %v4047_v23 = vpop.f32.mrf.mxu3 }
 0x3b4   :  { %v4058_v25 = vpop.f32.mrf.mxu0 }
 0x3b5   :  { %v4059_v28 = vadd.f32 %v4058_v25, %v4046_v27 }
 0x3bc   :  { %v4060_v26 = vpop.f32.mrf.mxu0 }
 0x3d4   :  { %v4071_v29 = vpop.f32.mrf.mxu1 }
 0x3d5   :  { %v4072_v1 = vadd.f32 %v4071_v29, %v4059_v28 }
 0x3d7   :  { %4075 = vst [vmem:[#allocation16] sm:$0xff] %v4072_v1 }
 0x3dc   :  { %v4073_v24 = vpop.f32.mrf.mxu1 }
 0x3dd   :  { %4079 = vsyncadd [#allocation6], 96  ;;  %s4082_s26 = sshll.u32 %s6888_s13, 4  ;;  %s6654_s27 = smov [#allocation16]   ;;  %s4083_s26 = int_to_ptr.hbm [resolvable:$true] %s4082_s26 }
 0x3de   :  { %s4080_s9 = sshll.u32 %s6654_s27, 4  ;;  %s6655_s29 = smov 2   ;;  %s4081_s9 = int_to_ptr.vmem [resolvable:$true] %s4080_s9 }
 0x3df   :  { %4088 = dma.vmem_to_hbm [thread:$0]  %s4081_s9, 32, %s4083_s26, [#allocation6], %s6647_s25, %s6647_s25, %s6655_s29  }
 0x3e0   :  { %6637 = dma.done.wait [#allocation6], 128  }
 0x3e1   :  { %6638 = vsyncadd [#allocation6], 4294967168 }
 0x3e2   :  { %4093 = vsyncpa [#allocation5], 1 }
 0x3e3   :  { %4094 = vsyncpa [#allocation8], 1 }
 0x3e4   :  { %4095 = vsyncpa [#allocation11], 1 }
 0x3e5   :  { %4096 = vsyncpa [#allocation14], 1 }
 0x3e6   :  { %4097 = vsyncpa [#allocation6], 1 }

// kernel: tpu_custom_call.1
= control target key start
LH: loop header
LB: loop body
LE: loop exit
PB: predicated region body
PF: predicated region fallthrough
CT: control target
= control target key end

     0   :  { %20 = vsyncpa [#allocation5], 0  ;;  %s6875_s0 = inlined_call_operand.<no memory space> [shape: f32[1], index: 0, kind: input, shape index: {}]   ;;  %s6876_s1 = inlined_call_operand.<no memory space> [shape: f32[1], index: 1, kind: input, shape index: {}]   ;;  %s6877_s2 = inlined_call_operand.hbm [shape: f32[2,1024], index: 2, kind: input, shape index: {}]   ;;  %s6878_s3 = inlined_call_operand.hbm [shape: bf16[1024,128], index: 3, kind: input, shape index: {}]   ;;  %s6879_s4 = inlined_call_operand.vmem [shape: f32[1,128], index: 4, kind: input, shape index: {}]   ;;  %s6880_s5 = inlined_call_operand.hbm [shape: bf16[128,256], index: 5, kind: input, shape index: {}]   ;;  %s6881_s6 = inlined_call_operand.vmem [shape: f32[1,256], index: 6, kind: input, shape index: {}]   ;;  %s6882_s7 = inlined_call_operand.hbm [shape: bf16[256,512], index: 7, kind: input, shape index: {}]   ;;  %s6883_s8 = inlined_call_operand.hbm [shape: f32[1,512], index: 8, kind: input, shape index: {}]   ;;  %s6884_s9 = inlined_call_operand.hbm [shape: bf16[512,1024], index: 9, kind: input, shape index: {}]   ;;  %s6885_s10 = inlined_call_operand.vmem [shape: f32[1,1024], index: 10, kind: input, shape index: {}]   ;;  %s6886_s11 = inlined_call_operand.hbm [shape: bf16[1024,128], index: 11, kind: input, shape index: {}]   ;;  %s6887_s12 = inlined_call_operand.vmem [shape: f32[1,128], index: 12, kind: input, shape index: {}]   ;;  %s6888_s13 = inlined_call_operand.hbm [shape: f32[2,128], index: 13, kind: output, shape index: {}]  }
   0x1   :  { %21 = vsyncpa [#allocation8], 0 }
   0x2   :  { %22 = vsyncpa [#allocation11], 0 }
   0x3   :  { %23 = vsyncpa [#allocation14], 0 }
   0x4   :  { %24 = vsyncpa [#allocation6], 0  ;;  %s46_s25 = sshll.u32 %s6878_s3, 4  ;;  %s47_s25 = int_to_ptr.hbm [resolvable:$true] %s46_s25 }
   0x5   :  { %32 = vsyncadd [#allocation5], 768  ;;  %s6639_s26 = smov [#allocation7]   ;;  %s6640_s28 = smov 64  }
   0x6   :  { %s48_s27 = sshll.u32 %s6639_s26, 4  ;;  %s6641_s0 = smov 4   ;;  %s49_s27 = int_to_ptr.vmem [resolvable:$true] %s48_s27 }
   0x7   :  { %54 = dma.hbm_to_vmem [thread:$0]  %s47_s25, 8192, %s49_s27, [#allocation8], %s6640_s28, %s6640_s28, %s6641_s0  }
   0x8   :  { %s76_s30 = sshll.u32 %s6882_s7, 4  ;;  %s6642_s14 = smov [#allocation10]   ;;  %s77_s30 = int_to_ptr.hbm [resolvable:$true] %s76_s30 }
   0x9   :  { %s78_s15 = sshll.u32 %s6642_s14, 4  ;;  %s100_s17 = sshll.u32 %s6884_s9, 4  ;;  %s79_s15 = int_to_ptr.vmem [resolvable:$true] %s78_s15  ;;  %s101_s17 = int_to_ptr.hbm [resolvable:$true] %s100_s17 }
   0xa   :  { %s6643_s18 = smov 256   ;;  %s6644_s19 = smov 16  }
   0xb   :  { %84 = dma.hbm_to_vmem [thread:$0]  %s77_s30, 8192, %s79_s15, [#allocation11], %s6643_s18, %s6643_s18, %s6644_s19  }
   0xc   :  { %s6645_s20 = smov [#allocation13]   ;;  %s33_s24 = sshll.u32 %s6877_s2, 4  ;;  %s34_s24 = int_to_ptr.hbm [resolvable:$true] %s33_s24 }
   0xd   :  { %s102_s21 = sshll.u32 %s6645_s20, 4  ;;  %s6646_s7 = smov 512   ;;  %s103_s21 = int_to_ptr.vmem [resolvable:$true] %s102_s21 }
   0xe   :  { %s6647_s25 = smov 32   ;;  %s6648_s26 = smov [#allocation4]  }
   0xf   :  { %108 = dma.hbm_to_vmem [thread:$0]  %s101_s17, 32768, %s103_s21, [#allocation14], %s6646_s7, %s6646_s7, %s6647_s25  }
  0x10   :  { %s35_s27 = sshll.u32 %s6648_s26, 4  ;;  %s61_s1 = sshll.u32 %s6880_s5, 4  ;;  %s36_s27 = int_to_ptr.vmem [resolvable:$true] %s35_s27  ;;  %s62_s1 = int_to_ptr.hbm [resolvable:$true] %s61_s1 }
  0x11   :  { %41 = dma.hbm_to_vmem [thread:$0]  %s34_s24, 256, %s36_s27, [#allocation5], %s6643_s18, %s6643_s18, %s6644_s19  }
  0x12   :  { %s6649_s30 = smov [#allocation9]   ;;  %s90_s2 = sshll.u32 %s6883_s8, 4  ;;  %s91_s2 = int_to_ptr.hbm [resolvable:$true] %s90_s2 }
  0x13   :  { %s63_s14 = sshll.u32 %s6649_s30, 4  ;;  %s6650_s3 = smov 128   ;;  %s64_s14 = int_to_ptr.vmem [resolvable:$true] %s63_s14 }
  0x14   :  { %s6651_s20 = smov 8   ;;  %s6652_s17 = smov [#allocation12]  }
  0x15   :  { %69 = dma.hbm_to_vmem [thread:$0]  %s62_s1, 2048, %s64_s14, [#allocation8], %s6650_s3, %s6650_s3, %s6651_s20  }
  0x16   :  { %s92_s21 = sshll.u32 %s6652_s17, 4  ;;  %s115_s5 = sshll.u32 %s6886_s11, 4  ;;  %s93_s21 = int_to_ptr.vmem [resolvable:$true] %s92_s21  ;;  %s116_s5 = int_to_ptr.hbm [resolvable:$true] %s115_s5 }
  0x17   :  { %95 = dma.hbm_to_vmem [thread:$0]  %s91_s2, 64, %s93_s21, [#allocation11]  }
  0x18   :  { %s6653_s18 = smov [#allocation15]  }
  0x19   :  { %s117_s19 = sshll.u32 %s6653_s18, 4  ;;  %s118_s19 = int_to_ptr.vmem [resolvable:$true] %s117_s19 }
  0x1a   :  { %123 = dma.hbm_to_vmem [thread:$0]  %s116_s5, 8192, %s118_s19, [#allocation14], %s6640_s28, %s6640_s28, %s6641_s0  }
  0x1b   :  { %6629 = dma.done.wait [#allocation5], 1024  }
  0x1c   :  { %6630 = vsyncadd [#allocation5], 4294966272 }
  0x1d   :  { %6631 = dma.done.wait [#allocation8], 10240  }
  0x1e   :  { %6632 = vsyncadd [#allocation8], 4294957056 }
  0x1f   :  { %6633 = dma.done.wait [#allocation11], 8256  }
  0x20   :  { %6634 = vsyncadd [#allocation11], 4294959040 }
  0x21   :  { %6635 = dma.done.wait [#allocation14], 40960  }
  0x22   :  { %6636 = vsyncadd [#allocation14], 4294926336  ;;  %v5961_v0 = vld [vmem:[#allocation7 + $0x38] sm:$0xff]  ;;  %v5960_v4 = vld [vmem:[#allocation7 + $0x30] sm:$0xff] }
  0x23   :  { %v5969_v1 = vld [vmem:[#allocation7 + $0x78] sm:$0xff]  ;;  %725 = vmatpush.bf16.msra.mxu0 %v5961_v0  ;;  %v5968_v5 = vld [vmem:[#allocation7 + $0x70] sm:$0xff]  ;;  %v5959_v8 = vld [vmem:[#allocation7 + $0x28] sm:$0xff] }
  0x24   :  { %v5977_v2 = vld [vmem:[#allocation7 + $0xb8] sm:$0xff]  ;;  %738 = vmatpush.bf16.msra.mxu1 %v5969_v1  ;;  %v5976_v6 = vld [vmem:[#allocation7 + $0xb0] sm:$0xff]  ;;  %v5967_v9 = vld [vmem:[#allocation7 + $0x68] sm:$0xff] }
  0x25   :  { %v5985_v3 = vld [vmem:[#allocation7 + $0xf8] sm:$0xff]  ;;  %751 = vmatpush.bf16.msra.mxu2 %v5977_v2  ;;  %v5984_v7 = vld [vmem:[#allocation7 + $0xf0] sm:$0xff]  ;;  %v5975_v10 = vld [vmem:[#allocation7 + $0xa8] sm:$0xff] }
  0x26   :  { %764 = vmatpush.bf16.msra.mxu3 %v5985_v3  ;;  %v5983_v11 = vld [vmem:[#allocation7 + $0xe8] sm:$0xff]  ;;  %v5958_v12 = vld [vmem:[#allocation7 + $0x20] sm:$0xff]  ;;  %v5957_v16 = vld [vmem:[#allocation7 + $0x18] sm:$0xff] }
  0x27   :  { %726 = vmatpush.bf16.msra.mxu0 %v5960_v4  ;;  %v5966_v13 = vld [vmem:[#allocation7 + $0x60] sm:$0xff]  ;;  %v156_v18 = vld [vmem:[#allocation4 + $0x10] sm:$0xff]  ;;  %v5965_v19 = vld [vmem:[#allocation7 + $0x58] sm:$0xff] }
  0x28   :  { %739 = vmatpush.bf16.msra.mxu1 %v5968_v5  ;;  %v5974_v14 = vld [vmem:[#allocation7 + $0xa0] sm:$0xff]  ;;  %v160_v21 = vld [vmem:[#allocation4 + $0x30] sm:$0xff]  ;;  %v5973_v22 = vld [vmem:[#allocation7 + $0x98] sm:$0xff]  ;;  %172 = vst [vmem:[#allocation1 + $0x1] ss:$4 sm:$0xff] %v156_v18 }
  0x29   :  { %752 = vmatpush.bf16.msra.mxu2 %v5976_v6  ;;  %v5982_v15 = vld [vmem:[#allocation7 + $0xe0] sm:$0xff]  ;;  %v5981_v23 = vld [vmem:[#allocation7 + $0xd8] sm:$0xff]  ;;  %176 = vst [vmem:[#allocation1 + $0x3] ss:$4 sm:$0xff] %v160_v21  ;;  %v5956_v24 = vld [vmem:[#allocation7 + $0x10] sm:$0xff] }
  0x2a   :  { %765 = vmatpush.bf16.msra.mxu3 %v5984_v7  ;;  %v154_v17 = vld [vmem:[#allocation4] sm:$0xff]  ;;  %v5964_v25 = vld [vmem:[#allocation7 + $0x50] sm:$0xff]  ;;  %v155_v28 = vld [vmem:[#allocation4 + $0x8] sm:$0xff] }
  0x2b   :  { %727 = vmatpush.bf16.msra.mxu0 %v5959_v8  ;;  %v158_v20 = vld [vmem:[#allocation4 + $0x20] sm:$0xff]  ;;  %170 = vst [vmem:[#allocation1] ss:$4 sm:$0xff] %v154_v17  ;;  %v5972_v26 = vld [vmem:[#allocation7 + $0x90] sm:$0xff]  ;;  %v157_v29 = vld [vmem:[#allocation4 + $0x18] sm:$0xff] }
  0x2c   :  { %740 = vmatpush.bf16.msra.mxu1 %v5967_v9  ;;  %174 = vst [vmem:[#allocation1 + $0x2] ss:$4 sm:$0xff] %v158_v20  ;;  %v5980_v27 = vld [vmem:[#allocation7 + $0xd0] sm:$0xff]  ;;  %v5955_v30 = vld [vmem:[#allocation7 + $0x8] sm:$0xff]  ;;  %v5954_v35 = vld [vmem:[#allocation7] sm:$0xff] }
  0x2d   :  { %753 = vmatpush.bf16.msra.mxu2 %v5975_v10  ;;  %v5963_v31 = vld [vmem:[#allocation7 + $0x48] sm:$0xff]  ;;  %178 = vst [vmem:[#allocation1 + $0x20] ss:$4 sm:$0xff] %v155_v28  ;;  %v161_v36 = vld [vmem:[#allocation4 + $0x38] sm:$0xff]  ;;  %v5962_v37 = vld [vmem:[#allocation7 + $0x40] sm:$0xff] }
  0x2e   :  { %766 = vmatpush.bf16.msra.mxu3 %v5983_v11  ;;  %v5971_v32 = vld [vmem:[#allocation7 + $0x88] sm:$0xff]  ;;  %180 = vst [vmem:[#allocation1 + $0x21] ss:$4 sm:$0xff] %v157_v29  ;;  %v5970_v38 = vld [vmem:[#allocation7 + $0x80] sm:$0xff]  ;;  %v5993_v40 = vld [vmem:[#allocation7 + $0x138] sm:$0xff] }
  0x2f   :  { %728 = vmatpush.bf16.msra.mxu0 %v5958_v12  ;;  %v5979_v33 = vld [vmem:[#allocation7 + $0xc8] sm:$0xff]  ;;  %v5978_v39 = vld [vmem:[#allocation7 + $0xc0] sm:$0xff]  ;;  %v6001_v42 = vld [vmem:[#allocation7 + $0x178] sm:$0xff]  ;;  %184 = vst [vmem:[#allocation1 + $0x23] ss:$4 sm:$0xff] %v161_v36 }
  0x30   :  { %741 = vmatpush.bf16.msra.mxu1 %v5966_v13  ;;  %v159_v34 = vld [vmem:[#allocation4 + $0x28] sm:$0xff]  ;;  %v6009_v46 = vld [vmem:[#allocation7 + $0x1b8] sm:$0xff]  ;;  %v5992_v52 = vld [vmem:[#allocation7 + $0x130] sm:$0xff] }
  0x31   :  { %754 = vmatpush.bf16.msra.mxu2 %v5974_v14  ;;  %182 = vst [vmem:[#allocation1 + $0x22] ss:$4 sm:$0xff] %v159_v34  ;;  %v6017_v47 = vld [vmem:[#allocation7 + $0x1f8] sm:$0xff]  ;;  %v6000_v53 = vld [vmem:[#allocation7 + $0x170] sm:$0xff]  ;;  %v5991_v56 = vld [vmem:[#allocation7 + $0x128] sm:$0xff] }
  0x32   :  { %767 = vmatpush.bf16.msra.mxu3 %v5982_v15  ;;  %v6008_v54 = vld [vmem:[#allocation7 + $0x1b0] sm:$0xff]  ;;  %v5999_v57 = vld [vmem:[#allocation7 + $0x168] sm:$0xff]  ;;  %v5990_v60 = vld [vmem:[#allocation7 + $0x120] sm:$0xff] }
  0x33   :  { %729 = vmatpush.bf16.msra.mxu0 %v5957_v16  ;;  %v187_v41 = vld.sshfl [vmem:[#allocation1 + $0x10] sm:$0xff pattern:$0x73625140]  ;;  %v185_v43 = vld.sshfl [vmem:[#allocation1] sm:$0xff pattern:$0x73625140] }
  0x34   :  { %742 = vmatpush.bf16.msra.mxu1 %v5965_v19  ;;  %v188_v44 = vld.sshfl [vmem:[#allocation1 + $0x18] sm:$0xff pattern:$0x73625140]  ;;  %v186_v45 = vld.sshfl [vmem:[#allocation1 + $0x8] sm:$0xff pattern:$0x73625140]  ;;  %v203_v48 = vpack.c.bf16 %v187_v41, %v187_v41  ;;  %v201_v49 = vpack.c.bf16 %v185_v43, %v185_v43 }
  0x35   :  { %755 = vmatpush.bf16.msra.mxu2 %v5973_v22  ;;  %v204_v50 = vpack.c.bf16 %v188_v44, %v188_v44  ;;  %v202_v51 = vpack.c.bf16 %v186_v45, %v186_v45  ;;  %v6016_v55 = vld [vmem:[#allocation7 + $0x1f0] sm:$0xff]  ;;  %v6007_v58 = vld [vmem:[#allocation7 + $0x1a8] sm:$0xff]  ;;  %v5998_v61 = vld [vmem:[#allocation7 + $0x160] sm:$0xff] }
  0x36   :  { %768 = vmatpush.bf16.msra.mxu3 %v5981_v23  ;;  %v6015_v59 = vld [vmem:[#allocation7 + $0x1e8] sm:$0xff]  ;;  %v6006_v62 = vld [vmem:[#allocation7 + $0x1a0] sm:$0xff]  ;;  %v5989_v0 = vld [vmem:[#allocation7 + $0x118] sm:$0xff] }
  0x37   :  { %730 = vmatpush.bf16.msra.mxu0 %v5956_v24  ;;  %v6014_v63 = vld [vmem:[#allocation7 + $0x1e0] sm:$0xff]  ;;  %v5997_v1 = vld [vmem:[#allocation7 + $0x158] sm:$0xff]  ;;  %v5988_v4 = vld [vmem:[#allocation7 + $0x110] sm:$0xff] }
  0x38   :  { %743 = vmatpush.bf16.msra.mxu1 %v5964_v25  ;;  %v6005_v2 = vld [vmem:[#allocation7 + $0x198] sm:$0xff]  ;;  %v5996_v5 = vld [vmem:[#allocation7 + $0x150] sm:$0xff]  ;;  %v5987_v8 = vld [vmem:[#allocation7 + $0x108] sm:$0xff] }
  0x39   :  { %756 = vmatpush.bf16.msra.mxu2 %v5972_v26  ;;  %v6013_v3 = vld [vmem:[#allocation7 + $0x1d8] sm:$0xff]  ;;  %v6004_v6 = vld [vmem:[#allocation7 + $0x190] sm:$0xff]  ;;  %v5995_v9 = vld [vmem:[#allocation7 + $0x148] sm:$0xff] }
  0x3a   :  { %769 = vmatpush.bf16.msra.mxu3 %v5980_v27  ;;  %v6012_v7 = vld [vmem:[#allocation7 + $0x1d0] sm:$0xff]  ;;  %v6003_v10 = vld [vmem:[#allocation7 + $0x188] sm:$0xff]  ;;  %v5986_v12 = vld [vmem:[#allocation7 + $0x100] sm:$0xff] }
  0x3b   :  { %731 = vmatpush.bf16.msra.mxu0 %v5955_v30  ;;  %v6011_v11 = vld [vmem:[#allocation7 + $0x1c8] sm:$0xff]  ;;  %v5994_v13 = vld [vmem:[#allocation7 + $0x140] sm:$0xff]  ;;  %v189_v16 = vld.sshfl [vmem:[#allocation1 + $0x20] sm:$0xff pattern:$0x73625140] }
  0x3c   :  { %744 = vmatpush.bf16.msra.mxu1 %v5963_v31  ;;  %v6002_v14 = vld [vmem:[#allocation7 + $0x180] sm:$0xff]  ;;  %v191_v18 = vld.sshfl [vmem:[#allocation1 + $0x30] sm:$0xff pattern:$0x73625140]  ;;  %v205_v20 = vpack.c.bf16 %v189_v16, %v189_v16  ;;  %v4412_v24 = vld [vmem:[#allocation9 + $0x70] sm:$0xf] }
  0x3d   :  { %757 = vmatpush.bf16.msra.mxu2 %v5971_v32  ;;  %v6010_v15 = vld [vmem:[#allocation7 + $0x1c0] sm:$0xff]  ;;  %v192_v19 = vld.sshfl [vmem:[#allocation1 + $0x38] sm:$0xff pattern:$0x73625140]  ;;  %v207_v22 = vpack.c.bf16 %v191_v18, %v191_v18  ;;  %v6033_v25 = vld [vmem:[#allocation9 + $0x74] sm:$0xf0] }
  0x3e   :  { %770 = vmatpush.bf16.msra.mxu3 %v5979_v33  ;;  %v190_v17 = vld.sshfl [vmem:[#allocation1 + $0x28] sm:$0xff pattern:$0x73625140]  ;;  %v208_v23 = vpack.c.bf16 %v192_v19, %v192_v19  ;;  %v6032_v26 = vld [vmem:[#allocation9 + $0x74] sm:$0xf]  ;;  %v4413_v27 = vor.u32 %v6033_v25, %v4412_v24 }
  0x3f   :  { %732 = vmatpush.bf16.msra.mxu0 %v5954_v35  ;;  %v206_v21 = vpack.c.bf16 %v190_v17, %v190_v17  ;;  %v4414_v28 = vld [vmem:[#allocation9 + $0x78] sm:$0xf0]  ;;  %v4404_v29 = vld [vmem:[#allocation9 + $0x60] sm:$0xf]  ;;  %v6031_v30 = vld [vmem:[#allocation9 + $0x64] sm:$0xf0] }
  0x40   :  { %745 = vmatpush.bf16.msra.mxu1 %v5962_v37  ;;  %v4417_v31 = vor.u32 %v6032_v26, %v4414_v28  ;;  %v6030_v32 = vld [vmem:[#allocation9 + $0x64] sm:$0xf]  ;;  %v4406_v33 = vld [vmem:[#allocation9 + $0x68] sm:$0xf0]  ;;  %v4405_v34 = vor.u32 %v6031_v30, %v4404_v29  ;;  %v4396_v36 = vld [vmem:[#allocation9 + $0x50] sm:$0xf] }
  0x41   :  { %758 = vmatpush.bf16.msra.mxu2 %v5970_v38  ;;  %v4409_v35 = vor.u32 %v6030_v32, %v4406_v33  ;;  %v6029_v37 = vld [vmem:[#allocation9 + $0x54] sm:$0xf0]  ;;  %v6028_v38 = vld [vmem:[#allocation9 + $0x54] sm:$0xf]  ;;  %v6027_v43 = vld [vmem:[#allocation9 + $0x44] sm:$0xf0] }
  0x42   :  { %771 = vmatpush.bf16.msra.mxu3 %v5978_v39  ;;  %733 = vmatmul.bf16.vlgmr.msra.gmra.mxu0 %v201_v49  ;;  %v4397_v39 = vor.u32 %v6029_v37, %v4396_v36  ;;  %v6026_v44 = vld [vmem:[#allocation9 + $0x44] sm:$0xf]  ;;  %v4390_v45 = vld [vmem:[#allocation9 + $0x48] sm:$0xf0]  ;;  %v6025_v49 = vld [vmem:[#allocation9 + $0x34] sm:$0xf0] }
  0x43   :  { %777 = vmatpush.bf16.msrb.mxu0 %v5993_v40  ;;  %746 = vmatmul.bf16.vlgmr.msra.gmra.mxu1 %v202_v51  ;;  %v4398_v40 = vld [vmem:[#allocation9 + $0x58] sm:$0xf0]  ;;  %v6064_v16 = vld [vmem:[#allocation10 + $0xec] sm:$0xf0]  ;;  %v4660_v17 = vld [vmem:[#allocation10 + $0x1e0] sm:$0xf] }
  0x44   :  { %790 = vmatpush.bf16.msrb.mxu1 %v6001_v42  ;;  %759 = vmatmul.bf16.vlgmr.msra.gmra.mxu2 %v203_v48  ;;  %v4401_v41 = vor.u32 %v6028_v38, %v4398_v40  ;;  %v4388_v42 = vld [vmem:[#allocation9 + $0x40] sm:$0xf]  ;;  %v4380_v48 = vld [vmem:[#allocation9 + $0x30] sm:$0xf]  ;;  %v6094_v26 = vld [vmem:[#allocation10 + $0x1e4] sm:$0xf] }
  0x45   :  { %803 = vmatpush.bf16.msrb.mxu2 %v6009_v46  ;;  %772 = vmatmul.bf16.vlgmr.msra.gmra.mxu3 %v204_v50  ;;  %v4389_v46 = vor.u32 %v6027_v43, %v4388_v42  ;;  %v6024_v50 = vld [vmem:[#allocation9 + $0x34] sm:$0xf]  ;;  %v4381_v51 = vor.u32 %v6025_v49, %v4380_v48  ;;  %v4516_v28 = vld [vmem:[#allocation10 + $0xc0] sm:$0xf]  ;;  %v6060_v30 = vld [vmem:[#allocation10 + $0xcc] sm:$0xf0] }
  0x46   :  { %816 = vmatpush.bf16.msrb.mxu3 %v6017_v47  ;;  %v4393_v47 = vor.u32 %v6026_v44, %v4390_v45  ;;  %v6092_v32 = vld [vmem:[#allocation10 + $0x1cc] sm:$0xf0]  ;;  %v6058_v36 = vld [vmem:[#allocation10 + $0xc4] sm:$0xf]  ;;  %v4518_v37 = vld [vmem:[#allocation10 + $0xd0] sm:$0xf0] }
  0x47   :  { %778 = vmatpush.bf16.msrb.mxu0 %v5992_v52  ;;  %v4382_v52 = vld [vmem:[#allocation9 + $0x38] sm:$0xf0]  ;;  %v6090_v38 = vld [vmem:[#allocation10 + $0x1c4] sm:$0xf]  ;;  %v4646_v40 = vld [vmem:[#allocation10 + $0x1d0] sm:$0xf0] }
  0x48   :  { %791 = vmatpush.bf16.msrb.mxu1 %v6000_v53  ;;  %v4385_v53 = vor.u32 %v6024_v50, %v4382_v52  ;;  %v6056_v42 = vld [vmem:[#allocation10 + $0xac] sm:$0xf0]  ;;  %v4649_v43 = vor.u32 %v6090_v38, %v4646_v40  ;;  %v4628_v44 = vld [vmem:[#allocation10 + $0x1a0] sm:$0xf]  ;;  %v4502_v48 = vld [vmem:[#allocation10 + $0xb0] sm:$0xf0] }
  0x49   :  { %804 = vmatpush.bf16.msrb.mxu2 %v6008_v54  ;;  %v4372_v54 = vld [vmem:[#allocation9 + $0x20] sm:$0xf]  ;;  %v6088_v45 = vld [vmem:[#allocation10 + $0x1ac] sm:$0xf0]  ;;  %v6086_v49 = vld [vmem:[#allocation10 + $0x1a4] sm:$0xf] }
  0x4a   :  { %817 = vmatpush.bf16.msrb.mxu3 %v6016_v55  ;;  %v6023_v55 = vld [vmem:[#allocation9 + $0x24] sm:$0xf0]  ;;  %v4630_v50 = vld [vmem:[#allocation10 + $0x1b0] sm:$0xf0]  ;;  %v4629_v52 = vor.u32 %v6088_v45, %v4628_v44 }
  0x4b   :  { %779 = vmatpush.bf16.msrb.mxu0 %v5991_v56  ;;  %v6022_v56 = vld [vmem:[#allocation9 + $0x24] sm:$0xf]  ;;  %v4566_v40 = vld [vmem:[#allocation10 + $0x130] sm:$0xf0] }
  0x4c   :  { %792 = vmatpush.bf16.msrb.mxu1 %v5999_v57 }
  0x4d   :  { %805 = vmatpush.bf16.msrb.mxu2 %v6007_v58  ;;  %v4373_v58 = vor.u32 %v6023_v55, %v4372_v54  ;;  %v4484_v54 = vld [vmem:[#allocation10 + $0x80] sm:$0xf]  ;;  %v6052_v55 = vld [vmem:[#allocation10 + $0x8c] sm:$0xf0] }
  0x4e   :  { %818 = vmatpush.bf16.msrb.mxu3 %v6015_v59  ;;  %v4374_v59 = vld [vmem:[#allocation9 + $0x28] sm:$0xf0] }
  0x4f   :  { %780 = vmatpush.bf16.msrb.mxu0 %v5990_v60 }
  0x50   :  { %793 = vmatpush.bf16.msrb.mxu1 %v5998_v61  ;;  %v4377_v61 = vor.u32 %v6022_v56, %v4374_v59  ;;  %v4612_v56 = vld [vmem:[#allocation10 + $0x180] sm:$0xf]  ;;  %v6050_v59 = vld [vmem:[#allocation10 + $0x84] sm:$0xf] }
  0x51   :  { %806 = vmatpush.bf16.msrb.mxu2 %v6006_v62  ;;  %v4364_v62 = vld [vmem:[#allocation9 + $0x10] sm:$0xf] }
  0x52   :  { %819 = vmatpush.bf16.msrb.mxu3 %v6014_v63  ;;  %v6021_v63 = vld [vmem:[#allocation9 + $0x14] sm:$0xf0] }
  0x53   :  { %781 = vmatpush.bf16.msrb.mxu0 %v5989_v0  ;;  %v6020_v0 = vld [vmem:[#allocation9 + $0x14] sm:$0xf] }
  0x54   :  { %794 = vmatpush.bf16.msrb.mxu1 %v5997_v1  ;;  %v4365_v1 = vor.u32 %v6021_v63, %v4364_v62  ;;  %v6082_v62 = vld [vmem:[#allocation10 + $0x184] sm:$0xf]  ;;  %v4614_v63 = vld [vmem:[#allocation10 + $0x190] sm:$0xf0] }
  0x55   :  { %807 = vmatpush.bf16.msrb.mxu2 %v6005_v2  ;;  %v4366_v2 = vld [vmem:[#allocation9 + $0x18] sm:$0xf0] }
  0x56   :  { %820 = vmatpush.bf16.msrb.mxu3 %v6013_v3  ;;  %v4369_v3 = vor.u32 %v6020_v0, %v4366_v2  ;;  %v4485_v0 = vor.u32 %v6052_v55, %v4484_v54  ;;  %v6034_v54 = vld [vmem:[#allocation10 + $0x4] sm:$0xf]  ;;  %v4422_v55 = vld [vmem:[#allocation10 + $0x10] sm:$0xf0] }
  0x57   :  { %782 = vmatpush.bf16.msrb.mxu0 %v5988_v4 }
  0x58   :  { %795 = vmatpush.bf16.msrb.mxu1 %v5996_v5 }
  0x59   :  { %808 = vmatpush.bf16.msrb.mxu2 %v6004_v6  ;;  %v4356_v6 = vld [vmem:[#allocation9] sm:$0xf] }
  0x5a   :  { %821 = vmatpush.bf16.msrb.mxu3 %v6012_v7  ;;  %v6019_v7 = vld [vmem:[#allocation9 + $0x4] sm:$0xf0] }
  0x5b   :  { %783 = vmatpush.bf16.msrb.mxu0 %v5987_v8  ;;  %v6018_v8 = vld [vmem:[#allocation9 + $0x4] sm:$0xf] }
  0x5c   :  { %796 = vmatpush.bf16.msrb.mxu1 %v5995_v9 }
  0x5d   :  { %809 = vmatpush.bf16.msrb.mxu2 %v6003_v10  ;;  %v4357_v10 = vor.u32 %v6019_v7, %v4356_v6  ;;  %v6048_v6 = vld [vmem:[#allocation10 + $0x6c] sm:$0xf0]  ;;  %v4596_v7 = vld [vmem:[#allocation10 + $0x160] sm:$0xf] }
  0x5e   :  { %822 = vmatpush.bf16.msrb.mxu3 %v6011_v11  ;;  %v4358_v11 = vld [vmem:[#allocation9 + $0x8] sm:$0xf0] }
  0x5f   :  { %784 = vmatpush.bf16.msrb.mxu0 %v5986_v12 }
  0x60   :  { %797 = vmatpush.bf16.msrb.mxu1 %v5994_v13  ;;  %v4361_v13 = vor.u32 %v6018_v8, %v4358_v11  ;;  %v4617_v8 = vor.u32 %v6082_v62, %v4614_v63  ;;  %v4470_v11 = vld [vmem:[#allocation10 + $0x70] sm:$0xf0]  ;;  %v6065_v62 = vld [vmem:[#allocation10 + $0xf4] sm:$0xf0]  ;;  %v4668_v63 = vld [vmem:[#allocation10 + $0x1e8] sm:$0xf] }
  0x61   :  { %810 = vmatpush.bf16.msrb.mxu2 %v6002_v14  ;;  %v6435_v14 = vld [vmem:[%s6879_s4] ss:$0 sm:$0xff] }
  0x62   :  { %823 = vmatpush.bf16.msrb.mxu3 %v6010_v15  ;;  %785 = vmatmul.bf16.vlgmr.msrb.gmra.mxu0 %v205_v20  ;;  %v4532_v15 = vld [vmem:[#allocation10 + $0xe0] sm:$0xf]  ;;  %v6096_v20 = vld [vmem:[#allocation10 + $0x1ec] sm:$0xf0] }
  0x63   :  { %798 = vmatmul.bf16.vlgmr.msrb.gmra.mxu1 %v206_v21  ;;  %933 = vmatpush.bf16.msra.mxu0 %v4413_v27  ;;  %v4533_v19 = vor.u32 %v6064_v16, %v4532_v15  ;;  %v6062_v21 = vld [vmem:[#allocation10 + $0xe4] sm:$0xf]  ;;  %v4661_v24 = vor.u32 %v6096_v20, %v4660_v17  ;;  %v4662_v27 = vld [vmem:[#allocation10 + $0x1f0] sm:$0xf0]  ;;  %v6044_v20 = vld [vmem:[#allocation10 + $0x4c] sm:$0xf0] }
  0x64   :  { %811 = vmatmul.bf16.vlgmr.msrb.gmra.mxu2 %v207_v22  ;;  %946 = vmatpush.bf16.msra.mxu1 %v4417_v31  ;;  %v4534_v22 = vld [vmem:[#allocation10 + $0xf0] sm:$0xf0]  ;;  %v4665_v29 = vor.u32 %v6094_v26, %v4662_v27  ;;  %v4644_v31 = vld [vmem:[#allocation10 + $0x1c0] sm:$0xf]  ;;  %v6074_v27 = vld [vmem:[#allocation10 + $0x144] sm:$0xf] }
  0x65   :  { %824 = vmatmul.bf16.vlgmr.msrb.gmra.mxu3 %v208_v23  ;;  %v4537_v25 = vor.u32 %v6062_v21, %v4534_v22  ;;  %1357 = vmatpush.bf16.msra.mxu2 %v4533_v19  ;;  %v4452_v19 = vld [vmem:[#allocation10 + $0x40] sm:$0xf] }
  0x66   :  { %1370 = vmatpush.bf16.msra.mxu3 %v4661_v24  ;;  %v4580_v21 = vld [vmem:[#allocation10 + $0x140] sm:$0xf]  ;;  %v6042_v24 = vld [vmem:[#allocation10 + $0x44] sm:$0xf] }
  0x67   :  { %934 = vmatpush.bf16.msra.mxu0 %v4405_v34  ;;  %v4517_v34 = vor.u32 %v6060_v30, %v4516_v28  ;;  %v4582_v28 = vld [vmem:[#allocation10 + $0x150] sm:$0xf0] }
  0x68   :  { %947 = vmatpush.bf16.msra.mxu1 %v4409_v35  ;;  %v4645_v35 = vor.u32 %v6092_v32, %v4644_v31  ;;  %v4436_v31 = vld [vmem:[#allocation10 + $0x20] sm:$0xf]  ;;  %v6040_v32 = vld [vmem:[#allocation10 + $0x2c] sm:$0xf0] }
  0x69   :  { %1358 = vmatpush.bf16.msra.mxu2 %v4517_v34  ;;  %v4585_v34 = vor.u32 %v6074_v27, %v4582_v28  ;;  %v4508_v28 = vld [vmem:[#allocation10 + $0xa8] sm:$0xf] }
  0x6a   :  { %1371 = vmatpush.bf16.msra.mxu3 %v4645_v35  ;;  %v6072_v35 = vld [vmem:[#allocation10 + $0x12c] sm:$0xf0] }
  0x6b   :  { %935 = vmatpush.bf16.msra.mxu0 %v4397_v39  ;;  %v4521_v39 = vor.u32 %v6058_v36, %v4518_v37  ;;  %v6038_v36 = vld [vmem:[#allocation10 + $0x24] sm:$0xf]  ;;  %v4438_v37 = vld [vmem:[#allocation10 + $0x30] sm:$0xf0] }
  0x6c   :  { %948 = vmatpush.bf16.msra.mxu1 %v4401_v41  ;;  %v4500_v41 = vld [vmem:[#allocation10 + $0xa0] sm:$0xf] }
  0x6e   :  { %1372 = vmatpush.bf16.msra.mxu3 %v4629_v52 }
  0x6f   :  { %936 = vmatpush.bf16.msra.mxu0 %v4389_v46  ;;  %v6054_v46 = vld [vmem:[#allocation10 + $0xa4] sm:$0xf] }
  0x70   :  { %949 = vmatpush.bf16.msra.mxu1 %v4393_v47  ;;  %v4501_v47 = vor.u32 %v6056_v42, %v4500_v41 }
  0x72   :  { %1359 = vmatpush.bf16.msra.mxu2 %v4501_v47 }
  0x73   :  { %937 = vmatpush.bf16.msra.mxu0 %v4381_v51 }
  0x74   :  { %950 = vmatpush.bf16.msra.mxu1 %v4385_v53  ;;  %v4505_v53 = vor.u32 %v6054_v46, %v4502_v48  ;;  %v4441_v48 = vor.u32 %v6038_v36, %v4438_v37  ;;  %v6087_v36 = vld [vmem:[#allocation10 + $0x1ac] sm:$0xf]  ;;  %v4638_v37 = vld [vmem:[#allocation10 + $0x1b8] sm:$0xf0] }
  0x76   :  { %1360 = vmatpush.bf16.msra.mxu2 %v4485_v0  ;;  %v6097_v0 = vld [vmem:[#allocation10 + $0x1f4] sm:$0xf0] }
  0x77   :  { %938 = vmatpush.bf16.msra.mxu0 %v4373_v58  ;;  %v6084_v58 = vld [vmem:[#allocation10 + $0x18c] sm:$0xf0] }
  0x78   :  { %951 = vmatpush.bf16.msra.mxu1 %v4377_v61  ;;  %v4486_v61 = vld [vmem:[#allocation10 + $0x90] sm:$0xf0] }
  0x79   :  { %v4489_v2 = vor.u32 %v6050_v59, %v4486_v61  ;;  %v4540_v59 = vld [vmem:[#allocation10 + $0xe8] sm:$0xf] }
  0x7b   :  { %939 = vmatpush.bf16.msra.mxu0 %v4365_v1 }
  0x7c   :  { %952 = vmatpush.bf16.msra.mxu1 %v4369_v3  ;;  %v4468_v3 = vld [vmem:[#allocation10 + $0x60] sm:$0xf] }
  0x7f   :  { %940 = vmatpush.bf16.msra.mxu0 %v4357_v10  ;;  %v6046_v10 = vld [vmem:[#allocation10 + $0x64] sm:$0xf] }
  0x80   :  { %953 = vmatpush.bf16.msra.mxu1 %v4361_v13  ;;  %v4598_v13 = vld [vmem:[#allocation10 + $0x170] sm:$0xf0] }
  0x83   :  { %1383 = vmatpush.bf16.msrb.mxu0 %v4537_v25  ;;  %v4454_v25 = vld [vmem:[#allocation10 + $0x50] sm:$0xf0] }
  0x84   :  { %1396 = vmatpush.bf16.msrb.mxu1 %v4665_v29  ;;  %v4453_v29 = vor.u32 %v6044_v20, %v4452_v19  ;;  %v4457_v30 = vor.u32 %v6042_v24, %v4454_v25  ;;  %v6093_v19 = vld [vmem:[#allocation10 + $0x1d4] sm:$0xf0]  ;;  %v6059_v20 = vld [vmem:[#allocation10 + $0xcc] sm:$0xf] }
  0x87   :  { %1384 = vmatpush.bf16.msrb.mxu0 %v4521_v39  ;;  %v6070_v39 = vld [vmem:[#allocation10 + $0x124] sm:$0xf] }
  0x88   :  { %1397 = vmatpush.bf16.msrb.mxu1 %v4649_v43  ;;  %v4437_v43 = vor.u32 %v6040_v32, %v4436_v31  ;;  %v4569_v52 = vor.u32 %v6070_v39, %v4566_v40  ;;  %v6089_v31 = vld [vmem:[#allocation10 + $0x1b4] sm:$0xf0]  ;;  %v6055_v32 = vld [vmem:[#allocation10 + $0xac] sm:$0xf]  ;;  %v4492_v39 = vld [vmem:[#allocation10 + $0x88] sm:$0xf] }
  0x89   :  { %v6053_v40 = vld [vmem:[#allocation10 + $0x94] sm:$0xf0] }
  0x8b   :  { %1385 = vmatpush.bf16.msrb.mxu0 %v4505_v53  ;;  %v6068_v53 = vld [vmem:[#allocation10 + $0x10c] sm:$0xf0] }
  0x8f   :  { %1386 = vmatpush.bf16.msrb.mxu0 %v4489_v2  ;;  %v4542_v2 = vld [vmem:[#allocation10 + $0xf8] sm:$0xf0] }
  0xbf   :  { %v734_v57 = vpop.f32.mrf.mxu0 }
  0xc0   :  { %v6754_v60 = vpop.f32.mrf.mxu1  ;;  %v735_v33 = vadd.f32 %v6435_v14, %v734_v57  ;;  %v4633_v57 = vor.u32 %v6086_v49, %v4630_v50  ;;  %v4469_v14 = vor.u32 %v6048_v6, %v4468_v3  ;;  %v4420_v49 = vld [vmem:[#allocation10] sm:$0xf]  ;;  %v6036_v50 = vld [vmem:[#allocation10 + $0xc] sm:$0xf0]  ;;  %v4425_v6 = vor.u32 %v6034_v54, %v4422_v55  ;;  %v6081_v55 = vld [vmem:[#allocation10 + $0x174] sm:$0xf0] }
  0xc1   :  { %v4421_v61 = vor.u32 %v6036_v50, %v4420_v49  ;;  %v4622_v49 = vld [vmem:[#allocation10 + $0x198] sm:$0xf0] }
  0xc2   :  { %v748_v51 = vadd.f32 %v6754_v60, %v735_v33  ;;  %v4613_v60 = vor.u32 %v6084_v58, %v4612_v56  ;;  %1398 = vmatpush.bf16.msrb.mxu1 %v4633_v57  ;;  %1361 = vmatpush.bf16.msra.mxu2 %v4469_v14  ;;  %v4564_v33 = vld [vmem:[#allocation10 + $0x120] sm:$0xf]  ;;  %v6066_v57 = vld [vmem:[#allocation10 + $0x104] sm:$0xf]  ;;  %v4550_v58 = vld [vmem:[#allocation10 + $0x110] sm:$0xf0]  ;;  %v4669_v14 = vor.u32 %v6097_v0, %v4668_v63 }
  0xc3   :  { %v4565_v47 = vor.u32 %v6072_v35, %v4564_v33  ;;  %v4510_v33 = vld [vmem:[#allocation10 + $0xb8] sm:$0xf0]  ;;  %v4460_v63 = vld [vmem:[#allocation10 + $0x48] sm:$0xf] }
  0xc4   :  { %1373 = vmatpush.bf16.msra.mxu3 %v4613_v60  ;;  %v6063_v60 = vld [vmem:[#allocation10 + $0xec] sm:$0xf]  ;;  %v4513_v35 = vor.u32 %v6055_v32, %v4510_v33 }
  0xc6   :  { %1399 = vmatpush.bf16.msrb.mxu1 %v4617_v8  ;;  %1362 = vmatpush.bf16.msra.mxu2 %v4453_v29  ;;  %v4670_v8 = vld [vmem:[#allocation10 + $0x1f8] sm:$0xf0]  ;;  %v6057_v29 = vld [vmem:[#allocation10 + $0xb4] sm:$0xf0] }
  0xc7   :  { %v6756_v4 = vpop.f32.mrf.mxu2  ;;  %v736_v9 = vpop.f32.mrf.mxu0 }
  0xc8   :  { %v6758_v5 = vpop.f32.mrf.mxu3  ;;  %v749_v12 = vpop.f32.mrf.mxu1  ;;  %v761_v1 = vadd.f32 %v6756_v4, %v748_v51  ;;  %v6080_v9 = vld [vmem:[#allocation10 + $0x16c] sm:$0xf0]  ;;  %v4548_v51 = vld [vmem:[#allocation10 + $0x100] sm:$0xf] }
  0xc9   :  { %v6078_v12 = vld [vmem:[#allocation10 + $0x164] sm:$0xf]  ;;  %v4597_v17 = vor.u32 %v6080_v9, %v4596_v7  ;;  %v4549_v3 = vor.u32 %v6068_v53, %v4548_v51  ;;  %v6095_v7 = vld [vmem:[#allocation10 + $0x1ec] sm:$0xf]  ;;  %v4476_v51 = vld [vmem:[#allocation10 + $0x68] sm:$0xf] }
  0xca   :  { %v774_v15 = vadd.f32 %v6758_v5, %v761_v1  ;;  %v4601_v22 = vor.u32 %v6078_v12, %v4598_v13  ;;  %1363 = vmatpush.bf16.msra.mxu2 %v4437_v43  ;;  %v6085_v43 = vld [vmem:[#allocation10 + $0x194] sm:$0xf0]  ;;  %v4604_v53 = vld [vmem:[#allocation10 + $0x168] sm:$0xf] }
  0xcb   :  { %1374 = vmatpush.bf16.msra.mxu3 %v4597_v17  ;;  %v4652_v17 = vld [vmem:[#allocation10 + $0x1c8] sm:$0xf] }
  0xcc   :  { %1400 = vmatpush.bf16.msrb.mxu1 %v4601_v22  ;;  %v6091_v22 = vld [vmem:[#allocation10 + $0x1cc] sm:$0xf]  ;;  %v4653_v25 = vor.u32 %v6093_v19, %v4652_v17 }
  0xcd   :  { %v6071_v19 = vld [vmem:[#allocation10 + $0x12c] sm:$0xf] }
  0xce   :  { %1364 = vmatpush.bf16.msra.mxu2 %v4421_v61  ;;  %v6079_v61 = vld [vmem:[#allocation10 + $0x16c] sm:$0xf] }
  0xcf   :  { %v762_v18 = vpop.f32.mrf.mxu2 }
  0xd0   :  { %v775_v23 = vpop.f32.mrf.mxu3  ;;  %v4473_v18 = vor.u32 %v6046_v10, %v4470_v11  ;;  %1401 = vmatpush.bf16.msrb.mxu1 %v4585_v34  ;;  %v4553_v10 = vor.u32 %v6066_v57, %v4550_v58  ;;  %v4541_v11 = vor.u32 %v6065_v62, %v4540_v59  ;;  %v4478_v57 = vld [vmem:[#allocation10 + $0x78] sm:$0xf0]  ;;  %v4605_v58 = vor.u32 %v6081_v55, %v4604_v53  ;;  %v5124_v55 = vld [vmem:[#allocation13 + $0x380] sm:$0xf] }
  0xd1   :  { %v6076_v23 = vld [vmem:[#allocation10 + $0x14c] sm:$0xf0]  ;;  %v4606_v62 = vld [vmem:[#allocation10 + $0x178] sm:$0xf0] }
  0xd2   :  { %1387 = vmatpush.bf16.msrb.mxu0 %v4473_v18  ;;  %v4581_v5 = vor.u32 %v6076_v23, %v4580_v21  ;;  %v4673_v18 = vor.u32 %v6095_v7, %v4670_v8  ;;  %v4526_v21 = vld [vmem:[#allocation10 + $0xd8] sm:$0xf0]  ;;  %1409 = vmatpush.bf16.msrb.mxu2 %v4541_v11  ;;  %v4609_v0 = vor.u32 %v6079_v61, %v4606_v62  ;;  %v6043_v7 = vld [vmem:[#allocation10 + $0x4c] sm:$0xf]  ;;  %v5636_v62 = vld [vmem:[#allocation13 + $0x780] sm:$0xf] }
  0xd3   :  { %v4654_v23 = vld [vmem:[#allocation10 + $0x1d8] sm:$0xf0] }
  0xd4   :  { %1375 = vmatpush.bf16.msra.mxu3 %v4581_v5  ;;  %1402 = vmatpush.bf16.msrb.mxu1 %v4569_v52  ;;  %v4657_v27 = vor.u32 %v6091_v22, %v4654_v23  ;;  %v4636_v5 = vld [vmem:[#allocation10 + $0x1a8] sm:$0xf]  ;;  %v6049_v52 = vld [vmem:[#allocation10 + $0x74] sm:$0xf0]  ;;  %v4462_v8 = vld [vmem:[#allocation10 + $0x58] sm:$0xf0] }
  0xd5   :  { %v4637_v34 = vor.u32 %v6089_v31, %v4636_v5  ;;  %v4477_v54 = vor.u32 %v6049_v52, %v4476_v51  ;;  %v4590_v11 = vld [vmem:[#allocation10 + $0x158] sm:$0xf0]  ;;  %v4428_v23 = vld [vmem:[#allocation10 + $0x8] sm:$0xf]  ;;  %v6067_v5 = vld [vmem:[#allocation10 + $0x10c] sm:$0xf] }
  0xd6   :  { %1388 = vmatpush.bf16.msrb.mxu0 %v4457_v30  ;;  %v4509_v30 = vor.u32 %v6057_v29, %v4508_v28  ;;  %v6035_v28 = vld [vmem:[#allocation10 + $0xc] sm:$0xf]  ;;  %v4430_v29 = vld [vmem:[#allocation10 + $0x18] sm:$0xf0]  ;;  %v6286_v51 = vld [vmem:[#allocation13 + $0x5dc] sm:$0xf0] }
  0xd7   :  { %v4433_v33 = vor.u32 %v6035_v28, %v4430_v29  ;;  %v6262_v28 = vld [vmem:[#allocation13 + $0x51c] sm:$0xf0] }
  0xd8   :  { %1376 = vmatpush.bf16.msra.mxu3 %v4565_v47  ;;  %1403 = vmatpush.bf16.msrb.mxu1 %v4553_v10  ;;  %v4465_v10 = vor.u32 %v6043_v7, %v4462_v8  ;;  %v5092_v7 = vld [vmem:[#allocation13 + $0x340] sm:$0xf] }
  0xd9   :  { %v6206_v8 = vld [vmem:[#allocation13 + $0x35c] sm:$0xf0] }
  0xda   :  { %1389 = vmatpush.bf16.msrb.mxu0 %v4441_v48  ;;  %v6083_v48 = vld [vmem:[#allocation10 + $0x18c] sm:$0xf] }
  0xdb   :  { %v4625_v50 = vor.u32 %v6083_v48, %v4622_v49 }
  0xdc   :  { %1377 = vmatpush.bf16.msra.mxu3 %v4549_v3 }
  0xde   :  { %1390 = vmatpush.bf16.msrb.mxu0 %v4425_v6 }
  0xdf   :  { %v786_v16 = vpop.f32.mrf.mxu0 }
  0xe0   :  { %v799_v4 = vpop.f32.mrf.mxu1  ;;  %v787_v26 = vadd.f32 %v786_v16, %v774_v15  ;;  %v4545_v15 = vor.u32 %v6063_v60, %v4542_v2  ;;  %v4524_v16 = vld [vmem:[#allocation10 + $0xc8] sm:$0xf]  ;;  %1422 = vmatpush.bf16.msrb.mxu3 %v4669_v14  ;;  %v6077_v2 = vld [vmem:[#allocation10 + $0x154] sm:$0xf0] }
  0xe1   :  { %v4588_v60 = vld [vmem:[#allocation10 + $0x148] sm:$0xf] }
  0xe2   :  { %v800_v38 = vadd.f32 %v799_v4, %v787_v26  ;;  %v6061_v4 = vld [vmem:[#allocation10 + $0xd4] sm:$0xf0]  ;;  %v4529_v26 = vor.u32 %v6059_v20, %v4526_v21  ;;  %v4589_v6 = vor.u32 %v6077_v2, %v4588_v60  ;;  %v4574_v20 = vld [vmem:[#allocation10 + $0x138] sm:$0xf0]  ;;  %v6278_v60 = vld [vmem:[#allocation13 + $0x59c] sm:$0xf0] }
  0xe3   :  { %v4525_v24 = vor.u32 %v6061_v4, %v4524_v16  ;;  %v6073_v16 = vld [vmem:[#allocation10 + $0x134] sm:$0xf0]  ;;  %v6039_v4 = vld [vmem:[#allocation10 + $0x2c] sm:$0xf] }
  0xe4   :  { %1423 = vmatpush.bf16.msrb.mxu3 %v4653_v25  ;;  %v4556_v25 = vld [vmem:[#allocation10 + $0x108] sm:$0xf] }
  0xe5   :  { %1410 = vmatpush.bf16.msrb.mxu2 %v4525_v24  ;;  %v6037_v24 = vld [vmem:[#allocation10 + $0x14] sm:$0xf0] }
  0xe6   :  { %v4429_v31 = vor.u32 %v6037_v24, %v4428_v23  ;;  %v5572_v24 = vld [vmem:[#allocation13 + $0x700] sm:$0xf] }
  0xe7   :  { %v812_v41 = vpop.f32.mrf.mxu2  ;;  %v788_v45 = vpop.f32.mrf.mxu0 }
  0xe8   :  { %v825_v42 = vpop.f32.mrf.mxu3  ;;  %v813_v44 = vadd.f32 %v812_v41, %v800_v38  ;;  %v801_v46 = vpop.f32.mrf.mxu1  ;;  %v4641_v38 = vor.u32 %v6087_v36, %v4638_v37  ;;  %1424 = vmatpush.bf16.msrb.mxu3 %v4637_v34  ;;  %v4620_v41 = vld [vmem:[#allocation10 + $0x188] sm:$0xf]  ;;  %v4494_v45 = vld [vmem:[#allocation10 + $0x98] sm:$0xf0] }
  0xe9   :  { %1411 = vmatpush.bf16.msrb.mxu2 %v4509_v30  ;;  %v4621_v46 = vor.u32 %v6085_v43, %v4620_v41  ;;  %v4558_v30 = vld [vmem:[#allocation10 + $0x118] sm:$0xf0]  ;;  %v6222_v43 = vld [vmem:[#allocation13 + $0x3dc] sm:$0xf0] }
  0xea   :  { %v826_v56 = vadd.f32 %v825_v42, %v813_v44  ;;  %v4493_v42 = vor.u32 %v6053_v40, %v4492_v39  ;;  %v6051_v44 = vld [vmem:[#allocation10 + $0x8c] sm:$0xf]  ;;  %v4561_v34 = vor.u32 %v6067_v5, %v4558_v30  ;;  %v5028_v5 = vld [vmem:[#allocation13 + $0x2c0] sm:$0xf] }
  0xeb   :  { %v4497_v47 = vor.u32 %v6051_v44, %v4494_v45  ;;  %v4900_v44 = vld [vmem:[#allocation13 + $0x1c0] sm:$0xf] }
  0xec   :  { %v829_v1 = vmax.f32 %v826_v56, 0.0  ;;  %1425 = vmatpush.bf16.msrb.mxu3 %v4621_v46  ;;  %v6047_v56 = vld [vmem:[#allocation10 + $0x6c] sm:$0xf]  ;;  %v6158_v45 = vld [vmem:[#allocation13 + $0x1dc] sm:$0xf0] }
  0xed   :  { %1412 = vmatpush.bf16.msrb.mxu2 %v4493_v42  ;;  %v4481_v59 = vor.u32 %v6047_v56, %v4478_v57  ;;  %v5156_v42 = vld [vmem:[#allocation13 + $0x3c0] sm:$0xf]  ;;  %v4901_v57 = vor.u32 %v6158_v45, %v4900_v44 }
  0xee   :  { %v830_v9 = vpack.c.bf16 %v829_v1, %v829_v1  ;;  %v6045_v1 = vld [vmem:[#allocation10 + $0x54] sm:$0xf0]  ;;  %v5668_v46 = vld [vmem:[#allocation13 + $0x7c0] sm:$0xf] }
  0xef   :  { %v814_v12 = vpop.f32.mrf.mxu2  ;;  %v4461_v3 = vor.u32 %v6045_v1, %v4460_v63  ;;  %v6214_v56 = vld [vmem:[#allocation13 + $0x39c] sm:$0xf0] }
  0xf0   :  { %v827_v13 = vpop.f32.mrf.mxu3  ;;  %941 = vmatmul.bf16.vlgmr.msra.gmra.mxu0 %v830_v9  ;;  %954 = vmatmul.bf16.vlgmr.msra.gmra.mxu1 %v830_v9  ;;  %v6075_v9 = vld [vmem:[#allocation10 + $0x14c] sm:$0xf]  ;;  %v4444_v12 = vld [vmem:[#allocation10 + $0x28] sm:$0xf]  ;;  %v5380_v1 = vld [vmem:[#allocation13 + $0x580] sm:$0xf] }
  0xf1   :  { %1435 = vmatpush.bf16.msra.mxu0 %v4545_v15  ;;  %1448 = vmatpush.bf16.msra.mxu1 %v4673_v18  ;;  %v6041_v13 = vld [vmem:[#allocation10 + $0x34] sm:$0xf0]  ;;  %v4593_v14 = vor.u32 %v6075_v9, %v4590_v11  ;;  %v4572_v15 = vld [vmem:[#allocation10 + $0x128] sm:$0xf]  ;;  %v4446_v18 = vld [vmem:[#allocation10 + $0x38] sm:$0xf0] }
  0xf2   :  { %1413 = vmatpush.bf16.msrb.mxu2 %v4477_v54  ;;  %1426 = vmatpush.bf16.msrb.mxu3 %v4605_v58  ;;  %v4445_v17 = vor.u32 %v6041_v13, %v4444_v12  ;;  %v4573_v21 = vor.u32 %v6073_v16, %v4572_v15  ;;  %v4449_v22 = vor.u32 %v6039_v4, %v4446_v18  ;;  %v4868_v58 = vld [vmem:[#allocation13 + $0x180] sm:$0xf] }
  0xf3   :  { %v5157_v54 = vor.u32 %v6222_v43, %v5156_v42  ;;  %v6142_v11 = vld [vmem:[#allocation13 + $0x15c] sm:$0xf0] }
  0xf4   :  { %v5604_v13 = vld [vmem:[#allocation13 + $0x740] sm:$0xf] }
  0xf5   :  { %1436 = vmatpush.bf16.msra.mxu0 %v4529_v26  ;;  %1449 = vmatpush.bf16.msra.mxu1 %v4657_v27  ;;  %v4577_v26 = vor.u32 %v6071_v19, %v4574_v20  ;;  %v6069_v27 = vld [vmem:[#allocation10 + $0x114] sm:$0xf0]  ;;  %v6334_v15 = vld [vmem:[#allocation13 + $0x75c] sm:$0xf0] }
  0xf6   :  { %1414 = vmatpush.bf16.msrb.mxu2 %v4461_v3  ;;  %1427 = vmatpush.bf16.msrb.mxu3 %v4589_v6  ;;  %v4557_v32 = vor.u32 %v6069_v27, %v4556_v25  ;;  %v5125_v6 = vor.u32 %v6214_v56, %v5124_v55  ;;  %v5348_v16 = vld [vmem:[#allocation13 + $0x540] sm:$0xf]  ;;  %v5605_v23 = vor.u32 %v6334_v15, %v5604_v13  ;;  %v4902_v13 = vld [vmem:[#allocation13 + $0x1e0] sm:$0xf0] }
  0xf7   :  { %v6270_v4 = vld [vmem:[#allocation13 + $0x55c] sm:$0xf0] }
  0xf8   :  { %v5060_v18 = vld [vmem:[#allocation13 + $0x300] sm:$0xf]  ;;  %v5349_v25 = vor.u32 %v6270_v4, %v5348_v16 }
  0xf9   :  { %1437 = vmatpush.bf16.msra.mxu0 %v4513_v35  ;;  %1450 = vmatpush.bf16.msra.mxu1 %v4641_v38  ;;  %v847_v35 = vld [vmem:[%s6881_s6] sm:$0x3]  ;;  %v6198_v19 = vld [vmem:[#allocation13 + $0x31c] sm:$0xf0] }
  0xfa   :  { %1415 = vmatpush.bf16.msrb.mxu2 %v4445_v17  ;;  %1428 = vmatpush.bf16.msrb.mxu3 %v4573_v21  ;;  %v849_v36 = vperm.slane %v847_v35, 0  ;;  %v850_v37 = vperm.slane %v847_v35, 1  ;;  %v5093_v17 = vor.u32 %v6206_v8, %v5092_v7  ;;  %v4804_v21 = vld [vmem:[#allocation13 + $0x100] sm:$0xf]  ;;  %v5061_v29 = vor.u32 %v6198_v19, %v5060_v18  ;;  %v5670_v18 = vld [vmem:[#allocation13 + $0x7e0] sm:$0xf0] }
  0xfb   :  { %v5316_v27 = vld [vmem:[#allocation13 + $0x500] sm:$0xf] }
  0xfc   :  { %v6190_v30 = vld [vmem:[#allocation13 + $0x2dc] sm:$0xf0] }
  0xfd   :  { %1438 = vmatpush.bf16.msra.mxu0 %v4497_v47  ;;  %1451 = vmatpush.bf16.msra.mxu1 %v4625_v50  ;;  %v6350_v47 = vld [vmem:[#allocation13 + $0x7dc] sm:$0xf0] }
  0xfe   :  { %1416 = vmatpush.bf16.msrb.mxu2 %v4429_v31  ;;  %1429 = vmatpush.bf16.msrb.mxu3 %v4557_v32  ;;  %v5412_v50 = vld [vmem:[#allocation13 + $0x5c0] sm:$0xf]  ;;  %v5669_v61 = vor.u32 %v6350_v47, %v5668_v46 }
  0xff   :  { %v5413_v63 = vor.u32 %v6286_v51, %v5412_v50  ;;  %v4772_v32 = vld [vmem:[#allocation13 + $0xc0] sm:$0xf] }
 0x100   :  { %v5540_v35 = vld [vmem:[#allocation13 + $0x6c0] sm:$0xf] }
 0x101   :  { %1439 = vmatpush.bf16.msra.mxu0 %v4481_v59  ;;  %1452 = vmatpush.bf16.msra.mxu1 %v4609_v0  ;;  %v6150_v59 = vld [vmem:[#allocation13 + $0x19c] sm:$0xf0] }
 0x102   :  { %v6342_v0 = vld [vmem:[#allocation13 + $0x79c] sm:$0xf0]  ;;  %v4869_v9 = vor.u32 %v6150_v59, %v4868_v58 }
 0x103   :  { %v5637_v12 = vor.u32 %v6342_v0, %v5636_v62  ;;  %v6182_v42 = vld [vmem:[#allocation13 + $0x29c] sm:$0xf0] }
 0x104   :  { %v4740_v44 = vld [vmem:[#allocation13 + $0x80] sm:$0xf] }
 0x105   :  { %1440 = vmatpush.bf16.msra.mxu0 %v4465_v10  ;;  %1453 = vmatpush.bf16.msra.mxu1 %v4593_v14  ;;  %v4836_v10 = vld [vmem:[#allocation13 + $0x140] sm:$0xf]  ;;  %v5381_v14 = vor.u32 %v6278_v60, %v5380_v1 }
 0x106   :  { %v4837_v20 = vor.u32 %v6142_v11, %v4836_v10  ;;  %v6118_v45 = vld [vmem:[#allocation13 + $0x9c] sm:$0xf0]  ;;  %v5158_v11 = vld [vmem:[#allocation13 + $0x3e0] sm:$0xf0] }
 0x107   :  { %v5508_v47 = vld [vmem:[#allocation13 + $0x680] sm:$0xf] }
 0x108   :  { %v5252_v50 = vld [vmem:[#allocation13 + $0x480] sm:$0xf] }
 0x109   :  { %1441 = vmatpush.bf16.msra.mxu0 %v4449_v22  ;;  %1454 = vmatpush.bf16.msra.mxu1 %v4577_v26  ;;  %v6134_v22 = vld [vmem:[#allocation13 + $0x11c] sm:$0xf0] }
 0x10a   :  { %v6326_v26 = vld [vmem:[#allocation13 + $0x71c] sm:$0xf0]  ;;  %v4805_v31 = vor.u32 %v6134_v22, %v4804_v21  ;;  %v5126_v22 = vld [vmem:[#allocation13 + $0x3a0] sm:$0xf0] }
 0x10b   :  { %v6246_v51 = vld [vmem:[#allocation13 + $0x49c] sm:$0xf0] }
 0x10c   :  { %v4964_v55 = vld [vmem:[#allocation13 + $0x240] sm:$0xf] }
 0x10d   :  { %1442 = vmatpush.bf16.msra.mxu0 %v4433_v33  ;;  %1455 = vmatpush.bf16.msra.mxu1 %v4561_v34  ;;  %v6126_v33 = vld [vmem:[#allocation13 + $0xdc] sm:$0xf0]  ;;  %v5573_v34 = vor.u32 %v6326_v26, %v5572_v24  ;;  %v4870_v24 = vld [vmem:[#allocation13 + $0x1a0] sm:$0xf0] }
 0x10e   :  { %v4773_v43 = vor.u32 %v6126_v33, %v4772_v32  ;;  %v6174_v56 = vld [vmem:[#allocation13 + $0x25c] sm:$0xf0]  ;;  %v6194_v33 = vld [vmem:[#allocation13 + $0x304] sm:$0xf] }
 0x10f   :  { %v4708_v58 = vld [vmem:[#allocation13 + $0x40] sm:$0xf] }
 0x110   :  { %v6110_v59 = vld [vmem:[#allocation13 + $0x5c] sm:$0xf0] }
 0x111   :  { %v5476_v62 = vld [vmem:[#allocation13 + $0x640] sm:$0xf] }
 0x112   :  { %v6302_v0 = vld [vmem:[#allocation13 + $0x65c] sm:$0xf0] }
 0x113   :  { %v5220_v1 = vld [vmem:[#allocation13 + $0x440] sm:$0xf] }
 0x114   :  { %v6238_v60 = vld [vmem:[#allocation13 + $0x45c] sm:$0xf0] }
 0x115   :  { %v4676_v7 = vld [vmem:[#allocation13] sm:$0xf]  ;;  %v5221_v10 = vor.u32 %v6238_v60, %v5220_v1  ;;  %v5606_v1 = vld [vmem:[#allocation13 + $0x760] sm:$0xf0] }
 0x116   :  { %v6102_v8 = vld [vmem:[#allocation13 + $0x1c] sm:$0xf0] }
 0x117   :  { %v6294_v15 = vld [vmem:[#allocation13 + $0x61c] sm:$0xf0]  ;;  %v4677_v4 = vor.u32 %v6102_v8, %v4676_v7  ;;  %v6162_v8 = vld [vmem:[#allocation13 + $0x204] sm:$0xf] }
 0x16d   :  { %v942_v38 = vpop.f32.mrf.mxu0  ;;  %v955_v39 = vpop.f32.mrf.mxu1 }
 0x16e   :  { %v943_v40 = vadd.f32 %v942_v38, %v849_v36  ;;  %v956_v41 = vadd.f32 %v955_v39, %v850_v37  ;;  %v5317_v36 = vor.u32 %v6262_v28, %v5316_v27  ;;  %v6318_v37 = vld [vmem:[#allocation13 + $0x6dc] sm:$0xf0]  ;;  %v6202_v28 = vld [vmem:[#allocation13 + $0x344] sm:$0xf] }
 0x16f   :  { %v5284_v38 = vld [vmem:[#allocation13 + $0x4c0] sm:$0xf]  ;;  %v5541_v46 = vor.u32 %v6318_v37, %v5540_v35  ;;  %v5062_v35 = vld [vmem:[#allocation13 + $0x320] sm:$0xf0] }
 0x170   :  { %v959_v48 = vmax.f32 %v943_v40, 0.0  ;;  %v960_v49 = vmax.f32 %v956_v41, 0.0  ;;  %v6254_v39 = vld [vmem:[#allocation13 + $0x4dc] sm:$0xf0]  ;;  %v5029_v40 = vor.u32 %v6190_v30, %v5028_v5  ;;  %v5094_v5 = vld [vmem:[#allocation13 + $0x360] sm:$0xf0] }
 0x171   :  { %v4996_v41 = vld [vmem:[#allocation13 + $0x280] sm:$0xf]  ;;  %v6138_v30 = vld [vmem:[#allocation13 + $0x144] sm:$0xf]  ;;  %v5097_v32 = vor.u32 %v6202_v28, %v5094_v5 }
 0x172   :  { %v6769_v52 = vpack.c.bf16 %v959_v48, %v959_v48  ;;  %v6771_v53 = vpack.c.bf16 %v960_v49, %v960_v49  ;;  %v5285_v48 = vor.u32 %v6254_v39, %v5284_v38  ;;  %v6310_v49 = vld [vmem:[#allocation13 + $0x69c] sm:$0xf0]  ;;  %v4806_v37 = vld [vmem:[#allocation13 + $0x120] sm:$0xf0]  ;;  %v5065_v38 = vor.u32 %v6194_v33, %v5062_v35 }
 0x173   :  { %v6306_v28 = vld [vmem:[#allocation13 + $0x684] sm:$0xf] }
 0x174   :  { %1365 = vmatmul.bf16.vlgmr.msra.gmra.mxu2 %v6769_v52  ;;  %1378 = vmatmul.bf16.vlgmr.msra.gmra.mxu3 %v6771_v53  ;;  %v6298_v33 = vld [vmem:[#allocation13 + $0x644] sm:$0xf] }
 0x175   :  { %1391 = vmatmul.bf16.vlgmr.msrb.gmra.mxu0 %v6769_v52  ;;  %1404 = vmatmul.bf16.vlgmr.msrb.gmra.mxu1 %v6771_v53  ;;  %v944_v2 = vpop.f32.mrf.mxu0  ;;  %v957_v3 = vpop.f32.mrf.mxu1 }
 0x176   :  { %3036 = vmatpush.bf16.msra.mxu3 %v5157_v54  ;;  %3023 = vmatpush.bf16.msra.mxu2 %v4901_v57  ;;  %v4997_v54 = vor.u32 %v6182_v42, %v4996_v41  ;;  %v4741_v57 = vor.u32 %v6118_v45, %v4740_v44  ;;  %v6166_v2 = vld [vmem:[#allocation13 + $0x21c] sm:$0xf0]  ;;  %v4709_v3 = vor.u32 %v6110_v59, %v4708_v58  ;;  %v5030_v41 = vld [vmem:[#allocation13 + $0x2e0] sm:$0xf0] }
 0x177   :  { %3062 = vmatpush.bf16.msrb.mxu1 %v5669_v61  ;;  %3049 = vmatpush.bf16.msrb.mxu0 %v5413_v63  ;;  %v5509_v61 = vor.u32 %v6310_v49, %v5508_v47  ;;  %v5253_v63 = vor.u32 %v6246_v51, %v5252_v50  ;;  %v4998_v44 = vld [vmem:[#allocation13 + $0x2a0] sm:$0xf0]  ;;  %v6230_v49 = vld [vmem:[#allocation13 + $0x41c] sm:$0xf0] }
 0x178   :  { %v6338_v45 = vld [vmem:[#allocation13 + $0x784] sm:$0xf] }
 0x179   :  { %v5638_v47 = vld [vmem:[#allocation13 + $0x7a0] sm:$0xf0] }
 0x17a   :  { %3037 = vmatpush.bf16.msra.mxu3 %v5125_v6  ;;  %3024 = vmatpush.bf16.msra.mxu2 %v4869_v9  ;;  %v6218_v6 = vld [vmem:[#allocation13 + $0x3c4] sm:$0xf]  ;;  %v5477_v9 = vor.u32 %v6302_v0, %v5476_v62  ;;  %v5641_v50 = vor.u32 %v6338_v45, %v5638_v47  ;;  %v6781_v45 = vld [vmem:[#allocation12] sm:$0xf] }
 0x17b   :  { %3063 = vmatpush.bf16.msrb.mxu1 %v5637_v12  ;;  %3050 = vmatpush.bf16.msrb.mxu0 %v5381_v14  ;;  %v6154_v12 = vld [vmem:[#allocation13 + $0x1c4] sm:$0xf]  ;;  %v5444_v14 = vld [vmem:[#allocation13 + $0x600] sm:$0xf]  ;;  %v5161_v19 = vor.u32 %v6218_v6, %v5158_v11 }
 0x17c   :  { %v4905_v21 = vor.u32 %v6154_v12, %v4902_v13  ;;  %v5414_v58 = vld [vmem:[#allocation13 + $0x5e0] sm:$0xf0] }
 0x17d   :  { %v4966_v62 = vld [vmem:[#allocation13 + $0x260] sm:$0xf0] }
 0x17e   :  { %3038 = vmatpush.bf16.msra.mxu3 %v5093_v17  ;;  %3025 = vmatpush.bf16.msra.mxu2 %v4837_v20  ;;  %v6346_v17 = vld [vmem:[#allocation13 + $0x7c4] sm:$0xf] }
 0x17f   :  { %3064 = vmatpush.bf16.msrb.mxu1 %v5605_v23  ;;  %3051 = vmatpush.bf16.msrb.mxu0 %v5349_v25  ;;  %v6210_v20 = vld [vmem:[#allocation13 + $0x384] sm:$0xf]  ;;  %v5445_v25 = vor.u32 %v6294_v15, %v5444_v14  ;;  %v5673_v26 = vor.u32 %v6346_v17, %v5670_v18 }
 0x180   :  { %v6146_v23 = vld [vmem:[#allocation13 + $0x184] sm:$0xf]  ;;  %v5129_v27 = vor.u32 %v6210_v20, %v5126_v22 }
 0x181   :  { %v5382_v6 = vld [vmem:[#allocation13 + $0x5a0] sm:$0xf0] }
 0x182   :  { %3039 = vmatpush.bf16.msra.mxu3 %v5061_v29  ;;  %3026 = vmatpush.bf16.msra.mxu2 %v4805_v31  ;;  %v4873_v29 = vor.u32 %v6146_v23, %v4870_v24  ;;  %v4838_v31 = vld [vmem:[#allocation13 + $0x160] sm:$0xf0] }
 0x183   :  { %3065 = vmatpush.bf16.msrb.mxu1 %v5573_v34  ;;  %3052 = vmatpush.bf16.msrb.mxu0 %v5317_v36  ;;  %v4841_v34 = vor.u32 %v6138_v30, %v4838_v31  ;;  %v6130_v36 = vld [vmem:[#allocation13 + $0x104] sm:$0xf] }
 0x184   :  { %1417 = vmatmul.bf16.vlgmr.msrb.gmra.mxu2 %v6769_v52  ;;  %1430 = vmatmul.bf16.vlgmr.msrb.gmra.mxu3 %v6771_v53  ;;  %v4809_v39 = vor.u32 %v6130_v36, %v4806_v37  ;;  %v6322_v11 = vld [vmem:[#allocation13 + $0x704] sm:$0xf] }
 0x185   :  { %1443 = vmatmul.bf16.vlgmr.msra.gmra.mxu0 %v6769_v52  ;;  %1456 = vmatmul.bf16.vlgmr.msra.gmra.mxu1 %v6771_v53  ;;  %v4965_v52 = vor.u32 %v6174_v56, %v4964_v55  ;;  %v4932_v53 = vld [vmem:[#allocation13 + $0x200] sm:$0xf]  ;;  %v4774_v55 = vld [vmem:[#allocation13 + $0xe0] sm:$0xf0] }
 0x186   :  { %3040 = vmatpush.bf16.msra.mxu3 %v5029_v40  ;;  %3027 = vmatpush.bf16.msra.mxu2 %v4773_v43  ;;  %v4933_v16 = vor.u32 %v6166_v2, %v4932_v53  ;;  %v6186_v40 = vld [vmem:[#allocation13 + $0x2c4] sm:$0xf] }
 0x187   :  { %3066 = vmatpush.bf16.msrb.mxu1 %v5541_v46  ;;  %3053 = vmatpush.bf16.msrb.mxu0 %v5285_v48  ;;  %v5033_v42 = vor.u32 %v6186_v40, %v5030_v41  ;;  %v6178_v43 = vld [vmem:[#allocation13 + $0x284] sm:$0xf]  ;;  %v5188_v48 = vld [vmem:[#allocation13 + $0x400] sm:$0xf] }
 0x188   :  { %v5001_v46 = vor.u32 %v6178_v43, %v4998_v44  ;;  %v5189_v51 = vor.u32 %v6230_v49, %v5188_v48  ;;  %v6282_v56 = vld [vmem:[#allocation13 + $0x5c4] sm:$0xf]  ;;  %v1030_v48 = vperm.slane %v6781_v45, 1 }
 0x189   :  { %v5417_v59 = vor.u32 %v6282_v56, %v5414_v58  ;;  %v4742_v53 = vld [vmem:[#allocation13 + $0xa0] sm:$0xf0]  ;;  %v6223_v58 = vld [vmem:[#allocation13 + $0x3e4] sm:$0xf0] }
 0x18a   :  { %3041 = vmatpush.bf16.msra.mxu3 %v4997_v54  ;;  %3028 = vmatpush.bf16.msra.mxu2 %v4741_v57  ;;  %v6122_v54 = vld [vmem:[#allocation13 + $0xc4] sm:$0xf] }
 0x18b   :  { %3067 = vmatpush.bf16.msrb.mxu1 %v5509_v61  ;;  %3054 = vmatpush.bf16.msrb.mxu0 %v5253_v63  ;;  %v4777_v57 = vor.u32 %v6122_v54, %v4774_v55  ;;  %v6170_v61 = vld [vmem:[#allocation13 + $0x244] sm:$0xf]  ;;  %v1029_v55 = vperm.slane %v6781_v45, 0 }
 0x18c   :  { %v6330_v63 = vld [vmem:[#allocation13 + $0x744] sm:$0xf]  ;;  %v4969_v0 = vor.u32 %v6170_v61, %v4966_v62 }
 0x18d   :  { %v5609_v60 = vor.u32 %v6330_v63, %v5606_v1  ;;  %v6274_v2 = vld [vmem:[#allocation13 + $0x584] sm:$0xf] }
 0x18e   :  { %3042 = vmatpush.bf16.msra.mxu3 %v4965_v52  ;;  %3029 = vmatpush.bf16.msra.mxu2 %v4709_v3  ;;  %v6114_v52 = vld [vmem:[#allocation13 + $0x84] sm:$0xf]  ;;  %v5385_v7 = vor.u32 %v6274_v2, %v5382_v6  ;;  %v4908_v6 = vld [vmem:[#allocation13 + $0x1c8] sm:$0xf] }
 0x18f   :  { %3068 = vmatpush.bf16.msrb.mxu1 %v5477_v9  ;;  %3055 = vmatpush.bf16.msrb.mxu0 %v5221_v10  ;;  %v4745_v3 = vor.u32 %v6114_v52, %v4742_v53  ;;  %v4934_v9 = vld [vmem:[#allocation13 + $0x220] sm:$0xf0]  ;;  %v6215_v52 = vld [vmem:[#allocation13 + $0x3a4] sm:$0xf0] }
 0x190   :  { %v4937_v10 = vor.u32 %v6162_v8, %v4934_v9  ;;  %v5574_v12 = vld [vmem:[#allocation13 + $0x720] sm:$0xf0] }
 0x191   :  { %v5577_v13 = vor.u32 %v6322_v11, %v5574_v12  ;;  %v6106_v14 = vld [vmem:[#allocation13 + $0x44] sm:$0xf]  ;;  %v5100_v11 = vld [vmem:[#allocation13 + $0x348] sm:$0xf] }
 0x192   :  { %3043 = vmatpush.bf16.msra.mxu3 %v4933_v16  ;;  %3030 = vmatpush.bf16.msra.mxu2 %v4677_v4  ;;  %v4710_v15 = vld [vmem:[#allocation13 + $0x60] sm:$0xf0]  ;;  %v6207_v12 = vld [vmem:[#allocation13 + $0x364] sm:$0xf0] }
 0x193   :  { %3069 = vmatpush.bf16.msrb.mxu1 %v5445_v25  ;;  %3056 = vmatpush.bf16.msrb.mxu0 %v5189_v51  ;;  %v6266_v16 = vld [vmem:[#allocation13 + $0x544] sm:$0xf]  ;;  %v4713_v4 = vor.u32 %v6106_v14, %v4710_v15  ;;  %v4876_v14 = vld [vmem:[#allocation13 + $0x188] sm:$0xf] }
 0x194   :  { %v5350_v17 = vld [vmem:[#allocation13 + $0x560] sm:$0xf0]  ;;  %v6151_v15 = vld [vmem:[#allocation13 + $0x1a4] sm:$0xf0] }
 0x195   :  { %v5353_v18 = vor.u32 %v6266_v16, %v5350_v17  ;;  %v5542_v20 = vld [vmem:[#allocation13 + $0x6e0] sm:$0xf0]  ;;  %v1032_v17 = vperm.slane %v6781_v45, 3 }
 0x196   :  { %3088 = vmatpush.bf16.msrb.mxu3 %v5161_v19  ;;  %3075 = vmatpush.bf16.msrb.mxu2 %v4905_v21  ;;  %v6314_v19 = vld [vmem:[#allocation13 + $0x6c4] sm:$0xf] }
 0x197   :  { %3114 = vmatpush.bf16.msra.mxu1 %v5673_v26  ;;  %3101 = vmatpush.bf16.msra.mxu0 %v5417_v59  ;;  %v5545_v21 = vor.u32 %v6314_v19, %v5542_v20  ;;  %v6098_v22 = vld [vmem:[#allocation13 + $0x4] sm:$0xf]  ;;  %v4877_v19 = vor.u32 %v6151_v15, %v4876_v14  ;;  %v5068_v20 = vld [vmem:[#allocation13 + $0x308] sm:$0xf] }
 0x198   :  { %v4678_v23 = vld [vmem:[#allocation13 + $0x20] sm:$0xf0]  ;;  %v6167_v14 = vld [vmem:[#allocation13 + $0x224] sm:$0xf0] }
 0x199   :  { %v6258_v24 = vld [vmem:[#allocation13 + $0x504] sm:$0xf]  ;;  %v4681_v25 = vor.u32 %v6098_v22, %v4678_v23  ;;  %v5580_v15 = vld [vmem:[#allocation13 + $0x708] sm:$0xf] }
 0x19a   :  { %3089 = vmatpush.bf16.msrb.mxu3 %v5129_v27  ;;  %3076 = vmatpush.bf16.msrb.mxu2 %v4873_v29  ;;  %v5318_v26 = vld [vmem:[#allocation13 + $0x520] sm:$0xf0] }
 0x19b   :  { %3115 = vmatpush.bf16.msra.mxu1 %v5641_v50  ;;  %3102 = vmatpush.bf16.msra.mxu0 %v5385_v7  ;;  %v5321_v27 = vor.u32 %v6258_v24, %v5318_v26  ;;  %v5510_v29 = vld [vmem:[#allocation13 + $0x6a0] sm:$0xf0]  ;;  %v6159_v7 = vld [vmem:[#allocation13 + $0x1e4] sm:$0xf0] }
 0x19c   :  { %v5513_v5 = vor.u32 %v6306_v28, %v5510_v29  ;;  %v6250_v30 = vld [vmem:[#allocation13 + $0x4c4] sm:$0xf]  ;;  %v4844_v24 = vld [vmem:[#allocation13 + $0x148] sm:$0xf]  ;;  %v1031_v28 = vperm.slane %v6781_v45, 2 }
 0x19d   :  { %v5286_v31 = vld [vmem:[#allocation13 + $0x4e0] sm:$0xf0]  ;;  %v5036_v29 = vld [vmem:[#allocation13 + $0x2c8] sm:$0xf] }
 0x19e   :  { %3090 = vmatpush.bf16.msrb.mxu3 %v5097_v32  ;;  %3077 = vmatpush.bf16.msrb.mxu2 %v4841_v34  ;;  %v5289_v32 = vor.u32 %v6250_v30, %v5286_v31  ;;  %v5478_v34 = vld [vmem:[#allocation13 + $0x660] sm:$0xf0]  ;;  %v6191_v31 = vld [vmem:[#allocation13 + $0x2e4] sm:$0xf0] }
 0x19f   :  { %3116 = vmatpush.bf16.msra.mxu1 %v5609_v60  ;;  %3103 = vmatpush.bf16.msra.mxu0 %v5353_v18  ;;  %v5481_v35 = vor.u32 %v6298_v33, %v5478_v34  ;;  %v6242_v36 = vld [vmem:[#allocation13 + $0x484] sm:$0xf]  ;;  %v5132_v60 = vld [vmem:[#allocation13 + $0x388] sm:$0xf]  ;;  %v5101_v18 = vor.u32 %v6207_v12, %v5100_v11 }
 0x1a0   :  { %v5254_v37 = vld [vmem:[#allocation13 + $0x4a0] sm:$0xf0]  ;;  %v5133_v9 = vor.u32 %v6215_v52, %v5132_v60  ;;  %v6351_v33 = vld [vmem:[#allocation13 + $0x7e4] sm:$0xf0] }
 0x1a1   :  { %v5446_v40 = vld [vmem:[#allocation13 + $0x620] sm:$0xf0]  ;;  %v4812_v34 = vld [vmem:[#allocation13 + $0x108] sm:$0xf] }
 0x1a2   :  { %3091 = vmatpush.bf16.msrb.mxu3 %v5065_v38  ;;  %3078 = vmatpush.bf16.msrb.mxu2 %v4809_v39  ;;  %v5257_v38 = vor.u32 %v6242_v36, %v5254_v37  ;;  %v6290_v39 = vld [vmem:[#allocation13 + $0x604] sm:$0xf]  ;;  %v6183_v45 = vld [vmem:[#allocation13 + $0x2a4] sm:$0xf0] }
 0x1a3   :  { %3117 = vmatpush.bf16.msra.mxu1 %v5577_v13  ;;  %3104 = vmatpush.bf16.msra.mxu0 %v5321_v27  ;;  %v5449_v41 = vor.u32 %v6290_v39, %v5446_v40  ;;  %v5222_v43 = vld [vmem:[#allocation13 + $0x460] sm:$0xf0]  ;;  %v5037_v40 = vor.u32 %v6191_v31, %v5036_v29  ;;  %v4940_v12 = vld [vmem:[#allocation13 + $0x208] sm:$0xf]  ;;  %v5134_v31 = vld [vmem:[#allocation13 + $0x3a8] sm:$0xf0] }
 0x1a4   :  { %v5190_v47 = vld [vmem:[#allocation13 + $0x420] sm:$0xf0] }
 0x1a6   :  { %3092 = vmatpush.bf16.msrb.mxu3 %v5033_v42  ;;  %3079 = vmatpush.bf16.msrb.mxu2 %v4777_v57  ;;  %v6234_v42 = vld [vmem:[#allocation13 + $0x444] sm:$0xf]  ;;  %v5164_v57 = vld [vmem:[#allocation13 + $0x3c8] sm:$0xf] }
 0x1a7   :  { %3118 = vmatpush.bf16.msra.mxu1 %v5545_v21  ;;  %3105 = vmatpush.bf16.msra.mxu0 %v5289_v32  ;;  %v5225_v44 = vor.u32 %v6234_v42, %v5222_v43  ;;  %v6199_v21 = vld [vmem:[#allocation13 + $0x324] sm:$0xf0] }
 0x1a8   :  { %v5069_v27 = vor.u32 %v6199_v21, %v5068_v20  ;;  %v5676_v32 = vld [vmem:[#allocation13 + $0x7c8] sm:$0xf] }
 0x1a9   :  { %v5004_v42 = vld [vmem:[#allocation13 + $0x288] sm:$0xf] }
 0x1aa   :  { %3093 = vmatpush.bf16.msrb.mxu3 %v5001_v46  ;;  %3080 = vmatpush.bf16.msrb.mxu2 %v4745_v3  ;;  %v6226_v46 = vld [vmem:[#allocation13 + $0x404] sm:$0xf]  ;;  %v4716_v20 = vld [vmem:[#allocation13 + $0x48] sm:$0xf] }
 0x1ab   :  { %3119 = vmatpush.bf16.msra.mxu1 %v5513_v5  ;;  %3106 = vmatpush.bf16.msra.mxu0 %v5257_v38  ;;  %v5193_v49 = vor.u32 %v6226_v46, %v5190_v47  ;;  %v5644_v46 = vld [vmem:[#allocation13 + $0x788] sm:$0xf] }
 0x1ac   :  { %v6343_v47 = vld [vmem:[#allocation13 + $0x7a4] sm:$0xf0] }
 0x1ad   :  { %v6111_v21 = vld [vmem:[#allocation13 + $0x64] sm:$0xf0] }
 0x1ae   :  { %3094 = vmatpush.bf16.msrb.mxu3 %v4969_v0  ;;  %3081 = vmatpush.bf16.msrb.mxu2 %v4713_v4  ;;  %v5165_v0 = vor.u32 %v6223_v58, %v5164_v57  ;;  %v5005_v58 = vor.u32 %v6183_v45, %v5004_v42  ;;  %v4717_v29 = vor.u32 %v6111_v21, %v4716_v20  ;;  %v6203_v45 = vld [vmem:[#allocation13 + $0x34c] sm:$0xf] }
 0x1af   :  { %3120 = vmatpush.bf16.msra.mxu1 %v5481_v35  ;;  %3107 = vmatpush.bf16.msra.mxu0 %v5225_v44  ;;  %v6135_v35 = vld [vmem:[#allocation13 + $0x124] sm:$0xf0]  ;;  %v6179_v21 = vld [vmem:[#allocation13 + $0x28c] sm:$0xf] }
 0x1b0   :  { %v4813_v44 = vor.u32 %v6135_v35, %v4812_v34  ;;  %v5324_v34 = vld [vmem:[#allocation13 + $0x508] sm:$0xf] }
 0x1b1   :  { %v6263_v35 = vld [vmem:[#allocation13 + $0x524] sm:$0xf0] }
 0x1b2   :  { %3095 = vmatpush.bf16.msrb.mxu3 %v4937_v10  ;;  %3082 = vmatpush.bf16.msrb.mxu2 %v4681_v25  ;;  %v4909_v10 = vor.u32 %v6159_v7, %v4908_v6  ;;  %v6143_v25 = vld [vmem:[#allocation13 + $0x164] sm:$0xf0] }
 0x1b3   :  { %3121 = vmatpush.bf16.msra.mxu1 %v5449_v41  ;;  %3108 = vmatpush.bf16.msra.mxu0 %v5193_v49  ;;  %v4845_v30 = vor.u32 %v6143_v25, %v4844_v24  ;;  %v5677_v41 = vor.u32 %v6351_v33, %v5676_v32  ;;  %v6119_v7 = vld [vmem:[#allocation13 + $0xa4] sm:$0xf0]  ;;  %v4941_v24 = vor.u32 %v6167_v14, %v4940_v12  ;;  %v5678_v12 = vld [vmem:[#allocation13 + $0x7e8] sm:$0xf0] }
 0x1b4   :  { %v4684_v32 = vld [vmem:[#allocation13 + $0x8] sm:$0xf] }
 0x1b5   :  { %v6103_v33 = vld [vmem:[#allocation13 + $0x24] sm:$0xf0] }
 0x1b6   :  { %v4685_v42 = vor.u32 %v6103_v33, %v4684_v32 }
 0x1f2   :  { %v1392_v50 = vpop.f32.mrf.mxu0  ;;  %v1405_v51 = vpop.f32.mrf.mxu1 }
 0x1f3   :  { %v1393_v54 = vadd.f32 %v1392_v50, %v1030_v48 }
 0x1f5   :  { %v1406_v56 = vadd.f32 %v1405_v51, %v1393_v54  ;;  %v4780_v51 = vld [vmem:[#allocation13 + $0xc8] sm:$0xf] }
 0x1f6   :  { %v6127_v54 = vld [vmem:[#allocation13 + $0xe4] sm:$0xf0] }
 0x1f7   :  { %v1462_v59 = vmax.f32 %v1406_v56, 0.0  ;;  %v1366_v61 = vpop.f32.mrf.mxu2  ;;  %v1379_v62 = vpop.f32.mrf.mxu3  ;;  %v6287_v56 = vld [vmem:[#allocation13 + $0x5e4] sm:$0xf0]  ;;  %v4781_v52 = vor.u32 %v6127_v54, %v4780_v51  ;;  %v6147_v51 = vld [vmem:[#allocation13 + $0x18c] sm:$0xf] }
 0x1f8   :  { %v1367_v63 = vadd.f32 %v1366_v61, %v1029_v55  ;;  %v5420_v55 = vld [vmem:[#allocation13 + $0x5c8] sm:$0xf]  ;;  %v4878_v54 = vld [vmem:[#allocation13 + $0x1a8] sm:$0xf0] }
 0x1f9   :  { %v6785_v1 = vpack.c.bf16 %v1462_v59, %v1462_v59  ;;  %v5645_v59 = vor.u32 %v6343_v47, %v5644_v46  ;;  %v4972_v61 = vld [vmem:[#allocation13 + $0x248] sm:$0xf]  ;;  %v5102_v46 = vld [vmem:[#allocation13 + $0x368] sm:$0xf0] }
 0x1fa   :  { %v1380_v53 = vadd.f32 %v1379_v62, %v1367_v63  ;;  %v1394_v2 = vpop.f32.mrf.mxu0  ;;  %v1407_v3 = vpop.f32.mrf.mxu1  ;;  %v6175_v62 = vld [vmem:[#allocation13 + $0x264] sm:$0xf0] }
 0x1fb   :  { %3044 = vmatmul.bf16.vlgmr.msra.gmra.mxu3 %v6785_v1  ;;  %v5612_v63 = vld [vmem:[#allocation13 + $0x748] sm:$0xf] }
 0x1fc   :  { %v1461_v8 = vmax.f32 %v1380_v53, 0.0  ;;  %3140 = vmatpush.bf16.msra.mxu3 %v5165_v0  ;;  %v6335_v0 = vld [vmem:[#allocation13 + $0x764] sm:$0xf0]  ;;  %v5421_v53 = vor.u32 %v6287_v56, %v5420_v55  ;;  %v5105_v55 = vor.u32 %v6203_v45, %v5102_v46  ;;  %v5390_v45 = vld [vmem:[#allocation13 + $0x5a8] sm:$0xf0] }
 0x1fd   :  { %v4748_v2 = vld [vmem:[#allocation13 + $0x88] sm:$0xf]  ;;  %v5613_v11 = vor.u32 %v6335_v0, %v5612_v63 }
 0x1fe   :  { %v6788_v13 = vpack.c.bf16 %v1461_v8, %v1461_v8  ;;  %v5388_v8 = vld [vmem:[#allocation13 + $0x588] sm:$0xf] }
 0x1ff   :  { %v1368_v16 = vpop.f32.mrf.mxu2  ;;  %v1381_v4 = vpop.f32.mrf.mxu3  ;;  %v5484_v56 = vld [vmem:[#allocation13 + $0x648] sm:$0xf] }
 0x200   :  { %3141 = vmatpush.bf16.msra.mxu3 %v5133_v9  ;;  %3031 = vmatmul.bf16.vlgmr.msra.gmra.mxu2 %v6788_v13  ;;  %v6279_v9 = vld [vmem:[#allocation13 + $0x5a4] sm:$0xf0]  ;;  %v4749_v4 = vor.u32 %v6119_v7, %v4748_v2  ;;  %v4846_v2 = vld [vmem:[#allocation13 + $0x168] sm:$0xf0] }
 0x201   :  { %3127 = vmatpush.bf16.msra.mxu2 %v4909_v10  ;;  %v4973_v10 = vor.u32 %v6175_v62, %v4972_v61  ;;  %v6327_v16 = vld [vmem:[#allocation13 + $0x724] sm:$0xf0]  ;;  %v5070_v61 = vld [vmem:[#allocation13 + $0x328] sm:$0xf0]  ;;  %v4881_v62 = vor.u32 %v6147_v51, %v4878_v54 }
 0x202   :  { %v1444_v22 = vpop.f32.mrf.mxu0  ;;  %v1457_v23 = vpop.f32.mrf.mxu1  ;;  %v5581_v25 = vor.u32 %v6327_v16, %v5580_v15  ;;  %v5260_v63 = vld [vmem:[#allocation13 + $0x488] sm:$0xf]  ;;  %v5582_v51 = vld [vmem:[#allocation13 + $0x728] sm:$0xf0] }
 0x203   :  { %v1445_v26 = vadd.f32 %v1444_v22, %v1032_v17  ;;  %v5389_v17 = vor.u32 %v6279_v9, %v5388_v8  ;;  %v5356_v22 = vld [vmem:[#allocation13 + $0x548] sm:$0xf]  ;;  %v6187_v8 = vld [vmem:[#allocation13 + $0x2cc] sm:$0xf] }
 0x204   :  { %3142 = vmatpush.bf16.msra.mxu3 %v5101_v18  ;;  %v6219_v18 = vld [vmem:[#allocation13 + $0x3cc] sm:$0xf]  ;;  %v6247_v0 = vld [vmem:[#allocation13 + $0x4a4] sm:$0xf0] }
 0x205   :  { %v1458_v5 = vadd.f32 %v1457_v23, %v1445_v26  ;;  %3128 = vmatpush.bf16.msra.mxu2 %v4877_v19  ;;  %v5166_v19 = vld [vmem:[#allocation13 + $0x3e8] sm:$0xf0]  ;;  %v6271_v23 = vld [vmem:[#allocation13 + $0x564] sm:$0xf0]  ;;  %v5261_v9 = vor.u32 %v6247_v0, %v5260_v63 }
 0x206   :  { %v5169_v26 = vor.u32 %v6219_v18, %v5166_v19  ;;  %v6295_v7 = vld [vmem:[#allocation13 + $0x624] sm:$0xf0]  ;;  %v4814_v18 = vld [vmem:[#allocation13 + $0x128] sm:$0xf0] }
 0x207   :  { %v1464_v36 = vmax.f32 %v1458_v5, 0.0  ;;  %v1418_v37 = vpop.f32.mrf.mxu2  ;;  %v1431_v38 = vpop.f32.mrf.mxu3  ;;  %v5357_v5 = vor.u32 %v6271_v23, %v5356_v22  ;;  %v5228_v15 = vld [vmem:[#allocation13 + $0x448] sm:$0xf]  ;;  %v5006_v23 = vld [vmem:[#allocation13 + $0x2a8] sm:$0xf0] }
 0x208   :  { %3143 = vmatpush.bf16.msra.mxu3 %v5069_v27  ;;  %v1419_v39 = vadd.f32 %v1418_v37, %v1031_v28  ;;  %v5548_v27 = vld [vmem:[#allocation13 + $0x6c8] sm:$0xf]  ;;  %v6155_v37 = vld [vmem:[#allocation13 + $0x1cc] sm:$0xf]  ;;  %v5009_v32 = vor.u32 %v6179_v21, %v5006_v23  ;;  %v5108_v21 = vld [vmem:[#allocation13 + $0x350] sm:$0xf] }
 0x209   :  { %v6793_v43 = vpack.c.bf16 %v1464_v36, %v1464_v36  ;;  %3129 = vmatpush.bf16.msra.mxu2 %v4845_v30  ;;  %v6319_v28 = vld [vmem:[#allocation13 + $0x6e4] sm:$0xf0]  ;;  %v6211_v30 = vld [vmem:[#allocation13 + $0x38c] sm:$0xf] }
 0x20a   :  { %v1432_v48 = vadd.f32 %v1431_v38, %v1419_v39  ;;  %v1446_v49 = vpop.f32.mrf.mxu0  ;;  %v1459_v50 = vpop.f32.mrf.mxu1  ;;  %v5549_v36 = vor.u32 %v6319_v28, %v5548_v27  ;;  %v4910_v38 = vld [vmem:[#allocation13 + $0x1e8] sm:$0xf0]  ;;  %v5137_v39 = vor.u32 %v6211_v30, %v5134_v31  ;;  %v6239_v16 = vld [vmem:[#allocation13 + $0x464] sm:$0xf0] }
 0x20b   :  { %3070 = vmatmul.bf16.vlgmr.msrb.gmra.mxu1 %v6793_v43  ;;  %3096 = vmatmul.bf16.vlgmr.msrb.gmra.mxu3 %v6785_v1  ;;  %v4913_v47 = vor.u32 %v6155_v37, %v4910_v38  ;;  %v6255_v49 = vld [vmem:[#allocation13 + $0x4e4] sm:$0xf0]  ;;  %v5229_v22 = vor.u32 %v6239_v16, %v5228_v15  ;;  %v6283_v30 = vld [vmem:[#allocation13 + $0x5cc] sm:$0xf]  ;;  %v4916_v15 = vld [vmem:[#allocation13 + $0x1d0] sm:$0xf] }
 0x20c   :  { %v1463_v57 = vmax.f32 %v1432_v48, 0.0  ;;  %3144 = vmatpush.bf16.msra.mxu3 %v5037_v40  ;;  %3166 = vmatpush.bf16.msrb.mxu1 %v5677_v41  ;;  %v5516_v40 = vld [vmem:[#allocation13 + $0x688] sm:$0xf]  ;;  %v5422_v31 = vld [vmem:[#allocation13 + $0x5e8] sm:$0xf0] }
 0x20d   :  { %3130 = vmatpush.bf16.msra.mxu2 %v4813_v44  ;;  %v6311_v41 = vld [vmem:[#allocation13 + $0x6a4] sm:$0xf0]  ;;  %v5325_v44 = vor.u32 %v6263_v35, %v5324_v34  ;;  %v6171_v34 = vld [vmem:[#allocation13 + $0x24c] sm:$0xf]  ;;  %v6160_v16 = vld [vmem:[#allocation13 + $0x1ec] sm:$0xf0] }
 0x20e   :  { %v6797_v60 = vpack.c.bf16 %v1463_v57, %v1463_v57  ;;  %v5292_v48 = vld [vmem:[#allocation13 + $0x4c8] sm:$0xf]  ;;  %v5517_v50 = vor.u32 %v6311_v41, %v5516_v40  ;;  %v6331_v37 = vld [vmem:[#allocation13 + $0x74c] sm:$0xf]  ;;  %v5425_v40 = vor.u32 %v6283_v30, %v5422_v31  ;;  %v4917_v23 = vor.u32 %v6160_v16, %v4916_v15 }
 0x20f   :  { %v1420_v3 = vpop.f32.mrf.mxu2  ;;  %v1433_v6 = vpop.f32.mrf.mxu3  ;;  %v6303_v57 = vld [vmem:[#allocation13 + $0x664] sm:$0xf0]  ;;  %v5614_v38 = vld [vmem:[#allocation13 + $0x768] sm:$0xf0] }
 0x210   :  { %3145 = vmatpush.bf16.msra.mxu3 %v5005_v58  ;;  %3167 = vmatpush.bf16.msrb.mxu1 %v5645_v59  ;;  %v5293_v58 = vor.u32 %v6255_v49, %v5292_v48  ;;  %v6195_v59 = vld [vmem:[#allocation13 + $0x30c] sm:$0xf]  ;;  %v5452_v6 = vld [vmem:[#allocation13 + $0x608] sm:$0xf] }
 0x211   :  { %3057 = vmatmul.bf16.vlgmr.msrb.gmra.mxu0 %v6797_v60  ;;  %3083 = vmatmul.bf16.vlgmr.msrb.gmra.mxu2 %v6788_v13  ;;  %v5073_v3 = vor.u32 %v6195_v59, %v5070_v61  ;;  %v5196_v27 = vld [vmem:[#allocation13 + $0x408] sm:$0xf]  ;;  %v6115_v41 = vld [vmem:[#allocation13 + $0x8c] sm:$0xf] }
 0x212   :  { %3131 = vmatpush.bf16.msra.mxu2 %v4781_v52  ;;  %3153 = vmatpush.bf16.msrb.mxu0 %v5421_v53  ;;  %v5485_v52 = vor.u32 %v6303_v57, %v5484_v56  ;;  %v6139_v53 = vld [vmem:[#allocation13 + $0x14c] sm:$0xf]  ;;  %v6231_v28 = vld [vmem:[#allocation13 + $0x424] sm:$0xf0]  ;;  %v5172_v56 = vld [vmem:[#allocation13 + $0x3d0] sm:$0xf] }
 0x213   :  { %v4849_v14 = vor.u32 %v6139_v53, %v4846_v2  ;;  %v5197_v35 = vor.u32 %v6231_v28, %v5196_v27  ;;  %v6163_v48 = vld [vmem:[#allocation13 + $0x20c] sm:$0xf]  ;;  %v6224_v57 = vld [vmem:[#allocation13 + $0x3ec] sm:$0xf0] }
 0x214   :  { %3146 = vmatpush.bf16.msra.mxu3 %v4973_v10  ;;  %3168 = vmatpush.bf16.msrb.mxu1 %v5613_v11  ;;  %v5038_v10 = vld [vmem:[#allocation13 + $0x2e8] sm:$0xf0]  ;;  %v4884_v27 = vld [vmem:[#allocation13 + $0x190] sm:$0xf] }
 0x215   :  { %v6347_v11 = vld [vmem:[#allocation13 + $0x7cc] sm:$0xf]  ;;  %v5041_v19 = vor.u32 %v6187_v8, %v5038_v10  ;;  %v6216_v8 = vld [vmem:[#allocation13 + $0x3ac] sm:$0xf0] }
 0x216   :  { %3132 = vmatpush.bf16.msra.mxu2 %v4749_v4  ;;  %3154 = vmatpush.bf16.msrb.mxu0 %v5389_v17  ;;  %v5453_v4 = vor.u32 %v6295_v7, %v5452_v6  ;;  %v6131_v17 = vld [vmem:[#allocation13 + $0x10c] sm:$0xf]  ;;  %v5681_v20 = vor.u32 %v6347_v11, %v5678_v12  ;;  %v5140_v7 = vld [vmem:[#allocation13 + $0x390] sm:$0xf] }
 0x217   :  { %v4942_v49 = vld [vmem:[#allocation13 + $0x228] sm:$0xf0]  ;;  %v6152_v28 = vld [vmem:[#allocation13 + $0x1ac] sm:$0xf0] }
 0x218   :  { %3147 = vmatpush.bf16.msra.mxu3 %v4941_v24  ;;  %3169 = vmatpush.bf16.msrb.mxu1 %v5581_v25  ;;  %v6339_v24 = vld [vmem:[#allocation13 + $0x78c] sm:$0xf]  ;;  %v4945_v63 = vor.u32 %v6163_v48, %v4942_v49  ;;  %v6352_v48 = vld [vmem:[#allocation13 + $0x7ec] sm:$0xf0] }
 0x219   :  { %v5646_v25 = vld [vmem:[#allocation13 + $0x7a8] sm:$0xf0] }
 0x21a   :  { %3133 = vmatpush.bf16.msra.mxu2 %v4717_v29  ;;  %3155 = vmatpush.bf16.msrb.mxu0 %v5357_v5  ;;  %v6123_v29 = vld [vmem:[#allocation13 + $0xcc] sm:$0xf]  ;;  %v5649_v33 = vor.u32 %v6339_v24, %v5646_v25 }
 0x21b   :  { %3122 = vmatmul.bf16.vlgmr.msra.gmra.mxu1 %v6793_v43  ;;  %3148 = vmatmul.bf16.vlgmr.msra.gmra.mxu3 %v6785_v1  ;;  %v4782_v5 = vld [vmem:[#allocation13 + $0xe8] sm:$0xf0] }
 0x21c   :  { %3192 = vmatpush.bf16.msrb.mxu3 %v5169_v26  ;;  %3170 = vmatpush.bf16.msrb.mxu1 %v5549_v36  ;;  %v4817_v26 = vor.u32 %v6131_v17, %v4814_v18  ;;  %v4974_v36 = vld [vmem:[#allocation13 + $0x268] sm:$0xf0] }
 0x21d   :  { %v4977_v46 = vor.u32 %v6171_v34, %v4974_v36  ;;  %v4718_v59 = vld [vmem:[#allocation13 + $0x68] sm:$0xf0]  ;;  %v4885_v34 = vor.u32 %v6152_v28, %v4884_v27  ;;  %v6328_v27 = vld [vmem:[#allocation13 + $0x72c] sm:$0xf0] }
 0x21e   :  { %3134 = vmatpush.bf16.msra.mxu2 %v4685_v42  ;;  %3156 = vmatpush.bf16.msrb.mxu0 %v5325_v44  ;;  %v4750_v42 = vld [vmem:[#allocation13 + $0xa8] sm:$0xf0] }
 0x21f   :  { %v6275_v44 = vld [vmem:[#allocation13 + $0x58c] sm:$0xf]  ;;  %v4753_v54 = vor.u32 %v6115_v41, %v4750_v42 }
 0x220   :  { %3193 = vmatpush.bf16.msrb.mxu3 %v5137_v39  ;;  %3171 = vmatpush.bf16.msrb.mxu1 %v5517_v50  ;;  %v4785_v39 = vor.u32 %v6123_v29, %v4782_v5  ;;  %v6323_v50 = vld [vmem:[#allocation13 + $0x70c] sm:$0xf] }
 0x221   :  { %3109 = vmatmul.bf16.vlgmr.msra.gmra.mxu0 %v6797_v60  ;;  %3135 = vmatmul.bf16.vlgmr.msra.gmra.mxu2 %v6788_v13  ;;  %v6267_v61 = vld [vmem:[#allocation13 + $0x54c] sm:$0xf]  ;;  %v5585_v0 = vor.u32 %v6323_v50, %v5582_v51 }
 0x222   :  { %3179 = vmatpush.bf16.msrb.mxu2 %v4913_v47  ;;  %3157 = vmatpush.bf16.msrb.mxu0 %v5293_v58  ;;  %v5617_v47 = vor.u32 %v6331_v37, %v5614_v38  ;;  %v6107_v58 = vld [vmem:[#allocation13 + $0x4c] sm:$0xf]  ;;  %v4852_v38 = vld [vmem:[#allocation13 + $0x150] sm:$0xf] }
 0x223   :  { %v6315_v53 = vld [vmem:[#allocation13 + $0x6cc] sm:$0xf] }
 0x224   :  { %3194 = vmatpush.bf16.msrb.mxu3 %v5105_v55  ;;  %3172 = vmatpush.bf16.msrb.mxu1 %v5485_v52  ;;  %v5393_v55 = vor.u32 %v6275_v44, %v5390_v45  ;;  %v5173_v52 = vor.u32 %v6224_v57, %v5172_v56  ;;  %v5550_v2 = vld [vmem:[#allocation13 + $0x6e8] sm:$0xf0]  ;;  %v5044_v44 = vld [vmem:[#allocation13 + $0x2d0] sm:$0xf] }
 0x225   :  { %v4686_v10 = vld [vmem:[#allocation13 + $0x28] sm:$0xf0]  ;;  %v6136_v56 = vld [vmem:[#allocation13 + $0x12c] sm:$0xf0] }
 0x226   :  { %3180 = vmatpush.bf16.msrb.mxu2 %v4881_v62  ;;  %3158 = vmatpush.bf16.msrb.mxu0 %v5261_v9  ;;  %v5358_v62 = vld [vmem:[#allocation13 + $0x568] sm:$0xf0] }
 0x227   :  { %v5361_v6 = vor.u32 %v6267_v61, %v5358_v62  ;;  %v6099_v9 = vld [vmem:[#allocation13 + $0xc] sm:$0xf]  ;;  %v6184_v62 = vld [vmem:[#allocation13 + $0x2ac] sm:$0xf0] }
 0x228   :  { %3195 = vmatpush.bf16.msrb.mxu3 %v5073_v3  ;;  %3173 = vmatpush.bf16.msrb.mxu1 %v5453_v4  ;;  %v4721_v3 = vor.u32 %v6107_v58, %v4718_v59  ;;  %v6259_v11 = vld [vmem:[#allocation13 + $0x50c] sm:$0xf]  ;;  %v5141_v4 = vor.u32 %v6216_v8, %v5140_v7  ;;  %v5012_v59 = vld [vmem:[#allocation13 + $0x290] sm:$0xf] }
 0x229   :  { %v5326_v12 = vld [vmem:[#allocation13 + $0x528] sm:$0xf0]  ;;  %v5428_v7 = vld [vmem:[#allocation13 + $0x5d0] sm:$0xf] }
 0x22a   :  { %3181 = vmatpush.bf16.msrb.mxu2 %v4849_v14  ;;  %3159 = vmatpush.bf16.msrb.mxu0 %v5229_v22  ;;  %v5553_v14 = vor.u32 %v6315_v53, %v5550_v2  ;;  %v6307_v17 = vld [vmem:[#allocation13 + $0x68c] sm:$0xf]  ;;  %v6208_v22 = vld [vmem:[#allocation13 + $0x36c] sm:$0xf0] }
 0x22b   :  { %3174 = vmatmul.bf16.vlgmr.msrb.gmra.mxu1 %v6793_v43  ;;  %v5518_v18 = vld [vmem:[#allocation13 + $0x6a8] sm:$0xf0]  ;;  %v5109_v29 = vor.u32 %v6208_v22, %v5108_v21  ;;  %v6288_v8 = vld [vmem:[#allocation13 + $0x5ec] sm:$0xf0] }
 0x22c   :  { %3196 = vmatpush.bf16.msrb.mxu3 %v5041_v19  ;;  %3218 = vmatpush.bf16.msra.mxu1 %v5681_v20  ;;  %v4689_v19 = vor.u32 %v6099_v9, %v4686_v10  ;;  %v5329_v20 = vor.u32 %v6259_v11, %v5326_v12  ;;  %v6251_v24 = vld [vmem:[#allocation13 + $0x4cc] sm:$0xf]  ;;  %v5013_v9 = vor.u32 %v6184_v62, %v5012_v59  ;;  %v4980_v12 = vld [vmem:[#allocation13 + $0x250] sm:$0xf]  ;;  %v6204_v59 = vld [vmem:[#allocation13 + $0x354] sm:$0xf] }
 0x22d   :  { %v5294_v25 = vld [vmem:[#allocation13 + $0x4e8] sm:$0xf0]  ;;  %v5429_v16 = vor.u32 %v6288_v8, %v5428_v7  ;;  %v6280_v21 = vld [vmem:[#allocation13 + $0x5ac] sm:$0xf0]  ;;  %v5110_v62 = vld [vmem:[#allocation13 + $0x370] sm:$0xf0] }
 0x22e   :  { %3182 = vmatpush.bf16.msrb.mxu2 %v4817_v26  ;;  %3160 = vmatpush.bf16.msrb.mxu0 %v5197_v35  ;;  %v5521_v26 = vor.u32 %v6307_v17, %v5518_v18  ;;  %v6299_v5 = vld [vmem:[#allocation13 + $0x64c] sm:$0xf]  ;;  %v5297_v31 = vor.u32 %v6251_v24, %v5294_v25  ;;  %v6336_v17 = vld [vmem:[#allocation13 + $0x76c] sm:$0xf0] }
 0x22f   :  { %v5486_v30 = vld [vmem:[#allocation13 + $0x668] sm:$0xf0]  ;;  %v4756_v18 = vld [vmem:[#allocation13 + $0x90] sm:$0xf] }
 0x230   :  { %3197 = vmatpush.bf16.msrb.mxu3 %v5009_v32  ;;  %3219 = vmatpush.bf16.msra.mxu1 %v5649_v33  ;;  %v5076_v32 = vld [vmem:[#allocation13 + $0x310] sm:$0xf]  ;;  %v6243_v35 = vld [vmem:[#allocation13 + $0x48c] sm:$0xf]  ;;  %v5489_v37 = vor.u32 %v6299_v5, %v5486_v30  ;;  %v6220_v5 = vld [vmem:[#allocation13 + $0x3d4] sm:$0xf] }
 0x231   :  { %3161 = vmatmul.bf16.vlgmr.msrb.gmra.mxu0 %v6797_v60  ;;  %v6200_v33 = vld [vmem:[#allocation13 + $0x32c] sm:$0xf0]  ;;  %v5262_v36 = vld [vmem:[#allocation13 + $0x4a8] sm:$0xf0]  ;;  %v5174_v30 = vld [vmem:[#allocation13 + $0x3f0] sm:$0xf0] }
 0x232   :  { %3183 = vmatpush.bf16.msrb.mxu2 %v4785_v39  ;;  %3205 = vmatpush.bf16.msra.mxu0 %v5425_v40  ;;  %v6144_v39 = vld [vmem:[#allocation13 + $0x16c] sm:$0xf0]  ;;  %v5077_v40 = vor.u32 %v6200_v33, %v5076_v32  ;;  %v6291_v41 = vld [vmem:[#allocation13 + $0x60c] sm:$0xf]  ;;  %v5265_v45 = vor.u32 %v6243_v35, %v5262_v36 }
 0x233   :  { %v5454_v42 = vld [vmem:[#allocation13 + $0x628] sm:$0xf0]  ;;  %v4853_v49 = vor.u32 %v6144_v39, %v4852_v38  ;;  %v6168_v25 = vld [vmem:[#allocation13 + $0x22c] sm:$0xf0] }
 0x234   :  { %3198 = vmatpush.bf16.msrb.mxu3 %v4977_v46  ;;  %3220 = vmatpush.bf16.msra.mxu1 %v5617_v47  ;;  %v6192_v46 = vld [vmem:[#allocation13 + $0x2ec] sm:$0xf0]  ;;  %v6235_v50 = vld [vmem:[#allocation13 + $0x44c] sm:$0xf] }
 0x235   :  { %v5684_v47 = vld [vmem:[#allocation13 + $0x7d0] sm:$0xf]  ;;  %v5230_v51 = vld [vmem:[#allocation13 + $0x468] sm:$0xf0]  ;;  %v5045_v57 = vor.u32 %v6192_v46, %v5044_v44  ;;  %v5142_v44 = vld [vmem:[#allocation13 + $0x3b0] sm:$0xf0] }
 0x236   :  { %3184 = vmatpush.bf16.msrb.mxu2 %v4753_v54  ;;  %3206 = vmatpush.bf16.msra.mxu0 %v5393_v55  ;;  %v5457_v54 = vor.u32 %v6291_v41, %v5454_v42  ;;  %v4820_v55 = vld [vmem:[#allocation13 + $0x110] sm:$0xf]  ;;  %v5685_v58 = vor.u32 %v6352_v48, %v5684_v47  ;;  %v5233_v61 = vor.u32 %v6235_v50, %v5230_v51  ;;  %v6227_v53 = vld [vmem:[#allocation13 + $0x40c] sm:$0xf]  ;;  %v6212_v42 = vld [vmem:[#allocation13 + $0x394] sm:$0xf] }
 0x237   :  { %v5198_v2 = vld [vmem:[#allocation13 + $0x428] sm:$0xf0]  ;;  %v6112_v32 = vld [vmem:[#allocation13 + $0x6c] sm:$0xf0]  ;;  %v4918_v50 = vld [vmem:[#allocation13 + $0x1f0] sm:$0xf0] }
 0x238   :  { %3199 = vmatpush.bf16.msrb.mxu3 %v4945_v63  ;;  %3221 = vmatpush.bf16.msra.mxu1 %v5585_v0  ;;  %v5652_v63 = vld [vmem:[#allocation13 + $0x790] sm:$0xf]  ;;  %v5201_v11 = vor.u32 %v6227_v53, %v5198_v2  ;;  %v4886_v53 = vld [vmem:[#allocation13 + $0x1b0] sm:$0xf0] }
 0x239   :  { %v6344_v0 = vld [vmem:[#allocation13 + $0x7ac] sm:$0xf0] }
 0x23a   :  { %3185 = vmatpush.bf16.msrb.mxu2 %v4721_v3  ;;  %3207 = vmatpush.bf16.msra.mxu0 %v5361_v6  ;;  %v4788_v3 = vld [vmem:[#allocation13 + $0xd0] sm:$0xf]  ;;  %v5653_v10 = vor.u32 %v6344_v0, %v5652_v63 }
 0x23b   :  { %3200 = vmatmul.bf16.vlgmr.msrb.gmra.mxu3 %v6785_v1  ;;  %v6128_v6 = vld [vmem:[#allocation13 + $0xec] sm:$0xf0] }
 0x23c   :  { %3244 = vmatpush.bf16.msra.mxu3 %v5173_v52  ;;  %3222 = vmatpush.bf16.msra.mxu1 %v5553_v14  ;;  %v4821_v52 = vor.u32 %v6136_v56, %v4820_v55  ;;  %v6176_v14 = vld [vmem:[#allocation13 + $0x26c] sm:$0xf0]  ;;  %v4789_v15 = vor.u32 %v6128_v6, %v4788_v3  ;;  %v5113_v3 = vor.u32 %v6204_v59, %v5110_v62  ;;  %v5398_v59 = vld [vmem:[#allocation13 + $0x5b0] sm:$0xf0] }
 0x23d   :  { %v4981_v22 = vor.u32 %v6176_v14, %v4980_v12  ;;  %v5364_v33 = vld [vmem:[#allocation13 + $0x550] sm:$0xf]  ;;  %v6164_v62 = vld [vmem:[#allocation13 + $0x214] sm:$0xf] }
 0x23e   :  { %3186 = vmatpush.bf16.msrb.mxu2 %v4689_v19  ;;  %3208 = vmatpush.bf16.msra.mxu0 %v5329_v20  ;;  %v6120_v19 = vld [vmem:[#allocation13 + $0xac] sm:$0xf0] }
 0x23f   :  { %v5396_v20 = vld [vmem:[#allocation13 + $0x590] sm:$0xf]  ;;  %v4757_v28 = vor.u32 %v6120_v19, %v4756_v18 }
 0x240   :  { %3245 = vmatpush.bf16.msra.mxu3 %v5141_v4  ;;  %3223 = vmatpush.bf16.msra.mxu1 %v5521_v26  ;;  %v5620_v4 = vld [vmem:[#allocation13 + $0x750] sm:$0xf] }
 0x241   :  { %3187 = vmatmul.bf16.vlgmr.msrb.gmra.mxu2 %v6788_v13  ;;  %v5621_v24 = vor.u32 %v6336_v17, %v5620_v4  ;;  %v5588_v26 = vld [vmem:[#allocation13 + $0x710] sm:$0xf] }
 0x242   :  { %3231 = vmatpush.bf16.msra.mxu2 %v4917_v23  ;;  %3209 = vmatpush.bf16.msra.mxu0 %v5297_v31  ;;  %v4948_v23 = vld [vmem:[#allocation13 + $0x210] sm:$0xf]  ;;  %v5589_v36 = vor.u32 %v6328_v27, %v5588_v26 }
 0x243   :  { %v4724_v31 = vld [vmem:[#allocation13 + $0x50] sm:$0xf]  ;;  %v4949_v35 = vor.u32 %v6168_v25, %v4948_v23  ;;  %v5686_v25 = vld [vmem:[#allocation13 + $0x7f0] sm:$0xf0] }
 0x244   :  { %3246 = vmatpush.bf16.msra.mxu3 %v5109_v29  ;;  %3224 = vmatpush.bf16.msra.mxu1 %v5489_v37  ;;  %v5397_v29 = vor.u32 %v6280_v21, %v5396_v20  ;;  %v5177_v37 = vor.u32 %v6220_v5, %v5174_v30  ;;  %v5556_v38 = vld [vmem:[#allocation13 + $0x6d0] sm:$0xf]  ;;  %v6188_v21 = vld [vmem:[#allocation13 + $0x2d4] sm:$0xf] }
 0x245   :  { %v6320_v39 = vld [vmem:[#allocation13 + $0x6ec] sm:$0xf0] }
 0x246   :  { %3232 = vmatpush.bf16.msra.mxu2 %v4885_v34  ;;  %3210 = vmatpush.bf16.msra.mxu0 %v5265_v45  ;;  %v6272_v34 = vld [vmem:[#allocation13 + $0x56c] sm:$0xf0]  ;;  %v5557_v51 = vor.u32 %v6320_v39, %v5556_v38 }
 0x247   :  { %v5365_v41 = vor.u32 %v6272_v34, %v5364_v33  ;;  %v4692_v45 = vld [vmem:[#allocation13 + $0x10] sm:$0xf]  ;;  %v5014_v33 = vld [vmem:[#allocation13 + $0x2b0] sm:$0xf0] }
 0x248   :  { %3247 = vmatpush.bf16.msra.mxu3 %v5077_v40  ;;  %3225 = vmatpush.bf16.msra.mxu1 %v5457_v54  ;;  %v4725_v40 = vor.u32 %v6112_v32, %v4724_v31  ;;  %v6104_v46 = vld [vmem:[#allocation13 + $0x2c] sm:$0xf0]  ;;  %v5145_v54 = vor.u32 %v6212_v42, %v5142_v44  ;;  %v6180_v32 = vld [vmem:[#allocation13 + $0x294] sm:$0xf] }
 0x249   :  { %v5332_v47 = vld [vmem:[#allocation13 + $0x510] sm:$0xf]  ;;  %v4693_v55 = vor.u32 %v6104_v46, %v4692_v45  ;;  %v6284_v42 = vld [vmem:[#allocation13 + $0x5d4] sm:$0xf]  ;;  %v5017_v45 = vor.u32 %v6180_v32, %v5014_v33  ;;  %v5116_v32 = vld [vmem:[#allocation13 + $0x358] sm:$0xf] }
 0x24a   :  { %3233 = vmatpush.bf16.msra.mxu2 %v4853_v49  ;;  %3211 = vmatpush.bf16.msra.mxu0 %v5233_v61  ;;  %v6264_v48 = vld [vmem:[#allocation13 + $0x52c] sm:$0xf0]  ;;  %v6156_v49 = vld [vmem:[#allocation13 + $0x1d4] sm:$0xf] }
 0x24b   :  { %3226 = vmatmul.bf16.vlgmr.msra.gmra.mxu1 %v6793_v43  ;;  %v5333_v56 = vor.u32 %v6264_v48, %v5332_v47  ;;  %v4921_v61 = vor.u32 %v6156_v49, %v4918_v50  ;;  %v5300_v63 = vld [vmem:[#allocation13 + $0x4d0] sm:$0xf]  ;;  %v5430_v44 = vld [vmem:[#allocation13 + $0x5f0] sm:$0xf0] }
 0x24c   :  { %3248 = vmatpush.bf16.msra.mxu3 %v5045_v57  ;;  %3270 = vmatpush.bf16.msrb.mxu1 %v5685_v58  ;;  %v5524_v57 = vld [vmem:[#allocation13 + $0x690] sm:$0xf]  ;;  %v6172_v49 = vld [vmem:[#allocation13 + $0x254] sm:$0xf] }
 0x24d   :  { %v6312_v58 = vld [vmem:[#allocation13 + $0x6ac] sm:$0xf0]  ;;  %v4982_v50 = vld [vmem:[#allocation13 + $0x270] sm:$0xf0] }
 0x24e   :  { %3234 = vmatpush.bf16.msra.mxu2 %v4821_v52  ;;  %3212 = vmatpush.bf16.msra.mxu0 %v5201_v11  ;;  %v6256_v0 = vld [vmem:[#allocation13 + $0x4ec] sm:$0xf0]  ;;  %v6148_v52 = vld [vmem:[#allocation13 + $0x194] sm:$0xf]  ;;  %v5525_v2 = vor.u32 %v6312_v58, %v5524_v57 }
 0x24f   :  { %v5301_v6 = vor.u32 %v6256_v0, %v5300_v63  ;;  %v5492_v7 = vld [vmem:[#allocation13 + $0x650] sm:$0xf]  ;;  %v5078_v11 = vld [vmem:[#allocation13 + $0x330] sm:$0xf0] }
 0x250   :  { %3249 = vmatpush.bf16.msra.mxu3 %v5013_v9  ;;  %3271 = vmatpush.bf16.msrb.mxu1 %v5653_v10  ;;  %v6304_v8 = vld [vmem:[#allocation13 + $0x66c] sm:$0xf0]  ;;  %v6196_v9 = vld [vmem:[#allocation13 + $0x314] sm:$0xf]  ;;  %v4889_v10 = vor.u32 %v6148_v52, %v4886_v53 }
 0x251   :  { %3213 = vmatmul.bf16.vlgmr.msra.gmra.mxu0 %v6797_v60  ;;  %v5268_v12 = vld [vmem:[#allocation13 + $0x490] sm:$0xf]  ;;  %v5493_v4 = vor.u32 %v6304_v8, %v5492_v7  ;;  %v5081_v18 = vor.u32 %v6196_v9, %v5078_v11  ;;  %v4758_v57 = vld [vmem:[#allocation13 + $0xb0] sm:$0xf0]  ;;  %v6225_v7 = vld [vmem:[#allocation13 + $0x3f4] sm:$0xf0] }
 0x252   :  { %3235 = vmatpush.bf16.msra.mxu2 %v4789_v15  ;;  %3257 = vmatpush.bf16.msrb.mxu0 %v5429_v16  ;;  %v6248_v14 = vld [vmem:[#allocation13 + $0x4ac] sm:$0xf0]  ;;  %v6140_v15 = vld [vmem:[#allocation13 + $0x154] sm:$0xf] }
 0x253   :  { %v4854_v16 = vld [vmem:[#allocation13 + $0x170] sm:$0xf0]  ;;  %v5460_v17 = vld [vmem:[#allocation13 + $0x610] sm:$0xf]  ;;  %v5269_v19 = vor.u32 %v6248_v14, %v5268_v12 }
 0x254   :  { %3250 = vmatpush.bf16.msra.mxu3 %v4981_v22  ;;  %3272 = vmatpush.bf16.msrb.mxu1 %v5621_v24  ;;  %v6296_v20 = vld [vmem:[#allocation13 + $0x62c] sm:$0xf0]  ;;  %v5046_v22 = vld [vmem:[#allocation13 + $0x2f0] sm:$0xf0]  ;;  %v4857_v23 = vor.u32 %v6140_v15, %v4854_v16 }
 0x255   :  { %v6348_v24 = vld [vmem:[#allocation13 + $0x7d4] sm:$0xf]  ;;  %v5236_v26 = vld [vmem:[#allocation13 + $0x450] sm:$0xf]  ;;  %v5461_v5 = vor.u32 %v6296_v20, %v5460_v17  ;;  %v5049_v30 = vor.u32 %v6188_v21, %v5046_v22  ;;  %v6217_v20 = vld [vmem:[#allocation13 + $0x3b4] sm:$0xf0] }
 0x256   :  { %3236 = vmatpush.bf16.msra.mxu2 %v4757_v28  ;;  %3258 = vmatpush.bf16.msrb.mxu0 %v5397_v29  ;;  %v6240_v27 = vld [vmem:[#allocation13 + $0x46c] sm:$0xf0]  ;;  %v6132_v28 = vld [vmem:[#allocation13 + $0x114] sm:$0xf]  ;;  %v5689_v31 = vor.u32 %v6348_v24, %v5686_v25  ;;  %v4924_v25 = vld [vmem:[#allocation13 + $0x1d8] sm:$0xf] }
 0x257   :  { %v4822_v29 = vld [vmem:[#allocation13 + $0x130] sm:$0xf0]  ;;  %v5237_v34 = vor.u32 %v6240_v27, %v5236_v26  ;;  %v5204_v38 = vld [vmem:[#allocation13 + $0x410] sm:$0xf]  ;;  %v6161_v26 = vld [vmem:[#allocation13 + $0x1f4] sm:$0xf0] }
 0x258   :  { %3251 = vmatpush.bf16.msra.mxu3 %v4949_v35  ;;  %3273 = vmatpush.bf16.msrb.mxu1 %v5589_v36  ;;  %v4825_v35 = vor.u32 %v6132_v28, %v4822_v29  ;;  %v6340_v36 = vld [vmem:[#allocation13 + $0x794] sm:$0xf]  ;;  %v6232_v39 = vld [vmem:[#allocation13 + $0x42c] sm:$0xf0]  ;;  %v4925_v33 = vor.u32 %v6161_v26, %v4924_v25 }
 0x259   :  { %v5205_v47 = vor.u32 %v6232_v39, %v5204_v38  ;;  %v6276_v58 = vld [vmem:[#allocation13 + $0x594] sm:$0xf]  ;;  %v6153_v38 = vld [vmem:[#allocation13 + $0x1b4] sm:$0xf0] }
 0x25a   :  { %3237 = vmatpush.bf16.msra.mxu2 %v4725_v40  ;;  %3259 = vmatpush.bf16.msrb.mxu0 %v5365_v41  ;;  %v6124_v40 = vld [vmem:[#allocation13 + $0xd4] sm:$0xf] }
 0x25b   :  { %3252 = vmatmul.bf16.vlgmr.msra.gmra.mxu3 %v6785_v1  ;;  %v4790_v41 = vld [vmem:[#allocation13 + $0xf0] sm:$0xf0] }
 0x25c   :  { %3296 = vmatpush.bf16.msrb.mxu3 %v5177_v37  ;;  %3274 = vmatpush.bf16.msrb.mxu1 %v5557_v51  ;;  %v5654_v37 = vld [vmem:[#allocation13 + $0x7b0] sm:$0xf0]  ;;  %v4793_v48 = vor.u32 %v6124_v40, %v4790_v41 }
 0x25d   :  { %v5657_v46 = vor.u32 %v6340_v36, %v5654_v37  ;;  %v6332_v51 = vld [vmem:[#allocation13 + $0x754] sm:$0xf]  ;;  %v4892_v37 = vld [vmem:[#allocation13 + $0x198] sm:$0xf] }
 0x25e   :  { %3238 = vmatpush.bf16.msra.mxu2 %v4693_v55  ;;  %3260 = vmatpush.bf16.msrb.mxu0 %v5333_v56  ;;  %v5622_v55 = vld [vmem:[#allocation13 + $0x770] sm:$0xf0] }
 0x25f   :  { %v6116_v56 = vld [vmem:[#allocation13 + $0x94] sm:$0xf]  ;;  %v5625_v63 = vor.u32 %v6332_v51, %v5622_v55  ;;  %v6145_v51 = vld [vmem:[#allocation13 + $0x174] sm:$0xf0] }
 0x260   :  { %3297 = vmatpush.bf16.msrb.mxu3 %v5145_v54  ;;  %3275 = vmatpush.bf16.msrb.mxu1 %v5525_v2  ;;  %v5433_v54 = vor.u32 %v6284_v42, %v5430_v44  ;;  %v4761_v0 = vor.u32 %v6116_v56, %v4758_v57  ;;  %v4950_v52 = vld [vmem:[#allocation13 + $0x230] sm:$0xf0] }
 0x261   :  { %3239 = vmatmul.bf16.vlgmr.msra.gmra.mxu2 %v6788_v13  ;;  %v6324_v53 = vld [vmem:[#allocation13 + $0x714] sm:$0xf]  ;;  %v4953_v12 = vor.u32 %v6164_v62, %v4950_v52 }
 0x262   :  { %3283 = vmatpush.bf16.msrb.mxu2 %v4921_v61  ;;  %3261 = vmatpush.bf16.msrb.mxu0 %v5301_v6  ;;  %v4985_v61 = vor.u32 %v6172_v49, %v4982_v50  ;;  %v5590_v2 = vld [vmem:[#allocation13 + $0x730] sm:$0xf0]  ;;  %v5180_v6 = vld [vmem:[#allocation13 + $0x3d8] sm:$0xf] }
 0x263   :  { %v6108_v8 = vld [vmem:[#allocation13 + $0x54] sm:$0xf]  ;;  %v5593_v14 = vor.u32 %v6324_v53, %v5590_v2  ;;  %v5181_v15 = vor.u32 %v6225_v7, %v5180_v6  ;;  %v4860_v50 = vld [vmem:[#allocation13 + $0x158] sm:$0xf] }
 0x264   :  { %3298 = vmatpush.bf16.msrb.mxu3 %v5113_v3  ;;  %3276 = vmatpush.bf16.msrb.mxu1 %v5493_v4  ;;  %v5401_v3 = vor.u32 %v6276_v58, %v5398_v59  ;;  %v4726_v9 = vld [vmem:[#allocation13 + $0x70] sm:$0xf0]  ;;  %v5052_v59 = vld [vmem:[#allocation13 + $0x2d8] sm:$0xf]  ;;  %v4861_v62 = vor.u32 %v6145_v51, %v4860_v50  ;;  %v6221_v50 = vld [vmem:[#allocation13 + $0x3dc] sm:$0xf] }
 0x265   :  { %v5366_v11 = vld [vmem:[#allocation13 + $0x570] sm:$0xf0]  ;;  %v4729_v17 = vor.u32 %v6108_v8, %v4726_v9  ;;  %v4828_v2 = vld [vmem:[#allocation13 + $0x118] sm:$0xf]  ;;  %v5182_v51 = vld [vmem:[#allocation13 + $0x3f8] sm:$0xf0] }
 0x266   :  { %3284 = vmatpush.bf16.msrb.mxu2 %v4889_v10  ;;  %3262 = vmatpush.bf16.msrb.mxu0 %v5269_v19  ;;  %v6268_v10 = vld [vmem:[#allocation13 + $0x554] sm:$0xf]  ;;  %v5148_v19 = vld [vmem:[#allocation13 + $0x398] sm:$0xf] }
 0x267   :  { %v6316_v16 = vld [vmem:[#allocation13 + $0x6d4] sm:$0xf]  ;;  %v5149_v28 = vor.u32 %v6217_v20, %v5148_v19  ;;  %v4796_v20 = vld [vmem:[#allocation13 + $0xd8] sm:$0xf] }
 0x268   :  { %3299 = vmatpush.bf16.msrb.mxu3 %v5081_v18  ;;  %3277 = vmatpush.bf16.msrb.mxu1 %v5461_v5  ;;  %v5558_v4 = vld [vmem:[#allocation13 + $0x6f0] sm:$0xf0]  ;;  %v5369_v18 = vor.u32 %v6268_v10, %v5366_v11  ;;  %v5020_v11 = vld [vmem:[#allocation13 + $0x298] sm:$0xf] }
 0x269   :  { %v6100_v21 = vld [vmem:[#allocation13 + $0x14] sm:$0xf]  ;;  %v5561_v27 = vor.u32 %v6316_v16, %v5558_v4  ;;  %v6345_v4 = vld [vmem:[#allocation13 + $0x7b4] sm:$0xf0] }
 0x26a   :  { %3285 = vmatpush.bf16.msrb.mxu2 %v4857_v23  ;;  %3263 = vmatpush.bf16.msrb.mxu0 %v5237_v34  ;;  %v4694_v22 = vld [vmem:[#allocation13 + $0x30] sm:$0xf0]  ;;  %v6209_v34 = vld [vmem:[#allocation13 + $0x374] sm:$0xf0] }
 0x26b   :  { %3278 = vmatmul.bf16.vlgmr.msrb.gmra.mxu1 %v6793_v43  ;;  %v6260_v23 = vld [vmem:[#allocation13 + $0x514] sm:$0xf]  ;;  %v4697_v29 = vor.u32 %v6100_v21, %v4694_v22  ;;  %v5117_v40 = vor.u32 %v6209_v34, %v5116_v32  ;;  %v6129_v21 = vld [vmem:[#allocation13 + $0xf4] sm:$0xf0] }
 0x26c   :  { %3300 = vmatpush.bf16.msrb.mxu3 %v5049_v30  ;;  %3322 = vmatpush.bf16.msra.mxu1 %v5689_v31  ;;  %v5334_v24 = vld [vmem:[#allocation13 + $0x530] sm:$0xf0]  ;;  %v5436_v22 = vld [vmem:[#allocation13 + $0x5d8] sm:$0xf] }
 0x26d   :  { %v5337_v5 = vor.u32 %v6260_v23, %v5334_v24  ;;  %v6308_v30 = vld [vmem:[#allocation13 + $0x694] sm:$0xf]  ;;  %v6289_v23 = vld [vmem:[#allocation13 + $0x5f4] sm:$0xf0] }
 0x26e   :  { %3286 = vmatpush.bf16.msrb.mxu2 %v4825_v35  ;;  %3264 = vmatpush.bf16.msrb.mxu0 %v5205_v47  ;;  %v5526_v31 = vld [vmem:[#allocation13 + $0x6b0] sm:$0xf0]  ;;  %v6201_v47 = vld [vmem:[#allocation13 + $0x334] sm:$0xf0]  ;;  %v5437_v32 = vor.u32 %v6289_v23, %v5436_v22  ;;  %v6205_v23 = vld [vmem:[#allocation13 + $0x35c] sm:$0xf] }
 0x26f   :  { %v6252_v35 = vld [vmem:[#allocation13 + $0x4d4] sm:$0xf]  ;;  %v5529_v39 = vor.u32 %v6308_v30, %v5526_v31  ;;  %v5628_v30 = vld [vmem:[#allocation13 + $0x758] sm:$0xf] }
 0x270   :  { %3301 = vmatpush.bf16.msrb.mxu3 %v5017_v45  ;;  %3323 = vmatpush.bf16.msra.mxu1 %v5657_v46  ;;  %v5302_v36 = vld [vmem:[#allocation13 + $0x4f0] sm:$0xf0]  ;;  %v5084_v45 = vld [vmem:[#allocation13 + $0x318] sm:$0xf]  ;;  %v4893_v46 = vor.u32 %v6153_v38, %v4892_v37 }
 0x271   :  { %3265 = vmatmul.bf16.vlgmr.msrb.gmra.mxu0 %v6797_v60  ;;  %v5305_v41 = vor.u32 %v6252_v35, %v5302_v36  ;;  %v6300_v42 = vld [vmem:[#allocation13 + $0x654] sm:$0xf]  ;;  %v5085_v56 = vor.u32 %v6201_v47, %v5084_v45  ;;  %v4764_v34 = vld [vmem:[#allocation13 + $0x98] sm:$0xf] }
 0x272   :  { %3287 = vmatpush.bf16.msrb.mxu2 %v4793_v48  ;;  %3309 = vmatpush.bf16.msra.mxu0 %v5433_v54  ;;  %v5494_v44 = vld [vmem:[#allocation13 + $0x670] sm:$0xf0]  ;;  %v6121_v35 = vld [vmem:[#allocation13 + $0xb4] sm:$0xf0] }
 0x273   :  { %v6244_v48 = vld [vmem:[#allocation13 + $0x494] sm:$0xf]  ;;  %v5497_v54 = vor.u32 %v6300_v42, %v5494_v44  ;;  %v5404_v36 = vld [vmem:[#allocation13 + $0x598] sm:$0xf]  ;;  %v4765_v44 = vor.u32 %v6121_v35, %v4764_v34 }
 0x274   :  { %3302 = vmatpush.bf16.msrb.mxu3 %v4985_v61  ;;  %3324 = vmatpush.bf16.msra.mxu1 %v5625_v63  ;;  %v5270_v49 = vld [vmem:[#allocation13 + $0x4b0] sm:$0xf0]  ;;  %v6193_v61 = vld [vmem:[#allocation13 + $0x2f4] sm:$0xf0] }
 0x275   :  { %v6292_v55 = vld [vmem:[#allocation13 + $0x614] sm:$0xf]  ;;  %v5273_v57 = vor.u32 %v6244_v48, %v5270_v49  ;;  %v5692_v63 = vld [vmem:[#allocation13 + $0x7d8] sm:$0xf]  ;;  %v5053_v9 = vor.u32 %v6193_v61, %v5052_v59 }
 0x276   :  { %3288 = vmatpush.bf16.msrb.mxu2 %v4761_v0  ;;  %3310 = vmatpush.bf16.msra.mxu0 %v5401_v3  ;;  %v5462_v58 = vld [vmem:[#allocation13 + $0x630] sm:$0xf0]  ;;  %v6353_v0 = vld [vmem:[#allocation13 + $0x7f4] sm:$0xf0] }
 0x277   :  { %v6236_v52 = vld [vmem:[#allocation13 + $0x454] sm:$0xf]  ;;  %v6137_v3 = vld [vmem:[#allocation13 + $0x134] sm:$0xf0]  ;;  %v5465_v6 = vor.u32 %v6292_v55, %v5462_v58  ;;  %v5693_v10 = vor.u32 %v6353_v0, %v5692_v63 }
 0x278   :  { %3303 = vmatpush.bf16.msrb.mxu3 %v4953_v12  ;;  %3325 = vmatpush.bf16.msra.mxu1 %v5593_v14  ;;  %v5238_v53 = vld [vmem:[#allocation13 + $0x470] sm:$0xf0]  ;;  %v6185_v12 = vld [vmem:[#allocation13 + $0x2b4] sm:$0xf0]  ;;  %v4829_v16 = vor.u32 %v6137_v3, %v4828_v2  ;;  %v6213_v2 = vld [vmem:[#allocation13 + $0x39c] sm:$0xf] }
 0x279   :  { %v6820_v7 = vld [vmem:[%s6885_s10] sm:$0xff]  ;;  %v5021_v24 = vor.u32 %v6185_v12, %v5020_v11  ;;  %v5150_v3 = vld [vmem:[#allocation13 + $0x3b8] sm:$0xf0] }
 0x27a   :  { %3289 = vmatpush.bf16.msrb.mxu2 %v4729_v17  ;;  %3311 = vmatpush.bf16.msra.mxu0 %v5369_v18  ;;  %v5660_v14 = vld [vmem:[#allocation13 + $0x798] sm:$0xf]  ;;  %v6228_v17 = vld [vmem:[#allocation13 + $0x414] sm:$0xf]  ;;  %v1727_v19 = vperm.slane %v6820_v7, 0 }
 0x27b   :  { %3304 = vmatmul.bf16.vlgmr.msrb.gmra.mxu3 %v6785_v1  ;;  %v5206_v18 = vld [vmem:[#allocation13 + $0x430] sm:$0xf0]  ;;  %v5661_v25 = vor.u32 %v6345_v4, %v5660_v14  ;;  %v6281_v37 = vld [vmem:[#allocation13 + $0x5b4] sm:$0xf0]  ;;  %v6157_v14 = vld [vmem:[#allocation13 + $0x1dc] sm:$0xf] }
 0x27c   :  { %3348 = vmatpush.bf16.msra.mxu3 %v5181_v15  ;;  %3326 = vmatpush.bf16.msra.mxu1 %v5561_v27  ;;  %v5241_v15 = vor.u32 %v6236_v52, %v5238_v53  ;;  %v5209_v27 = vor.u32 %v6228_v17, %v5206_v18  ;;  %v6169_v45 = vld [vmem:[#allocation13 + $0x234] sm:$0xf0]  ;;  %v5405_v49 = vor.u32 %v6281_v37, %v5404_v36  ;;  %v6197_v36 = vld [vmem:[#allocation13 + $0x31c] sm:$0xf] }
 0x27d   :  { %v6329_v47 = vld [vmem:[#allocation13 + $0x734] sm:$0xf0]  ;;  %v5153_v17 = vor.u32 %v6213_v2, %v5150_v3  ;;  %v6181_v3 = vld [vmem:[#allocation13 + $0x29c] sm:$0xf] }
 0x27e   :  { %3290 = vmatpush.bf16.msrb.mxu2 %v4697_v29  ;;  %3312 = vmatpush.bf16.msra.mxu0 %v5337_v5  ;;  %v3045_v8 = vpop.f32.mrf.mxu3  ;;  %v4988_v29 = vld [vmem:[#allocation13 + $0x258] sm:$0xf] }
 0x27f   :  { %v6177_v5 = vld [vmem:[#allocation13 + $0x274] sm:$0xf0] }
 0x280   :  { %3349 = vmatpush.bf16.msra.mxu3 %v5149_v28  ;;  %3327 = vmatpush.bf16.msra.mxu1 %v5529_v39  ;;  %v4797_v28 = vor.u32 %v6129_v21, %v4796_v20  ;;  %v4989_v39 = vor.u32 %v6177_v5, %v4988_v29  ;;  %v6113_v55 = vld [vmem:[#allocation13 + $0x74] sm:$0xf0]  ;;  %v6149_v29 = vld [vmem:[#allocation13 + $0x19c] sm:$0xf] }
 0x281   :  { %3291 = vmatmul.bf16.vlgmr.msrb.gmra.mxu2 %v6788_v13  ;;  %v5564_v63 = vld [vmem:[#allocation13 + $0x6d8] sm:$0xf]  ;;  %v4894_v5 = vld [vmem:[#allocation13 + $0x1b8] sm:$0xf0] }
 0x282   :  { %3335 = vmatpush.bf16.msra.mxu2 %v4925_v33  ;;  %3313 = vmatpush.bf16.msra.mxu0 %v5305_v41  ;;  %v6337_v33 = vld [vmem:[#allocation13 + $0x774] sm:$0xf0]  ;;  %v4897_v37 = vor.u32 %v6149_v29, %v4894_v5  ;;  %v6333_v29 = vld [vmem:[#allocation13 + $0x75c] sm:$0xf] }
 0x283   :  { %v3032_v26 = vpop.f32.mrf.mxu2  ;;  %v5629_v42 = vor.u32 %v6337_v33, %v5628_v30  ;;  %v6321_v0 = vld [vmem:[#allocation13 + $0x6f4] sm:$0xf0] }
 0x284   :  { %3350 = vmatpush.bf16.msra.mxu3 %v5117_v40  ;;  %3328 = vmatpush.bf16.msra.mxu1 %v5497_v54  ;;  %v3033_v31 = vadd.f32 %v3032_v26, %v1727_v19  ;;  %v4956_v40 = vld [vmem:[#allocation13 + $0x218] sm:$0xf]  ;;  %v5565_v4 = vor.u32 %v6321_v0, %v5564_v63  ;;  %v5118_v26 = vld [vmem:[#allocation13 + $0x378] sm:$0xf0] }
 0x285   :  { %v4732_v54 = vld [vmem:[#allocation13 + $0x58] sm:$0xf]  ;;  %v4957_v58 = vor.u32 %v6169_v45, %v4956_v40  ;;  %v4862_v45 = vld [vmem:[#allocation13 + $0x178] sm:$0xf0] }
 0x286   :  { %3336 = vmatpush.bf16.msra.mxu2 %v4893_v46  ;;  %3314 = vmatpush.bf16.msra.mxu0 %v5273_v57  ;;  %v3047_v38 = vpop.f32.mrf.mxu3  ;;  %v3046_v41 = vadd.f32 %v3045_v8, %v3033_v31  ;;  %v5596_v46 = vld [vmem:[#allocation13 + $0x718] sm:$0xf]  ;;  %v4733_v52 = vor.u32 %v6113_v55, %v4732_v54  ;;  %v6189_v54 = vld [vmem:[#allocation13 + $0x2dc] sm:$0xf] }
 0x287   :  { %v6273_v57 = vld [vmem:[#allocation13 + $0x574] sm:$0xf0]  ;;  %v5597_v59 = vor.u32 %v6329_v47, %v5596_v46  ;;  %v5086_v38 = vld [vmem:[#allocation13 + $0x338] sm:$0xf0] }
 0x288   :  { %3351 = vmatpush.bf16.msra.mxu3 %v5085_v56  ;;  %3329 = vmatpush.bf16.msra.mxu1 %v5465_v6  ;;  %v3071_v48 = vpop.f32.mrf.mxu1  ;;  %v5372_v56 = vld [vmem:[#allocation13 + $0x558] sm:$0xf]  ;;  %v5054_v55 = vld [vmem:[#allocation13 + $0x2f8] sm:$0xf0] }
 0x289   :  { %v5373_v53 = vor.u32 %v6273_v57, %v5372_v56  ;;  %v4700_v6 = vld [vmem:[#allocation13 + $0x18] sm:$0xf]  ;;  %v6349_v57 = vld [vmem:[#allocation13 + $0x7dc] sm:$0xf] }
 0x28a   :  { %3337 = vmatpush.bf16.msra.mxu2 %v4861_v62  ;;  %3315 = vmatpush.bf16.msra.mxu0 %v5241_v15  ;;  %v5185_v62 = vor.u32 %v6221_v50, %v5182_v51  ;;  %v6105_v8 = vld [vmem:[#allocation13 + $0x34] sm:$0xf0]  ;;  %v4926_v15 = vld [vmem:[#allocation13 + $0x1f8] sm:$0xf0] }
 0x28b   :  { %3330 = vmatmul.bf16.vlgmr.msra.gmra.mxu1 %v6793_v43  ;;  %v3034_v61 = vpop.f32.mrf.mxu2  ;;  %v4701_v19 = vor.u32 %v6105_v8, %v4700_v6  ;;  %v5532_v21 = vld [vmem:[#allocation13 + $0x698] sm:$0xf]  ;;  %v4830_v63 = vld [vmem:[#allocation13 + $0x138] sm:$0xf0] }
 0x28c   :  { %3352 = vmatpush.bf16.msra.mxu3 %v5053_v9  ;;  %3374 = vmatpush.bf16.msrb.mxu1 %v5693_v10  ;;  %v5340_v9 = vld [vmem:[#allocation13 + $0x518] sm:$0xf]  ;;  %v5022_v6 = vld [vmem:[#allocation13 + $0x2b8] sm:$0xf0] }
 0x28d   :  { %v6265_v10 = vld [vmem:[#allocation13 + $0x534] sm:$0xf0] }
 0x28e   :  { %3338 = vmatpush.bf16.msra.mxu2 %v4829_v16  ;;  %3316 = vmatpush.bf16.msra.mxu0 %v5209_v27  ;;  %v3058_v11 = vpop.f32.mrf.mxu0  ;;  %v6825_v12 = vpop.f32.mrf.mxu3  ;;  %v5341_v20 = vor.u32 %v6265_v10, %v5340_v9  ;;  %v6313_v22 = vld [vmem:[#allocation13 + $0x6b4] sm:$0xf0]  ;;  %v6341_v10 = vld [vmem:[#allocation13 + $0x79c] sm:$0xf] }
 0x28f   :  { %v3059_v16 = vadd.f32 %v3058_v11, %v3046_v41  ;;  %v5308_v27 = vld [vmem:[#allocation13 + $0x4d8] sm:$0xf]  ;;  %v5533_v30 = vor.u32 %v6313_v22, %v5532_v21  ;;  %v5662_v11 = vld [vmem:[#allocation13 + $0x7b8] sm:$0xf0]  ;;  %v5025_v22 = vor.u32 %v6181_v3, %v5022_v6 }
 0x290   :  { %3353 = vmatpush.bf16.msra.mxu3 %v5021_v24  ;;  %3375 = vmatpush.bf16.msrb.mxu1 %v5661_v25  ;;  %v3073_v18 = vpop.f32.mrf.mxu1  ;;  %v4929_v25 = vor.u32 %v6157_v14, %v4926_v15  ;;  %v5500_v34 = vld [vmem:[#allocation13 + $0x658] sm:$0xf] }
 0x291   :  { %3317 = vmatmul.bf16.vlgmr.msra.gmra.mxu0 %v6797_v60  ;;  %v6827_v24 = vadd.f32 %v3071_v48, %v3059_v16  ;;  %v6305_v35 = vld [vmem:[#allocation13 + $0x674] sm:$0xf0]  ;;  %v4798_v18 = vld [vmem:[#allocation13 + $0xf8] sm:$0xf0] }
 0x292   :  { %3339 = vmatpush.bf16.msra.mxu2 %v4797_v28  ;;  %3361 = vmatpush.bf16.msrb.mxu0 %v5437_v32  ;;  %v6257_v28 = vld [vmem:[#allocation13 + $0x4f4] sm:$0xf0]  ;;  %v5121_v32 = vor.u32 %v6205_v23, %v5118_v26  ;;  %v5501_v46 = vor.u32 %v6305_v35, %v5500_v34  ;;  %v5665_v23 = vor.u32 %v6341_v10, %v5662_v11  ;;  %v6277_v34 = vld [vmem:[#allocation13 + $0x59c] sm:$0xf] }
 0x293   :  { %v5309_v33 = vor.u32 %v6257_v28, %v5308_v27  ;;  %v6249_v40 = vld [vmem:[#allocation13 + $0x4b4] sm:$0xf0]  ;;  %v6173_v27 = vld [vmem:[#allocation13 + $0x25c] sm:$0xf] }
 0x294   :  { %3354 = vmatpush.bf16.msra.mxu3 %v4989_v39  ;;  %3376 = vmatpush.bf16.msrb.mxu1 %v5629_v42  ;;  %v6830_v31 = vpop.f32.mrf.mxu2  ;;  %v5276_v39 = vld [vmem:[#allocation13 + $0x498] sm:$0xf]  ;;  %v4990_v28 = vld [vmem:[#allocation13 + $0x278] sm:$0xf0] }
 0x295   :  { %v5468_v47 = vld [vmem:[#allocation13 + $0x618] sm:$0xf]  ;;  %v5277_v50 = vor.u32 %v6249_v40, %v5276_v39  ;;  %v5406_v35 = vld [vmem:[#allocation13 + $0x5b8] sm:$0xf0] }
 0x296   :  { %3340 = vmatpush.bf16.msra.mxu2 %v4765_v44  ;;  %3362 = vmatpush.bf16.msrb.mxu0 %v5405_v49  ;;  %v3060_v41 = vpop.f32.mrf.mxu0  ;;  %v3099_v42 = vpop.f32.mrf.mxu3  ;;  %v6141_v44 = vld [vmem:[#allocation13 + $0x15c] sm:$0xf]  ;;  %v5089_v49 = vor.u32 %v6197_v36, %v5086_v38  ;;  %v6297_v51 = vld [vmem:[#allocation13 + $0x634] sm:$0xf0]  ;;  %v4993_v36 = vor.u32 %v6173_v27, %v4990_v28  ;;  %v6360_v27 = vld [vmem:[#allocation15 + $0x30] sm:$0xff] }
 0x297   :  { %v4865_v56 = vor.u32 %v6141_v44, %v4862_v45  ;;  %v6241_v61 = vld [vmem:[#allocation13 + $0x474] sm:$0xf0]  ;;  %v5469_v0 = vor.u32 %v6297_v51, %v5468_v47  ;;  %v6165_v40 = vld [vmem:[#allocation13 + $0x21c] sm:$0xf]  ;;  %v5409_v45 = vor.u32 %v6277_v34, %v5406_v35 }
 0x298   :  { %3355 = vmatpush.bf16.msra.mxu3 %v4957_v58  ;;  %3377 = vmatpush.bf16.msrb.mxu1 %v5597_v59  ;;  %v6833_v48 = vpop.f32.mrf.mxu1  ;;  %v5694_v58 = vld [vmem:[#allocation13 + $0x7f8] sm:$0xf0]  ;;  %v5244_v59 = vld [vmem:[#allocation13 + $0x458] sm:$0xf] }
 0x299   :  { %v5697_v2 = vor.u32 %v6349_v57, %v5694_v58  ;;  %v5245_v8 = vor.u32 %v6241_v61, %v5244_v59  ;;  %v5212_v14 = vld [vmem:[#allocation13 + $0x418] sm:$0xf]  ;;  %v4958_v41 = vld [vmem:[#allocation13 + $0x238] sm:$0xf0] }
 0x29a   :  { %3341 = vmatpush.bf16.msra.mxu2 %v4733_v52  ;;  %3363 = vmatpush.bf16.msrb.mxu0 %v5373_v53  ;;  %v5057_v53 = vor.u32 %v6189_v54, %v5054_v55  ;;  %v5598_v47 = vld [vmem:[#allocation13 + $0x738] sm:$0xf0] }
 0x29b   :  { %3356 = vmatmul.bf16.vlgmr.msra.gmra.mxu3 %v6785_v1  ;;  %v6269_v51 = vld [vmem:[#allocation13 + $0x55c] sm:$0xf] }
 0x29c   :  { %3400 = vmatpush.bf16.msrb.mxu3 %v5185_v62  ;;  %3378 = vmatpush.bf16.msrb.mxu1 %v5565_v4  ;;  %v6133_v62 = vld [vmem:[#allocation13 + $0x11c] sm:$0xf]  ;;  %v3086_v52 = vpop.f32.mrf.mxu2  ;;  %v6233_v4 = vld [vmem:[#allocation13 + $0x434] sm:$0xf0] }
 0x29d   :  { %v4833_v9 = vor.u32 %v6133_v62, %v4830_v63  ;;  %v5374_v54 = vld [vmem:[#allocation13 + $0x578] sm:$0xf0] }
 0x29e   :  { %3342 = vmatpush.bf16.msra.mxu2 %v4701_v19  ;;  %3364 = vmatpush.bf16.msrb.mxu0 %v5341_v20  ;;  %v6835_v15 = vpop.f32.mrf.mxu0  ;;  %v6837_v16 = vpop.f32.mrf.mxu3  ;;  %v6285_v19 = vld [vmem:[#allocation13 + $0x5dc] sm:$0xf]  ;;  %v5377_v61 = vor.u32 %v6269_v51, %v5374_v54  ;;  %v6364_v51 = vld [vmem:[#allocation15 + $0x50] sm:$0xff] }
 0x29f   :  { %v5438_v20 = vld [vmem:[#allocation13 + $0x5f8] sm:$0xf0]  ;;  %v6384_v54 = vld [vmem:[#allocation15 + $0xf0] sm:$0xff] }
 0x2a0   :  { %3401 = vmatpush.bf16.msrb.mxu3 %v5153_v17  ;;  %3379 = vmatpush.bf16.msrb.mxu1 %v5533_v30  ;;  %v6125_v17 = vld [vmem:[#allocation13 + $0xdc] sm:$0xf]  ;;  %v3125_v21 = vpop.f32.mrf.mxu1  ;;  %v5441_v5 = vor.u32 %v6285_v19, %v5438_v20 }
 0x2a1   :  { %3343 = vmatmul.bf16.vlgmr.msra.gmra.mxu2 %v6788_v13  ;;  %v4801_v26 = vor.u32 %v6125_v17, %v4798_v18  ;;  %v5630_v30 = vld [vmem:[#allocation13 + $0x778] sm:$0xf0] }
 0x2a2   :  { %3387 = vmatpush.bf16.msrb.mxu2 %v4929_v25  ;;  %3365 = vmatpush.bf16.msrb.mxu0 %v5309_v33  ;;  %v5213_v25 = vor.u32 %v6233_v4, %v5212_v14  ;;  %v4766_v33 = vld [vmem:[#allocation13 + $0xb8] sm:$0xf0]  ;;  %v5633_v38 = vor.u32 %v6333_v29, %v5630_v30  ;;  %v6366_v30 = vld [vmem:[#allocation15 + $0x60] sm:$0xff] }
 0x2a3   :  { %v6369_v58 = vld [vmem:[#allocation15 + $0x78] sm:$0xff] }
 0x2a4   :  { %3402 = vmatpush.bf16.msrb.mxu3 %v5121_v32  ;;  %3380 = vmatpush.bf16.msrb.mxu1 %v5501_v46  ;;  %v6117_v32 = vld [vmem:[#allocation13 + $0x9c] sm:$0xf] }
 0x2a5   :  { %v4769_v39 = vor.u32 %v6117_v32, %v4766_v33  ;;  %v6325_v46 = vld [vmem:[#allocation13 + $0x71c] sm:$0xf] }
 0x2a6   :  { %3388 = vmatpush.bf16.msrb.mxu2 %v4897_v37  ;;  %3366 = vmatpush.bf16.msrb.mxu0 %v5277_v50  ;;  %v6840_v37 = vpop.f32.mrf.mxu2  ;;  %v3112_v42 = vpop.f32.mrf.mxu0  ;;  %v4734_v50 = vld [vmem:[#allocation13 + $0x78] sm:$0xf0]  ;;  %v5601_v57 = vor.u32 %v6325_v46, %v5598_v47  ;;  %v6358_v46 = vld [vmem:[#allocation15 + $0x20] sm:$0xff] }
 0x2a7   :  { %v3151_v44 = vpop.f32.mrf.mxu3  ;;  %v6317_v62 = vld [vmem:[#allocation13 + $0x6dc] sm:$0xf] }
 0x2a8   :  { %3403 = vmatpush.bf16.msrb.mxu3 %v5089_v49  ;;  %3381 = vmatpush.bf16.msrb.mxu1 %v5469_v0  ;;  %v6109_v49 = vld [vmem:[#allocation13 + $0x5c] sm:$0xf]  ;;  %v6843_v55 = vpop.f32.mrf.mxu1 }
 0x2a9   :  { %v4737_v59 = vor.u32 %v6109_v49, %v4734_v50  ;;  %v5566_v63 = vld [vmem:[#allocation13 + $0x6f8] sm:$0xf0] }
 0x2aa   :  { %3389 = vmatpush.bf16.msrb.mxu2 %v4865_v56  ;;  %3367 = vmatpush.bf16.msrb.mxu0 %v5245_v8  ;;  %v4961_v56 = vor.u32 %v6165_v40, %v4958_v41  ;;  %v6101_v0 = vld [vmem:[#allocation13 + $0x1c] sm:$0xf]  ;;  %v5569_v6 = vor.u32 %v6317_v62, %v5566_v63  ;;  %v6368_v8 = vld [vmem:[#allocation15 + $0x70] sm:$0xff]  ;;  %v6383_v62 = vld [vmem:[#allocation15 + $0xe8] sm:$0xff] }
 0x2ab   :  { %3382 = vmatmul.bf16.vlgmr.msrb.gmra.mxu1 %v6793_v43  ;;  %v4702_v52 = vld [vmem:[#allocation13 + $0x38] sm:$0xf0] }
 0x2ac   :  { %3404 = vmatpush.bf16.msrb.mxu3 %v5057_v53  ;;  %3426 = vmatpush.bf16.msra.mxu1 %v5697_v2  ;;  %v6261_v53 = vld [vmem:[#allocation13 + $0x51c] sm:$0xf] }
 0x2ad   :  { %v5342_v2 = vld [vmem:[#allocation13 + $0x538] sm:$0xf0] }
 0x2ae   :  { %3390 = vmatpush.bf16.msrb.mxu2 %v4833_v9  ;;  %3368 = vmatpush.bf16.msrb.mxu0 %v5213_v25  ;;  %v3138_v3 = vpop.f32.mrf.mxu2  ;;  %v4705_v9 = vor.u32 %v6101_v0, %v4702_v52  ;;  %v5345_v10 = vor.u32 %v6261_v53, %v5342_v2  ;;  %v6309_v11 = vld [vmem:[#allocation13 + $0x69c] sm:$0xf]  ;;  %v6846_v4 = vpop.f32.mrf.mxu0  ;;  %v6356_v0 = vld [vmem:[#allocation15 + $0x10] sm:$0xff]  ;;  %v1730_v53 = vperm.slane %v6820_v7, 3 }
 0x2af   :  { %v5534_v14 = vld [vmem:[#allocation13 + $0x6b8] sm:$0xf0]  ;;  %v6382_v3 = vld [vmem:[#allocation15 + $0xe0] sm:$0xff] }
 0x2b0   :  { %3405 = vmatpush.bf16.msrb.mxu3 %v5025_v22  ;;  %3427 = vmatpush.bf16.msra.mxu1 %v5665_v23  ;;  %v6361_v17 = vld [vmem:[#allocation15 + $0x38] sm:$0xff]  ;;  %v3177_v20 = vpop.f32.mrf.mxu1  ;;  %v5537_v21 = vor.u32 %v6309_v11, %v5534_v14  ;;  %v6367_v22 = vld [vmem:[#allocation15 + $0x68] sm:$0xff]  ;;  %v1729_v11 = vperm.slane %v6820_v7, 2 }
 0x2b1   :  { %3369 = vmatmul.bf16.vlgmr.msrb.gmra.mxu0 %v6797_v60  ;;  %v6253_v18 = vld [vmem:[#allocation13 + $0x4dc] sm:$0xf] }
 0x2b2   :  { %3391 = vmatpush.bf16.msrb.mxu2 %v4801_v26  ;;  %3413 = vmatpush.bf16.msra.mxu0 %v5441_v5  ;;  %v5310_v19 = vld [vmem:[#allocation13 + $0x4f8] sm:$0xf0] }
 0x2b3   :  { %v5313_v23 = vor.u32 %v6253_v18, %v5310_v19  ;;  %v6301_v25 = vld [vmem:[#allocation13 + $0x65c] sm:$0xf]  ;;  %v3439_v18 = vmax.f32 %v6827_v24, 0.0  ;;  %v6374_v19 = vld [vmem:[#allocation15 + $0xa0] sm:$0xff]  ;;  %v6400_v24 = vld [vmem:[#allocation15 + $0x170] sm:$0xff] }
 0x2b4   :  { %3406 = vmatpush.bf16.msrb.mxu3 %v4993_v36  ;;  %3428 = vmatpush.bf16.msra.mxu1 %v5633_v38  ;;  %v5502_v26 = vld [vmem:[#allocation13 + $0x678] sm:$0xf0]  ;;  %v6359_v36 = vld [vmem:[#allocation15 + $0x28] sm:$0xff] }
 0x2b5   :  { %v6245_v28 = vld [vmem:[#allocation13 + $0x49c] sm:$0xf]  ;;  %v5505_v5 = vor.u32 %v6301_v25, %v5502_v26  ;;  %v6380_v25 = vld [vmem:[#allocation15 + $0xd0] sm:$0xff]  ;;  %v3447_v26 = vpack.c.bf16 %v3439_v18, %v3439_v18 }
 0x2b6   :  { %3392 = vmatpush.bf16.msrb.mxu2 %v4769_v39  ;;  %3414 = vmatpush.bf16.msra.mxu0 %v5409_v45  ;;  %v5278_v29 = vld [vmem:[#allocation13 + $0x4b8] sm:$0xf0]  ;;  %v3164_v35 = vpop.f32.mrf.mxu0 }
 0x2b7   :  { %v5281_v32 = vor.u32 %v6245_v28, %v5278_v29  ;;  %v6293_v33 = vld [vmem:[#allocation13 + $0x61c] sm:$0xf]  ;;  %v6392_v29 = vld [vmem:[#allocation15 + $0x130] sm:$0xff] }
 0x2b8   :  { %3407 = vmatpush.bf16.msrb.mxu3 %v4961_v56  ;;  %3429 = vmatpush.bf16.msra.mxu1 %v5601_v57  ;;  %v5470_v34 = vld [vmem:[#allocation13 + $0x638] sm:$0xf0] }
 0x2b9   :  { %v6237_v38 = vld [vmem:[#allocation13 + $0x45c] sm:$0xf]  ;;  %v5473_v41 = vor.u32 %v6293_v33, %v5470_v34  ;;  %v6391_v34 = vld [vmem:[#allocation15 + $0x128] sm:$0xff] }
 0x2ba   :  { %3393 = vmatpush.bf16.msrb.mxu2 %v4737_v59  ;;  %3415 = vmatpush.bf16.msra.mxu0 %v5377_v61  ;;  %v5246_v39 = vld [vmem:[#allocation13 + $0x478] sm:$0xf0]  ;;  %v6363_v61 = vld [vmem:[#allocation15 + $0x48] sm:$0xff] }
 0x2bb   :  { %3408 = vmatmul.bf16.vlgmr.msrb.gmra.mxu3 %v6785_v1  ;;  %v1728_v1 = vperm.slane %v6820_v7, 1  ;;  %v6365_v42 = vld [vmem:[#allocation15 + $0x58] sm:$0xff]  ;;  %v5249_v45 = vor.u32 %v6237_v38, %v5246_v39  ;;  %v6378_v38 = vld [vmem:[#allocation15 + $0xc0] sm:$0xff] }
 0x2bc   :  { %3984 = vmatpush.bf16.msra.mxu3 %v6369_v58  ;;  %3430 = vmatpush.bf16.msra.mxu1 %v5569_v6  ;;  %v6229_v47 = vld [vmem:[#allocation13 + $0x41c] sm:$0xf]  ;;  %v6355_v6 = vld [vmem:[#allocation15 + $0x8] sm:$0xff] }
 0x2bd   :  { %v3085_v40 = vadd.f32 %v6830_v31, %v1728_v1  ;;  %v5214_v49 = vld [vmem:[#allocation13 + $0x438] sm:$0xf0] }
 0x2be   :  { %3394 = vmatpush.bf16.msrb.mxu2 %v4705_v9  ;;  %3416 = vmatpush.bf16.msra.mxu0 %v5345_v10  ;;  %v3201_v44 = vpop.f32.mrf.mxu3  ;;  %v5217_v56 = vor.u32 %v6229_v47, %v5214_v49  ;;  %v6357_v57 = vld [vmem:[#allocation15 + $0x18] sm:$0xff]  ;;  %v1731_v49 = vperm.slane %v6820_v7, 4 }
 0x2bf   :  { %v3098_v50 = vadd.f32 %v6825_v12, %v3085_v40  ;;  %v6377_v58 = vld [vmem:[#allocation15 + $0xb8] sm:$0xff] }
 0x2c0   :  { %3985 = vmatpush.bf16.msra.mxu3 %v6368_v8  ;;  %3431 = vmatpush.bf16.msra.mxu1 %v5537_v21  ;;  %v6381_v14 = vld [vmem:[#allocation15 + $0xd8] sm:$0xff] }
 0x2c1   :  { %3395 = vmatmul.bf16.vlgmr.msrb.gmra.mxu2 %v6788_v13  ;;  %v6385_v13 = vld [vmem:[#allocation15 + $0xf8] sm:$0xff]  ;;  %v3111_v31 = vadd.f32 %v6835_v15, %v3098_v50  ;;  %v6376_v15 = vld [vmem:[#allocation15 + $0xb0] sm:$0xff] }
 0x2c2   :  { %3971 = vmatpush.bf16.msra.mxu2 %v6361_v17  ;;  %3417 = vmatpush.bf16.msra.mxu0 %v5313_v23  ;;  %v6393_v20 = vld [vmem:[#allocation15 + $0x138] sm:$0xff]  ;;  %v3137_v23 = vadd.f32 %v6840_v37, %v1729_v11  ;;  %v6372_v37 = vld [vmem:[#allocation15 + $0x90] sm:$0xff] }
 0x2c3   :  { %v3124_v12 = vadd.f32 %v6833_v48, %v3111_v31  ;;  %v6375_v48 = vld [vmem:[#allocation15 + $0xa8] sm:$0xff]  ;;  %v6373_v28 = vld [vmem:[#allocation15 + $0x98] sm:$0xff] }
 0x2c4   :  { %3986 = vmatpush.bf16.msra.mxu3 %v6367_v22  ;;  %3432 = vmatpush.bf16.msra.mxu1 %v5505_v5  ;;  %v3188_v59 = vpop.f32.mrf.mxu2  ;;  %v6401_v1 = vld [vmem:[#allocation15 + $0x178] sm:$0xff]  ;;  %v3150_v5 = vadd.f32 %v6837_v16, %v3137_v23  ;;  %v6390_v16 = vld [vmem:[#allocation15 + $0x120] sm:$0xff] }
 0x2c5   :  { %v3440_v2 = vmax.f32 %v3124_v12, 0.0  ;;  %v3189_v9 = vadd.f32 %v3188_v59, %v1730_v53  ;;  %v6386_v12 = vld [vmem:[#allocation15 + $0x100] sm:$0xff] }
 0x2c6   :  { %3972 = vmatpush.bf16.msra.mxu2 %v6360_v27  ;;  %3418 = vmatpush.bf16.msra.mxu0 %v5281_v32  ;;  %v3203_v63 = vpop.f32.mrf.mxu3  ;;  %v3163_v35 = vadd.f32 %v6846_v4, %v3150_v5 }
 0x2c7   :  { %v3448_v10 = vpack.c.bf16 %v3440_v2, %v3440_v2  ;;  %v3202_v22 = vadd.f32 %v3201_v44, %v3189_v9  ;;  %v6370_v44 = vld [vmem:[#allocation15 + $0x80] sm:$0xff]  ;;  %v6409_v2 = vld [vmem:[#allocation15 + $0x1b8] sm:$0xff] }
 0x2c8   :  { %3987 = vmatpush.bf16.msra.mxu3 %v6366_v30  ;;  %3433 = vmatpush.bf16.msra.mxu1 %v5473_v41  ;;  %v3227_v52 = vpop.f32.mrf.mxu1  ;;  %v6379_v30 = vld [vmem:[#allocation15 + $0xc8] sm:$0xff] }
 0x2c9   :  { %v6371_v41 = vld [vmem:[#allocation15 + $0x88] sm:$0xff] }
 0x2ca   :  { %3973 = vmatpush.bf16.msra.mxu2 %v6359_v36  ;;  %3419 = vmatpush.bf16.msra.mxu0 %v5249_v45  ;;  %v6399_v36 = vld [vmem:[#allocation15 + $0x168] sm:$0xff]  ;;  %v6389_v45 = vld [vmem:[#allocation15 + $0x118] sm:$0xff] }
 0x2cb   :  { %3434 = vmatmul.bf16.vlgmr.msra.gmra.mxu1 %v6793_v43  ;;  %v6362_v43 = vld [vmem:[#allocation15 + $0x40] sm:$0xff] }
 0x2cc   :  { %3988 = vmatpush.bf16.msra.mxu3 %v6365_v42  ;;  %4010 = vmatpush.bf16.msrb.mxu1 %v6385_v13  ;;  %v3190_v8 = vpop.f32.mrf.mxu2  ;;  %v3176_v42 = vadd.f32 %v6843_v55, %v3163_v35  ;;  %v6397_v55 = vld [vmem:[#allocation15 + $0x158] sm:$0xff] }
 0x2cd   :  { %v6407_v8 = vld [vmem:[#allocation15 + $0x1a8] sm:$0xff] }
 0x2ce   :  { %3974 = vmatpush.bf16.msra.mxu2 %v6358_v46  ;;  %3420 = vmatpush.bf16.msra.mxu0 %v5217_v56  ;;  %v3214_v17 = vpop.f32.mrf.mxu0  ;;  %v3441_v4 = vmax.f32 %v3176_v42, 0.0  ;;  %v6398_v46 = vld [vmem:[#allocation15 + $0x160] sm:$0xff] }
 0x2cf   :  { %v3215_v27 = vadd.f32 %v3214_v17, %v3202_v22 }
 0x2d0   :  { %3989 = vmatpush.bf16.msra.mxu3 %v6364_v51  ;;  %4011 = vmatpush.bf16.msrb.mxu1 %v6384_v54  ;;  %v3229_v21 = vpop.f32.mrf.mxu1  ;;  %v6388_v51 = vld [vmem:[#allocation15 + $0x110] sm:$0xff]  ;;  %v3449_v54 = vpack.c.bf16 %v3441_v4, %v3441_v4 }
 0x2d1   :  { %3421 = vmatmul.bf16.vlgmr.msra.gmra.mxu0 %v6797_v60  ;;  %v6354_v60 = vld [vmem:[#allocation15] sm:$0xff]  ;;  %v3228_v33 = vadd.f32 %v3227_v52, %v3215_v27 }
 0x2d2   :  { %3975 = vmatpush.bf16.msra.mxu2 %v6357_v57  ;;  %3997 = vmatpush.bf16.msrb.mxu0 %v6377_v58  ;;  %v6387_v57 = vld [vmem:[#allocation15 + $0x108] sm:$0xff]  ;;  %v6396_v58 = vld [vmem:[#allocation15 + $0x150] sm:$0xff] }
 0x2d3   :  { %v3442_v39 = vmax.f32 %v3228_v33, 0.0  ;;  %v6415_v33 = vld [vmem:[#allocation15 + $0x1e8] sm:$0xff] }
 0x2d4   :  { %3990 = vmatpush.bf16.msra.mxu3 %v6363_v61  ;;  %4012 = vmatpush.bf16.msrb.mxu1 %v6383_v62 }
 0x2d5   :  { %v3450_v13 = vpack.c.bf16 %v3442_v39, %v3442_v39  ;;  %v6413_v39 = vld [vmem:[#allocation15 + $0x1d8] sm:$0xff] }
 0x2d6   :  { %3976 = vmatpush.bf16.msra.mxu2 %v6356_v0  ;;  %3998 = vmatpush.bf16.msrb.mxu0 %v6376_v15  ;;  %v3216_v32 = vpop.f32.mrf.mxu0  ;;  %v6395_v0 = vld [vmem:[#allocation15 + $0x148] sm:$0xff] }
 0x2d8   :  { %3991 = vmatpush.bf16.msra.mxu3 %v6362_v43  ;;  %4013 = vmatpush.bf16.msrb.mxu1 %v6382_v3  ;;  %v6394_v43 = vld [vmem:[#allocation15 + $0x140] sm:$0xff] }
 0x2da   :  { %3977 = vmatpush.bf16.msra.mxu2 %v6355_v6  ;;  %3999 = vmatpush.bf16.msrb.mxu0 %v6375_v48  ;;  %v6408_v6 = vld [vmem:[#allocation15 + $0x1b0] sm:$0xff] }
 0x2db   :  { %3992 = vmatmul.bf16.vlgmr.msra.gmra.mxu3 %v3448_v10  ;;  %v6406_v10 = vld [vmem:[#allocation15 + $0x1a0] sm:$0xff] }
 0x2dc   :  { %4014 = vmatpush.bf16.msrb.mxu1 %v6381_v14  ;;  %4036 = vmatpush.bf16.msrb.mxu3 %v6401_v1  ;;  %v1732_v14 = vperm.slane %v6820_v7, 5 }
 0x2de   :  { %3978 = vmatpush.bf16.msra.mxu2 %v6354_v60  ;;  %4000 = vmatpush.bf16.msrb.mxu0 %v6374_v19  ;;  %v3253_v40 = vpop.f32.mrf.mxu3  ;;  %v6405_v60 = vld [vmem:[#allocation15 + $0x198] sm:$0xff] }
 0x2e0   :  { %4015 = vmatpush.bf16.msrb.mxu1 %v6380_v25  ;;  %4037 = vmatpush.bf16.msrb.mxu3 %v6400_v24  ;;  %v6403_v25 = vld [vmem:[#allocation15 + $0x188] sm:$0xff]  ;;  %v6417_v24 = vld [vmem:[#allocation15 + $0x1f8] sm:$0xff] }
 0x2e1   :  { %3979 = vmatmul.bf16.vlgmr.msra.gmra.mxu2 %v3447_v26 }
 0x2e2   :  { %4023 = vmatpush.bf16.msrb.mxu2 %v6393_v20  ;;  %4001 = vmatpush.bf16.msrb.mxu0 %v6373_v28  ;;  %v6404_v20 = vld [vmem:[#allocation15 + $0x190] sm:$0xff] }
 0x2e4   :  { %4016 = vmatpush.bf16.msrb.mxu1 %v6379_v30  ;;  %4038 = vmatpush.bf16.msrb.mxu3 %v6399_v36  ;;  %v3240_v47 = vpop.f32.mrf.mxu2  ;;  %v6416_v30 = vld [vmem:[#allocation15 + $0x1f0] sm:$0xff]  ;;  %v1733_v36 = vperm.slane %v6820_v7, 6 }
 0x2e5   :  { %v3241_v56 = vadd.f32 %v3240_v47, %v1731_v49  ;;  %v6410_v49 = vld [vmem:[#allocation15 + $0x1c0] sm:$0xff] }
 0x2e6   :  { %4024 = vmatpush.bf16.msrb.mxu2 %v6392_v29  ;;  %4002 = vmatpush.bf16.msrb.mxu0 %v6372_v37  ;;  %v3255_v50 = vpop.f32.mrf.mxu3  ;;  %v6402_v29 = vld [vmem:[#allocation15 + $0x180] sm:$0xff] }
 0x2e7   :  { %v3254_v61 = vadd.f32 %v3253_v40, %v3241_v56  ;;  %v1734_v56 = vperm.slane %v6820_v7, 7 }
 0x2e8   :  { %4017 = vmatpush.bf16.msrb.mxu1 %v6378_v38  ;;  %4039 = vmatpush.bf16.msrb.mxu3 %v6398_v46  ;;  %v3279_v31 = vpop.f32.mrf.mxu1 }
 0x2ea   :  { %4025 = vmatpush.bf16.msrb.mxu2 %v6391_v34  ;;  %4003 = vmatpush.bf16.msrb.mxu0 %v6371_v41  ;;  %v6414_v34 = vld [vmem:[#allocation15 + $0x1e0] sm:$0xff] }
 0x2eb   :  { %4018 = vmatmul.bf16.vlgmr.msrb.gmra.mxu1 %v3450_v13 }
 0x2ec   :  { %4040 = vmatpush.bf16.msrb.mxu3 %v6397_v55  ;;  %v3242_v59 = vpop.f32.mrf.mxu2  ;;  %4062 = vmatpush.bf16.msra.mxu1 %v6417_v24 }
 0x2ee   :  { %4026 = vmatpush.bf16.msrb.mxu2 %v6390_v16  ;;  %4004 = vmatpush.bf16.msrb.mxu0 %v6370_v44  ;;  %v3266_v62 = vpop.f32.mrf.mxu0  ;;  %v6412_v16 = vld [vmem:[#allocation15 + $0x1d0] sm:$0xff]  ;;  %v6411_v44 = vld [vmem:[#allocation15 + $0x1c8] sm:$0xff] }
 0x2ef   :  { %v3267_v63 = vadd.f32 %v3266_v62, %v3254_v61 }
 0x2f0   :  { %4041 = vmatpush.bf16.msrb.mxu3 %v6396_v58  ;;  %v3281_v15 = vpop.f32.mrf.mxu1  ;;  %4063 = vmatpush.bf16.msra.mxu1 %v6416_v30 }
 0x2f1   :  { %4005 = vmatmul.bf16.vlgmr.msrb.gmra.mxu0 %v3449_v54  ;;  %v3280_v52 = vadd.f32 %v3279_v31, %v3267_v63 }
 0x2f2   :  { %4027 = vmatpush.bf16.msrb.mxu2 %v6389_v45  ;;  %4049 = vmatpush.bf16.msra.mxu0 %v6409_v2 }
 0x2f3   :  { %v3443_v53 = vmax.f32 %v3280_v52, 0.0 }
 0x2f4   :  { %4042 = vmatpush.bf16.msrb.mxu3 %v6395_v0  ;;  %4064 = vmatpush.bf16.msra.mxu1 %v6415_v33 }
 0x2f5   :  { %v3451_v3 = vpack.c.bf16 %v3443_v53, %v3443_v53 }
 0x2f6   :  { %4028 = vmatpush.bf16.msrb.mxu2 %v6388_v51  ;;  %v3268_v48 = vpop.f32.mrf.mxu0  ;;  %4050 = vmatpush.bf16.msra.mxu0 %v6408_v6 }
 0x2f8   :  { %4043 = vmatpush.bf16.msrb.mxu3 %v6394_v43  ;;  %4065 = vmatpush.bf16.msra.mxu1 %v6414_v34 }
 0x2fa   :  { %4029 = vmatpush.bf16.msrb.mxu2 %v6387_v57  ;;  %4051 = vmatpush.bf16.msra.mxu0 %v6407_v8 }
 0x2fc   :  { %4066 = vmatpush.bf16.msra.mxu1 %v6413_v39 }
 0x2fe   :  { %4030 = vmatpush.bf16.msrb.mxu2 %v6386_v12  ;;  %v3305_v9 = vpop.f32.mrf.mxu3  ;;  %4052 = vmatpush.bf16.msra.mxu0 %v6406_v10 }
 0x300   :  { %4067 = vmatpush.bf16.msra.mxu1 %v6412_v16 }
 0x301   :  { %4031 = vmatmul.bf16.vlgmr.msrb.gmra.mxu2 %v3451_v3  ;;  %v6436_v3 = vld [vmem:[%s6887_s12] ss:$0 sm:$0xff] }
 0x302   :  { %4053 = vmatpush.bf16.msra.mxu0 %v6405_v60 }
 0x304   :  { %v3292_v11 = vpop.f32.mrf.mxu2  ;;  %4068 = vmatpush.bf16.msra.mxu1 %v6411_v44 }
 0x305   :  { %v3293_v19 = vadd.f32 %v3292_v11, %v1732_v14 }
 0x306   :  { %v3307_v17 = vpop.f32.mrf.mxu3  ;;  %4054 = vmatpush.bf16.msra.mxu0 %v6404_v20 }
 0x307   :  { %v3306_v22 = vadd.f32 %v3305_v9, %v3293_v19 }
 0x308   :  { %v3331_v18 = vpop.f32.mrf.mxu1  ;;  %4069 = vmatpush.bf16.msra.mxu1 %v6410_v49 }
 0x30a   :  { %4055 = vmatpush.bf16.msra.mxu0 %v6403_v25 }
 0x30c   :  { %v3294_v21 = vpop.f32.mrf.mxu2 }
 0x30e   :  { %v3318_v23 = vpop.f32.mrf.mxu0  ;;  %4056 = vmatpush.bf16.msra.mxu0 %v6402_v29 }
 0x30f   :  { %v3319_v26 = vadd.f32 %v3318_v23, %v3306_v22 }
 0x310   :  { %v3333_v27 = vpop.f32.mrf.mxu1 }
 0x311   :  { %v3332_v28 = vadd.f32 %v3331_v18, %v3319_v26 }
 0x313   :  { %v3444_v1 = vmax.f32 %v3332_v28, 0.0 }
 0x315   :  { %v3452_v5 = vpack.c.bf16 %v3444_v1, %v3444_v1 }
 0x316   :  { %v3320_v32 = vpop.f32.mrf.mxu0 }
 0x317   :  { %4044 = vmatmul.bf16.vlgmr.msrb.gmra.mxu3 %v3452_v5 }
 0x31e   :  { %v3357_v37 = vpop.f32.mrf.mxu3 }
 0x324   :  { %v3344_v35 = vpop.f32.mrf.mxu2 }
 0x325   :  { %v3345_v41 = vadd.f32 %v3344_v35, %v1733_v36 }
 0x326   :  { %v3359_v38 = vpop.f32.mrf.mxu3 }
 0x327   :  { %v3358_v13 = vadd.f32 %v3357_v37, %v3345_v41 }
 0x328   :  { %v3383_v40 = vpop.f32.mrf.mxu1 }
 0x32c   :  { %v3346_v42 = vpop.f32.mrf.mxu2 }
 0x32e   :  { %v3370_v45 = vpop.f32.mrf.mxu0 }
 0x32f   :  { %v3371_v4 = vadd.f32 %v3370_v45, %v3358_v13 }
 0x330   :  { %v3385_v46 = vpop.f32.mrf.mxu1 }
 0x331   :  { %v3384_v47 = vadd.f32 %v3383_v40, %v3371_v4 }
 0x333   :  { %v3445_v50 = vmax.f32 %v3384_v47, 0.0 }
 0x335   :  { %v3453_v51 = vpack.c.bf16 %v3445_v50, %v3445_v50 }
 0x336   :  { %v3372_v54 = vpop.f32.mrf.mxu0 }
 0x337   :  { %4057 = vmatmul.bf16.vlgmr.msra.gmra.mxu0 %v3453_v51 }
 0x33e   :  { %v3409_v55 = vpop.f32.mrf.mxu3 }
 0x344   :  { %v3396_v31 = vpop.f32.mrf.mxu2 }
 0x345   :  { %v3397_v59 = vadd.f32 %v3396_v31, %v1734_v56 }
 0x346   :  { %v3411_v57 = vpop.f32.mrf.mxu3 }
 0x347   :  { %v3410_v12 = vadd.f32 %v3409_v55, %v3397_v59 }
 0x348   :  { %v3435_v58 = vpop.f32.mrf.mxu1 }
 0x34c   :  { %v3398_v61 = vpop.f32.mrf.mxu2 }
 0x34e   :  { %v3422_v62 = vpop.f32.mrf.mxu0 }
 0x34f   :  { %v3423_v63 = vadd.f32 %v3422_v62, %v3410_v12 }
 0x350   :  { %v3437_v0 = vpop.f32.mrf.mxu1 }
 0x351   :  { %v3436_v15 = vadd.f32 %v3435_v58, %v3423_v63 }
 0x353   :  { %v3446_v52 = vmax.f32 %v3436_v15, 0.0 }
 0x355   :  { %v3454_v53 = vpack.c.bf16 %v3446_v52, %v3446_v52 }
 0x356   :  { %v3424_v43 = vpop.f32.mrf.mxu0 }
 0x357   :  { %4070 = vmatmul.bf16.vlgmr.msra.gmra.mxu1 %v3454_v53 }
 0x35e   :  { %v3993_v2 = vpop.f32.mrf.mxu3 }
 0x364   :  { %v3980_v6 = vpop.f32.mrf.mxu2 }
 0x365   :  { %v3981_v7 = vadd.f32 %v6436_v3, %v3980_v6 }
 0x366   :  { %v3995_v48 = vpop.f32.mrf.mxu3 }
 0x367   :  { %v3994_v8 = vadd.f32 %v3993_v2, %v3981_v7 }
 0x368   :  { %v4019_v9 = vpop.f32.mrf.mxu1 }
 0x36c   :  { %v3982_v10 = vpop.f32.mrf.mxu2 }
 0x36e   :  { %v4006_v11 = vpop.f32.mrf.mxu0 }
 0x36f   :  { %v4007_v14 = vadd.f32 %v4006_v11, %v3994_v8 }
 0x370   :  { %v4021_v17 = vpop.f32.mrf.mxu1 }
 0x371   :  { %v4020_v60 = vadd.f32 %v4019_v9, %v4007_v14 }
 0x376   :  { %v4008_v18 = vpop.f32.mrf.mxu0 }
 0x384   :  { %v4032_v19 = vpop.f32.mrf.mxu2 }
 0x385   :  { %v4033_v20 = vadd.f32 %v4032_v19, %v4020_v60 }
 0x38c   :  { %v4034_v21 = vpop.f32.mrf.mxu2 }
 0x39a   :  { %v4045_v22 = vpop.f32.mrf.mxu3 }
 0x39b   :  { %v4046_v27 = vadd.f32 %v4045_v22, %v4033_v20 }
 0x3a2   :  { %v4047_v23 = vpop.f32.mrf.mxu3 }
 0x3b4   :  { %v4058_v25 = vpop.f32.mrf.mxu0 }
 0x3b5   :  { %v4059_v28 = vadd.f32 %v4058_v25, %v4046_v27 }
 0x3bc   :  { %v4060_v26 = vpop.f32.mrf.mxu0 }
 0x3d4   :  { %v4071_v29 = vpop.f32.mrf.mxu1 }
 0x3d5   :  { %v4072_v1 = vadd.f32 %v4071_v29, %v4059_v28 }
 0x3d7   :  { %4075 = vst [vmem:[#allocation16] sm:$0xff] %v4072_v1 }
 0x3dc   :  { %v4073_v24 = vpop.f32.mrf.mxu1 }
 0x3dd   :  { %4079 = vsyncadd [#allocation6], 96  ;;  %s4082_s26 = sshll.u32 %s6888_s13, 4  ;;  %s6654_s27 = smov [#allocation16]   ;;  %s4083_s26 = int_to_ptr.hbm [resolvable:$true] %s4082_s26 }
 0x3de   :  { %s4080_s9 = sshll.u32 %s6654_s27, 4  ;;  %s6655_s29 = smov 2   ;;  %s4081_s9 = int_to_ptr.vmem [resolvable:$true] %s4080_s9 }
 0x3df   :  { %4088 = dma.vmem_to_hbm [thread:$0]  %s4081_s9, 32, %s4083_s26, [#allocation6], %s6647_s25, %s6647_s25, %s6655_s29  }
 0x3e0   :  { %6637 = dma.done.wait [#allocation6], 128  }
 0x3e1   :  { %6638 = vsyncadd [#allocation6], 4294967168 }
 0x3e2   :  { %4093 = vsyncpa [#allocation5], 1 }
 0x3e3   :  { %4094 = vsyncpa [#allocation8], 1 }
 0x3e4   :  { %4095 = vsyncpa [#allocation11], 1 }
 0x3e5   :  { %4096 = vsyncpa [#allocation14], 1 }
 0x3e6   :  { %4097 = vsyncpa [#allocation6], 1 }

</bundles_post_ra>
